<compile_context>
chip_gen: v7x
topology: tpu7x:2x2x1
jax: 0.10.0
libtpu: 0.0.40
codegen_flags: <defaults>
</compile_context>

<pallas_src>
import math
import functools

import jax
import jax.numpy as jnp
from jax.experimental import pallas as pl
from jax.experimental.pallas import tpu as pltpu


# ---------------------------------------------------------------------------
# Pallas kernel: one grid step == BB sequences of x and y (M = BB*T rows each)
# ---------------------------------------------------------------------------
def encoder_kernel(x_ref, y_ref,
                   wx_ref, bx_ref, wy_ref, by_ref,
                   wc_ref, bc_ref, wc2_ref, bc2_ref,
                   g1_ref, be1_ref, w1_ref, b1_ref, w2_ref, b2_ref,
                   g2_ref, be2_ref,
                   o1_ref, o2_ref,
                   *, n_head, n_seq, d_model):
    H, BB, C = n_head, n_seq, d_model
    T = x_ref.shape[0]
    M = BB * T
    dh = C // H
    scale = 1.0 / math.sqrt(dh)

    # Lane-dense (T, BB*C) block -> sequence-major (M, C) rows (row = b*T + t).
    def rows(ld):
        return jnp.concatenate(
            [ld[:, b * C:(b + 1) * C] for b in range(BB)], axis=0)

    xf = rows(x_ref[...]).astype(jnp.float32)        # (M, C)
    yf = rows(y_ref[...]).astype(jnp.float32)

    def mxu(a, w_bf16):
        # bf16 MXU operands (weights pre-cast in the wrapper), f32 accumulate.
        return jnp.dot(a.astype(jnp.bfloat16), w_bf16,
                       preferred_element_type=jnp.float32)

    # Fused projections: two wide matmuls instead of six small ones.
    #   x @ [w_q | w_k2 | w_v2]   and   y @ [w_k | w_v | w_q2]
    px = mxu(xf, wx_ref[...]) + bx_ref[...]          # (M, 3C) = [q  | k2 | v2]
    py = mxu(yf, wy_ref[...]) + by_ref[...]          # (M, 3C) = [k  | v  | q2]

    def heads(t):
        # (M, C) -> (H*BB, T, dh) bf16, batch index g = h*BB + b.
        return jnp.concatenate(
            [t[:, h * dh:(h + 1) * dh].reshape(BB, T, dh) for h in range(H)],
            axis=0).astype(jnp.bfloat16)

    def attn(q, k, v, wc_r, bc_r):
        # All heads folded into the batch dim of a single dot_general for the
        # QK^T and PV contractions, then ONE output-projection matmul on the
        # head-concatenated context (K = C instead of H matmuls with K = dh).
        qh, kh, vh = heads(q), heads(k), heads(v)
        s = jnp.einsum('gtd,gsd->gts', qh, kh,
                       preferred_element_type=jnp.float32) * scale
        s = s - jnp.max(s, axis=-1, keepdims=True)
        e = jnp.exp(s)
        p = e * pl.reciprocal(jnp.sum(e, axis=-1, keepdims=True),
                              approx=True)           # softmax(dim=-1)
        ctx = jnp.einsum('gts,gsd->gtd', p.astype(jnp.bfloat16), vh,
                         preferred_element_type=jnp.float32)   # (H*BB, T, dh)
        cat = jnp.concatenate(
            [ctx[h * BB:(h + 1) * BB].reshape(M, dh) for h in range(H)],
            axis=-1)                                  # (M, C), feature = h*dh+d
        return mxu(cat, wc_r[...]) + bc_r[...]

    # Cross wiring of the reference module:
    #   attn(q = w_q(x), k = w_k(y), v = w_v(y))
    #   attn(q2 = w_q2(y), k2 = w_k2(x), v2 = w_v2(x))
    out1 = attn(px[:, 0:C],         py[:, 0:C],     py[:, C:2 * C],
                wc_ref, bc_ref)
    out2 = attn(py[:, 2 * C:3 * C], px[:, C:2 * C], px[:, 2 * C:3 * C],
                wc2_ref, bc2_ref)

    def layernorm(t, g_r, b_r):
        mu = jnp.mean(t, axis=-1, keepdims=True)
        var = jnp.mean((t - mu) ** 2, axis=-1, keepdims=True)  # unbiased=False
        # eps = 1e-12 matches the reference repo's custom LayerNorm.
        return g_r[...] * ((t - mu) * jax.lax.rsqrt(var + 1e-12)) + b_r[...]

    # dropout1 -> identity (eval).  Both branches share norm1 parameters.
    o1 = layernorm(out1 + xf, g1_ref, be1_ref)
    o2 = layernorm(out2 + yf, g1_ref, be1_ref)

    # Position-wise FFN run per stream (no concatenate/slice round trip);
    # dropout2 -> identity; shared norm2.
    def ffn(t):
        hid = jnp.maximum(mxu(t, w1_ref[...]) + b1_ref[...], 0.0)
        return mxu(hid, w2_ref[...]) + b2_ref[...]

    r1 = layernorm(ffn(o1) + o1, g2_ref, be2_ref)    # (M, C)
    r2 = layernorm(ffn(o2) + o2, g2_ref, be2_ref)

    # Pack back to the lane-dense (T, BB*C) layout and do ONE full-width,
    # unmasked store per output (no per-sequence masked stores).
    def lane_dense(r):
        return jnp.concatenate(
            [r[b * T:(b + 1) * T, :] for b in range(BB)], axis=-1)

    o1_ref[...] = lane_dense(r1).astype(o1_ref.dtype)
    o2_ref[...] = lane_dense(r2).astype(o2_ref.dtype)


# ---------------------------------------------------------------------------
# Wrapper
# ---------------------------------------------------------------------------
def _num_tensorcores():
    """TensorCores per chip: 1 on v5e/v6e, 2 on v7x (capped at 2)."""
    try:
        info = pltpu.get_tpu_info()
        for name in ("num_cores", "core_count", "num_tensorcores",
                     "tensorcore_count", "cores_per_chip"):
            v = getattr(info, name, None)
            if isinstance(v, int) and v > 0:
                return max(1, min(int(v), 2))
    except Exception:
        pass
    try:
        kind = jax.devices()[0].device_kind.lower()
        if "v7" in kind or "7x" in kind:
            return 2
    except Exception:
        pass
    return 1


def encoder_layer_pallas(x, y, params, n_head):
    """x, y: (N, C, T, V) float32.  Returns (out1, out2), each (N, C, T, V)."""
    (wq, bq, wk, bk, wv, bv,
     wq2, bq2, wk2, bk2, wv2, bv2,
     wc, bc, wc2, bc2,
     g1, be1, w1, b1, w2, b2, g2, be2) = params

    N, C, T, V = x.shape
    B = N * V
    F = w1.shape[1]

    # (N, C, T, V) -> lane-dense (T, B*C):  x_ld[t, (n*V+v)*C + c] = x[n,c,t,v].
    # Same layout as the kernel outputs, so input loads and writeback stores
    # are both >=128-lane dense.
    def to_lane_dense(a):
        return jnp.transpose(a, (2, 0, 3, 1)).reshape(T, B * C)

    x_ld = to_lane_dense(x)
    y_ld = to_lane_dense(y)

    # Fuse the six input projections into two wide (C, 3C) matmuls; pre-cast
    # every MXU weight to bf16 (halves weight DMA bytes); keep biases and
    # layernorm parameters in f32.
    bf16 = jnp.bfloat16
    wx = jnp.concatenate([wq, wk2, wv2], axis=1).astype(bf16)   # x -> [q |k2|v2]
    bx = jnp.concatenate([bq, bk2, bv2], axis=1)
    wy = jnp.concatenate([wk, wv, wq2], axis=1).astype(bf16)    # y -> [k |v |q2]
    by = jnp.concatenate([bk, bv, bq2], axis=1)
    fused = [wx, bx, wy, by,
             wc.astype(bf16), bc, wc2.astype(bf16), bc2,
             g1, be1, w1.astype(bf16), b1, w2.astype(bf16), b2, g2, be2]

    # Grid size = TensorCore count: the grid is a serial loop on v5e/v6e, so
    # G=1 there; G=2 on v7x shards sequences across both cores.
    G = _num_tensorcores()
    if B < G:
        G = 1

    # Keep a multi-core split legal by padding the batch (sequences) instead
    # of falling back to a single core: need (B/G)*C lanes % 128 == 0.
    Bp = B
    if G > 1:
        lane_unit = 128 // math.gcd(C, 128)
        unit = G * lane_unit
        Bp = ((B + unit - 1) // unit) * unit
        if Bp != B:
            pad = jnp.zeros((T, (Bp - B) * C), jnp.float32)
            x_ld = jnp.concatenate([x_ld, pad], axis=1)
            y_ld = jnp.concatenate([y_ld, pad], axis=1)
    BB = Bp // G
    M = BB * T

    io_spec = pl.BlockSpec((T, BB * C), lambda g: (0, g))

    def full_spec(a):
        return pl.BlockSpec(a.shape, lambda g: (0,) * a.ndim)

    kernel = functools.partial(encoder_kernel, n_head=n_head, n_seq=BB,
                               d_model=C)

    # Explicit VMEM budget: double-buffered I/O blocks + weights + f32
    # intermediates.  Default scoped VMEM is only 16 MiB on v5e / 32 MiB on
    # v6e & v7x; v7x physical VMEM is 64 MiB, so cap there.
    io_bytes = 2 * (2 + 2) * T * BB * C * 4
    param_bytes = sum(int(a.size) * a.dtype.itemsize for a in fused)
    inter_bytes = (4 * M * (2 * 3 * C + 8 * C + 2 * F)
                   + 4 * 2 * BB * n_head * T * T)
    vmem_limit = int(min(max(2 * (io_bytes + param_bytes + inter_bytes),
                             32 << 20), 64 << 20))

    o1, o2 = pl.pallas_call(
        kernel,
        out_shape=[jax.ShapeDtypeStruct((T, Bp * C), jnp.float32),
                   jax.ShapeDtypeStruct((T, Bp * C), jnp.float32)],
        grid=(G,),
        in_specs=[io_spec, io_spec] + [full_spec(p) for p in fused],
        out_specs=[io_spec, io_spec],
        compiler_params=pltpu.CompilerParams(
            dimension_semantics=("parallel",),
            vmem_limit_bytes=vmem_limit),
    )(x_ld, y_ld, *fused)

    def back(o):
        # (T, Bp*C) -> drop padding -> (T, N, V, C) -> (N, C, T, V)
        o = o[:, :B * C].reshape(T, N, V, C)
        return jnp.transpose(o, (1, 3, 0, 2))

    return back(o1), back(o2)


# ---------------------------------------------------------------------------
# Deterministic parameter construction
# ---------------------------------------------------------------------------
def init_params(key, d_model, ffn_dim):
    C, F = d_model, ffn_dim
    keys = jax.random.split(key, 20)

    def mat(k, shape):
        return jax.random.normal(k, shape, jnp.float32) * 0.05

    def vec(k, n):
        return jax.random.normal(k, (1, n), jnp.float32) * 0.05

    wq,  bq  = mat(keys[0],  (C, C)), vec(keys[1],  C)
    wk,  bk  = mat(keys[2],  (C, C)), vec(keys[3],  C)
    wv,  bv  = mat(keys[4],  (C, C)), vec(keys[5],  C)
    wq2, bq2 = mat(keys[6],  (C, C)), vec(keys[7],  C)
    wk2, bk2 = mat(keys[8],  (C, C)), vec(keys[9],  C)
    wv2, bv2 = mat(keys[10], (C, C)), vec(keys[11], C)
    wc,  bc  = mat(keys[12], (C, C)), vec(keys[13], C)
    wc2, bc2 = mat(keys[14], (C, C)), vec(keys[15], C)
    g1,  be1 = jnp.ones((1, C), jnp.float32), jnp.zeros((1, C), jnp.float32)
    w1,  b1  = mat(keys[16], (C, F)), vec(keys[17], F)
    w2,  b2  = mat(keys[18], (F, C)), vec(keys[19], C)
    g2,  be2 = jnp.ones((1, C), jnp.float32), jnp.zeros((1, C), jnp.float32)

    return [wq, bq, wk, bk, wv, bv,
            wq2, bq2, wk2, bk2, wv2, bv2,
            wc, bc, wc2, bc2,
            g1, be1, w1, b1, w2, b2, g2, be2]


# ---------------------------------------------------------------------------
# Pure-JAX reference (f32) for a correctness sanity check
# ---------------------------------------------------------------------------
def encoder_layer_ref(x, y, params, n_head):
    (wq, bq, wk, bk, wv, bv,
     wq2, bq2, wk2, bk2, wv2, bv2,
     wc, bc, wc2, bc2,
     g1, be1, w1, b1, w2, b2, g2, be2) = params

    N, C, T, V = x.shape
    B = N * V
    xb = jnp.transpose(x, (0, 3, 2, 1)).reshape(B, T, C)
    yb = jnp.transpose(y, (0, 3, 2, 1)).reshape(B, T, C)
    H, dh = n_head, C // n_head

    def lin(t, w, b):
        return t @ w + b

    def split(t):
        return t.reshape(B, T, H, dh).transpose(0, 2, 1, 3)

    def sdpa(q, k, v):
        s = jnp.einsum("bhtd,bhsd->bhts", q, k) / math.sqrt(dh)
        p = jax.nn.softmax(s, axis=-1)
        return jnp.einsum("bhts,bhsd->bhtd", p, v)

    def concat(t):
        return t.transpose(0, 2, 1, 3).reshape(B, T, C)

    q,  k,  v  = lin(xb, wq, bq),   lin(yb, wk, bk),   lin(yb, wv, bv)
    q2, k2, v2 = lin(yb, wq2, bq2), lin(xb, wk2, bk2), lin(xb, wv2, bv2)
    out1 = lin(concat(sdpa(split(q),  split(k),  split(v))),  wc,  bc)
    out2 = lin(concat(sdpa(split(q2), split(k2), split(v2))), wc2, bc2)

    def ln(t, g, b):
        m = jnp.mean(t, -1, keepdims=True)
        var = jnp.mean((t - m) ** 2, -1, keepdims=True)
        return g * ((t - m) / jnp.sqrt(var + 1e-12)) + b

    o1 = ln(out1 + xb, g1, be1)
    o2 = ln(out2 + yb, g1, be1)

    def ffn(t):
        return jnp.maximum(t @ w1 + b1, 0.0) @ w2 + b2

    r1 = ln(ffn(o1) + o1, g2, be2)
    r2 = ln(ffn(o2) + o2, g2, be2)
    r1 = r1.reshape(N, V, T, C).transpose(0, 3, 2, 1)
    r2 = r2.reshape(N, V, T, C).transpose(0, 3, 2, 1)
    return r1, r2


# ---------------------------------------------------------------------------
if __name__ == "__main__":
    N, C, T, V = 2, 32, 8, 4        # d_model = C = 32
    n_head = 4
    ffn_dim = 64

    key = jax.random.PRNGKey(0)
    kx, ky, kp = jax.random.split(key, 3)
    x = jax.random.normal(kx, (N, C, T, V), jnp.float32)
    y = jax.random.normal(ky, (N, C, T, V), jnp.float32)
    params = init_params(kp, C, ffn_dim)

    out1, out2 = encoder_layer_pallas(x, y, params, n_head)
    jax.block_until_ready((out1, out2))

    ref1, ref2 = encoder_layer_ref(x, y, params, n_head)
    assert out1.shape == (N, C, T, V) and out2.shape == (N, C, T, V)
    # bf16 MXU operands (f32 accumulation) vs f32 reference -> loosened tol.
    assert jnp.allclose(out1, ref1, rtol=3e-2, atol=3e-2)
    assert jnp.allclose(out2, ref2, rtol=3e-2, atol=3e-2)

    print("KERNEL_OK")
</pallas_src>

<mosaic_0001>
module attributes {stable_mosaic.version = 11 : i64} {
  func.func @encoder_kernel(%arg0: i32, %arg1: memref<8x256xf32, #tpu.memory_space<vmem>>, %arg2: memref<8x256xf32, #tpu.memory_space<vmem>>, %arg3: memref<32x96xbf16, #tpu.memory_space<vmem>>, %arg4: memref<1x96xf32, #tpu.memory_space<vmem>>, %arg5: memref<32x96xbf16, #tpu.memory_space<vmem>>, %arg6: memref<1x96xf32, #tpu.memory_space<vmem>>, %arg7: memref<32x32xbf16, #tpu.memory_space<vmem>>, %arg8: memref<1x32xf32, #tpu.memory_space<vmem>>, %arg9: memref<32x32xbf16, #tpu.memory_space<vmem>>, %arg10: memref<1x32xf32, #tpu.memory_space<vmem>>, %arg11: memref<1x32xf32, #tpu.memory_space<vmem>>, %arg12: memref<1x32xf32, #tpu.memory_space<vmem>>, %arg13: memref<32x64xbf16, #tpu.memory_space<vmem>>, %arg14: memref<1x64xf32, #tpu.memory_space<vmem>>, %arg15: memref<64x32xbf16, #tpu.memory_space<vmem>>, %arg16: memref<1x32xf32, #tpu.memory_space<vmem>>, %arg17: memref<1x32xf32, #tpu.memory_space<vmem>>, %arg18: memref<1x32xf32, #tpu.memory_space<vmem>>, %arg19: memref<8x256xf32, #tpu.memory_space<vmem>>, %arg20: memref<8x256xf32, #tpu.memory_space<vmem>>) attributes {dimension_semantics = [#tpu.dimension_semantics<parallel>], iteration_bounds = array<i64: 1>, scalar_prefetch = 0 : i64, scratch_operands = 0 : i64, tpu.core_type = #tpu.core_type<tc>, window_params = [{transform_indices = @transform_0, window_bounds = array<i64: 8, 256>}, {transform_indices = @transform_1, window_bounds = array<i64: 8, 256>}, {pipeline_mode = #tpu.pipeline_mode<synchronous>, transform_indices = @transform_2, window_bounds = array<i64: 32, 96>}, {pipeline_mode = #tpu.pipeline_mode<synchronous>, transform_indices = @transform_3, window_bounds = array<i64: 1, 96>}, {pipeline_mode = #tpu.pipeline_mode<synchronous>, transform_indices = @transform_4, window_bounds = array<i64: 32, 96>}, {pipeline_mode = #tpu.pipeline_mode<synchronous>, transform_indices = @transform_5, window_bounds = array<i64: 1, 96>}, {pipeline_mode = #tpu.pipeline_mode<synchronous>, transform_indices = @transform_6, window_bounds = array<i64: 32, 32>}, {pipeline_mode = #tpu.pipeline_mode<synchronous>, transform_indices = @transform_7, window_bounds = array<i64: 1, 32>}, {pipeline_mode = #tpu.pipeline_mode<synchronous>, transform_indices = @transform_8, window_bounds = array<i64: 32, 32>}, {pipeline_mode = #tpu.pipeline_mode<synchronous>, transform_indices = @transform_9, window_bounds = array<i64: 1, 32>}, {pipeline_mode = #tpu.pipeline_mode<synchronous>, transform_indices = @transform_10, window_bounds = array<i64: 1, 32>}, {pipeline_mode = #tpu.pipeline_mode<synchronous>, transform_indices = @transform_11, window_bounds = array<i64: 1, 32>}, {pipeline_mode = #tpu.pipeline_mode<synchronous>, transform_indices = @transform_12, window_bounds = array<i64: 32, 64>}, {pipeline_mode = #tpu.pipeline_mode<synchronous>, transform_indices = @transform_13, window_bounds = array<i64: 1, 64>}, {pipeline_mode = #tpu.pipeline_mode<synchronous>, transform_indices = @transform_14, window_bounds = array<i64: 64, 32>}, {pipeline_mode = #tpu.pipeline_mode<synchronous>, transform_indices = @transform_15, window_bounds = array<i64: 1, 32>}, {pipeline_mode = #tpu.pipeline_mode<synchronous>, transform_indices = @transform_16, window_bounds = array<i64: 1, 32>}, {pipeline_mode = #tpu.pipeline_mode<synchronous>, transform_indices = @transform_17, window_bounds = array<i64: 1, 32>}, {transform_indices = @transform_18, window_bounds = array<i64: 8, 256>}, {transform_indices = @transform_19, window_bounds = array<i64: 8, 256>}]} {
    %c0 = arith.constant 0 : index
    %c0_0 = arith.constant 0 : index
    %0 = vector.load %arg1[%c0, %c0_0] : memref<8x256xf32, #tpu.memory_space<vmem>>, vector<8x256xf32>
    %1 = vector.extract_strided_slice %0 {offsets = [0, 0], sizes = [8, 32], strides = [1, 1]} : vector<8x256xf32> to vector<8x32xf32>
    %2 = vector.extract_strided_slice %0 {offsets = [0, 32], sizes = [8, 32], strides = [1, 1]} : vector<8x256xf32> to vector<8x32xf32>
    %3 = vector.extract_strided_slice %0 {offsets = [0, 64], sizes = [8, 32], strides = [1, 1]} : vector<8x256xf32> to vector<8x32xf32>
    %4 = vector.extract_strided_slice %0 {offsets = [0, 96], sizes = [8, 32], strides = [1, 1]} : vector<8x256xf32> to vector<8x32xf32>
    %5 = vector.extract_strided_slice %0 {offsets = [0, 128], sizes = [8, 32], strides = [1, 1]} : vector<8x256xf32> to vector<8x32xf32>
    %6 = vector.extract_strided_slice %0 {offsets = [0, 160], sizes = [8, 32], strides = [1, 1]} : vector<8x256xf32> to vector<8x32xf32>
    %7 = vector.extract_strided_slice %0 {offsets = [0, 192], sizes = [8, 32], strides = [1, 1]} : vector<8x256xf32> to vector<8x32xf32>
    %8 = vector.extract_strided_slice %0 {offsets = [0, 224], sizes = [8, 32], strides = [1, 1]} : vector<8x256xf32> to vector<8x32xf32>
    %9 = tpu.concatenate %1, %2, %3, %4, %5, %6, %7, %8 in 0 : vector<8x32xf32>, vector<8x32xf32>, vector<8x32xf32>, vector<8x32xf32>, vector<8x32xf32>, vector<8x32xf32>, vector<8x32xf32>, vector<8x32xf32> -> vector<64x32xf32>
    %c0_1 = arith.constant 0 : index
    %c0_2 = arith.constant 0 : index
    %10 = vector.load %arg2[%c0_1, %c0_2] : memref<8x256xf32, #tpu.memory_space<vmem>>, vector<8x256xf32>
    %11 = vector.extract_strided_slice %10 {offsets = [0, 0], sizes = [8, 32], strides = [1, 1]} : vector<8x256xf32> to vector<8x32xf32>
    %12 = vector.extract_strided_slice %10 {offsets = [0, 32], sizes = [8, 32], strides = [1, 1]} : vector<8x256xf32> to vector<8x32xf32>
    %13 = vector.extract_strided_slice %10 {offsets = [0, 64], sizes = [8, 32], strides = [1, 1]} : vector<8x256xf32> to vector<8x32xf32>
    %14 = vector.extract_strided_slice %10 {offsets = [0, 96], sizes = [8, 32], strides = [1, 1]} : vector<8x256xf32> to vector<8x32xf32>
    %15 = vector.extract_strided_slice %10 {offsets = [0, 128], sizes = [8, 32], strides = [1, 1]} : vector<8x256xf32> to vector<8x32xf32>
    %16 = vector.extract_strided_slice %10 {offsets = [0, 160], sizes = [8, 32], strides = [1, 1]} : vector<8x256xf32> to vector<8x32xf32>
    %17 = vector.extract_strided_slice %10 {offsets = [0, 192], sizes = [8, 32], strides = [1, 1]} : vector<8x256xf32> to vector<8x32xf32>
    %18 = vector.extract_strided_slice %10 {offsets = [0, 224], sizes = [8, 32], strides = [1, 1]} : vector<8x256xf32> to vector<8x32xf32>
    %19 = tpu.concatenate %11, %12, %13, %14, %15, %16, %17, %18 in 0 : vector<8x32xf32>, vector<8x32xf32>, vector<8x32xf32>, vector<8x32xf32>, vector<8x32xf32>, vector<8x32xf32>, vector<8x32xf32>, vector<8x32xf32> -> vector<64x32xf32>
    %c0_3 = arith.constant 0 : index
    %c0_4 = arith.constant 0 : index
    %20 = vector.load %arg3[%c0_3, %c0_4] : memref<32x96xbf16, #tpu.memory_space<vmem>>, vector<32x96xbf16>
    %21 = arith.truncf %9 : vector<64x32xf32> to vector<64x32xbf16>
    %cst = arith.constant dense<0.000000e+00> : vector<64x96xf32>
    %22 = tpu.matmul %21, %20, %cst {dimension_numbers = #tpu.dot_dimension_numbers<[1], [0], [0], [1], [0, 0, 1, 1], [], []>} : vector<64x32xbf16>, vector<32x96xbf16>, vector<64x96xf32> -> vector<64x96xf32>
    %c0_5 = arith.constant 0 : index
    %c0_6 = arith.constant 0 : index
    %23 = vector.load %arg4[%c0_5, %c0_6] : memref<1x96xf32, #tpu.memory_space<vmem>>, vector<1x96xf32>
    %24 = vector.broadcast %23 : vector<1x96xf32> to vector<64x96xf32>
    %25 = arith.addf %22, %24 : vector<64x96xf32>
    %c0_7 = arith.constant 0 : index
    %c0_8 = arith.constant 0 : index
    %26 = vector.load %arg5[%c0_7, %c0_8] : memref<32x96xbf16, #tpu.memory_space<vmem>>, vector<32x96xbf16>
    %27 = arith.truncf %19 : vector<64x32xf32> to vector<64x32xbf16>
    %cst_9 = arith.constant dense<0.000000e+00> : vector<64x96xf32>
    %28 = tpu.matmul %27, %26, %cst_9 {dimension_numbers = #tpu.dot_dimension_numbers<[1], [0], [0], [1], [0, 0, 1, 1], [], []>} : vector<64x32xbf16>, vector<32x96xbf16>, vector<64x96xf32> -> vector<64x96xf32>
    %c0_10 = arith.constant 0 : index
    %c0_11 = arith.constant 0 : index
    %29 = vector.load %arg6[%c0_10, %c0_11] : memref<1x96xf32, #tpu.memory_space<vmem>>, vector<1x96xf32>
    %30 = vector.broadcast %29 : vector<1x96xf32> to vector<64x96xf32>
    %31 = arith.addf %28, %30 : vector<64x96xf32>
    %32 = vector.extract_strided_slice %25 {offsets = [0, 0], sizes = [64, 32], strides = [1, 1]} : vector<64x96xf32> to vector<64x32xf32>
    %33 = vector.extract_strided_slice %31 {offsets = [0, 0], sizes = [64, 32], strides = [1, 1]} : vector<64x96xf32> to vector<64x32xf32>
    %34 = vector.extract_strided_slice %31 {offsets = [0, 32], sizes = [64, 32], strides = [1, 1]} : vector<64x96xf32> to vector<64x32xf32>
    %35 = vector.extract_strided_slice %32 {offsets = [0, 0], sizes = [64, 8], strides = [1, 1]} : vector<64x32xf32> to vector<64x8xf32>
    %36 = vector.shape_cast %35 : vector<64x8xf32> to vector<8x8x8xf32>
    %37 = vector.extract_strided_slice %32 {offsets = [0, 8], sizes = [64, 8], strides = [1, 1]} : vector<64x32xf32> to vector<64x8xf32>
    %38 = vector.shape_cast %37 : vector<64x8xf32> to vector<8x8x8xf32>
    %39 = vector.extract_strided_slice %32 {offsets = [0, 16], sizes = [64, 8], strides = [1, 1]} : vector<64x32xf32> to vector<64x8xf32>
    %40 = vector.shape_cast %39 : vector<64x8xf32> to vector<8x8x8xf32>
    %41 = vector.extract_strided_slice %32 {offsets = [0, 24], sizes = [64, 8], strides = [1, 1]} : vector<64x32xf32> to vector<64x8xf32>
    %42 = vector.shape_cast %41 : vector<64x8xf32> to vector<8x8x8xf32>
    %43 = tpu.concatenate %36, %38, %40, %42 in 0 : vector<8x8x8xf32>, vector<8x8x8xf32>, vector<8x8x8xf32>, vector<8x8x8xf32> -> vector<32x8x8xf32>
    %44 = arith.truncf %43 : vector<32x8x8xf32> to vector<32x8x8xbf16>
    %45 = vector.extract_strided_slice %33 {offsets = [0, 0], sizes = [64, 8], strides = [1, 1]} : vector<64x32xf32> to vector<64x8xf32>
    %46 = vector.shape_cast %45 : vector<64x8xf32> to vector<8x8x8xf32>
    %47 = vector.extract_strided_slice %33 {offsets = [0, 8], sizes = [64, 8], strides = [1, 1]} : vector<64x32xf32> to vector<64x8xf32>
    %48 = vector.shape_cast %47 : vector<64x8xf32> to vector<8x8x8xf32>
    %49 = vector.extract_strided_slice %33 {offsets = [0, 16], sizes = [64, 8], strides = [1, 1]} : vector<64x32xf32> to vector<64x8xf32>
    %50 = vector.shape_cast %49 : vector<64x8xf32> to vector<8x8x8xf32>
    %51 = vector.extract_strided_slice %33 {offsets = [0, 24], sizes = [64, 8], strides = [1, 1]} : vector<64x32xf32> to vector<64x8xf32>
    %52 = vector.shape_cast %51 : vector<64x8xf32> to vector<8x8x8xf32>
    %53 = tpu.concatenate %46, %48, %50, %52 in 0 : vector<8x8x8xf32>, vector<8x8x8xf32>, vector<8x8x8xf32>, vector<8x8x8xf32> -> vector<32x8x8xf32>
    %54 = arith.truncf %53 : vector<32x8x8xf32> to vector<32x8x8xbf16>
    %55 = vector.extract_strided_slice %34 {offsets = [0, 0], sizes = [64, 8], strides = [1, 1]} : vector<64x32xf32> to vector<64x8xf32>
    %56 = vector.shape_cast %55 : vector<64x8xf32> to vector<8x8x8xf32>
    %57 = vector.extract_strided_slice %34 {offsets = [0, 8], sizes = [64, 8], strides = [1, 1]} : vector<64x32xf32> to vector<64x8xf32>
    %58 = vector.shape_cast %57 : vector<64x8xf32> to vector<8x8x8xf32>
    %59 = vector.extract_strided_slice %34 {offsets = [0, 16], sizes = [64, 8], strides = [1, 1]} : vector<64x32xf32> to vector<64x8xf32>
    %60 = vector.shape_cast %59 : vector<64x8xf32> to vector<8x8x8xf32>
    %61 = vector.extract_strided_slice %34 {offsets = [0, 24], sizes = [64, 8], strides = [1, 1]} : vector<64x32xf32> to vector<64x8xf32>
    %62 = vector.shape_cast %61 : vector<64x8xf32> to vector<8x8x8xf32>
    %63 = tpu.concatenate %56, %58, %60, %62 in 0 : vector<8x8x8xf32>, vector<8x8x8xf32>, vector<8x8x8xf32>, vector<8x8x8xf32> -> vector<32x8x8xf32>
    %64 = arith.truncf %63 : vector<32x8x8xf32> to vector<32x8x8xbf16>
    "tpu.trace_start"() <{level = 10 : i32, message = "gtd,gsd->gts"}> : () -> ()
    %cst_12 = arith.constant dense<0.000000e+00> : vector<32x8x8xf32>
    %65 = tpu.matmul %44, %54, %cst_12 {dimension_numbers = #tpu.dot_dimension_numbers<[2], [2], [1], [1], [0, 0, 0, 1, 1, 1], [0], [0]>} : vector<32x8x8xbf16>, vector<32x8x8xbf16>, vector<32x8x8xf32> -> vector<32x8x8xf32>
    "tpu.trace_stop"() : () -> ()
    %cst_13 = arith.constant 0.353553385 : f32
    %66 = vector.broadcast %cst_13 : f32 to vector<32x8x8xf32>
    %67 = arith.mulf %65, %66 : vector<32x8x8xf32>
    %cst_14 = arith.constant dense<0xFF800000> : vector<32x8xf32>
    %68 = vector.multi_reduction <maximumf>, %67, %cst_14 [2] : vector<32x8x8xf32> to vector<32x8xf32>
    %69 = vector.shape_cast %68 : vector<32x8xf32> to vector<32x8x1xf32>
    %70 = vector.broadcast %69 : vector<32x8x1xf32> to vector<32x8x8xf32>
    %71 = arith.subf %67, %70 : vector<32x8x8xf32>
    %72 = math.exp %71 : vector<32x8x8xf32>
    %cst_15 = arith.constant dense<0.000000e+00> : vector<32x8xf32>
    %73 = vector.multi_reduction <add>, %72, %cst_15 [2] : vector<32x8x8xf32> to vector<32x8xf32>
    %74 = vector.shape_cast %73 : vector<32x8xf32> to vector<32x8x1xf32>
    %75 = tpu.reciprocal %74 {approx = true} : vector<32x8x1xf32> -> vector<32x8x1xf32>
    %76 = vector.broadcast %75 : vector<32x8x1xf32> to vector<32x8x8xf32>
    %77 = arith.mulf %72, %76 : vector<32x8x8xf32>
    %78 = arith.truncf %77 : vector<32x8x8xf32> to vector<32x8x8xbf16>
    "tpu.trace_start"() <{level = 10 : i32, message = "gts,gsd->gtd"}> : () -> ()
    %cst_16 = arith.constant dense<0.000000e+00> : vector<32x8x8xf32>
    %79 = tpu.matmul %78, %64, %cst_16 {dimension_numbers = #tpu.dot_dimension_numbers<[2], [1], [1], [2], [0, 0, 0, 1, 1, 2], [0], [0]>} : vector<32x8x8xbf16>, vector<32x8x8xbf16>, vector<32x8x8xf32> -> vector<32x8x8xf32>
    "tpu.trace_stop"() : () -> ()
    %80 = vector.extract_strided_slice %79 {offsets = [0, 0, 0], sizes = [8, 8, 8], strides = [1, 1, 1]} : vector<32x8x8xf32> to vector<8x8x8xf32>
    %81 = vector.shape_cast %80 : vector<8x8x8xf32> to vector<64x8xf32>
    %82 = vector.extract_strided_slice %79 {offsets = [8, 0, 0], sizes = [8, 8, 8], strides = [1, 1, 1]} : vector<32x8x8xf32> to vector<8x8x8xf32>
    %83 = vector.shape_cast %82 : vector<8x8x8xf32> to vector<64x8xf32>
    %84 = vector.extract_strided_slice %79 {offsets = [16, 0, 0], sizes = [8, 8, 8], strides = [1, 1, 1]} : vector<32x8x8xf32> to vector<8x8x8xf32>
    %85 = vector.shape_cast %84 : vector<8x8x8xf32> to vector<64x8xf32>
    %86 = vector.extract_strided_slice %79 {offsets = [24, 0, 0], sizes = [8, 8, 8], strides = [1, 1, 1]} : vector<32x8x8xf32> to vector<8x8x8xf32>
    %87 = vector.shape_cast %86 : vector<8x8x8xf32> to vector<64x8xf32>
    %88 = tpu.concatenate %81, %83, %85, %87 in 1 : vector<64x8xf32>, vector<64x8xf32>, vector<64x8xf32>, vector<64x8xf32> -> vector<64x32xf32>
    %c0_17 = arith.constant 0 : index
    %c0_18 = arith.constant 0 : index
    %89 = vector.load %arg7[%c0_17, %c0_18] : memref<32x32xbf16, #tpu.memory_space<vmem>>, vector<32x32xbf16>
    %90 = arith.truncf %88 : vector<64x32xf32> to vector<64x32xbf16>
    %cst_19 = arith.constant dense<0.000000e+00> : vector<64x32xf32>
    %91 = tpu.matmul %90, %89, %cst_19 {dimension_numbers = #tpu.dot_dimension_numbers<[1], [0], [0], [1], [0, 0, 1, 1], [], []>} : vector<64x32xbf16>, vector<32x32xbf16>, vector<64x32xf32> -> vector<64x32xf32>
    %c0_20 = arith.constant 0 : index
    %c0_21 = arith.constant 0 : index
    %92 = vector.load %arg8[%c0_20, %c0_21] : memref<1x32xf32, #tpu.memory_space<vmem>>, vector<1x32xf32>
    %93 = vector.broadcast %92 : vector<1x32xf32> to vector<64x32xf32>
    %94 = arith.addf %91, %93 : vector<64x32xf32>
    %95 = vector.extract_strided_slice %31 {offsets = [0, 64], sizes = [64, 32], strides = [1, 1]} : vector<64x96xf32> to vector<64x32xf32>
    %96 = vector.extract_strided_slice %25 {offsets = [0, 32], sizes = [64, 32], strides = [1, 1]} : vector<64x96xf32> to vector<64x32xf32>
    %97 = vector.extract_strided_slice %25 {offsets = [0, 64], sizes = [64, 32], strides = [1, 1]} : vector<64x96xf32> to vector<64x32xf32>
    %98 = vector.extract_strided_slice %95 {offsets = [0, 0], sizes = [64, 8], strides = [1, 1]} : vector<64x32xf32> to vector<64x8xf32>
    %99 = vector.shape_cast %98 : vector<64x8xf32> to vector<8x8x8xf32>
    %100 = vector.extract_strided_slice %95 {offsets = [0, 8], sizes = [64, 8], strides = [1, 1]} : vector<64x32xf32> to vector<64x8xf32>
    %101 = vector.shape_cast %100 : vector<64x8xf32> to vector<8x8x8xf32>
    %102 = vector.extract_strided_slice %95 {offsets = [0, 16], sizes = [64, 8], strides = [1, 1]} : vector<64x32xf32> to vector<64x8xf32>
    %103 = vector.shape_cast %102 : vector<64x8xf32> to vector<8x8x8xf32>
    %104 = vector.extract_strided_slice %95 {offsets = [0, 24], sizes = [64, 8], strides = [1, 1]} : vector<64x32xf32> to vector<64x8xf32>
    %105 = vector.shape_cast %104 : vector<64x8xf32> to vector<8x8x8xf32>
    %106 = tpu.concatenate %99, %101, %103, %105 in 0 : vector<8x8x8xf32>, vector<8x8x8xf32>, vector<8x8x8xf32>, vector<8x8x8xf32> -> vector<32x8x8xf32>
    %107 = arith.truncf %106 : vector<32x8x8xf32> to vector<32x8x8xbf16>
    %108 = vector.extract_strided_slice %96 {offsets = [0, 0], sizes = [64, 8], strides = [1, 1]} : vector<64x32xf32> to vector<64x8xf32>
    %109 = vector.shape_cast %108 : vector<64x8xf32> to vector<8x8x8xf32>
    %110 = vector.extract_strided_slice %96 {offsets = [0, 8], sizes = [64, 8], strides = [1, 1]} : vector<64x32xf32> to vector<64x8xf32>
    %111 = vector.shape_cast %110 : vector<64x8xf32> to vector<8x8x8xf32>
    %112 = vector.extract_strided_slice %96 {offsets = [0, 16], sizes = [64, 8], strides = [1, 1]} : vector<64x32xf32> to vector<64x8xf32>
    %113 = vector.shape_cast %112 : vector<64x8xf32> to vector<8x8x8xf32>
    %114 = vector.extract_strided_slice %96 {offsets = [0, 24], sizes = [64, 8], strides = [1, 1]} : vector<64x32xf32> to vector<64x8xf32>
    %115 = vector.shape_cast %114 : vector<64x8xf32> to vector<8x8x8xf32>
    %116 = tpu.concatenate %109, %111, %113, %115 in 0 : vector<8x8x8xf32>, vector<8x8x8xf32>, vector<8x8x8xf32>, vector<8x8x8xf32> -> vector<32x8x8xf32>
    %117 = arith.truncf %116 : vector<32x8x8xf32> to vector<32x8x8xbf16>
    %118 = vector.extract_strided_slice %97 {offsets = [0, 0], sizes = [64, 8], strides = [1, 1]} : vector<64x32xf32> to vector<64x8xf32>
    %119 = vector.shape_cast %118 : vector<64x8xf32> to vector<8x8x8xf32>
    %120 = vector.extract_strided_slice %97 {offsets = [0, 8], sizes = [64, 8], strides = [1, 1]} : vector<64x32xf32> to vector<64x8xf32>
    %121 = vector.shape_cast %120 : vector<64x8xf32> to vector<8x8x8xf32>
    %122 = vector.extract_strided_slice %97 {offsets = [0, 16], sizes = [64, 8], strides = [1, 1]} : vector<64x32xf32> to vector<64x8xf32>
    %123 = vector.shape_cast %122 : vector<64x8xf32> to vector<8x8x8xf32>
    %124 = vector.extract_strided_slice %97 {offsets = [0, 24], sizes = [64, 8], strides = [1, 1]} : vector<64x32xf32> to vector<64x8xf32>
    %125 = vector.shape_cast %124 : vector<64x8xf32> to vector<8x8x8xf32>
    %126 = tpu.concatenate %119, %121, %123, %125 in 0 : vector<8x8x8xf32>, vector<8x8x8xf32>, vector<8x8x8xf32>, vector<8x8x8xf32> -> vector<32x8x8xf32>
    %127 = arith.truncf %126 : vector<32x8x8xf32> to vector<32x8x8xbf16>
    "tpu.trace_start"() <{level = 10 : i32, message = "gtd,gsd->gts"}> : () -> ()
    %cst_22 = arith.constant dense<0.000000e+00> : vector<32x8x8xf32>
    %128 = tpu.matmul %107, %117, %cst_22 {dimension_numbers = #tpu.dot_dimension_numbers<[2], [2], [1], [1], [0, 0, 0, 1, 1, 1], [0], [0]>} : vector<32x8x8xbf16>, vector<32x8x8xbf16>, vector<32x8x8xf32> -> vector<32x8x8xf32>
    "tpu.trace_stop"() : () -> ()
    %cst_23 = arith.constant 0.353553385 : f32
    %129 = vector.broadcast %cst_23 : f32 to vector<32x8x8xf32>
    %130 = arith.mulf %128, %129 : vector<32x8x8xf32>
    %cst_24 = arith.constant dense<0xFF800000> : vector<32x8xf32>
    %131 = vector.multi_reduction <maximumf>, %130, %cst_24 [2] : vector<32x8x8xf32> to vector<32x8xf32>
    %132 = vector.shape_cast %131 : vector<32x8xf32> to vector<32x8x1xf32>
    %133 = vector.broadcast %132 : vector<32x8x1xf32> to vector<32x8x8xf32>
    %134 = arith.subf %130, %133 : vector<32x8x8xf32>
    %135 = math.exp %134 : vector<32x8x8xf32>
    %cst_25 = arith.constant dense<0.000000e+00> : vector<32x8xf32>
    %136 = vector.multi_reduction <add>, %135, %cst_25 [2] : vector<32x8x8xf32> to vector<32x8xf32>
    %137 = vector.shape_cast %136 : vector<32x8xf32> to vector<32x8x1xf32>
    %138 = tpu.reciprocal %137 {approx = true} : vector<32x8x1xf32> -> vector<32x8x1xf32>
    %139 = vector.broadcast %138 : vector<32x8x1xf32> to vector<32x8x8xf32>
    %140 = arith.mulf %135, %139 : vector<32x8x8xf32>
    %141 = arith.truncf %140 : vector<32x8x8xf32> to vector<32x8x8xbf16>
    "tpu.trace_start"() <{level = 10 : i32, message = "gts,gsd->gtd"}> : () -> ()
    %cst_26 = arith.constant dense<0.000000e+00> : vector<32x8x8xf32>
    %142 = tpu.matmul %141, %127, %cst_26 {dimension_numbers = #tpu.dot_dimension_numbers<[2], [1], [1], [2], [0, 0, 0, 1, 1, 2], [0], [0]>} : vector<32x8x8xbf16>, vector<32x8x8xbf16>, vector<32x8x8xf32> -> vector<32x8x8xf32>
    "tpu.trace_stop"() : () -> ()
    %143 = vector.extract_strided_slice %142 {offsets = [0, 0, 0], sizes = [8, 8, 8], strides = [1, 1, 1]} : vector<32x8x8xf32> to vector<8x8x8xf32>
    %144 = vector.shape_cast %143 : vector<8x8x8xf32> to vector<64x8xf32>
    %145 = vector.extract_strided_slice %142 {offsets = [8, 0, 0], sizes = [8, 8, 8], strides = [1, 1, 1]} : vector<32x8x8xf32> to vector<8x8x8xf32>
    %146 = vector.shape_cast %145 : vector<8x8x8xf32> to vector<64x8xf32>
    %147 = vector.extract_strided_slice %142 {offsets = [16, 0, 0], sizes = [8, 8, 8], strides = [1, 1, 1]} : vector<32x8x8xf32> to vector<8x8x8xf32>
    %148 = vector.shape_cast %147 : vector<8x8x8xf32> to vector<64x8xf32>
    %149 = vector.extract_strided_slice %142 {offsets = [24, 0, 0], sizes = [8, 8, 8], strides = [1, 1, 1]} : vector<32x8x8xf32> to vector<8x8x8xf32>
    %150 = vector.shape_cast %149 : vector<8x8x8xf32> to vector<64x8xf32>
    %151 = tpu.concatenate %144, %146, %148, %150 in 1 : vector<64x8xf32>, vector<64x8xf32>, vector<64x8xf32>, vector<64x8xf32> -> vector<64x32xf32>
    %c0_27 = arith.constant 0 : index
    %c0_28 = arith.constant 0 : index
    %152 = vector.load %arg9[%c0_27, %c0_28] : memref<32x32xbf16, #tpu.memory_space<vmem>>, vector<32x32xbf16>
    %153 = arith.truncf %151 : vector<64x32xf32> to vector<64x32xbf16>
    %cst_29 = arith.constant dense<0.000000e+00> : vector<64x32xf32>
    %154 = tpu.matmul %153, %152, %cst_29 {dimension_numbers = #tpu.dot_dimension_numbers<[1], [0], [0], [1], [0, 0, 1, 1], [], []>} : vector<64x32xbf16>, vector<32x32xbf16>, vector<64x32xf32> -> vector<64x32xf32>
    %c0_30 = arith.constant 0 : index
    %c0_31 = arith.constant 0 : index
    %155 = vector.load %arg10[%c0_30, %c0_31] : memref<1x32xf32, #tpu.memory_space<vmem>>, vector<1x32xf32>
    %156 = vector.broadcast %155 : vector<1x32xf32> to vector<64x32xf32>
    %157 = arith.addf %154, %156 : vector<64x32xf32>
    %158 = arith.addf %94, %9 : vector<64x32xf32>
    %cst_32 = arith.constant dense<0.000000e+00> : vector<64xf32>
    %159 = vector.multi_reduction <add>, %158, %cst_32 [1] : vector<64x32xf32> to vector<64xf32>
    %160 = vector.shape_cast %159 : vector<64xf32> to vector<64x1xf32>
    %cst_33 = arith.constant 3.200000e+01 : f32
    %161 = vector.broadcast %cst_33 : f32 to vector<64x1xf32>
    %162 = arith.divf %160, %161 : vector<64x1xf32>
    %163 = vector.broadcast %162 : vector<64x1xf32> to vector<64x32xf32>
    %164 = arith.subf %158, %163 : vector<64x32xf32>
    %165 = arith.mulf %164, %164 : vector<64x32xf32>
    %cst_34 = arith.constant dense<0.000000e+00> : vector<64xf32>
    %166 = vector.multi_reduction <add>, %165, %cst_34 [1] : vector<64x32xf32> to vector<64xf32>
    %167 = vector.shape_cast %166 : vector<64xf32> to vector<64x1xf32>
    %cst_35 = arith.constant 3.200000e+01 : f32
    %168 = vector.broadcast %cst_35 : f32 to vector<64x1xf32>
    %169 = arith.divf %167, %168 : vector<64x1xf32>
    %c0_36 = arith.constant 0 : index
    %c0_37 = arith.constant 0 : index
    %170 = vector.load %arg11[%c0_36, %c0_37] : memref<1x32xf32, #tpu.memory_space<vmem>>, vector<1x32xf32>
    %171 = vector.broadcast %162 : vector<64x1xf32> to vector<64x32xf32>
    %172 = arith.subf %158, %171 : vector<64x32xf32>
    %cst_38 = arith.constant 9.99999996E-13 : f32
    %173 = vector.broadcast %cst_38 : f32 to vector<64x1xf32>
    %174 = arith.addf %169, %173 : vector<64x1xf32>
    %175 = math.rsqrt %174 : vector<64x1xf32>
    %176 = vector.broadcast %175 : vector<64x1xf32> to vector<64x32xf32>
    %177 = arith.mulf %172, %176 : vector<64x32xf32>
    %178 = vector.broadcast %170 : vector<1x32xf32> to vector<64x32xf32>
    %179 = arith.mulf %178, %177 : vector<64x32xf32>
    %c0_39 = arith.constant 0 : index
    %c0_40 = arith.constant 0 : index
    %180 = vector.load %arg12[%c0_39, %c0_40] : memref<1x32xf32, #tpu.memory_space<vmem>>, vector<1x32xf32>
    %181 = vector.broadcast %180 : vector<1x32xf32> to vector<64x32xf32>
    %182 = arith.addf %179, %181 : vector<64x32xf32>
    %183 = arith.addf %157, %19 : vector<64x32xf32>
    %cst_41 = arith.constant dense<0.000000e+00> : vector<64xf32>
    %184 = vector.multi_reduction <add>, %183, %cst_41 [1] : vector<64x32xf32> to vector<64xf32>
    %185 = vector.shape_cast %184 : vector<64xf32> to vector<64x1xf32>
    %cst_42 = arith.constant 3.200000e+01 : f32
    %186 = vector.broadcast %cst_42 : f32 to vector<64x1xf32>
    %187 = arith.divf %185, %186 : vector<64x1xf32>
    %188 = vector.broadcast %187 : vector<64x1xf32> to vector<64x32xf32>
    %189 = arith.subf %183, %188 : vector<64x32xf32>
    %190 = arith.mulf %189, %189 : vector<64x32xf32>
    %cst_43 = arith.constant dense<0.000000e+00> : vector<64xf32>
    %191 = vector.multi_reduction <add>, %190, %cst_43 [1] : vector<64x32xf32> to vector<64xf32>
    %192 = vector.shape_cast %191 : vector<64xf32> to vector<64x1xf32>
    %cst_44 = arith.constant 3.200000e+01 : f32
    %193 = vector.broadcast %cst_44 : f32 to vector<64x1xf32>
    %194 = arith.divf %192, %193 : vector<64x1xf32>
    %c0_45 = arith.constant 0 : index
    %c0_46 = arith.constant 0 : index
    %195 = vector.load %arg11[%c0_45, %c0_46] : memref<1x32xf32, #tpu.memory_space<vmem>>, vector<1x32xf32>
    %196 = vector.broadcast %187 : vector<64x1xf32> to vector<64x32xf32>
    %197 = arith.subf %183, %196 : vector<64x32xf32>
    %cst_47 = arith.constant 9.99999996E-13 : f32
    %198 = vector.broadcast %cst_47 : f32 to vector<64x1xf32>
    %199 = arith.addf %194, %198 : vector<64x1xf32>
    %200 = math.rsqrt %199 : vector<64x1xf32>
    %201 = vector.broadcast %200 : vector<64x1xf32> to vector<64x32xf32>
    %202 = arith.mulf %197, %201 : vector<64x32xf32>
    %203 = vector.broadcast %195 : vector<1x32xf32> to vector<64x32xf32>
    %204 = arith.mulf %203, %202 : vector<64x32xf32>
    %c0_48 = arith.constant 0 : index
    %c0_49 = arith.constant 0 : index
    %205 = vector.load %arg12[%c0_48, %c0_49] : memref<1x32xf32, #tpu.memory_space<vmem>>, vector<1x32xf32>
    %206 = vector.broadcast %205 : vector<1x32xf32> to vector<64x32xf32>
    %207 = arith.addf %204, %206 : vector<64x32xf32>
    %c0_50 = arith.constant 0 : index
    %c0_51 = arith.constant 0 : index
    %208 = vector.load %arg13[%c0_50, %c0_51] : memref<32x64xbf16, #tpu.memory_space<vmem>>, vector<32x64xbf16>
    %209 = arith.truncf %182 : vector<64x32xf32> to vector<64x32xbf16>
    %cst_52 = arith.constant dense<0.000000e+00> : vector<64x64xf32>
    %210 = tpu.matmul %209, %208, %cst_52 {dimension_numbers = #tpu.dot_dimension_numbers<[1], [0], [0], [1], [0, 0, 1, 1], [], []>} : vector<64x32xbf16>, vector<32x64xbf16>, vector<64x64xf32> -> vector<64x64xf32>
    %c0_53 = arith.constant 0 : index
    %c0_54 = arith.constant 0 : index
    %211 = vector.load %arg14[%c0_53, %c0_54] : memref<1x64xf32, #tpu.memory_space<vmem>>, vector<1x64xf32>
    %212 = vector.broadcast %211 : vector<1x64xf32> to vector<64x64xf32>
    %213 = arith.addf %210, %212 : vector<64x64xf32>
    %cst_55 = arith.constant 0.000000e+00 : f32
    %214 = vector.broadcast %cst_55 : f32 to vector<64x64xf32>
    %215 = arith.maximumf %213, %214 : vector<64x64xf32>
    %c0_56 = arith.constant 0 : index
    %c0_57 = arith.constant 0 : index
    %216 = vector.load %arg15[%c0_56, %c0_57] : memref<64x32xbf16, #tpu.memory_space<vmem>>, vector<64x32xbf16>
    %217 = arith.truncf %215 : vector<64x64xf32> to vector<64x64xbf16>
    %cst_58 = arith.constant dense<0.000000e+00> : vector<64x32xf32>
    %218 = tpu.matmul %217, %216, %cst_58 {dimension_numbers = #tpu.dot_dimension_numbers<[1], [0], [0], [1], [0, 0, 1, 1], [], []>} : vector<64x64xbf16>, vector<64x32xbf16>, vector<64x32xf32> -> vector<64x32xf32>
    %c0_59 = arith.constant 0 : index
    %c0_60 = arith.constant 0 : index
    %219 = vector.load %arg16[%c0_59, %c0_60] : memref<1x32xf32, #tpu.memory_space<vmem>>, vector<1x32xf32>
    %220 = vector.broadcast %219 : vector<1x32xf32> to vector<64x32xf32>
    %221 = arith.addf %218, %220 : vector<64x32xf32>
    %222 = arith.addf %221, %182 : vector<64x32xf32>
    %cst_61 = arith.constant dense<0.000000e+00> : vector<64xf32>
    %223 = vector.multi_reduction <add>, %222, %cst_61 [1] : vector<64x32xf32> to vector<64xf32>
    %224 = vector.shape_cast %223 : vector<64xf32> to vector<64x1xf32>
    %cst_62 = arith.constant 3.200000e+01 : f32
    %225 = vector.broadcast %cst_62 : f32 to vector<64x1xf32>
    %226 = arith.divf %224, %225 : vector<64x1xf32>
    %227 = vector.broadcast %226 : vector<64x1xf32> to vector<64x32xf32>
    %228 = arith.subf %222, %227 : vector<64x32xf32>
    %229 = arith.mulf %228, %228 : vector<64x32xf32>
    %cst_63 = arith.constant dense<0.000000e+00> : vector<64xf32>
    %230 = vector.multi_reduction <add>, %229, %cst_63 [1] : vector<64x32xf32> to vector<64xf32>
    %231 = vector.shape_cast %230 : vector<64xf32> to vector<64x1xf32>
    %cst_64 = arith.constant 3.200000e+01 : f32
    %232 = vector.broadcast %cst_64 : f32 to vector<64x1xf32>
    %233 = arith.divf %231, %232 : vector<64x1xf32>
    %c0_65 = arith.constant 0 : index
    %c0_66 = arith.constant 0 : index
    %234 = vector.load %arg17[%c0_65, %c0_66] : memref<1x32xf32, #tpu.memory_space<vmem>>, vector<1x32xf32>
    %235 = vector.broadcast %226 : vector<64x1xf32> to vector<64x32xf32>
    %236 = arith.subf %222, %235 : vector<64x32xf32>
    %cst_67 = arith.constant 9.99999996E-13 : f32
    %237 = vector.broadcast %cst_67 : f32 to vector<64x1xf32>
    %238 = arith.addf %233, %237 : vector<64x1xf32>
    %239 = math.rsqrt %238 : vector<64x1xf32>
    %240 = vector.broadcast %239 : vector<64x1xf32> to vector<64x32xf32>
    %241 = arith.mulf %236, %240 : vector<64x32xf32>
    %242 = vector.broadcast %234 : vector<1x32xf32> to vector<64x32xf32>
    %243 = arith.mulf %242, %241 : vector<64x32xf32>
    %c0_68 = arith.constant 0 : index
    %c0_69 = arith.constant 0 : index
    %244 = vector.load %arg18[%c0_68, %c0_69] : memref<1x32xf32, #tpu.memory_space<vmem>>, vector<1x32xf32>
    %245 = vector.broadcast %244 : vector<1x32xf32> to vector<64x32xf32>
    %246 = arith.addf %243, %245 : vector<64x32xf32>
    %c0_70 = arith.constant 0 : index
    %c0_71 = arith.constant 0 : index
    %247 = vector.load %arg13[%c0_70, %c0_71] : memref<32x64xbf16, #tpu.memory_space<vmem>>, vector<32x64xbf16>
    %248 = arith.truncf %207 : vector<64x32xf32> to vector<64x32xbf16>
    %cst_72 = arith.constant dense<0.000000e+00> : vector<64x64xf32>
    %249 = tpu.matmul %248, %247, %cst_72 {dimension_numbers = #tpu.dot_dimension_numbers<[1], [0], [0], [1], [0, 0, 1, 1], [], []>} : vector<64x32xbf16>, vector<32x64xbf16>, vector<64x64xf32> -> vector<64x64xf32>
    %c0_73 = arith.constant 0 : index
    %c0_74 = arith.constant 0 : index
    %250 = vector.load %arg14[%c0_73, %c0_74] : memref<1x64xf32, #tpu.memory_space<vmem>>, vector<1x64xf32>
    %251 = vector.broadcast %250 : vector<1x64xf32> to vector<64x64xf32>
    %252 = arith.addf %249, %251 : vector<64x64xf32>
    %cst_75 = arith.constant 0.000000e+00 : f32
    %253 = vector.broadcast %cst_75 : f32 to vector<64x64xf32>
    %254 = arith.maximumf %252, %253 : vector<64x64xf32>
    %c0_76 = arith.constant 0 : index
    %c0_77 = arith.constant 0 : index
    %255 = vector.load %arg15[%c0_76, %c0_77] : memref<64x32xbf16, #tpu.memory_space<vmem>>, vector<64x32xbf16>
    %256 = arith.truncf %254 : vector<64x64xf32> to vector<64x64xbf16>
    %cst_78 = arith.constant dense<0.000000e+00> : vector<64x32xf32>
    %257 = tpu.matmul %256, %255, %cst_78 {dimension_numbers = #tpu.dot_dimension_numbers<[1], [0], [0], [1], [0, 0, 1, 1], [], []>} : vector<64x64xbf16>, vector<64x32xbf16>, vector<64x32xf32> -> vector<64x32xf32>
    %c0_79 = arith.constant 0 : index
    %c0_80 = arith.constant 0 : index
    %258 = vector.load %arg16[%c0_79, %c0_80] : memref<1x32xf32, #tpu.memory_space<vmem>>, vector<1x32xf32>
    %259 = vector.broadcast %258 : vector<1x32xf32> to vector<64x32xf32>
    %260 = arith.addf %257, %259 : vector<64x32xf32>
    %261 = arith.addf %260, %207 : vector<64x32xf32>
    %cst_81 = arith.constant dense<0.000000e+00> : vector<64xf32>
    %262 = vector.multi_reduction <add>, %261, %cst_81 [1] : vector<64x32xf32> to vector<64xf32>
    %263 = vector.shape_cast %262 : vector<64xf32> to vector<64x1xf32>
    %cst_82 = arith.constant 3.200000e+01 : f32
    %264 = vector.broadcast %cst_82 : f32 to vector<64x1xf32>
    %265 = arith.divf %263, %264 : vector<64x1xf32>
    %266 = vector.broadcast %265 : vector<64x1xf32> to vector<64x32xf32>
    %267 = arith.subf %261, %266 : vector<64x32xf32>
    %268 = arith.mulf %267, %267 : vector<64x32xf32>
    %cst_83 = arith.constant dense<0.000000e+00> : vector<64xf32>
    %269 = vector.multi_reduction <add>, %268, %cst_83 [1] : vector<64x32xf32> to vector<64xf32>
    %270 = vector.shape_cast %269 : vector<64xf32> to vector<64x1xf32>
    %cst_84 = arith.constant 3.200000e+01 : f32
    %271 = vector.broadcast %cst_84 : f32 to vector<64x1xf32>
    %272 = arith.divf %270, %271 : vector<64x1xf32>
    %c0_85 = arith.constant 0 : index
    %c0_86 = arith.constant 0 : index
    %273 = vector.load %arg17[%c0_85, %c0_86] : memref<1x32xf32, #tpu.memory_space<vmem>>, vector<1x32xf32>
    %274 = vector.broadcast %265 : vector<64x1xf32> to vector<64x32xf32>
    %275 = arith.subf %261, %274 : vector<64x32xf32>
    %cst_87 = arith.constant 9.99999996E-13 : f32
    %276 = vector.broadcast %cst_87 : f32 to vector<64x1xf32>
    %277 = arith.addf %272, %276 : vector<64x1xf32>
    %278 = math.rsqrt %277 : vector<64x1xf32>
    %279 = vector.broadcast %278 : vector<64x1xf32> to vector<64x32xf32>
    %280 = arith.mulf %275, %279 : vector<64x32xf32>
    %281 = vector.broadcast %273 : vector<1x32xf32> to vector<64x32xf32>
    %282 = arith.mulf %281, %280 : vector<64x32xf32>
    %c0_88 = arith.constant 0 : index
    %c0_89 = arith.constant 0 : index
    %283 = vector.load %arg18[%c0_88, %c0_89] : memref<1x32xf32, #tpu.memory_space<vmem>>, vector<1x32xf32>
    %284 = vector.broadcast %283 : vector<1x32xf32> to vector<64x32xf32>
    %285 = arith.addf %282, %284 : vector<64x32xf32>
    %286 = vector.extract_strided_slice %246 {offsets = [0, 0], sizes = [8, 32], strides = [1, 1]} : vector<64x32xf32> to vector<8x32xf32>
    %287 = vector.extract_strided_slice %246 {offsets = [8, 0], sizes = [8, 32], strides = [1, 1]} : vector<64x32xf32> to vector<8x32xf32>
    %288 = vector.extract_strided_slice %246 {offsets = [16, 0], sizes = [8, 32], strides = [1, 1]} : vector<64x32xf32> to vector<8x32xf32>
    %289 = vector.extract_strided_slice %246 {offsets = [24, 0], sizes = [8, 32], strides = [1, 1]} : vector<64x32xf32> to vector<8x32xf32>
    %290 = vector.extract_strided_slice %246 {offsets = [32, 0], sizes = [8, 32], strides = [1, 1]} : vector<64x32xf32> to vector<8x32xf32>
    %291 = vector.extract_strided_slice %246 {offsets = [40, 0], sizes = [8, 32], strides = [1, 1]} : vector<64x32xf32> to vector<8x32xf32>
    %292 = vector.extract_strided_slice %246 {offsets = [48, 0], sizes = [8, 32], strides = [1, 1]} : vector<64x32xf32> to vector<8x32xf32>
    %293 = vector.extract_strided_slice %246 {offsets = [56, 0], sizes = [8, 32], strides = [1, 1]} : vector<64x32xf32> to vector<8x32xf32>
    %294 = tpu.concatenate %286, %287, %288, %289, %290, %291, %292, %293 in 1 : vector<8x32xf32>, vector<8x32xf32>, vector<8x32xf32>, vector<8x32xf32>, vector<8x32xf32>, vector<8x32xf32>, vector<8x32xf32>, vector<8x32xf32> -> vector<8x256xf32>
    %c0_90 = arith.constant 0 : index
    %c0_91 = arith.constant 0 : index
    %295 = vector.load %arg19[%c0_90, %c0_91] : memref<8x256xf32, #tpu.memory_space<vmem>>, vector<8x256xf32>
    tpu.vector_store %arg19[%c0_90, %c0_91], %294 {strides = array<i32>} : memref<8x256xf32, #tpu.memory_space<vmem>>, vector<8x256xf32>,
    %296 = vector.extract_strided_slice %285 {offsets = [0, 0], sizes = [8, 32], strides = [1, 1]} : vector<64x32xf32> to vector<8x32xf32>
    %297 = vector.extract_strided_slice %285 {offsets = [8, 0], sizes = [8, 32], strides = [1, 1]} : vector<64x32xf32> to vector<8x32xf32>
    %298 = vector.extract_strided_slice %285 {offsets = [16, 0], sizes = [8, 32], strides = [1, 1]} : vector<64x32xf32> to vector<8x32xf32>
    %299 = vector.extract_strided_slice %285 {offsets = [24, 0], sizes = [8, 32], strides = [1, 1]} : vector<64x32xf32> to vector<8x32xf32>
    %300 = vector.extract_strided_slice %285 {offsets = [32, 0], sizes = [8, 32], strides = [1, 1]} : vector<64x32xf32> to vector<8x32xf32>
    %301 = vector.extract_strided_slice %285 {offsets = [40, 0], sizes = [8, 32], strides = [1, 1]} : vector<64x32xf32> to vector<8x32xf32>
    %302 = vector.extract_strided_slice %285 {offsets = [48, 0], sizes = [8, 32], strides = [1, 1]} : vector<64x32xf32> to vector<8x32xf32>
    %303 = vector.extract_strided_slice %285 {offsets = [56, 0], sizes = [8, 32], strides = [1, 1]} : vector<64x32xf32> to vector<8x32xf32>
    %304 = tpu.concatenate %296, %297, %298, %299, %300, %301, %302, %303 in 1 : vector<8x32xf32>, vector<8x32xf32>, vector<8x32xf32>, vector<8x32xf32>, vector<8x32xf32>, vector<8x32xf32>, vector<8x32xf32>, vector<8x32xf32> -> vector<8x256xf32>
    %c0_92 = arith.constant 0 : index
    %c0_93 = arith.constant 0 : index
    %305 = vector.load %arg20[%c0_92, %c0_93] : memref<8x256xf32, #tpu.memory_space<vmem>>, vector<8x256xf32>
    tpu.vector_store %arg20[%c0_92, %c0_93], %304 {strides = array<i32>} : memref<8x256xf32, #tpu.memory_space<vmem>>, vector<8x256xf32>,
    return
  }
  func.func @transform_0(%arg0: i32) -> (i32, i32) {
    %c0_i32 = arith.constant 0 : i32
    %c0_i32_0 = arith.constant 0 : i32
    return %c0_i32, %arg0 : i32, i32
  }
  func.func @transform_1(%arg0: i32) -> (i32, i32) {
    %c0_i32 = arith.constant 0 : i32
    %c0_i32_0 = arith.constant 0 : i32
    return %c0_i32, %arg0 : i32, i32
  }
  func.func @transform_2(%arg0: i32) -> (i32, i32) {
    %c0_i32 = arith.constant 0 : i32
    %c0_i32_0 = arith.constant 0 : i32
    %c0_i32_1 = arith.constant 0 : i32
    return %c0_i32, %c0_i32_0 : i32, i32
  }
  func.func @transform_3(%arg0: i32) -> (i32, i32) {
    %c0_i32 = arith.constant 0 : i32
    %c0_i32_0 = arith.constant 0 : i32
    %c0_i32_1 = arith.constant 0 : i32
    return %c0_i32, %c0_i32_0 : i32, i32
  }
  func.func @transform_4(%arg0: i32) -> (i32, i32) {
    %c0_i32 = arith.constant 0 : i32
    %c0_i32_0 = arith.constant 0 : i32
    %c0_i32_1 = arith.constant 0 : i32
    return %c0_i32, %c0_i32_0 : i32, i32
  }
  func.func @transform_5(%arg0: i32) -> (i32, i32) {
    %c0_i32 = arith.constant 0 : i32
    %c0_i32_0 = arith.constant 0 : i32
    %c0_i32_1 = arith.constant 0 : i32
    return %c0_i32, %c0_i32_0 : i32, i32
  }
  func.func @transform_6(%arg0: i32) -> (i32, i32) {
    %c0_i32 = arith.constant 0 : i32
    %c0_i32_0 = arith.constant 0 : i32
    %c0_i32_1 = arith.constant 0 : i32
    return %c0_i32, %c0_i32_0 : i32, i32
  }
  func.func @transform_7(%arg0: i32) -> (i32, i32) {
    %c0_i32 = arith.constant 0 : i32
    %c0_i32_0 = arith.constant 0 : i32
    %c0_i32_1 = arith.constant 0 : i32
    return %c0_i32, %c0_i32_0 : i32, i32
  }
  func.func @transform_8(%arg0: i32) -> (i32, i32) {
    %c0_i32 = arith.constant 0 : i32
    %c0_i32_0 = arith.constant 0 : i32
    %c0_i32_1 = arith.constant 0 : i32
    return %c0_i32, %c0_i32_0 : i32, i32
  }
  func.func @transform_9(%arg0: i32) -> (i32, i32) {
    %c0_i32 = arith.constant 0 : i32
    %c0_i32_0 = arith.constant 0 : i32
    %c0_i32_1 = arith.constant 0 : i32
    return %c0_i32, %c0_i32_0 : i32, i32
  }
  func.func @transform_10(%arg0: i32) -> (i32, i32) {
    %c0_i32 = arith.constant 0 : i32
    %c0_i32_0 = arith.constant 0 : i32
    %c0_i32_1 = arith.constant 0 : i32
    return %c0_i32, %c0_i32_0 : i32, i32
  }
  func.func @transform_11(%arg0: i32) -> (i32, i32) {
    %c0_i32 = arith.constant 0 : i32
    %c0_i32_0 = arith.constant 0 : i32
    %c0_i32_1 = arith.constant 0 : i32
    return %c0_i32, %c0_i32_0 : i32, i32
  }
  func.func @transform_12(%arg0: i32) -> (i32, i32) {
    %c0_i32 = arith.constant 0 : i32
    %c0_i32_0 = arith.constant 0 : i32
    %c0_i32_1 = arith.constant 0 : i32
    return %c0_i32, %c0_i32_0 : i32, i32
  }
  func.func @transform_13(%arg0: i32) -> (i32, i32) {
    %c0_i32 = arith.constant 0 : i32
    %c0_i32_0 = arith.constant 0 : i32
    %c0_i32_1 = arith.constant 0 : i32
    return %c0_i32, %c0_i32_0 : i32, i32
  }
  func.func @transform_14(%arg0: i32) -> (i32, i32) {
    %c0_i32 = arith.constant 0 : i32
    %c0_i32_0 = arith.constant 0 : i32
    %c0_i32_1 = arith.constant 0 : i32
    return %c0_i32, %c0_i32_0 : i32, i32
  }
  func.func @transform_15(%arg0: i32) -> (i32, i32) {
    %c0_i32 = arith.constant 0 : i32
    %c0_i32_0 = arith.constant 0 : i32
    %c0_i32_1 = arith.constant 0 : i32
    return %c0_i32, %c0_i32_0 : i32, i32
  }
  func.func @transform_16(%arg0: i32) -> (i32, i32) {
    %c0_i32 = arith.constant 0 : i32
    %c0_i32_0 = arith.constant 0 : i32
    %c0_i32_1 = arith.constant 0 : i32
    return %c0_i32, %c0_i32_0 : i32, i32
  }
  func.func @transform_17(%arg0: i32) -> (i32, i32) {
    %c0_i32 = arith.constant 0 : i32
    %c0_i32_0 = arith.constant 0 : i32
    %c0_i32_1 = arith.constant 0 : i32
    return %c0_i32, %c0_i32_0 : i32, i32
  }
  func.func @transform_18(%arg0: i32) -> (i32, i32) {
    %c0_i32 = arith.constant 0 : i32
    %c0_i32_0 = arith.constant 0 : i32
    return %c0_i32, %arg0 : i32, i32
  }
  func.func @transform_19(%arg0: i32) -> (i32, i32) {
    %c0_i32 = arith.constant 0 : i32
    %c0_i32_0 = arith.constant 0 : i32
    return %c0_i32, %arg0 : i32, i32
  }
}

</mosaic_0001>

<bundles_post_ra>
// kernel: tpu_custom_call.1
= control target key start
LH: loop header
LB: loop body
LE: loop exit
PB: predicated region body
PF: predicated region fallthrough
CT: control target
= control target key end

     0   :  { %s14492_s0 = inlined_call_operand.vmem [shape: f32[8,256], index: 0, kind: input, shape index: {}]   ;;  %s14493_s1 = inlined_call_operand.vmem [shape: f32[8,256], index: 1, kind: input, shape index: {}]   ;;  %s14494_s2 = inlined_call_operand.vmem [shape: bf16[32,96], index: 2, kind: input, shape index: {}]   ;;  %s14495_s3 = inlined_call_operand.vmem [shape: f32[1,96], index: 3, kind: input, shape index: {}]   ;;  %s14496_s4 = inlined_call_operand.hbm [shape: bf16[32,96], index: 4, kind: input, shape index: {}]   ;;  %s14497_s5 = inlined_call_operand.vmem [shape: f32[1,96], index: 5, kind: input, shape index: {}]   ;;  %s14498_s6 = inlined_call_operand.hbm [shape: bf16[32,32], index: 6, kind: input, shape index: {}]   ;;  %s14499_s7 = inlined_call_operand.hbm [shape: f32[1,32], index: 7, kind: input, shape index: {}]   ;;  %s14500_s8 = inlined_call_operand.hbm [shape: bf16[32,32], index: 8, kind: input, shape index: {}]   ;;  %s14501_s9 = inlined_call_operand.hbm [shape: f32[1,32], index: 9, kind: input, shape index: {}]   ;;  %s14502_s10 = inlined_call_operand.vmem [shape: f32[1,32], index: 10, kind: input, shape index: {}]   ;;  %s14503_s11 = inlined_call_operand.vmem [shape: f32[1,32], index: 11, kind: input, shape index: {}]   ;;  %s14504_s12 = inlined_call_operand.vmem [shape: bf16[32,64], index: 12, kind: input, shape index: {}]   ;;  %s14505_s13 = inlined_call_operand.vmem [shape: f32[1,64], index: 13, kind: input, shape index: {}]   ;;  %s14506_s14 = inlined_call_operand.vmem [shape: bf16[64,32], index: 14, kind: input, shape index: {}]   ;;  %s14507_s15 = inlined_call_operand.vmem [shape: f32[1,32], index: 15, kind: input, shape index: {}]   ;;  %s14508_s16 = inlined_call_operand.vmem [shape: f32[1,32], index: 16, kind: input, shape index: {}]   ;;  %s14509_s17 = inlined_call_operand.vmem [shape: f32[1,32], index: 17, kind: input, shape index: {}]   ;;  %s14510_s18 = inlined_call_operand.hbm [shape: f32[8,256], index: 18, kind: output, shape index: {0}]   ;;  %s14511_s19 = inlined_call_operand.hbm [shape: f32[8,256], index: 19, kind: output, shape index: {1}]  }
   0x1   :  { %14625 = sst [smem:[#allocation104_spill]] %s14492_s0 }
   0x2   :  { %14626 = sst [smem:[#allocation105_spill]] %s14493_s1 }
   0x3   :  { %14627 = sst [smem:[#allocation106_spill]] %s14494_s2 }
   0x4   :  { %14628 = sst [smem:[#allocation107_spill]] %s14495_s3 }
   0x5   :  { %25 = vsyncpa [#allocation3], 0 }
   0x6   :  { %26 = vsyncpa [#allocation6], 0 }
   0x7   :  { %27 = vsyncpa [#allocation9], 0 }
   0x8   :  { %28 = vsyncpa [#allocation4], 0 }
   0x9   :  { %29 = vsyncpa [#allocation13], 0  ;;  %s11266_s0 = smov [#allocation5]   ;;  %s11267_s20 = smov [#allocation8]  }
   0xa   :  { %s57_s30 = sshll.u32 %s11266_s0, 4  ;;  %s79_s21 = sshll.u32 %s11267_s20, 4  ;;  %s58_s30 = int_to_ptr.vmem [resolvable:$true] %s57_s30  ;;  %s11385_s21 = int_to_ptr.vmem [resolvable:$true] %s79_s21 }
   0xb   :  { %s11102_s2 = scalar_lea.hbm %s14498_s6, 256 }
   0xc   :  { %p11103_p0 = scmp.ne.s32.totalorder %s14498_s6, %s11102_s2  ;;  %p11106_p1 = scmp.lt.u32.totalorder %s11102_s2, %s14498_s6 }
   0xe   :  { %p11108_p2 = pnand %p11106_p1, %p11103_p0 }
  0x10   :  { %11111 = shalt.err (!%p11108_p2)
}
  0x11   :  { %s11112_s26 = scalar_lea.vmem %s58_s30, 256  ;;  %p11117_p4 = scmp.lt.s32.totalorder %s58_s30, %s58_s30 }
  0x12   :  { %p11113_p3 = scmp.ne.s32.totalorder %s58_s30, %s11112_s26  ;;  %p11118_p5 = scmp.lt.s32.totalorder %s11112_s26, %s11112_s26 }
  0x14   :  { %p11119_p6 = por %p11118_p5, %p11117_p4 }
  0x16   :  { %p11120_p7 = pnand %p11119_p6, %p11113_p3 }
  0x18   :  { %11123 = shalt.err (!%p11120_p7)
}
  0x19   :  { %s11268_s27 = smov 64   ;;  %s11269_s28 = smov 4  }
  0x1a   :  { %63 = dma.hbm_to_vmem [thread:$0]  %s14498_s6, 256, %s58_s30, [#allocation6], %s11268_s27, %s11268_s27, %s11269_s28  }
  0x1b   :  { %s11124_s22 = scalar_lea.hbm %s14500_s8, 256 }
  0x1c   :  { %p11125_p8 = scmp.ne.s32.totalorder %s14500_s8, %s11124_s22  ;;  %p11128_p9 = scmp.lt.u32.totalorder %s11124_s22, %s14500_s8 }
  0x1e   :  { %p11130_p10 = pnand %p11128_p9, %p11125_p8 }
  0x20   :  { %11133 = shalt.err (!%p11130_p10)
}
  0x21   :  { %s11134_s3 = scalar_lea.vmem %s11385_s21, 256  ;;  %p11139_p12 = scmp.lt.s32.totalorder %s11385_s21, %s11385_s21 }
  0x22   :  { %p11135_p11 = scmp.ne.s32.totalorder %s11385_s21, %s11134_s3  ;;  %p11140_p13 = scmp.lt.s32.totalorder %s11134_s3, %s11134_s3 }
  0x24   :  { %p11141_p0 = por %p11140_p13, %p11139_p12 }
  0x26   :  { %p11142_p1 = pnand %p11141_p0, %p11135_p11 }
  0x28   :  { %11145 = shalt.err (!%p11142_p1)
}
  0x29   :  { %85 = dma.hbm_to_vmem [thread:$0]  %s14500_s8, 256, %s11385_s21, [#allocation9], %s11268_s27, %s11268_s27, %s11269_s28  }
  0x2a   :  { %s11270_s26 = smov [#allocation2]   ;;  %s11271_s0 = smov [#allocation7]  }
  0x2b   :  { %s43_s29 = sshll.u32 %s11270_s26, 4  ;;  %s70_s20 = sshll.u32 %s11271_s0, 4  ;;  %s44_s29 = int_to_ptr.vmem [resolvable:$true] %s43_s29  ;;  %s71_s20 = int_to_ptr.vmem [resolvable:$true] %s70_s20 }
  0x2c   :  { %s11146_s2 = scalar_lea.hbm %s14496_s4, 256 }
  0x2d   :  { %p11147_p2 = scmp.ne.s32.totalorder %s14496_s4, %s11146_s2  ;;  %p11150_p3 = scmp.lt.u32.totalorder %s11146_s2, %s14496_s4 }
  0x2f   :  { %p11152_p4 = pnand %p11150_p3, %p11147_p2 }
  0x31   :  { %11155 = shalt.err (!%p11152_p4)
}
  0x32   :  { %s11156_s8 = scalar_lea.vmem %s44_s29, 256  ;;  %p11161_p6 = scmp.lt.s32.totalorder %s44_s29, %s44_s29 }
  0x33   :  { %p11157_p5 = scmp.ne.s32.totalorder %s44_s29, %s11156_s8  ;;  %p11162_p7 = scmp.lt.s32.totalorder %s11156_s8, %s11156_s8 }
  0x35   :  { %p11163_p8 = por %p11162_p7, %p11161_p6 }
  0x37   :  { %p11164_p9 = pnand %p11163_p8, %p11157_p5 }
  0x39   :  { %11167 = shalt.err (!%p11164_p9)
}
  0x3a   :  { %49 = dma.hbm_to_vmem [thread:$0]  %s14496_s4, 256, %s44_s29, [#allocation3], %s11268_s27, %s11268_s27, %s11269_s28  }
  0x3b   :  { %s11168_s0 = scalar_lea.hbm %s14499_s7, 16 }
  0x3c   :  { %p11169_p10 = scmp.ne.s32.totalorder %s14499_s7, %s11168_s0  ;;  %p11172_p11 = scmp.lt.u32.totalorder %s11168_s0, %s14499_s7 }
  0x3e   :  { %p11174_p12 = pnand %p11172_p11, %p11169_p10 }
  0x40   :  { %11177 = shalt.err (!%p11174_p12)
}
  0x41   :  { %s11178_s24 = scalar_lea.vmem %s71_s20, 16  ;;  %s11182_s25 = scalar_lea.vmem %s71_s20, 32 }
  0x42   :  { %p11179_p13 = scmp.ne.s32.totalorder %s71_s20, %s11178_s24  ;;  %p11183_p0 = scmp.lt.s32.totalorder %s71_s20, %s71_s20 }
  0x43   :  { %p11184_p1 = scmp.lt.s32.totalorder %s11182_s25, %s11178_s24 }
  0x45   :  { %p11185_p2 = por %p11184_p1, %p11183_p0 }
  0x47   :  { %p11186_p3 = pnand %p11185_p2, %p11179_p13 }
  0x49   :  { %11189 = shalt.err (!%p11186_p3)
}
  0x4a   :  { %73 = dma.hbm_to_vmem [thread:$0]  %s14499_s7, 16, %s71_s20, [#allocation6]  }
  0x4b   :  { %s11272_s29 = smov [#allocation10]   ;;  %s11190_s6 = scalar_lea.hbm %s14501_s9, 16 }
  0x4c   :  { %s92_s3 = sshll.u32 %s11272_s29, 4  ;;  %p11191_p4 = scmp.ne.s32.totalorder %s14501_s9, %s11190_s6  ;;  %s93_s3 = int_to_ptr.vmem [resolvable:$true] %s92_s3 }
  0x4d   :  { %p11194_p5 = scmp.lt.u32.totalorder %s11190_s6, %s14501_s9 }
  0x4f   :  { %p11196_p6 = pnand %p11194_p5, %p11191_p4 }
  0x51   :  { %11199 = shalt.err (!%p11196_p6)
}
  0x52   :  { %s11200_s22 = scalar_lea.vmem %s93_s3, 16  ;;  %s11204_s7 = scalar_lea.vmem %s93_s3, 32 }
  0x53   :  { %p11201_p7 = scmp.ne.s32.totalorder %s93_s3, %s11200_s22  ;;  %p11205_p8 = scmp.lt.s32.totalorder %s93_s3, %s93_s3 }
  0x54   :  { %p11206_p9 = scmp.lt.s32.totalorder %s11204_s7, %s11200_s22 }
  0x56   :  { %p11207_p10 = por %p11206_p9, %p11205_p8 }
  0x58   :  { %p11208_p11 = pnand %p11207_p10, %p11201_p7 }
  0x5a   :  { %11211 = shalt.err (!%p11208_p11)
}
  0x5b   :  { %95 = dma.hbm_to_vmem [thread:$0]  %s14501_s9, 16, %s93_s3, [#allocation9]  }
  0x5c   :  { %11256 = dma.done.wait [#allocation3], 256  }
  0x5d   :  { %11257 = vsyncadd [#allocation3], 4294967040 }
  0x5e   :  { %11258 = dma.done.wait [#allocation6], 272  }
  0x5f   :  { %11259 = vsyncadd [#allocation6], 4294967024 }
  0x60   :  { %11260 = dma.done.wait [#allocation9], 272  }
  0x61   :  { %11261 = vsyncadd [#allocation9], 4294967024  ;;  %s14629_s25 = sld [smem:[#allocation104_spill]]  ;;  %s11273_s4 = smov 32   ;;  %v10766_v4 = vld [vmem:[#allocation2] sm:$0xff]   ;;  %vm199_vm0 = vcmask 261120  }
  0x62   :  { %s11274_s28 = smov 96   ;;  %s14630_s21 = sld [smem:[#allocation105_spill]]  ;;  %v10767_v14 = vld [vmem:[#allocation2 + $0x8] sm:$0xff]   ;;  %v14541_v28 = vmov 0.0   ;;  %vm11276_vm1 = vmmov 0   ;;  %vm605_vm2 = vcmask 64512  }
  0x63   :  { %s14631_s6 = sld [smem:[#allocation106_spill]]  ;;  %s14644_s23 = sld [smem:[#allocation107_spill]]  ;;  %v9144_v40 = vld [vmem:[%s14497_s5] ss:$0 sm:$0xff]  ;;  %vm2500_vm3 = vcmask 1043456   ;;  %vm4167_vm4 = vcmask 130048  }
  0x64   :  { %s11277_s5 = smov 120   ;;  %s11278_s8 = smov 112   ;;  %vm4176_vm5 = vcmask 195584   ;;  %vm8523_vm6 = vcmask 523264   ;;  %vm9067_vm7 = vcmask 785408  }
  0x65   :  { %s11279_s9 = smov 104   ;;  %s11280_s3 = smov 8  }
  0x66   :  { %s11282_s30 = smov 24  }
  0x67   :  { %v129_v0 = vld [vmem:[%s14629_s25 + $0x8] sm:$0xff]  ;;  %v128_v5 = vld [vmem:[%s14629_s25] sm:$0xff] }
  0x68   :  { %147 = vrot.lane.b32.xlu1 %v129_v0, %s11273_s4  ;;  %141 = vrot.lane.b32.xlu0 %v129_v0, %s11274_s28  ;;  %v150_v1 = vld [vmem:[%s14630_s21] sm:$0xff]  ;;  %v151_v6 = vld [vmem:[%s14630_s21 + $0x8] sm:$0xff] }
  0x69   :  { %v10764_v2 = vld [vmem:[%s14631_s6] sm:$0xff]   ;;  %v10765_v3 = vld [vmem:[%s14631_s6 + $0x8] sm:$0xff]   ;;  %s11281_s6 = smov 16  }
  0x6a   :  { %10501 = vmatprep.subr.bf16.mxu1 %v10764_v2  ;;  %9629 = vmatprep.subr.bf16.mxu0 %v10764_v2  ;;  %v9137_v29 = vld [vmem:[%s14644_s23] ss:$0 sm:$0xff] }
  0x6b   :  { %10503 = vmatpush3.bf16.msra.mxu1 %v10764_v2  ;;  %9630 = vmatpush3.bf16.msra.mxu0 %v10764_v2 }
  0x6c   :  { %153 = vrot.lane.b32.xlu1 %v150_v1, %s11274_s28  ;;  %144 = vrot.lane.b32.xlu0 %v129_v0, %s11268_s27 }
  0x6d   :  { %10502 = vmatprep.subr.bf16.mxu1 %v10765_v3  ;;  %9631 = vmatprep.subr.bf16.mxu0 %v10765_v3 }
  0x6f   :  { %10504 = vmatpush3.bf16.msra.mxu1 %v10765_v3  ;;  %9632 = vmatpush3.bf16.msra.mxu0 %v10765_v3 }
  0x70   :  { %159 = vrot.lane.b32.xlu1 %v150_v1, %s11273_s4  ;;  %156 = vrot.lane.b32.xlu0 %v150_v1, %s11268_s27 }
  0x71   :  { %9641 = vmatprep.subr.bf16.mxu1 %v10766_v4  ;;  %9653 = vmatprep.subr.bf16.mxu0 %v14541_v28 }
  0x74   :  { %134 = vrot.lane.b32.xlu1 %v128_v5, %s11268_s27  ;;  %131 = vrot.lane.b32.xlu0 %v128_v5, %s11274_s28 }
  0x78   :  { %163 = vrot.lane.b32.xlu1 %v151_v6, %s11274_s28  ;;  %137 = vrot.lane.b32.xlu0 %v128_v5, %s11273_s4 }
  0x7c   :  { %169 = vrot.lane.b32.xlu1 %v151_v6, %s11273_s4  ;;  %166 = vrot.lane.b32.xlu0 %v151_v6, %s11268_s27 }
  0xda   :  { %v11491_v7 = vpop.permute.xlu1 %147  ;;  %v11493_v8 = vpop.permute.xlu0 %141 }
  0xdb   :  { %14632 = vst [vmem:[#allocation19_spill] sm:$0xff] %v11491_v7  ;;  %14633 = vst [vmem:[#allocation20_spill] sm:$0xff] %v11493_v8  ;;  %v178_v9 = vpack.c.bf16 %v11493_v8, %v129_v0 }
  0xdd   :  { %9637 = vmatprep.mubr.msk.bf16.mxu1 %vm199_vm0, %v178_v9 }
  0xde   :  { %v11497_v10 = vpop.permute.xlu1 %153  ;;  %v11499_v11 = vpop.permute.xlu0 %144 }
  0xdf   :  { %14634 = vst [vmem:[#allocation21_spill] sm:$0xff] %v11497_v10  ;;  %14635 = vst [vmem:[#allocation22_spill] sm:$0xff] %v11499_v11  ;;  %v281_v12 = vpack.c.bf16 %v11497_v10, %v150_v1  ;;  %v179_v13 = vpack.c.bf16 %v11491_v7, %v11499_v11 }
  0xe1   :  { %9638 = vmatmul.mubr.msk.bf16.vlgmr.msra.gmra.mrb[0].mxu1 %vm199_vm0, %v179_v13 }
  0xe2   :  { %v11505_v15 = vpop.permute.xlu1 %159  ;;  %9642 = vmatpush3.bf16.msra.mxu1 %v10766_v4  ;;  %v11507_v16 = vpop.permute.xlu0 %156  ;;  %9645 = vmatprep.mubr.msk.bf16.mxu1 %vm199_vm0, %v281_v12 }
  0xe3   :  { %14636 = vst [vmem:[#allocation23_spill] sm:$0xff] %v11505_v15  ;;  %14637 = vst [vmem:[#allocation24_spill] sm:$0xff] %v11507_v16  ;;  %9643 = vmatprep.subr.bf16.mxu1 %v10767_v14  ;;  %v282_v17 = vpack.c.bf16 %v11505_v15, %v11507_v16 }
  0xe6   :  { %9644 = vmatpush3.bf16.msra.mxu1 %v10767_v14  ;;  %v11512_v18 = vpop.permute.xlu1 %134  ;;  %v11514_v19 = vpop.permute.xlu0 %131 }
  0xe7   :  { %14638 = vst [vmem:[#allocation25_spill] sm:$0xff] %v11512_v18  ;;  %14639 = vst [vmem:[#allocation26_spill] sm:$0xff] %v11514_v19  ;;  %v176_v20 = vpack.c.bf16 %v11514_v19, %v128_v5  ;;  %9659 = vmatprep.subr.bf16.mxu1 %v14541_v28 }
  0xe9   :  { %9646 = vmatmul.mubr.msk.bf16.vlgmr.msra.gmra.mrb[4].mxu1 %vm199_vm0, %v282_v17  ;;  %9633 = vmatprep.mubr.msk.bf16.mxu0 %vm199_vm0, %v176_v20 }
  0xea   :  { %v11519_v21 = vpop.permute.xlu1 %163  ;;  %v11521_v22 = vpop.permute.xlu0 %137 }
  0xeb   :  { %14640 = vst [vmem:[#allocation27_spill] sm:$0xff] %v11519_v21  ;;  %14641 = vst [vmem:[#allocation28_spill] sm:$0xff] %v11521_v22  ;;  %v283_v23 = vpack.c.bf16 %v11519_v21, %v151_v6  ;;  %v177_v24 = vpack.c.bf16 %v11521_v22, %v11512_v18 }
  0xed   :  { %9634 = vmatmul.mubr.msk.bf16.vlgmr.msra.gmra.mrb[0].mxu0 %vm199_vm0, %v177_v24  ;;  %9649 = vmatprep.mubr.msk.bf16.mxu1 %vm199_vm0, %v283_v23 }
  0xee   :  { %v11528_v25 = vpop.permute.xlu1 %169  ;;  %v11530_v26 = vpop.permute.xlu0 %166  ;;  %9655 = vmatprep.mubr.msk.bf16.mxu0 %vm11276_vm1, %v14541_v28 }
  0xef   :  { %14642 = vst [vmem:[#allocation29_spill] sm:$0xff] %v11528_v25  ;;  %14643 = vst [vmem:[#allocation30_spill] sm:$0xff] %v11530_v26  ;;  %v284_v27 = vpack.c.bf16 %v11528_v25, %v11530_v26 }
  0xf1   :  { %9650 = vmatmul.mubr.msk.bf16.gmra.mrb[8].mxu1 %vm199_vm0, %v284_v27 }
  0xf2   :  { %9661 = vmatprep.mubr.msk.bf16.mxu1 %vm11276_vm1, %v14541_v28 }
 0x1b4   :  { %v9639_v30 = vpop.f32.mrb[0].mxu1 }
 0x1b5   :  { %v262_v31 = vpop.f32.mrb[1].mxu1  ;;  %v11544_v33 = vadd.f32 %v9639_v30, %v9137_v29 }
 0x1b6   :  { %v9640_v32 = vpop.f32.mrb[2].mxu1  ;;  %v11548_v36 = vadd.f32 %v9137_v29, %v262_v31 }
 0x1b7   :  { %v11546_v34 = vadd.f32 %v9640_v32, %v9137_v29  ;;  %v265_v35 = vpop.f32.mrb[3].mxu1 }
 0x1b8   :  { %v11550_v37 = vadd.f32 %v9137_v29, %v265_v35 }
 0x1b9   :  { %v11554_v38 = vpack.i.bf16 %v11546_v34, %v11544_v33 }
 0x1ba   :  { %v11558_v39 = vpack.i.bf16 %v11550_v37, %v11548_v36 }
 0x1bc   :  { %v9647_v41 = vpop.f32.mrb[4].mxu1 }
 0x1bd   :  { %v350_v42 = vpop.f32.mrb[5].mxu1  ;;  %v359_v45 = vadd.f32 %v9647_v41, %v9144_v40 }
 0x1be   :  { %v351_v43 = vadd.f32 %v9144_v40, %v350_v42  ;;  %v9648_v44 = vpop.f32.mrb[6].mxu1 }
 0x1bf   :  { %v362_v46 = vadd.f32 %v9648_v44, %v9144_v40  ;;  %v353_v47 = vpop.f32.mrb[7].mxu1  ;;  %v11578_v2 = vpack.c.bf16 %v359_v45, %v359_v45 }
 0x1c0   :  { %v354_v48 = vadd.f32 %v9144_v40, %v353_v47  ;;  %v9635_v49 = vpop.f32.mrb[0].mxu0  ;;  %v11563_v50 = vpack.c.bf16 %v351_v43, %v351_v43  ;;  %v11680_v47 = vpack.c.bf16 %v11546_v34, %v11546_v34 }
 0x1c1   :  { %v255_v51 = vadd.f32 %v9635_v49, %v9137_v29  ;;  %v246_v52 = vpop.f32.mrb[1].mxu0  ;;  %v11565_v53 = vpack.i.bf16 %v362_v46, %v359_v45  ;;  %14647 = vst [vmem:[#allocation33_spill] sm:$0xff] %v11578_v2  ;;  %v11591_v17 = vpack.c.bf16 %v362_v46, %v362_v46  ;;  %v702_v24 = vsel %vm605_vm2, %v11578_v2, 0 }
 0x1c2   :  { %14645 = vst [vmem:[#allocation31_spill] sm:$0xff] %v11563_v50  ;;  %v247_v54 = vadd.f32 %v9137_v29, %v246_v52  ;;  %v9636_v55 = vpop.f32.mrb[2].mxu0  ;;  %v610_v56 = vsel %vm605_vm2, %v11563_v50, 0  ;;  %v11569_v57 = vpack.i.bf16 %v354_v48, %v351_v43  ;;  %v11571_v58 = vpack.c.bf16 %v354_v48, %v354_v48  ;;  %14660 = vst [vmem:[#allocation46_spill] sm:$0xff] %v11680_v47 }
 0x1c3   :  { %v258_v59 = vadd.f32 %v9636_v55, %v9137_v29  ;;  %v249_v60 = vpop.f32.mrb[3].mxu0  ;;  %9654 = vmatpush3.bf16.xpose.msra.mxu0 %v610_v56  ;;  %14649 = vst [vmem:[#allocation35_spill] sm:$0xff] %v11591_v17  ;;  %v11616_v31 = vpack.c.bf16 %v255_v51, %v255_v51  ;;  %v11647_v43 = vpack.c.bf16 %v11548_v36, %v11548_v36 }
 0x1c4   :  { %14646 = vst [vmem:[#allocation32_spill] sm:$0xff] %v11571_v58  ;;  %v250_v61 = vadd.f32 %v9137_v29, %v249_v60  ;;  %10525 = vrot.lane.b32.xlu0 %v11569_v57, %s11277_s5  ;;  %v9651_v62 = vpop.f32.mrb[8].mxu1  ;;  %v656_v63 = vsel %vm605_vm2, %v11571_v58, 0  ;;  %9665 = vmatprep.subr.bf16.mxu0 %v14541_v28  ;;  %v11582_v4 = vpack.c.bf16 %v247_v54, %v247_v54  ;;  %v748_v29 = vsel %vm605_vm2, %v11591_v17, 0 }
 0x1c5   :  { %v375_v0 = vadd.f32 %v9651_v62, %v9144_v40  ;;  %v366_v1 = vpop.f32.mrb[9].mxu1  ;;  %9660 = vmatpush3.bf16.xpose.msra.mxu1 %v656_v63  ;;  %v11580_v3 = vpack.i.bf16 %v258_v59, %v255_v51  ;;  %14652 = vst [vmem:[#allocation38_spill] sm:$0xff] %v11616_v31  ;;  %14656 = vst [vmem:[#allocation42_spill] sm:$0xff] %v11647_v43  ;;  %v11655_v45 = vpack.c.bf16 %v11550_v37, %v11550_v37 }
 0x1c6   :  { %14648 = vst [vmem:[#allocation34_spill] sm:$0xff] %v11582_v4  ;;  %v367_v5 = vadd.f32 %v9144_v40, %v366_v1  ;;  %v9652_v6 = vpop.f32.mrb[10].mxu1  ;;  %v11584_v9 = vpack.i.bf16 %v250_v61, %v247_v54  ;;  %9671 = vmatprep.subr.bf16.mxu1 %v14541_v28  ;;  %v11595_v23 = vpack.c.bf16 %v250_v61, %v250_v61 }
 0x1c7   :  { %v378_v12 = vadd.f32 %v9652_v6, %v9144_v40  ;;  %v369_v13 = vpop.f32.mrb[11].mxu1  ;;  %v11642_v42 = vpack.c.bf16 %v375_v0, %v375_v0  ;;  %14658 = vst [vmem:[#allocation44_spill] sm:$0xff] %v11655_v45  ;;  %v11674_v37 = vpack.c.bf16 %v11544_v33, %v11544_v33 }
 0x1c8   :  { %v370_v14 = vadd.f32 %v9144_v40, %v369_v13  ;;  %10535 = vrot.lane.b32.xlu0 %v11565_v53, %s11277_s5  ;;  %10530 = vrot.lane.b32.xlu1 %v11584_v9, %s11277_s5  ;;  %14650 = vst [vmem:[#allocation36_spill] sm:$0xff] %v11595_v23  ;;  %v11609_v30 = vpack.c.bf16 %v367_v5, %v367_v5 }
 0x1c9   :  { %v11593_v20 = vpack.i.bf16 %v378_v12, %v375_v0  ;;  %v11626_v40 = vpack.c.bf16 %v258_v59, %v258_v59  ;;  %14655 = vst [vmem:[#allocation41_spill] sm:$0xff] %v11642_v42  ;;  %v11650_v44 = vpack.c.bf16 %v378_v12, %v378_v12  ;;  %v886_v46 = vsel %vm605_vm2, %v11642_v42, 0  ;;  %14659 = vst [vmem:[#allocation45_spill] sm:$0xff] %v11674_v37 }
 0x1ca   :  { %9656 = vmatmul.mubr.msk.bf16.vlgmr.msra.gmra.mrb[4].mxu0 %vm605_vm2, %v11582_v4  ;;  %v10544_v27 = vpack.i.bf16 %v370_v14, %v367_v5  ;;  %14651 = vst [vmem:[#allocation37_spill] sm:$0xff] %v11609_v30  ;;  %v794_v32 = vsel %vm605_vm2, %v11609_v30, 0  ;;  %v11622_v35 = vpack.c.bf16 %v370_v14, %v370_v14 }
 0x1cb   :  { %9666 = vmatpush3.bf16.xpose.msra.mxu0 %v702_v24  ;;  %9667 = vmatprep.mubr.msk.bf16.mxu0 %vm11276_vm1, %v14541_v28  ;;  %14654 = vst [vmem:[#allocation40_spill] sm:$0xff] %v11626_v40  ;;  %14657 = vst [vmem:[#allocation43_spill] sm:$0xff] %v11650_v44  ;;  %v932_v36 = vsel %vm605_vm2, %v11650_v44, 0 }
 0x1cc   :  { %10540 = vrot.lane.b32.xlu1 %v11580_v3, %s11277_s5  ;;  %9662 = vmatmul.mubr.msk.bf16.vlgmr.msra.gmra.mrb[12].mxu1 %vm605_vm2, %v11595_v23  ;;  %14653 = vst [vmem:[#allocation39_spill] sm:$0xff] %v11622_v35  ;;  %v840_v41 = vsel %vm605_vm2, %v11622_v35, 0 }
 0x1cd   :  { %10545 = vrot.lane.b32.xlu0 %v10544_v27, %s11277_s5  ;;  %9672 = vmatpush3.bf16.xpose.msra.mxu1 %v748_v29 }
 0x1ce   :  { %9677 = vmatprep.subr.bf16.mxu0 %v14541_v28  ;;  %9673 = vmatprep.mubr.msk.bf16.mxu1 %vm11276_vm1, %v14541_v28 }
 0x1cf   :  { %9683 = vmatprep.subr.bf16.mxu1 %v14541_v28 }
 0x1d0   :  { %10550 = vrot.lane.b32.xlu1 %v11558_v39, %s11277_s5 }
 0x1d1   :  { %10555 = vrot.lane.b32.xlu0 %v11593_v20, %s11277_s5 }
 0x1d2   :  { %9668 = vmatmul.mubr.msk.bf16.vlgmr.msra.gmra.mrb[8].mxu0 %vm605_vm2, %v11616_v31 }
 0x1d3   :  { %9678 = vmatpush3.bf16.xpose.msra.mxu0 %v794_v32  ;;  %9679 = vmatprep.mubr.msk.bf16.mxu0 %vm11276_vm1, %v14541_v28 }
 0x1d4   :  { %10560 = vrot.lane.b32.xlu1 %v11554_v38, %s11277_s5  ;;  %9674 = vmatmul.mubr.msk.bf16.vlgmr.msra.gmra.mrb[16].mxu1 %vm605_vm2, %v11626_v40 }
 0x1d5   :  { %10565 = vrot.lane.b32.xlu0 %v11569_v57, %s11278_s8  ;;  %9684 = vmatpush3.bf16.xpose.msra.mxu1 %v840_v41 }
 0x1d6   :  { %9689 = vmatprep.subr.bf16.mxu0 %v14541_v28  ;;  %9685 = vmatprep.mubr.msk.bf16.mxu1 %vm11276_vm1, %v14541_v28 }
 0x1d7   :  { %9695 = vmatprep.subr.bf16.mxu1 %v14541_v28 }
 0x1d8   :  { %10570 = vrot.lane.b32.xlu1 %v11584_v9, %s11278_s8 }
 0x1d9   :  { %10575 = vrot.lane.b32.xlu0 %v11565_v53, %s11278_s8 }
 0x1da   :  { %9680 = vmatmul.mubr.msk.bf16.vlgmr.msra.gmra.mrb[12].mxu0 %vm605_vm2, %v11647_v43 }
 0x1db   :  { %9690 = vmatpush3.bf16.xpose.msra.mxu0 %v886_v46  ;;  %9691 = vmatprep.mubr.msk.bf16.mxu0 %vm11276_vm1, %v14541_v28 }
 0x1dc   :  { %10580 = vrot.lane.b32.xlu1 %v11580_v3, %s11278_s8  ;;  %9686 = vmatmul.mubr.msk.bf16.vlgmr.msra.gmra.mrb[20].mxu1 %vm605_vm2, %v11655_v45 }
 0x1dd   :  { %10585 = vrot.lane.b32.xlu0 %v10544_v27, %s11278_s8  ;;  %9696 = vmatpush3.bf16.xpose.msra.mxu1 %v932_v36 }
 0x1de   :  { %9697 = vmatprep.mubr.msk.bf16.mxu1 %vm11276_vm1, %v14541_v28  ;;  %9701 = vmatprep.subr.bf16.mxu0 %v14541_v28 }
 0x1df   :  { %9707 = vmatprep.subr.bf16.mxu1 %v14541_v28 }
 0x1e0   :  { %10590 = vrot.lane.b32.xlu1 %v11558_v39, %s11278_s8 }
 0x1e1   :  { %10595 = vrot.lane.b32.xlu0 %v11593_v20, %s11278_s8 }
 0x1e2   :  { %9692 = vmatmul.mubr.msk.bf16.vlgmr.msra.gmra.mrb[16].mxu0 %vm605_vm2, %v11674_v37 }
 0x1e3   :  { %9703 = vmatprep.mubr.msk.bf16.mxu0 %vm11276_vm1, %v14541_v28 }
 0x1e4   :  { %10600 = vrot.lane.b32.xlu1 %v11554_v38, %s11278_s8  ;;  %9698 = vmatmul.mubr.msk.bf16.vlgmr.msra.gmra.mrb[24].mxu1 %vm605_vm2, %v11680_v47 }
 0x1e5   :  { %10605 = vrot.lane.b32.xlu0 %v11569_v57, %s11279_s9  ;;  %9709 = vmatprep.mubr.msk.bf16.mxu1 %vm11276_vm1, %v14541_v28 }
 0x1e8   :  { %10610 = vrot.lane.b32.xlu1 %v11584_v9, %s11279_s9 }
 0x1e9   :  { %10615 = vrot.lane.b32.xlu0 %v11565_v53, %s11279_s9 }
 0x1ec   :  { %10620 = vrot.lane.b32.xlu1 %v11580_v3, %s11279_s9 }
 0x1ed   :  { %10625 = vrot.lane.b32.xlu0 %v10544_v27, %s11279_s9 }
 0x1f0   :  { %10630 = vrot.lane.b32.xlu1 %v11558_v39, %s11279_s9 }
 0x1f1   :  { %10635 = vrot.lane.b32.xlu0 %v11593_v20, %s11279_s9 }
 0x1f4   :  { %10640 = vrot.lane.b32.xlu1 %v11554_v38, %s11279_s9 }
 0x1f5   :  { %2545 = vrot.lane.b32.xlu0 %v11571_v58, %s11274_s28 }
 0x1f8   :  { %2495 = vrot.lane.b32.xlu1 %v11563_v50, %s11274_s28 }
 0x1f9   :  { %2643 = vrot.lane.b32.xlu0 %v11591_v17, %s11274_s28 }
 0x1fc   :  { %2594 = vrot.lane.b32.xlu1 %v11578_v2, %s11274_s28 }
 0x1fd   :  { %2839 = vrot.lane.b32.xlu0 %v11650_v44, %s11274_s28 }
 0x200   :  { %2790 = vrot.lane.b32.xlu1 %v11642_v42, %s11274_s28 }
 0x201   :  { %2741 = vrot.lane.b32.xlu0 %v11622_v35, %s11274_s28 }
 0x204   :  { %2692 = vrot.lane.b32.xlu1 %v11609_v30, %s11274_s28 }
 0x236   :  { %v10526_v33 = vpop.permute.xlu0 %10525 }
 0x237   :  { %v10528_v34 = vunpack.i.h.bf16 %v10526_v33  ;;  %v10527_v38 = vunpack.i.l.bf16 %v10526_v33 }
 0x239   :  { %v11714_v39 = vpack.c.bf16 %v10528_v34, %v10528_v34  ;;  %v11716_v48 = vpack.c.bf16 %v10527_v38, %v10527_v38 }
 0x23a   :  { %v10536_v49 = vpop.permute.xlu0 %10535  ;;  %v10531_v51 = vpop.permute.xlu1 %10530 }
 0x23b   :  { %14661 = vst [vmem:[#allocation47_spill] sm:$0xff] %v11714_v39  ;;  %14662 = vst [vmem:[#allocation48_spill] sm:$0xff] %v11716_v48  ;;  %v10538_v52 = vunpack.i.h.bf16 %v10536_v49  ;;  %v10537_v53 = vunpack.i.l.bf16 %v10536_v49  ;;  %v978_v54 = vsel %vm605_vm2, %v11716_v48, 0  ;;  %v1024_v55 = vsel %vm605_vm2, %v11714_v39, 0 }
 0x23c   :  { %9702 = vmatpush3.bf16.xpose.msra.mxu0 %v978_v54  ;;  %9708 = vmatpush3.bf16.xpose.msra.mxu1 %v1024_v55  ;;  %v10533_v57 = vunpack.i.h.bf16 %v10531_v51  ;;  %v10532_v59 = vunpack.i.l.bf16 %v10531_v51 }
 0x23d   :  { %v11722_v56 = vpack.c.bf16 %v10538_v52, %v10538_v52  ;;  %v11724_v60 = vpack.c.bf16 %v10537_v53, %v10537_v53  ;;  %9713 = vmatprep.subr.bf16.mxu0 %v14541_v28  ;;  %9719 = vmatprep.subr.bf16.mxu1 %v14541_v28 }
 0x23e   :  { %v11732_v62 = vpack.c.bf16 %v10533_v57, %v10533_v57  ;;  %v11734_v63 = vpack.c.bf16 %v10532_v59, %v10532_v59  ;;  %v10541_v0 = vpop.permute.xlu1 %10540 }
 0x23f   :  { %14663 = vst [vmem:[#allocation49_spill] sm:$0xff] %v11722_v56  ;;  %14664 = vst [vmem:[#allocation50_spill] sm:$0xff] %v11724_v60  ;;  %v10546_v61 = vpop.permute.xlu0 %10545  ;;  %3035 = vrot.lane.b32.xlu0 %v11722_v56, %s11274_s28  ;;  %2986 = vrot.lane.b32.xlu1 %v11724_v60, %s11274_s28  ;;  %v1070_v6 = vsel %vm605_vm2, %v11724_v60, 0  ;;  %v1116_v9 = vsel %vm605_vm2, %v11722_v56, 0  ;;  %v10543_v12 = vunpack.i.h.bf16 %v10541_v0  ;;  %v10542_v13 = vunpack.i.l.bf16 %v10541_v0 }
 0x240   :  { %14665 = vst [vmem:[#allocation51_spill] sm:$0xff] %v11732_v62  ;;  %14666 = vst [vmem:[#allocation52_spill] sm:$0xff] %v11734_v63  ;;  %v10548_v3 = vunpack.i.h.bf16 %v10546_v61  ;;  %v10547_v5 = vunpack.i.l.bf16 %v10546_v61 }
 0x241   :  { %v11754_v27 = vpack.c.bf16 %v10543_v12, %v10543_v12  ;;  %v11756_v29 = vpack.c.bf16 %v10542_v13, %v10542_v13 }
 0x242   :  { %v11750_v20 = vpack.c.bf16 %v10548_v3, %v10548_v3  ;;  %v11752_v24 = vpack.c.bf16 %v10547_v5, %v10547_v5  ;;  %v10551_v32 = vpop.permute.xlu1 %10550 }
 0x243   :  { %v10556_v1 = vpop.permute.xlu0 %10555  ;;  %9704 = vmatmul.mubr.msk.bf16.vlgmr.msra.gmra.mrb[20].mxu0 %vm605_vm2, %v11734_v63  ;;  %9710 = vmatmul.mubr.msk.bf16.vlgmr.msra.gmra.mrb[28].mxu1 %vm605_vm2, %v11732_v62  ;;  %14669 = vst [vmem:[#allocation55_spill] sm:$0xff] %v11754_v27  ;;  %14670 = vst [vmem:[#allocation56_spill] sm:$0xff] %v11756_v29  ;;  %v10553_v51 = vunpack.i.h.bf16 %v10551_v32  ;;  %v10552_v54 = vunpack.i.l.bf16 %v10551_v32 }
 0x244   :  { %9714 = vmatpush3.bf16.xpose.msra.mxu0 %v1070_v6  ;;  %9720 = vmatpush3.bf16.xpose.msra.mxu1 %v1116_v9  ;;  %14667 = vst [vmem:[#allocation53_spill] sm:$0xff] %v11750_v20  ;;  %14668 = vst [vmem:[#allocation54_spill] sm:$0xff] %v11752_v24  ;;  %v1162_v33 = vsel %vm605_vm2, %v11752_v24, 0  ;;  %v1208_v34 = vsel %vm605_vm2, %v11750_v20, 0  ;;  %v10558_v38 = vunpack.i.h.bf16 %v10556_v1  ;;  %v10557_v49 = vunpack.i.l.bf16 %v10556_v1 }
 0x245   :  { %9715 = vmatprep.mubr.msk.bf16.mxu0 %vm11276_vm1, %v14541_v28  ;;  %9721 = vmatprep.mubr.msk.bf16.mxu1 %vm11276_vm1, %v14541_v28  ;;  %v11786_v61 = vpack.c.bf16 %v10553_v51, %v10553_v51  ;;  %v11788_v1 = vpack.c.bf16 %v10552_v54, %v10552_v54 }
 0x246   :  { %9725 = vmatprep.subr.bf16.mxu0 %v14541_v28  ;;  %9731 = vmatprep.subr.bf16.mxu1 %v14541_v28  ;;  %v11782_v57 = vpack.c.bf16 %v10558_v38, %v10558_v38  ;;  %v11784_v59 = vpack.c.bf16 %v10557_v49, %v10557_v49  ;;  %v10561_v6 = vpop.permute.xlu1 %10560 }
 0x247   :  { %v10566_v14 = vpop.permute.xlu0 %10565  ;;  %14675 = vst [vmem:[#allocation61_spill] sm:$0xff] %v11786_v61  ;;  %14676 = vst [vmem:[#allocation62_spill] sm:$0xff] %v11788_v1 }
 0x248   :  { %14673 = vst [vmem:[#allocation59_spill] sm:$0xff] %v11782_v57  ;;  %14674 = vst [vmem:[#allocation60_spill] sm:$0xff] %v11784_v59  ;;  %v10568_v0 = vunpack.i.h.bf16 %v10566_v14  ;;  %v10567_v3 = vunpack.i.l.bf16 %v10566_v14  ;;  %v1254_v9 = vsel %vm605_vm2, %v11784_v59, 0  ;;  %v1300_v12 = vsel %vm605_vm2, %v11782_v57, 0 }
 0x249   :  { %v10563_v14 = vunpack.i.h.bf16 %v10561_v6 }
 0x24a   :  { %v11802_v13 = vpack.c.bf16 %v10568_v0, %v10568_v0  ;;  %v10571_v51 = vpop.permute.xlu1 %10570 }
 0x24b   :  { %v10576_v41 = vpop.permute.xlu0 %10575  ;;  %9716 = vmatmul.mubr.msk.bf16.vlgmr.msra.gmra.mrb[24].mxu0 %vm605_vm2, %v11756_v29  ;;  %9722 = vmatmul.mubr.msk.bf16.vlgmr.msra.gmra.mrb[32].mxu1 %vm605_vm2, %v11754_v27  ;;  %v11821_v38 = vpack.c.bf16 %v10563_v14, %v10563_v14 }
 0x24c   :  { %v10578_v46 = vunpack.i.h.bf16 %v10576_v41  ;;  %v10577_v36 = vunpack.i.l.bf16 %v10576_v41  ;;  %9726 = vmatpush3.bf16.xpose.msra.mxu0 %v1162_v33  ;;  %9732 = vmatpush3.bf16.xpose.msra.mxu1 %v1208_v34  ;;  %14677 = vst [vmem:[#allocation63_spill] sm:$0xff] %v11802_v13  ;;  %v11806_v41 = vpack.c.bf16 %v10567_v3, %v10567_v3  ;;  %v1392_v54 = vsel %vm605_vm2, %v11802_v13, 0 }
 0x24d   :  { %9727 = vmatprep.mubr.msk.bf16.mxu0 %vm11276_vm1, %v14541_v28  ;;  %9733 = vmatprep.mubr.msk.bf16.mxu1 %vm11276_vm1, %v14541_v28  ;;  %14680 = vst [vmem:[#allocation66_spill] sm:$0xff] %v11821_v38 }
 0x24e   :  { %v11766_v52 = vpack.c.bf16 %v10578_v46, %v10578_v46  ;;  %v11768_v53 = vpack.c.bf16 %v10577_v36, %v10577_v36  ;;  %9743 = vmatprep.subr.bf16.mxu1 %v14541_v28  ;;  %9737 = vmatprep.subr.bf16.mxu0 %v14541_v28  ;;  %14678 = vst [vmem:[#allocation64_spill] sm:$0xff] %v11806_v41  ;;  %v10562_v46 = vunpack.i.l.bf16 %v10561_v6  ;;  %v1346_v0 = vsel %vm605_vm2, %v11806_v41, 0 }
 0x24f   :  { %v11774_v55 = vpop.permute.xlu0 %10585  ;;  %v10573_v6 = vunpack.i.h.bf16 %v10571_v51 }
 0x250   :  { %14671 = vst [vmem:[#allocation57_spill] sm:$0xff] %v11766_v52  ;;  %14672 = vst [vmem:[#allocation58_spill] sm:$0xff] %v11768_v53  ;;  %3427 = vrot.lane.b32.xlu0 %v11766_v52, %s11274_s28  ;;  %3378 = vrot.lane.b32.xlu1 %v11768_v53, %s11274_s28  ;;  %v11823_v49 = vpack.c.bf16 %v10562_v46, %v10562_v46  ;;  %v10588_v14 = vunpack.i.h.bf16 %v11774_v55 }
 0x252   :  { %14681 = vst [vmem:[#allocation67_spill] sm:$0xff] %v11823_v49 }
 0x253   :  { %v10596_v5 = vpop.permute.xlu0 %10595  ;;  %9734 = vmatmul.mubr.msk.bf16.vlgmr.msra.gmra.mrb[36].mxu1 %vm605_vm2, %v11786_v61  ;;  %9728 = vmatmul.mubr.msk.bf16.vlgmr.msra.gmra.mrb[28].mxu0 %vm605_vm2, %v11788_v1 }
 0x254   :  { %2937 = vrot.lane.b32.xlu0 %v11714_v39, %s11274_s28  ;;  %2888 = vrot.lane.b32.xlu1 %v11716_v48, %s11274_s28  ;;  %v10598_v33 = vunpack.i.h.bf16 %v10596_v5 }
 0x255   :  { %9738 = vmatpush3.bf16.xpose.msra.mxu0 %v1254_v9  ;;  %9744 = vmatpush3.bf16.xpose.msra.mxu1 %v1300_v12  ;;  %v10597_v9 = vunpack.i.l.bf16 %v10596_v5  ;;  %v10572_v12 = vunpack.i.l.bf16 %v10571_v51  ;;  %v11850_v5 = vpack.c.bf16 %v10573_v6, %v10573_v6  ;;  %v1484_v51 = vsel %vm605_vm2, %v11766_v52, 0 }
 0x256   :  { %9739 = vmatprep.mubr.msk.bf16.mxu0 %vm11276_vm1, %v14541_v28  ;;  %9745 = vmatprep.mubr.msk.bf16.mxu1 %vm11276_vm1, %v14541_v28  ;;  %v11837_v3 = vpack.c.bf16 %v10598_v33, %v10598_v33  ;;  %v10581_v33 = vpop.permute.xlu1 %10580  ;;  %v11869_v6 = vpack.c.bf16 %v10588_v14, %v10588_v14 }
 0x257   :  { %v11804_v32 = vpop.permute.xlu0 %10605  ;;  %9755 = vmatprep.subr.bf16.mxu1 %v14541_v28  ;;  %9749 = vmatprep.subr.bf16.mxu0 %v14541_v28  ;;  %14683 = vst [vmem:[#allocation69_spill] sm:$0xff] %v11850_v5  ;;  %v11852_v46 = vpack.c.bf16 %v10597_v9, %v10597_v9  ;;  %v10583_v9 = vunpack.i.h.bf16 %v10581_v33 }
 0x258   :  { %v10607_v36 = vunpack.i.l.bf16 %v11804_v32  ;;  %3329 = vrot.lane.b32.xlu0 %v11802_v13, %s11274_s28  ;;  %3280 = vrot.lane.b32.xlu1 %v11806_v41, %s11274_s28  ;;  %14682 = vst [vmem:[#allocation68_spill] sm:$0xff] %v11837_v3  ;;  %14686 = vst [vmem:[#allocation72_spill] sm:$0xff] %v11869_v6 }
 0x259   :  { %14684 = vst [vmem:[#allocation70_spill] sm:$0xff] %v11852_v46  ;;  %v11883_v14 = vpack.c.bf16 %v10583_v9, %v10583_v9 }
 0x25a   :  { %v11819_v34 = vpack.c.bf16 %v10607_v36, %v10607_v36  ;;  %v11854_v36 = vpack.c.bf16 %v10572_v12, %v10572_v12  ;;  %v10582_v12 = vunpack.i.l.bf16 %v10581_v33  ;;  %v10591_v33 = vpop.permute.xlu1 %10590 }
 0x25b   :  { %14688 = vst [vmem:[#allocation74_spill] sm:$0xff] %v11883_v14  ;;  %v10593_v9 = vunpack.i.h.bf16 %v10591_v33  ;;  %v10616_v15 = vpop.permute.xlu0 %10615 }
 0x25c   :  { %14679 = vst [vmem:[#allocation65_spill] sm:$0xff] %v11819_v34  ;;  %3231 = vrot.lane.b32.xlu0 %v11782_v57, %s11274_s28  ;;  %9746 = vmatmul.mubr.msk.bf16.vlgmr.msra.gmra.mrb[40].mxu1 %vm605_vm2, %v11821_v38  ;;  %14685 = vst [vmem:[#allocation71_spill] sm:$0xff] %v11854_v36  ;;  %v10617_v11 = vunpack.i.l.bf16 %v10616_v15 }
 0x25d   :  { %3672 = vrot.lane.b32.xlu1 %v11819_v34, %s11274_s28  ;;  %9740 = vmatmul.mubr.msk.bf16.vlgmr.msra.gmra.mrb[32].mxu0 %vm605_vm2, %v11823_v49  ;;  %v11903_v25 = vpack.c.bf16 %v10593_v9, %v10593_v9 }
 0x25e   :  { %9756 = vmatpush3.bf16.xpose.msra.mxu1 %v1392_v54  ;;  %9750 = vmatpush3.bf16.xpose.msra.mxu0 %v1346_v0  ;;  %v10587_v54 = vunpack.i.l.bf16 %v11774_v55  ;;  %v1438_v0 = vsel %vm605_vm2, %v11768_v53, 0  ;;  %v10601_v26 = vpop.permute.xlu1 %10600 }
 0x25f   :  { %9751 = vmatprep.mubr.msk.bf16.mxu0 %vm11276_vm1, %v14541_v28  ;;  %9757 = vmatprep.mubr.msk.bf16.mxu1 %vm11276_vm1, %v14541_v28  ;;  %14690 = vst [vmem:[#allocation76_spill] sm:$0xff] %v11903_v25  ;;  %v10603_v9 = vunpack.i.h.bf16 %v10601_v26  ;;  %v10626_v19 = vpop.permute.xlu0 %10625 }
 0x260   :  { %3623 = vrot.lane.b32.xlu0 %v11837_v3, %s11274_s28  ;;  %9767 = vmatprep.subr.bf16.mxu1 %v14541_v28  ;;  %v11880_v55 = vpack.c.bf16 %v10587_v54, %v10587_v54  ;;  %v10628_v22 = vunpack.i.h.bf16 %v10626_v19  ;;  %v10627_v18 = vunpack.i.l.bf16 %v10626_v19 }
 0x261   :  { %3182 = vrot.lane.b32.xlu1 %v11784_v59, %s11274_s28  ;;  %9761 = vmatprep.subr.bf16.mxu0 %v14541_v28  ;;  %v11924_v10 = vpack.c.bf16 %v10603_v9, %v10603_v9 }
 0x262   :  { %14687 = vst [vmem:[#allocation73_spill] sm:$0xff] %v11880_v55  ;;  %v1530_v54 = vsel %vm605_vm2, %v11880_v55, 0  ;;  %v11966_v19 = vpack.c.bf16 %v10627_v18, %v10627_v18 }
 0x263   :  { %14693 = vst [vmem:[#allocation79_spill] sm:$0xff] %v11924_v10 }
 0x264   :  { %3133 = vrot.lane.b32.xlu0 %v11750_v20, %s11274_s28  ;;  %v1898_v18 = vsel %vm605_vm2, %v11966_v19, 0 }
 0x265   :  { %9758 = vmatmul.mubr.msk.bf16.vlgmr.msra.gmra.mrb[44].mxu1 %vm605_vm2, %v11850_v5  ;;  %3574 = vrot.lane.b32.xlu1 %v11852_v46, %s11274_s28 }
 0x266   :  { %9752 = vmatmul.mubr.msk.bf16.vlgmr.msra.gmra.mrb[36].mxu0 %vm605_vm2, %v11854_v36  ;;  %9768 = vmatpush3.bf16.xpose.msra.mxu1 %v1484_v51  ;;  %v11885_v51 = vpack.c.bf16 %v10582_v12, %v10582_v12  ;;  %v10592_v12 = vunpack.i.l.bf16 %v10591_v33  ;;  %v1668_v33 = vsel %vm605_vm2, %v11837_v3, 0 }
 0x267   :  { %9762 = vmatpush3.bf16.xpose.msra.mxu0 %v1438_v0  ;;  %9763 = vmatprep.mubr.msk.bf16.mxu0 %vm11276_vm1, %v14541_v28  ;;  %v1576_v0 = vsel %vm605_vm2, %v11869_v6, 0 }
 0x268   :  { %3525 = vrot.lane.b32.xlu0 %v11869_v6, %s11274_s28  ;;  %9769 = vmatprep.mubr.msk.bf16.mxu1 %vm11276_vm1, %v14541_v28  ;;  %14689 = vst [vmem:[#allocation75_spill] sm:$0xff] %v11885_v51  ;;  %v11905_v21 = vpack.c.bf16 %v10592_v12, %v10592_v12  ;;  %v10602_v12 = vunpack.i.l.bf16 %v10601_v26 }
 0x269   :  { %3084 = vrot.lane.b32.xlu1 %v11752_v24, %s11274_s28  ;;  %9779 = vmatprep.subr.bf16.mxu1 %v14541_v28 }
 0x26a   :  { %9773 = vmatprep.subr.bf16.mxu0 %v14541_v28  ;;  %14691 = vst [vmem:[#allocation77_spill] sm:$0xff] %v11905_v21  ;;  %v11926_v16 = vpack.c.bf16 %v10602_v12, %v10602_v12 }
 0x26c   :  { %14694 = vst [vmem:[#allocation80_spill] sm:$0xff] %v11926_v16 }
 0x26d   :  { %9770 = vmatmul.mubr.msk.bf16.vlgmr.msra.gmra.mrb[48].mxu1 %vm605_vm2, %v11883_v14  ;;  %3476 = vrot.lane.b32.xlu1 %v11880_v55, %s11274_s28 }
 0x26e   :  { %9764 = vmatmul.mubr.msk.bf16.vlgmr.msra.gmra.mrb[40].mxu0 %vm605_vm2, %v11885_v51  ;;  %9780 = vmatpush3.bf16.xpose.msra.mxu1 %v1576_v0  ;;  %v10608_v0 = vunpack.i.h.bf16 %v11804_v32 }
 0x26f   :  { %9774 = vmatpush3.bf16.xpose.msra.mxu0 %v1530_v54  ;;  %9775 = vmatprep.mubr.msk.bf16.mxu0 %vm11276_vm1, %v14541_v28  ;;  %v1622_v54 = vsel %vm605_vm2, %v11852_v46, 0 }
 0x270   :  { %9781 = vmatprep.mubr.msk.bf16.mxu1 %vm11276_vm1, %v14541_v28  ;;  %9785 = vmatprep.subr.bf16.mxu0 %v14541_v28  ;;  %v11921_v32 = vpack.c.bf16 %v10608_v0, %v10608_v0  ;;  %v1714_v0 = vsel %vm605_vm2, %v11819_v34, 0 }
 0x271   :  { %9791 = vmatprep.subr.bf16.mxu1 %v14541_v28 }
 0x272   :  { %14692 = vst [vmem:[#allocation78_spill] sm:$0xff] %v11921_v32  ;;  %v1760_v26 = vsel %vm605_vm2, %v11921_v32, 0 }
 0x275   :  { %9782 = vmatmul.mubr.msk.bf16.vlgmr.msra.gmra.mrb[52].mxu1 %vm605_vm2, %v11903_v25 }
 0x276   :  { %9776 = vmatmul.mubr.msk.bf16.vlgmr.msra.gmra.mrb[44].mxu0 %vm605_vm2, %v11905_v21  ;;  %9792 = vmatpush3.bf16.xpose.msra.mxu1 %v1668_v33  ;;  %v10611_v33 = vpop.permute.xlu1 %10610 }
 0x277   :  { %9786 = vmatpush3.bf16.xpose.msra.mxu0 %v1622_v54  ;;  %9787 = vmatprep.mubr.msk.bf16.mxu0 %vm11276_vm1, %v14541_v28  ;;  %v10618_v54 = vunpack.i.h.bf16 %v10616_v15  ;;  %v10613_v9 = vunpack.i.h.bf16 %v10611_v33  ;;  %v10612_v12 = vunpack.i.l.bf16 %v10611_v33  ;;  %v11944_v15 = vpack.c.bf16 %v10617_v11, %v10617_v11 }
 0x278   :  { %9793 = vmatprep.mubr.msk.bf16.mxu1 %vm11276_vm1, %v14541_v28  ;;  %9797 = vmatprep.subr.bf16.mxu0 %v14541_v28 }
 0x279   :  { %9803 = vmatprep.subr.bf16.mxu1 %v14541_v28  ;;  %v11941_v7 = vpack.c.bf16 %v10618_v54, %v10618_v54  ;;  %14696 = vst [vmem:[#allocation82_spill] sm:$0xff] %v11944_v15  ;;  %v11946_v8 = vpack.c.bf16 %v10613_v9, %v10613_v9  ;;  %v1806_v11 = vsel %vm605_vm2, %v11944_v15, 0 }
 0x27b   :  { %14695 = vst [vmem:[#allocation81_spill] sm:$0xff] %v11941_v7  ;;  %14697 = vst [vmem:[#allocation83_spill] sm:$0xff] %v11946_v8  ;;  %v1852_v33 = vsel %vm605_vm2, %v11941_v7, 0 }
 0x27d   :  { %9794 = vmatmul.mubr.msk.bf16.vlgmr.msra.gmra.mrb[56].mxu1 %vm605_vm2, %v11924_v10 }
 0x27e   :  { %9788 = vmatmul.mubr.msk.bf16.vlgmr.msra.gmra.mrb[48].mxu0 %vm605_vm2, %v11926_v16  ;;  %9804 = vmatpush3.bf16.xpose.msra.mxu1 %v1760_v26  ;;  %v11948_v26 = vpack.c.bf16 %v10612_v12, %v10612_v12  ;;  %v11963_v12 = vpack.c.bf16 %v10628_v22, %v10628_v22 }
 0x27f   :  { %9798 = vmatpush3.bf16.xpose.msra.mxu0 %v1714_v0  ;;  %9799 = vmatprep.mubr.msk.bf16.mxu0 %vm11276_vm1, %v14541_v28  ;;  %v10621_v0 = vpop.permute.xlu1 %10620 }
 0x280   :  { %9805 = vmatprep.mubr.msk.bf16.mxu1 %vm11276_vm1, %v14541_v28  ;;  %9809 = vmatprep.subr.bf16.mxu0 %v14541_v28  ;;  %14698 = vst [vmem:[#allocation84_spill] sm:$0xff] %v11948_v26  ;;  %v10623_v54 = vunpack.i.h.bf16 %v10621_v0  ;;  %v10622_v9 = vunpack.i.l.bf16 %v10621_v0  ;;  %v1944_v0 = vsel %vm605_vm2, %v11963_v12, 0 }
 0x281   :  { %9815 = vmatprep.subr.bf16.mxu1 %v14541_v28 }
 0x282   :  { %v11968_v3 = vpack.c.bf16 %v10623_v54, %v10623_v54 }
 0x284   :  { %14699 = vst [vmem:[#allocation85_spill] sm:$0xff] %v11968_v3 }
 0x285   :  { %9806 = vmatmul.mubr.msk.bf16.vlgmr.msra.gmra.mrb[60].mxu1 %vm605_vm2, %v11946_v8  ;;  %v10636_v8 = vpop.permute.xlu0 %10635 }
 0x286   :  { %9800 = vmatmul.mubr.msk.bf16.vlgmr.msra.gmra.mrb[52].mxu0 %vm605_vm2, %v11948_v26  ;;  %9816 = vmatpush3.bf16.xpose.msra.mxu1 %v1852_v33  ;;  %v11970_v33 = vpack.c.bf16 %v10622_v9, %v10622_v9  ;;  %v10638_v10 = vunpack.i.h.bf16 %v10636_v8  ;;  %v10637_v6 = vunpack.i.l.bf16 %v10636_v8 }
 0x287   :  { %9810 = vmatpush3.bf16.xpose.msra.mxu0 %v1806_v11  ;;  %9811 = vmatprep.mubr.msk.bf16.mxu0 %vm11276_vm1, %v14541_v28  ;;  %v10631_v11 = vpop.permute.xlu1 %10630 }
 0x288   :  { %9817 = vmatprep.mubr.msk.bf16.mxu1 %vm11276_vm1, %v14541_v28  ;;  %9821 = vmatprep.subr.bf16.mxu0 %v14541_v28  ;;  %14700 = vst [vmem:[#allocation86_spill] sm:$0xff] %v11970_v33  ;;  %v10633_v22 = vunpack.i.h.bf16 %v10631_v11  ;;  %v10632_v54 = vunpack.i.l.bf16 %v10631_v11  ;;  %v11985_v9 = vpack.c.bf16 %v10638_v10, %v10638_v10  ;;  %v11988_v8 = vpack.c.bf16 %v10637_v6, %v10637_v6 }
 0x289   :  { %9827 = vmatprep.subr.bf16.mxu1 %v14541_v28 }
 0x28a   :  { %14701 = vst [vmem:[#allocation87_spill] sm:$0xff] %v11985_v9  ;;  %14702 = vst [vmem:[#allocation88_spill] sm:$0xff] %v11988_v8  ;;  %v2036_v11 = vsel %vm605_vm2, %v11985_v9, 0  ;;  %v1990_v10 = vsel %vm605_vm2, %v11988_v8, 0 }
 0x28d   :  { %9818 = vmatmul.mubr.msk.bf16.vlgmr.msra.gmra.mrb[64].mxu1 %vm605_vm2, %v11968_v3  ;;  %v11990_v3 = vpack.c.bf16 %v10633_v22, %v10633_v22 }
 0x28e   :  { %9812 = vmatmul.mubr.msk.bf16.vlgmr.msra.gmra.mrb[56].mxu0 %vm605_vm2, %v11970_v33  ;;  %9828 = vmatpush3.bf16.xpose.msra.mxu1 %v1944_v0  ;;  %v11992_v0 = vpack.c.bf16 %v10632_v54, %v10632_v54  ;;  %v2546_v54 = vpop.permute.xlu0 %2545 }
 0x28f   :  { %9822 = vmatpush3.bf16.xpose.msra.mxu0 %v1898_v18  ;;  %9823 = vmatprep.mubr.msk.bf16.mxu0 %vm11276_vm1, %v14541_v28  ;;  %14703 = vst [vmem:[#allocation89_spill] sm:$0xff] %v11990_v3  ;;  %v10641_v18 = vpop.permute.xlu1 %10640 }
 0x290   :  { %9829 = vmatprep.mubr.msk.bf16.mxu1 %vm11276_vm1, %v14541_v28  ;;  %9833 = vmatprep.subr.bf16.mxu0 %v14541_v28  ;;  %14704 = vst [vmem:[#allocation90_spill] sm:$0xff] %v11992_v0  ;;  %v10643_v6 = vunpack.i.h.bf16 %v10641_v18  ;;  %v10642_v22 = vunpack.i.l.bf16 %v10641_v18 }
 0x291   :  { %9839 = vmatprep.subr.bf16.mxu1 %v14541_v28 }
 0x293   :  { %v2496_v25 = vpop.permute.xlu1 %2495 }
 0x295   :  { %9830 = vmatmul.mubr.msk.bf16.vlgmr.msra.gmra.mrb[68].mxu1 %vm605_vm2, %v11990_v3  ;;  %v12008_v3 = vpack.c.bf16 %v10643_v6, %v10643_v6 }
 0x296   :  { %9824 = vmatmul.mubr.msk.bf16.vlgmr.msra.gmra.mrb[60].mxu0 %vm605_vm2, %v11992_v0  ;;  %9840 = vmatpush3.bf16.xpose.msra.mxu1 %v2036_v11  ;;  %v12010_v0 = vpack.c.bf16 %v10642_v22, %v10642_v22  ;;  %v2551_v11 = vsel %vm2500_vm3, %v2546_v54, 0  ;;  %v14707_v22 = vmov 0.0  }
 0x297   :  { %9834 = vmatpush3.bf16.xpose.msra.mxu0 %v1990_v10  ;;  %9835 = vmatprep.mubr.msk.bf16.mxu0 %vm11276_vm1, %v14541_v28  ;;  %14705 = vst [vmem:[#allocation91_spill] sm:$0xff] %v12008_v3  ;;  %v2502_v10 = vsel %vm2500_vm3, %v2496_v25, 0 }
 0x298   :  { %9841 = vmatprep.mubr.msk.bf16.mxu1 %vm11276_vm1, %v14541_v28  ;;  %9845 = vmatprep.subr.bf16.mxu0 %v14541_v28  ;;  %14706 = vst [vmem:[#allocation92_spill] sm:$0xff] %v12010_v0 }
 0x299   :  { %9851 = vmatprep.subr.bf16.mxu1 %v14541_v28 }
 0x29d   :  { %9842 = vmatmul.mubr.msk.bf16.vlgmr.msra.gmra.mrb[72].mxu1 %vm605_vm2, %v12008_v3  ;;  %v646_v18 = vpop.f32.mrb[4].mxu0 }
 0x29e   :  { %9836 = vmatmul.mubr.msk.bf16.vlgmr.msra.gmra.mrb[64].mxu0 %vm605_vm2, %v12010_v0  ;;  %9852 = vmatpush3.bf16.msra.mxu1 %v2551_v11  ;;  %v9657_v28 = vpop.f32.mrb[5].mxu0  ;;  %v12018_v52 = vmul.f32 0.35355338, %v646_v18 }
 0x29f   :  { %9846 = vmatpush3.bf16.msra.mxu0 %v2502_v10  ;;  %v649_v6 = vpop.f32.mrb[6].mxu0  ;;  %v692_v14 = vpop.f32.mrb[12].mxu1  ;;  %9853 = vmatprep.mubr.msk.bf16.mxu1 %vm11276_vm1, %v14707_v22 }
 0x2a0   :  { %v9658_v54 = vpop.f32.mrb[7].mxu0  ;;  %v9663_v33 = vpop.f32.mrb[13].mxu1  ;;  %v2110_v3 = vsel %vm605_vm2, %v12018_v52, -inf  ;;  %v12024_v13 = vmul.f32 0.35355338, %v692_v14  ;;  %9863 = vmatprep.subr.bf16.mxu1 %v14707_v22  ;;  %9847 = vmatprep.mubr.msk.bf16.mxu0 %vm11276_vm1, %v14707_v22 }
 0x2a1   :  { %v695_v25 = vpop.f32.mrb[14].mxu1  ;;  %2111 = vmax.xlane.f32.xlu0 %v2110_v3  ;;  %9857 = vmatprep.subr.bf16.mxu0 %v14707_v22 }
 0x2a2   :  { %v9664_v28 = vpop.f32.mrb[15].mxu1  ;;  %v2113_v11 = vsel %vm605_vm2, %v12024_v13, -inf }
 0x2a3   :  { %2114 = vmax.xlane.f32.xlu1 %v2113_v11 }
 0x2a5   :  { %v738_v33 = vpop.f32.mrb[8].mxu0 }
 0x2a6   :  { %v9669_v18 = vpop.f32.mrb[9].mxu0  ;;  %v12032_v10 = vmul.f32 0.35355338, %v738_v33 }
 0x2a7   :  { %v741_v14 = vpop.f32.mrb[10].mxu0  ;;  %v784_v6 = vpop.f32.mrb[16].mxu1 }
 0x2a8   :  { %v9670_v54 = vpop.f32.mrb[11].mxu0  ;;  %v9675_v0 = vpop.f32.mrb[17].mxu1  ;;  %v2116_v34 = vsel %vm605_vm2, %v12032_v10, -inf  ;;  %v12036_v25 = vmul.f32 0.35355338, %v784_v6 }
 0x2a9   :  { %v787_v3 = vpop.f32.mrb[18].mxu1  ;;  %2117 = vmax.xlane.f32.xlu0 %v2116_v34 }
 0x2aa   :  { %v9676_v28 = vpop.f32.mrb[19].mxu1  ;;  %v2119_v5 = vsel %vm605_vm2, %v12036_v25, -inf }
 0x2ad   :  { %v830_v11 = vpop.f32.mrb[12].mxu0  ;;  %2120 = vmax.xlane.f32.xlu0 %v2119_v5 }
 0x2ae   :  { %v9681_v18 = vpop.f32.mrb[13].mxu0  ;;  %v12040_v33 = vmul.f32 0.35355338, %v830_v11 }
 0x2af   :  { %v833_v14 = vpop.f32.mrb[14].mxu0  ;;  %v876_v26 = vpop.f32.mrb[20].mxu1 }
 0x2b0   :  { %v9682_v54 = vpop.f32.mrb[15].mxu0  ;;  %v9687_v0 = vpop.f32.mrb[21].mxu1  ;;  %v2122_v57 = vsel %vm605_vm2, %v12040_v33, -inf  ;;  %v12044_v6 = vmul.f32 0.35355338, %v876_v26 }
 0x2b1   :  { %v879_v3 = vpop.f32.mrb[22].mxu1  ;;  %2123 = vmax.xlane.f32.xlu1 %v2122_v57 }
 0x2b2   :  { %v9688_v34 = vpop.f32.mrb[23].mxu1  ;;  %v2125_v28 = vsel %vm605_vm2, %v12044_v6, -inf }
 0x2b3   :  { %2126 = vmax.xlane.f32.xlu0 %v2125_v28  ;;  %v12056_v28 = vpop.permute.xlu1 %2594 }
 0x2b5   :  { %v922_v5 = vpop.f32.mrb[16].mxu0 }
 0x2b6   :  { %v9693_v18 = vpop.f32.mrb[17].mxu0  ;;  %v12048_v11 = vmul.f32 0.35355338, %v922_v5  ;;  %v12058_v5 = vpop.permute.xlu0 %2643 }
 0x2b7   :  { %v925_v14 = vpop.f32.mrb[18].mxu0  ;;  %v968_v46 = vpop.f32.mrb[24].mxu1 }
 0x2b8   :  { %v9694_v54 = vpop.f32.mrb[19].mxu0  ;;  %v9699_v0 = vpop.f32.mrb[25].mxu1  ;;  %v2128_v38 = vsel %vm605_vm2, %v12048_v11, -inf  ;;  %v12052_v26 = vmul.f32 0.35355338, %v968_v46 }
 0x2b9   :  { %v971_v3 = vpop.f32.mrb[26].mxu1  ;;  %2129 = vmax.xlane.f32.xlu1 %v2128_v38  ;;  %v12060_v18 = vpop.permute.xlu1 %2790 }
 0x2ba   :  { %v9700_v57 = vpop.f32.mrb[27].mxu1  ;;  %v2131_v34 = vsel %vm605_vm2, %v12052_v26, -inf  ;;  %v12062_v14 = vpop.permute.xlu0 %2839 }
 0x2bb   :  { %2132 = vmax.xlane.f32.xlu0 %v2131_v34 }
 0x2bd   :  { %v12064_v54 = vpop.permute.xlu1 %2692 }
 0x2be   :  { %v12066_v0 = vpop.permute.xlu0 %2741 }
 0x2c1   :  { %v12068_v46 = vpop.permute.xlu1 %2986 }
 0x2c2   :  { %v12070_v38 = vpop.permute.xlu0 %3035 }
 0x2c5   :  { %v12072_v3 = vpop.permute.xlu1 %3378 }
 0x2c6   :  { %14708 = vst [vmem:[#allocation93_spill] sm:$0xff] %v12072_v3  ;;  %v12082_v41 = vpop.permute.xlu0 %3427 }
 0x2c7   :  { %14709 = vst [vmem:[#allocation94_spill] sm:$0xff] %v12082_v41 }
 0x2ca   :  { %v12094_v59 = vpop.permute.xlu0 %2937 }
 0x2ce   :  { %v12106_v24 = vpop.permute.xlu0 %3329 }
 0x2d2   :  { %v12118_v1 = vpop.permute.xlu0 %3231 }
 0x316   :  { %v1014_v57 = vpop.f32.mrb[20].mxu0  ;;  %v1060_v34 = vpop.f32.mrb[28].mxu1 }
 0x317   :  { %v9705_v16 = vpop.f32.mrb[21].mxu0  ;;  %v9711_v20 = vpop.f32.mrb[29].mxu1  ;;  %v12074_v55 = vmul.f32 0.35355338, %v1060_v34  ;;  %v12076_v61 = vmul.f32 0.35355338, %v1014_v57 }
 0x318   :  { %v1017_v21 = vpop.f32.mrb[22].mxu0  ;;  %v1063_v56 = vpop.f32.mrb[30].mxu1 }
 0x319   :  { %v9706_v53 = vpop.f32.mrb[23].mxu0  ;;  %v9712_v27 = vpop.f32.mrb[31].mxu1  ;;  %v2137_v51 = vsel %vm605_vm2, %v12074_v55, -inf  ;;  %v2134_v39 = vsel %vm605_vm2, %v12076_v61, -inf }
 0x31a   :  { %2138 = vmax.xlane.f32.xlu0 %v2137_v51  ;;  %2135 = vmax.xlane.f32.xlu1 %v2134_v39  ;;  %v12084_v16 = vpop.permute.xlu1 %2888 }
 0x31e   :  { %v1106_v20 = vpop.f32.mrb[24].mxu0  ;;  %v1152_v34 = vpop.f32.mrb[32].mxu1 }
 0x31f   :  { %v12086_v57 = vmul.f32 0.35355338, %v1152_v34  ;;  %v9717_v21 = vpop.f32.mrb[25].mxu0  ;;  %v9723_v56 = vpop.f32.mrb[33].mxu1  ;;  %v12088_v53 = vmul.f32 0.35355338, %v1106_v20 }
 0x320   :  { %v1109_v27 = vpop.f32.mrb[26].mxu0  ;;  %v1155_v62 = vpop.f32.mrb[34].mxu1 }
 0x321   :  { %v9718_v36 = vpop.f32.mrb[27].mxu0  ;;  %v9724_v44 = vpop.f32.mrb[35].mxu1  ;;  %v2143_v51 = vsel %vm605_vm2, %v12086_v57, -inf  ;;  %v2140_v39 = vsel %vm605_vm2, %v12088_v53, -inf }
 0x322   :  { %2144 = vmax.xlane.f32.xlu0 %v2143_v51  ;;  %2141 = vmax.xlane.f32.xlu1 %v2140_v39  ;;  %v12096_v34 = vpop.permute.xlu1 %3280 }
 0x323   :  { %14710 = vst [vmem:[#allocation95_spill] sm:$0xff] %v12096_v34 }
 0x326   :  { %v1244_v21 = vpop.f32.mrb[36].mxu1  ;;  %v1198_v56 = vpop.f32.mrb[28].mxu0 }
 0x327   :  { %v12098_v20 = vmul.f32 0.35355338, %v1244_v21  ;;  %v9735_v27 = vpop.f32.mrb[37].mxu1  ;;  %v9729_v62 = vpop.f32.mrb[29].mxu0  ;;  %v12100_v44 = vmul.f32 0.35355338, %v1198_v56 }
 0x328   :  { %v1247_v36 = vpop.f32.mrb[38].mxu1  ;;  %v1201_v47 = vpop.f32.mrb[30].mxu0 }
 0x329   :  { %v9736_v49 = vpop.f32.mrb[39].mxu1  ;;  %v2149_v35 = vsel %vm605_vm2, %v12098_v20, -inf  ;;  %v9730_v51 = vpop.f32.mrb[31].mxu0  ;;  %v2146_v39 = vsel %vm605_vm2, %v12100_v44, -inf }
 0x32a   :  { %2150 = vmax.xlane.f32.xlu0 %v2149_v35  ;;  %2147 = vmax.xlane.f32.xlu1 %v2146_v39  ;;  %v12108_v21 = vpop.permute.xlu1 %3672 }
 0x32b   :  { %14711 = vst [vmem:[#allocation96_spill] sm:$0xff] %v12108_v21 }
 0x32f   :  { %v1336_v27 = vpop.f32.mrb[40].mxu1 }
 0x330   :  { %v1290_v62 = vpop.f32.mrb[32].mxu0  ;;  %v12110_v36 = vmul.f32 0.35355338, %v1336_v27  ;;  %v9747_v56 = vpop.f32.mrb[41].mxu1 }
 0x331   :  { %v12112_v47 = vmul.f32 0.35355338, %v1290_v62  ;;  %v9741_v49 = vpop.f32.mrb[33].mxu0  ;;  %v1339_v45 = vpop.f32.mrb[42].mxu1 }
 0x332   :  { %v1293_v17 = vpop.f32.mrb[34].mxu0  ;;  %v9748_v51 = vpop.f32.mrb[43].mxu1  ;;  %v2155_v35 = vsel %vm605_vm2, %v12110_v36, -inf }
 0x333   :  { %v9742_v40 = vpop.f32.mrb[35].mxu0  ;;  %2156 = vmax.xlane.f32.xlu0 %v2155_v35  ;;  %v2152_v39 = vsel %vm605_vm2, %v12112_v47, -inf  ;;  %v12120_v27 = vpop.permute.xlu1 %3182 }
 0x334   :  { %2153 = vmax.xlane.f32.xlu1 %v2152_v39  ;;  %v12126_v40 = vpop.permute.xlu0 %3623 }
 0x335   :  { %14712 = vst [vmem:[#allocation97_spill] sm:$0xff] %v12126_v40 }
 0x337   :  { %v12128_v35 = vpop.permute.xlu1 %3574 }
 0x338   :  { %v12122_v56 = vpop.f32.mrb[44].mxu1  ;;  %14713 = vst [vmem:[#allocation98_spill] sm:$0xff] %v12128_v35 }
 0x339   :  { %v12124_v62 = vpop.f32.mrb[36].mxu0  ;;  %v9759_v45 = vpop.f32.mrb[45].mxu1 }
 0x33a   :  { %v9753_v17 = vpop.f32.mrb[37].mxu0  ;;  %v1431_v49 = vpop.f32.mrb[46].mxu1 }
 0x33b   :  { %v1385_v51 = vpop.f32.mrb[38].mxu0  ;;  %v9760_v60 = vpop.f32.mrb[47].mxu1 }
 0x33c   :  { %v9754_v29 = vpop.f32.mrb[39].mxu0  ;;  %v12134_v45 = vpop.permute.xlu0 %3133 }
 0x33d   :  { %v12136_v60 = vpop.permute.xlu1 %3084 }
 0x340   :  { %v1520_v48 = vpop.f32.mrb[48].mxu1 }
 0x341   :  { %v12130_v39 = vpop.f32.mrb[40].mxu0  ;;  %v9771_v63 = vpop.f32.mrb[49].mxu1 }
 0x342   :  { %v9765_v42 = vpop.f32.mrb[41].mxu0  ;;  %v1523_v37 = vpop.f32.mrb[50].mxu1 }
 0x343   :  { %v1477_v30 = vpop.f32.mrb[42].mxu0  ;;  %v9772_v43 = vpop.f32.mrb[51].mxu1 }
 0x344   :  { %v9766_v2 = vpop.f32.mrb[43].mxu0  ;;  %v12146_v63 = vpop.permute.xlu0 %3525 }
 0x345   :  { %3770 = vrot.lane.b32.xlu1 %v11944_v15, %s11274_s28  ;;  %14714 = vst [vmem:[#allocation99_spill] sm:$0xff] %v12146_v63  ;;  %v12148_v51 = vpop.permute.xlu1 %3476 }
 0x346   :  { %14715 = vst [vmem:[#allocation100_spill] sm:$0xff] %v12148_v51 }
 0x348   :  { %v12138_v29 = vpop.f32.mrb[52].mxu1  ;;  %v2112_v35 = vpop.xlane.xlu0 %2111 }
 0x349   :  { %v12140_v17 = vpop.f32.mrb[44].mxu0  ;;  %v9783_v49 = vpop.f32.mrb[53].mxu1  ;;  %3819 = vrot.lane.b32.xlu1 %v11941_v7, %s11274_s28  ;;  %3721 = vrot.lane.b32.xlu0 %v11921_v32, %s11274_s28 }
 0x34a   :  { %v9777_v42 = vpop.f32.mrb[45].mxu0  ;;  %v1615_v2 = vpop.f32.mrb[54].mxu1 }
 0x34b   :  { %v1569_v30 = vpop.f32.mrb[46].mxu0  ;;  %v9784_v43 = vpop.f32.mrb[55].mxu1 }
 0x34c   :  { %v9778_v37 = vpop.f32.mrb[47].mxu0  ;;  %v2115_v32 = vpop.xlane.xlu1 %2114 }
 0x34d   :  { %v2118_v2 = vpop.xlane.xlu0 %2117  ;;  %v2207_v3 = vsub.f32 %v12024_v13, %v2115_v32 }
 0x350   :  { %v12150_v15 = vpop.f32.mrb[56].mxu1 }
 0x351   :  { %v12152_v58 = vpop.f32.mrb[48].mxu0  ;;  %v9795_v49 = vpop.f32.mrb[57].mxu1 }
 0x352   :  { %v9789_v31 = vpop.f32.mrb[49].mxu0  ;;  %v1707_v21 = vpop.f32.mrb[58].mxu1 }
 0x353   :  { %v1661_v7 = vpop.f32.mrb[50].mxu0  ;;  %v9796_v42 = vpop.f32.mrb[59].mxu1  ;;  %v2240_v31 = vmul.f32 1.442695, %v2207_v3  ;;  %v12169_v3 = vmul.f32 0.35355338, %v1520_v48 }
 0x354   :  { %v9790_v40 = vpop.f32.mrb[51].mxu0  ;;  %v2206_v7 = vsub.f32 %v12018_v52, %v2112_v35  ;;  %v2121_v21 = vpop.xlane.xlu0 %2120  ;;  %v2208_v52 = vsub.f32 %v12032_v10, %v2118_v2 }
 0x355   :  { %10778 = vpow2.f32 %v2240_v31 }
 0x356   :  { %v2238_v13 = vmul.f32 1.442695, %v2206_v7  ;;  %v2242_v7 = vmul.f32 1.442695, %v2208_v52 }
 0x358   :  { %v12154_v30 = vpop.f32.mrb[60].mxu1  ;;  %10780 = vpow2.f32 %v2238_v13  ;;  %v2127_v35 = vpop.xlane.xlu0 %2126 }
 0x359   :  { %v12156_v43 = vpop.f32.mrb[52].mxu0  ;;  %v9807_v37 = vpop.f32.mrb[61].mxu1  ;;  %v2211_v10 = vsub.f32 %v12044_v6, %v2127_v35 }
 0x35a   :  { %v9801_v63 = vpop.f32.mrb[53].mxu0  ;;  %v1799_v51 = vpop.f32.mrb[62].mxu1 }
 0x35b   :  { %v1753_v41 = vpop.f32.mrb[54].mxu0  ;;  %v9808_v23 = vpop.f32.mrb[63].mxu1  ;;  %v2209_v63 = vsub.f32 %v12036_v25, %v2121_v21 }
 0x35c   :  { %v9802_v49 = vpop.f32.mrb[55].mxu0  ;;  %v12166_v23 = vmul.f32 0.35355338, %v12122_v56  ;;  %v2133_v52 = vpop.xlane.xlu0 %2132 }
 0x35d   :  { %v2244_v32 = vmul.f32 1.442695, %v2209_v63  ;;  %v2167_v63 = vsel %vm605_vm2, %v12169_v3, -inf }
 0x35f   :  { %10782 = vpow2.f32 %v2244_v32  ;;  %v12192_v32 = vmul.f32 0.35355338, %v12138_v29  ;;  %v2213_v29 = vsub.f32 %v12052_v26, %v2133_v52 }
 0x360   :  { %v12160_v42 = vpop.f32.mrb[64].mxu1  ;;  %10784 = vpow2.f32 %v2242_v7 }
 0x361   :  { %v12162_v40 = vpop.f32.mrb[56].mxu0  ;;  %v9819_v4 = vpop.f32.mrb[65].mxu1 }
 0x362   :  { %v9813_v50 = vpop.f32.mrb[57].mxu0  ;;  %v1891_v8 = vpop.f32.mrb[66].mxu1 }
 0x363   :  { %v1845_v51 = vpop.f32.mrb[58].mxu0  ;;  %v9820_v37 = vpop.f32.mrb[67].mxu1  ;;  %v2161_v50 = vsel %vm605_vm2, %v12166_v23, -inf  ;;  %v12176_v8 = vmul.f32 0.35355338, %v12124_v62 }
 0x364   :  { %v9814_v41 = vpop.f32.mrb[59].mxu0  ;;  %v12183_v51 = vpop.eup %10778  ;;  %v12186_v37 = vmul.f32 0.35355338, %v12130_v39 }
 0x365   :  { %v2124_v62 = vpop.xlane.xlu1 %2123  ;;  %v2158_v13 = vsel %vm605_vm2, %v12176_v8, -inf  ;;  %v2248_v41 = vmul.f32 1.442695, %v2211_v10 }
 0x366   :  { %v2210_v6 = vsub.f32 %v12040_v33, %v2124_v62 }
 0x367   :  { %10786 = vpow2.f32 %v2248_v41  ;;  %v2252_v41 = vmul.f32 1.442695, %v2213_v29 }
 0x368   :  { %v12171_v4 = vpop.f32.mrb[68].mxu1  ;;  %2162 = vmax.xlane.f32.xlu0 %v2161_v50  ;;  %v2305_v50 = vsel %vm605_vm2, %v12183_v51, 0.0  ;;  %v2246_v7 = vmul.f32 1.442695, %v2210_v6  ;;  %v12216_v6 = vmul.f32 0.35355338, %v12150_v15 }
 0x369   :  { %v12178_v25 = vpop.f32.mrb[60].mxu0  ;;  %v9831_v56 = vpop.f32.mrb[69].mxu1  ;;  %v12229_v15 = vmul.f32 0.35355338, %v12152_v58 }
 0x36a   :  { %v9825_v49 = vpop.f32.mrb[61].mxu0  ;;  %v1983_v31 = vpop.f32.mrb[70].mxu1  ;;  %10788 = vpow2.f32 %v2246_v7 }
 0x36b   :  { %v1937_v48 = vpop.f32.mrb[62].mxu0  ;;  %v9832_v2 = vpop.f32.mrb[71].mxu1  ;;  %v2164_v49 = vsel %vm605_vm2, %v12186_v37, -inf  ;;  %10790 = vpow2.f32 %v2252_v41  ;;  %v2176_v7 = vsel %vm605_vm2, %v12229_v15, -inf }
 0x36c   :  { %v9826_v21 = vpop.f32.mrb[63].mxu0  ;;  %2168 = vmax.xlane.f32.xlu0 %v2167_v63  ;;  %v12202_v31 = vpop.eup %10780  ;;  %v2173_v63 = vsel %vm605_vm2, %v12192_v32, -inf }
 0x36d   :  { %2159 = vmax.xlane.f32.xlu1 %v2158_v13  ;;  %v12207_v62 = vpop.eup %10782  ;;  %v2130_v13 = vpop.xlane.xlu1 %2129 }
 0x36e   :  { %v2212_v26 = vsub.f32 %v12048_v11, %v2130_v13  ;;  %v2311_v52 = vsel %vm605_vm2, %v12207_v62, 0.0  ;;  %v12247_v13 = vmul.f32 0.35355338, %v12156_v43  ;;  %v12261_v43 = vmul.f32 0.35355338, %v12171_v4 }
 0x36f   :  { %v12276_v4 = vmul.f32 0.35355338, %v12178_v25 }
 0x370   :  { %v12194_v35 = vpop.f32.mrb[72].mxu1  ;;  %2306 = vadd.xlane.f32.xlu0 %v2305_v50  ;;  %v12210_v50 = vmul.f32 0.35355338, %v12140_v17 }
 0x371   :  { %v12198_v39 = vpop.f32.mrb[64].mxu0  ;;  %v9843_v56 = vpop.f32.mrb[73].mxu1  ;;  %2165 = vmax.xlane.f32.xlu1 %v2164_v49 }
 0x372   :  { %v9837_v33 = vpop.f32.mrb[65].mxu0  ;;  %v2075_v10 = vpop.f32.mrb[74].mxu1  ;;  %v2302_v56 = vsel %vm605_vm2, %v12202_v31, 0.0  ;;  %v2170_v17 = vsel %vm605_vm2, %v12210_v50, -inf }
 0x373   :  { %v2029_v48 = vpop.f32.mrb[66].mxu0  ;;  %v9844_v2 = vpop.f32.mrb[75].mxu1  ;;  %v2250_v33 = vmul.f32 1.442695, %v2212_v26  ;;  %v2179_v10 = vsel %vm605_vm2, %v12216_v6, -inf  ;;  %v2182_v26 = vsel %vm605_vm2, %v12247_v13, -inf }
 0x374   :  { %v9838_v21 = vpop.f32.mrb[67].mxu0  ;;  %2174 = vmax.xlane.f32.xlu0 %v2173_v63  ;;  %v12222_v49 = vpop.eup %10784  ;;  %v12234_v48 = vmul.f32 0.35355338, %v12154_v30 }
 0x375   :  { %2303 = vadd.xlane.f32.xlu1 %v2302_v56  ;;  %v12226_v29 = vpop.eup %10786  ;;  %v2308_v11 = vsel %vm605_vm2, %v12222_v49, 0.0  ;;  %10792 = vpow2.f32 %v2250_v33  ;;  %v12252_v56 = vmul.f32 0.35355338, %v12160_v42  ;;  %v12266_v33 = vmul.f32 0.35355338, %v12162_v40 }
 0x376   :  { %v2317_v2 = vsel %vm605_vm2, %v12226_v29, 0.0  ;;  %v12240_v21 = vpop.eup %10788  ;;  %v2185_v58 = vsel %vm605_vm2, %v12234_v48, -inf }
 0x377   :  { %v12244_v63 = vpop.eup %10790  ;;  %v2314_v30 = vsel %vm605_vm2, %v12240_v21, 0.0 }
 0x378   :  { %2312 = vadd.xlane.f32.xlu0 %v2311_v52  ;;  %v2323_v41 = vsel %vm605_vm2, %v12244_v63, 0.0 }
 0x379   :  { %2171 = vmax.xlane.f32.xlu1 %v2170_v17  ;;  %v2191_v17 = vsel %vm605_vm2, %v12252_v56, -inf }
 0x37c   :  { %2180 = vmax.xlane.f32.xlu0 %v2179_v10  ;;  %v12271_v10 = vmul.f32 0.35355338, %v12194_v35  ;;  %v2194_v35 = vsel %vm605_vm2, %v12276_v4, -inf }
 0x37d   :  { %2309 = vadd.xlane.f32.xlu1 %v2308_v11  ;;  %v2197_v11 = vsel %vm605_vm2, %v12261_v43, -inf }
 0x37e   :  { %v2203_v40 = vsel %vm605_vm2, %v12271_v10, -inf }
 0x37f   :  { %v12258_v52 = vpop.eup %10792 }
 0x380   :  { %2318 = vadd.xlane.f32.xlu0 %v2317_v2  ;;  %v2320_v42 = vsel %vm605_vm2, %v12258_v52, 0.0  ;;  %v2188_v2 = vsel %vm605_vm2, %v12266_v33, -inf }
 0x381   :  { %2177 = vmax.xlane.f32.xlu1 %v2176_v7  ;;  %v12283_v7 = vmul.f32 0.35355338, %v12198_v39 }
 0x383   :  { %v2200_v25 = vsel %vm605_vm2, %v12283_v7, -inf }
 0x384   :  { %2186 = vmax.xlane.f32.xlu0 %v2185_v58 }
 0x385   :  { %2315 = vadd.xlane.f32.xlu1 %v2314_v30 }
 0x388   :  { %2324 = vadd.xlane.f32.xlu0 %v2323_v41 }
 0x389   :  { %2183 = vmax.xlane.f32.xlu1 %v2182_v26 }
 0x38c   :  { %2192 = vmax.xlane.f32.xlu0 %v2191_v17 }
 0x38d   :  { %2321 = vadd.xlane.f32.xlu1 %v2320_v42 }
 0x390   :  { %2198 = vmax.xlane.f32.xlu0 %v2197_v11 }
 0x391   :  { %2189 = vmax.xlane.f32.xlu1 %v2188_v2 }
 0x394   :  { %2204 = vmax.xlane.f32.xlu0 %v2203_v40 }
 0x395   :  { %2195 = vmax.xlane.f32.xlu1 %v2194_v35 }
 0x399   :  { %2201 = vmax.xlane.f32.xlu1 %v2200_v25 }
 0x3a7   :  { %v2139_v58 = vpop.xlane.xlu0 %2138  ;;  %v2136_v30 = vpop.xlane.xlu1 %2135 }
 0x3a8   :  { %v2215_v41 = vsub.f32 %v12074_v55, %v2139_v58  ;;  %v2214_v26 = vsub.f32 %v12076_v61, %v2136_v30 }
 0x3aa   :  { %v2256_v17 = vmul.f32 1.442695, %v2215_v41  ;;  %v2254_v42 = vmul.f32 1.442695, %v2214_v26 }
 0x3ac   :  { %10794 = vpow2.f32 %v2256_v17 }
 0x3ad   :  { %10796 = vpow2.f32 %v2254_v42 }
 0x3af   :  { %v2145_v39 = vpop.xlane.xlu0 %2144  ;;  %v2142_v11 = vpop.xlane.xlu1 %2141 }
 0x3b0   :  { %v2217_v2 = vsub.f32 %v12086_v57, %v2145_v39  ;;  %v2216_v40 = vsub.f32 %v12088_v53, %v2142_v11 }
 0x3b2   :  { %v2260_v35 = vmul.f32 1.442695, %v2217_v2  ;;  %v2258_v9 = vmul.f32 1.442695, %v2216_v40 }
 0x3b4   :  { %10798 = vpow2.f32 %v2260_v35 }
 0x3b5   :  { %10800 = vpow2.f32 %v2258_v9 }
 0x3b6   :  { %v12293_v25 = vpop.eup %10794 }
 0x3b7   :  { %v12295_v34 = vpop.eup %10796  ;;  %v2151_v55 = vpop.xlane.xlu0 %2150  ;;  %v2329_v61 = vsel %vm605_vm2, %v12293_v25, 0.0 }
 0x3b8   :  { %v2219_v58 = vsub.f32 %v12098_v20, %v2151_v55  ;;  %v2148_v30 = vpop.xlane.xlu1 %2147  ;;  %2330 = vadd.xlane.f32.xlu0 %v2329_v61  ;;  %v2326_v57 = vsel %vm605_vm2, %v12295_v34, 0.0 }
 0x3b9   :  { %v2218_v53 = vsub.f32 %v12100_v44, %v2148_v30  ;;  %2327 = vadd.xlane.f32.xlu1 %v2326_v57 }
 0x3ba   :  { %v2264_v41 = vmul.f32 1.442695, %v2219_v58 }
 0x3bb   :  { %v2262_v9 = vmul.f32 1.442695, %v2218_v53 }
 0x3bc   :  { %10802 = vpow2.f32 %v2264_v41 }
 0x3bd   :  { %10804 = vpow2.f32 %v2262_v9 }
 0x3be   :  { %v12303_v26 = vpop.eup %10798 }
 0x3bf   :  { %v12305_v17 = vpop.eup %10800  ;;  %v2335_v42 = vsel %vm605_vm2, %v12303_v26, 0.0 }
 0x3c0   :  { %v2157_v20 = vpop.xlane.xlu0 %2156  ;;  %2336 = vadd.xlane.f32.xlu0 %v2335_v42  ;;  %v2332_v39 = vsel %vm605_vm2, %v12305_v17, 0.0 }
 0x3c1   :  { %v2221_v11 = vsub.f32 %v12110_v36, %v2157_v20  ;;  %v2154_v44 = vpop.xlane.xlu1 %2153  ;;  %2333 = vadd.xlane.f32.xlu1 %v2332_v39 }
 0x3c2   :  { %v2220_v2 = vsub.f32 %v12112_v47, %v2154_v44 }
 0x3c3   :  { %v2268_v40 = vmul.f32 1.442695, %v2221_v11 }
 0x3c4   :  { %v2266_v35 = vmul.f32 1.442695, %v2220_v2  ;;  %v12331_v9 = vpop.permute.xlu0 %3721 }
 0x3c5   :  { %10806 = vpow2.f32 %v2268_v40  ;;  %v12329_v41 = vpop.permute.xlu1 %3770  ;;  %14717 = vst [vmem:[#allocation102_spill] sm:$0xff] %v12331_v9 }
 0x3c6   :  { %v12313_v55 = vpop.eup %10802  ;;  %10808 = vpow2.f32 %v2266_v35  ;;  %14716 = vst [vmem:[#allocation101_spill] sm:$0xff] %v12329_v41 }
 0x3c7   :  { %v12315_v61 = vpop.eup %10804  ;;  %v2341_v58 = vsel %vm605_vm2, %v12313_v55, 0.0 }
 0x3c8   :  { %2342 = vadd.xlane.f32.xlu0 %v2341_v58  ;;  %v2338_v30 = vsel %vm605_vm2, %v12315_v61, 0.0 }
 0x3c9   :  { %2339 = vadd.xlane.f32.xlu1 %v2338_v30  ;;  %v12333_v20 = vpop.permute.xlu1 %3819 }
 0x3ca   :  { %14718 = vst [vmem:[#allocation103_spill] sm:$0xff] %v12333_v20 }
 0x3cf   :  { %v12321_v36 = vpop.eup %10806 }
 0x3d0   :  { %v12323_v57 = vpop.eup %10808  ;;  %v2347_v47 = vsel %vm605_vm2, %v12321_v36, 0.0 }
 0x3d1   :  { %2348 = vadd.xlane.f32.xlu0 %v2347_v47  ;;  %v2344_v53 = vsel %vm605_vm2, %v12323_v57, 0.0 }
 0x3d2   :  { %2345 = vadd.xlane.f32.xlu1 %v2344_v53 }
 0x3f5   :  { %v2163_v42 = vpop.xlane.xlu0 %2162 }
 0x3f6   :  { %v2223_v39 = vsub.f32 %v12166_v23, %v2163_v42 }
 0x3f8   :  { %v2272_v11 = vmul.f32 1.442695, %v2223_v39 }
 0x3f9   :  { %v2169_v44 = vpop.xlane.xlu0 %2168 }
 0x3fa   :  { %10810 = vpow2.f32 %v2272_v11  ;;  %v2225_v2 = vsub.f32 %v12169_v3, %v2169_v44  ;;  %v2160_v40 = vpop.xlane.xlu1 %2159 }
 0x3fb   :  { %v2222_v35 = vsub.f32 %v12176_v8, %v2160_v40 }
 0x3fc   :  { %v2276_v58 = vmul.f32 1.442695, %v2225_v2 }
 0x3fd   :  { %v2270_v30 = vmul.f32 1.442695, %v2222_v35  ;;  %v2307_v47 = vpop.xlane.xlu0 %2306 }
 0x3fe   :  { %10812 = vpow2.f32 %v2276_v58  ;;  %v2166_v53 = vpop.xlane.xlu1 %2165 }
 0x3ff   :  { %10814 = vpow2.f32 %v2270_v30  ;;  %v2224_v41 = vsub.f32 %v12186_v37, %v2166_v53 }
 0x400   :  { %10816 = vrcp.f32 %v2307_v47 }
 0x401   :  { %v2274_v20 = vmul.f32 1.442695, %v2224_v41  ;;  %v2175_v9 = vpop.xlane.xlu0 %2174 }
 0x402   :  { %v2227_v23 = vsub.f32 %v12192_v32, %v2175_v9  ;;  %v2304_v42 = vpop.xlane.xlu1 %2303 }
 0x403   :  { %10818 = vpow2.f32 %v2274_v20 }
 0x404   :  { %v12340_v39 = vpop.eup %10810  ;;  %v2280_v3 = vmul.f32 1.442695, %v2227_v23  ;;  %10820 = vrcp.f32 %v2304_v42 }
 0x405   :  { %v2313_v8 = vpop.xlane.xlu0 %2312  ;;  %v2353_v11 = vsel %vm605_vm2, %v12340_v39, 0.0 }
 0x406   :  { %10822 = vpow2.f32 %v2280_v3  ;;  %v2172_v44 = vpop.xlane.xlu1 %2171  ;;  %2354 = vadd.xlane.f32.xlu0 %v2353_v11  ;;  %v2649_v11 = vsel %vm2500_vm3, %v12058_v5, 0 }
 0x407   :  { %10824 = vrcp.f32 %v2313_v8  ;;  %v2226_v37 = vsub.f32 %v12210_v50, %v2172_v44 }
 0x408   :  { %v12345_v41 = vpop.eup %10812 }
 0x409   :  { %v12347_v2 = vpop.eup %10814  ;;  %v2278_v32 = vmul.f32 1.442695, %v2226_v37  ;;  %v2181_v9 = vpop.xlane.xlu0 %2180  ;;  %v2359_v20 = vsel %vm605_vm2, %v12345_v41, 0.0 }
 0x40a   :  { %v10817_v40 = vpop.eup %10816  ;;  %v2229_v35 = vsub.f32 %v12216_v6, %v2181_v9  ;;  %v2310_v58 = vpop.xlane.xlu1 %2309  ;;  %2360 = vadd.xlane.f32.xlu0 %v2359_v20  ;;  %v2350_v30 = vsel %vm605_vm2, %v12347_v2, 0.0 }
 0x40b   :  { %10826 = vpow2.f32 %v2278_v32  ;;  %2351 = vadd.xlane.f32.xlu1 %v2350_v30  ;;  %v2431_v50 = vmul.f32 %v10817_v40, %v12183_v51 }
 0x40c   :  { %v2284_v47 = vmul.f32 1.442695, %v2229_v35  ;;  %10828 = vrcp.f32 %v2310_v58  ;;  %v2600_v58 = vsel %vm2500_vm3, %v12056_v28, 0 }
 0x40d   :  { %v12355_v53 = vpop.eup %10818  ;;  %v2463_v23 = vpack.c.bf16 %v2431_v50, %v2431_v50  ;;  %v2319_v42 = vpop.xlane.xlu0 %2318 }
 0x40e   :  { %v10821_v3 = vpop.eup %10820  ;;  %10830 = vpow2.f32 %v2284_v47  ;;  %v2178_v8 = vpop.xlane.xlu1 %2177  ;;  %v2356_v6 = vsel %vm605_vm2, %v12355_v53, 0.0 }
 0x40f   :  { %9854 = vmatmul.mubr.msk.bf16.vlgmr.msra.gmra.mrb[76].mxu1 %vm605_vm2, %v2463_v23  ;;  %10832 = vrcp.f32 %v2319_v42  ;;  %v2228_v51 = vsub.f32 %v12229_v15, %v2178_v8  ;;  %2357 = vadd.xlane.f32.xlu1 %v2356_v6  ;;  %v2430_v44 = vmul.f32 %v10821_v3, %v12202_v31  ;;  %v2747_v42 = vsel %vm2500_vm3, %v12066_v0, 0 }
 0x410   :  { %v12364_v37 = vpop.eup %10822  ;;  %9864 = vmatpush3.bf16.msra.mxu1 %v2649_v11  ;;  %9865 = vmatprep.mubr.msk.bf16.mxu1 %vm11276_vm1, %v14707_v22 }
 0x411   :  { %v10825_v32 = vpop.eup %10824  ;;  %v2282_v9 = vmul.f32 1.442695, %v2228_v51  ;;  %v2187_v20 = vpop.xlane.xlu0 %2186  ;;  %v2462_v40 = vpack.c.bf16 %v2430_v44, %v2430_v44  ;;  %v2365_v5 = vsel %vm605_vm2, %v12364_v37, 0.0  ;;  %9875 = vmatprep.subr.bf16.mxu1 %v14707_v22 }
 0x412   :  { %v2231_v15 = vsub.f32 %v12234_v48, %v2187_v20  ;;  %v2316_v35 = vpop.xlane.xlu1 %2315  ;;  %2366 = vadd.xlane.f32.xlu0 %v2365_v5  ;;  %v2433_v31 = vmul.f32 %v10825_v32, %v12207_v62  ;;  %v2698_v20 = vsel %vm2500_vm3, %v12064_v54, 0 }
 0x413   :  { %10834 = vpow2.f32 %v2282_v9  ;;  %9848 = vmatmul.mubr.msk.bf16.vlgmr.msra.gmra.mrb[68].mxu0 %vm605_vm2, %v2462_v40 }
 0x414   :  { %v2288_v30 = vmul.f32 1.442695, %v2231_v15  ;;  %9858 = vmatpush3.bf16.msra.mxu0 %v2600_v58  ;;  %10836 = vrcp.f32 %v2316_v35  ;;  %v2465_v50 = vpack.c.bf16 %v2433_v31, %v2433_v31  ;;  %9859 = vmatprep.mubr.msk.bf16.mxu0 %vm11276_vm1, %v14707_v22  ;;  %v2845_v35 = vsel %vm2500_vm3, %v12062_v14, 0 }
 0x415   :  { %v12378_v47 = vpop.eup %10826  ;;  %v2325_v48 = vpop.xlane.xlu0 %2324  ;;  %9869 = vmatprep.subr.bf16.mxu0 %v14707_v22 }
 0x416   :  { %v10829_v23 = vpop.eup %10828  ;;  %10838 = vpow2.f32 %v2288_v30  ;;  %v2184_v62 = vpop.xlane.xlu1 %2183  ;;  %v2362_v28 = vsel %vm605_vm2, %v12378_v47, 0.0 }
 0x417   :  { %9866 = vmatmul.mubr.msk.bf16.vlgmr.msra.gmra.mrb[80].mxu1 %vm605_vm2, %v2465_v50  ;;  %10840 = vrcp.f32 %v2325_v48  ;;  %v2230_v3 = vsub.f32 %v12247_v13, %v2184_v62  ;;  %2363 = vadd.xlane.f32.xlu1 %v2362_v28  ;;  %v2432_v8 = vmul.f32 %v10829_v23, %v12222_v49 }
 0x418   :  { %v12388_v6 = vpop.eup %10830  ;;  %9876 = vmatpush3.bf16.msra.mxu1 %v2747_v42  ;;  %9877 = vmatprep.mubr.msk.bf16.mxu1 %vm11276_vm1, %v14707_v22 }
 0x419   :  { %v10833_v11 = vpop.eup %10832  ;;  %v2286_v51 = vmul.f32 1.442695, %v2230_v3  ;;  %v2193_v44 = vpop.xlane.xlu0 %2192  ;;  %v2464_v32 = vpack.c.bf16 %v2432_v8, %v2432_v8  ;;  %v2371_v0 = vsel %vm605_vm2, %v12388_v6, 0.0  ;;  %9887 = vmatprep.subr.bf16.mxu1 %v14707_v22 }
 0x41a   :  { %v2233_v13 = vsub.f32 %v12252_v56, %v2193_v44  ;;  %v2322_v9 = vpop.xlane.xlu1 %2321  ;;  %2372 = vadd.xlane.f32.xlu0 %v2371_v0  ;;  %v2435_v49 = vmul.f32 %v10833_v11, %v12226_v29 }
 0x41b   :  { %10842 = vpow2.f32 %v2286_v51  ;;  %9860 = vmatmul.mubr.msk.bf16.vlgmr.msra.gmra.mrb[72].mxu0 %vm605_vm2, %v2464_v32 }
 0x41c   :  { %v2292_v40 = vmul.f32 1.442695, %v2233_v13  ;;  %9870 = vmatpush3.bf16.msra.mxu0 %v2698_v20  ;;  %10844 = vrcp.f32 %v2322_v9  ;;  %v2467_v5 = vpack.c.bf16 %v2435_v49, %v2435_v49  ;;  %9871 = vmatprep.mubr.msk.bf16.mxu0 %vm11276_vm1, %v14707_v22 }
 0x41d   :  { %v12402_v15 = vpop.eup %10834  ;;  %9881 = vmatprep.subr.bf16.mxu0 %v14707_v22  ;;  %v2199_v32 = vpop.xlane.xlu0 %2198 }
 0x41e   :  { %v10837_v56 = vpop.eup %10836  ;;  %10846 = vpow2.f32 %v2292_v40  ;;  %v2190_v29 = vpop.xlane.xlu1 %2189  ;;  %v2368_v54 = vsel %vm605_vm2, %v12402_v15, 0.0  ;;  %v2235_v20 = vsub.f32 %v12261_v43, %v2199_v32 }
 0x41f   :  { %9878 = vmatmul.mubr.msk.bf16.vlgmr.msra.gmra.mrb[84].mxu1 %vm605_vm2, %v2467_v5  ;;  %v2232_v31 = vsub.f32 %v12266_v33, %v2190_v29  ;;  %2369 = vadd.xlane.f32.xlu1 %v2368_v54  ;;  %v2434_v58 = vmul.f32 %v10837_v56, %v12240_v21  ;;  %v2796_v21 = vsel %vm2500_vm3, %v12060_v18, 0 }
 0x420   :  { %v12412_v30 = vpop.eup %10838  ;;  %9888 = vmatpush3.bf16.msra.mxu1 %v2845_v35  ;;  %9889 = vmatprep.mubr.msk.bf16.mxu1 %vm11276_vm1, %v14707_v22  ;;  %v2296_v5 = vmul.f32 1.442695, %v2235_v20 }
 0x421   :  { %v10841_v50 = vpop.eup %10840  ;;  %v2290_v48 = vmul.f32 1.442695, %v2232_v31  ;;  %v2466_v23 = vpack.c.bf16 %v2434_v58, %v2434_v58  ;;  %v2377_v62 = vsel %vm605_vm2, %v12412_v30, 0.0  ;;  %9899 = vmatprep.subr.bf16.mxu1 %v14707_v22 }
 0x422   :  { %2378 = vadd.xlane.f32.xlu0 %v2377_v62  ;;  %v2437_v14 = vmul.f32 %v10841_v50, %v12244_v63  ;;  %v2943_v63 = vsel %vm2500_vm3, %v12094_v59, 0  ;;  %v2894_v59 = vsel %vm2500_vm3, %v12084_v16, 0  ;;  %v2196_v0 = vpop.xlane.xlu1 %2195  ;;  %v2205_v16 = vpop.xlane.xlu0 %2204 }
 0x423   :  { %10848 = vpow2.f32 %v2290_v48  ;;  %9872 = vmatmul.mubr.msk.bf16.vlgmr.msra.gmra.mrb[76].mxu0 %vm605_vm2, %v2466_v23  ;;  %v2237_v40 = vsub.f32 %v12271_v10, %v2205_v16  ;;  %v2234_v56 = vsub.f32 %v12276_v4, %v2196_v0  ;;  %v3041_v4 = vsel %vm2500_vm3, %v12070_v38, 0 }
 0x424   :  { %9882 = vmatpush3.bf16.msra.mxu0 %v2796_v21  ;;  %v2469_v33 = vpack.c.bf16 %v2437_v14, %v2437_v14  ;;  %9883 = vmatprep.mubr.msk.bf16.mxu0 %vm11276_vm1, %v14707_v22  ;;  %v2992_v21 = vsel %vm2500_vm3, %v12068_v46, 0 }
 0x425   :  { %v12425_v28 = vpop.eup %10842  ;;  %9893 = vmatprep.subr.bf16.mxu0 %v14707_v22  ;;  %v2300_v31 = vmul.f32 1.442695, %v2237_v40  ;;  %v2294_v50 = vmul.f32 1.442695, %v2234_v56  ;;  %v3237_v40 = vsel %vm2500_vm3, %v12118_v1, 0 }
 0x426   :  { %v10845_v42 = vpop.eup %10844  ;;  %v2374_v3 = vsel %vm605_vm2, %v12425_v28, 0.0  ;;  %v2202_v13 = vpop.xlane.xlu1 %2201 }
 0x427   :  { %9890 = vmatmul.mubr.msk.bf16.vlgmr.msra.gmra.mrb[88].mxu1 %vm605_vm2, %v2469_v33  ;;  %2375 = vadd.xlane.f32.xlu1 %v2374_v3  ;;  %v2436_v18 = vmul.f32 %v10845_v42, %v12258_v52  ;;  %v2236_v23 = vsub.f32 %v12283_v7, %v2202_v13 }
 0x428   :  { %v12434_v8 = vpop.eup %10846  ;;  %9900 = vmatpush3.bf16.msra.mxu1 %v2943_v63  ;;  %9901 = vmatprep.mubr.msk.bf16.mxu1 %vm11276_vm1, %v14707_v22 }
 0x429   :  { %v2468_v11 = vpack.c.bf16 %v2436_v18, %v2436_v18  ;;  %v2383_v51 = vsel %vm605_vm2, %v12434_v8, 0.0  ;;  %9911 = vmatprep.subr.bf16.mxu1 %v14707_v22  ;;  %v2298_v33 = vmul.f32 1.442695, %v2236_v23  ;;  %v3139_v18 = vsel %vm2500_vm3, %v12134_v45, 0 }
 0x42a   :  { %2384 = vadd.xlane.f32.xlu0 %v2383_v51  ;;  %v3090_v51 = vsel %vm2500_vm3, %v12136_v60, 0 }
 0x42b   :  { %9884 = vmatmul.mubr.msk.bf16.vlgmr.msra.gmra.mrb[80].mxu0 %vm605_vm2, %v2468_v11 }
 0x42c   :  { %9894 = vmatpush3.bf16.msra.mxu0 %v2894_v59  ;;  %9895 = vmatprep.mubr.msk.bf16.mxu0 %vm11276_vm1, %v14707_v22 }
 0x42d   :  { %v12446_v52 = vpop.eup %10848  ;;  %9905 = vmatprep.subr.bf16.mxu0 %v14707_v22 }
 0x42e   :  { %v2380_v44 = vsel %vm605_vm2, %v12446_v52, 0.0 }
 0x42f   :  { %2381 = vadd.xlane.f32.xlu1 %v2380_v44 }
 0x440   :  { %3917 = vrot.lane.b32.xlu1 %v11963_v12, %s11274_s28  ;;  %3868 = vrot.lane.b32.xlu0 %v11966_v19, %s11274_s28 }
 0x445   :  { %v2331_v9 = vpop.xlane.xlu0 %2330 }
 0x446   :  { %10850 = vrcp.f32 %v2331_v9  ;;  %v2328_v49 = vpop.xlane.xlu1 %2327 }
 0x447   :  { %10852 = vrcp.f32 %v2328_v49 }
 0x44d   :  { %v2337_v29 = vpop.xlane.xlu0 %2336 }
 0x44e   :  { %10854 = vrcp.f32 %v2337_v29  ;;  %v2334_v54 = vpop.xlane.xlu1 %2333 }
 0x44f   :  { %10856 = vrcp.f32 %v2334_v54 }
 0x450   :  { %v10851_v35 = vpop.eup %10850  ;;  %10858 = vpow2.f32 %v2296_v5 }
 0x451   :  { %v10853_v58 = vpop.eup %10852  ;;  %v2439_v48 = vmul.f32 %v10851_v35, %v12293_v25  ;;  %10860 = vpow2.f32 %v2300_v31  ;;  %v3335_v35 = vsel %vm2500_vm3, %v12106_v24, 0  ;;  %v14719_v31 = vld [vmem:[#allocation95_spill] sm:$0xff] }
 0x452   :  { %v2438_v43 = vmul.f32 %v10853_v58, %v12295_v34  ;;  %10862 = vpow2.f32 %v2294_v50  ;;  %v3286_v58 = vsel %vm2500_vm3, %v14719_v31, 0  ;;  %v14720_v24 = vld [vmem:[#allocation87_spill] sm:$0xff]  ;;  %v14723_v50 = vld [vmem:[#allocation34_spill] sm:$0xff] }
 0x453   :  { %v2471_v62 = vpack.c.bf16 %v2439_v48, %v2439_v48  ;;  %v14724_v48 = vld [vmem:[#allocation36_spill] sm:$0xff] }
 0x454   :  { %v2470_v10 = vpack.c.bf16 %v2438_v43, %v2438_v43 }
 0x455   :  { %9902 = vmatmul.mubr.msk.bf16.vlgmr.msra.gmra.mrb[92].mxu1 %vm605_vm2, %v2471_v62  ;;  %v2343_v14 = vpop.xlane.xlu0 %2342 }
 0x456   :  { %9912 = vmatpush3.bf16.msra.mxu1 %v3041_v4  ;;  %10864 = vrcp.f32 %v2343_v14  ;;  %9896 = vmatmul.mubr.msk.bf16.vlgmr.msra.gmra.mrb[84].mxu0 %vm605_vm2, %v2470_v10  ;;  %v2340_v7 = vpop.xlane.xlu1 %2339 }
 0x457   :  { %9906 = vmatpush3.bf16.msra.mxu0 %v2992_v21  ;;  %10866 = vrcp.f32 %v2340_v7  ;;  %9907 = vmatprep.mubr.msk.bf16.mxu0 %vm11276_vm1, %v14707_v22 }
 0x458   :  { %v10855_v34 = vpop.eup %10854  ;;  %9913 = vmatprep.mubr.msk.bf16.mxu1 %vm11276_vm1, %v14707_v22  ;;  %9917 = vmatprep.subr.bf16.mxu0 %v14707_v22  ;;  %10868 = vpow2.f32 %v2298_v33 }
 0x459   :  { %v10857_v38 = vpop.eup %10856  ;;  %9923 = vmatprep.subr.bf16.mxu1 %v14707_v22  ;;  %v2441_v46 = vmul.f32 %v10855_v34, %v12303_v26 }
 0x45a   :  { %v2440_v25 = vmul.f32 %v10857_v38, %v12305_v17  ;;  %v12475_v42 = vpop.eup %10858  ;;  %v14725_v38 = vld [vmem:[#allocation94_spill] sm:$0xff] }
 0x45b   :  { %v2473_v3 = vpack.c.bf16 %v2441_v46, %v2441_v46  ;;  %v12480_v11 = vpop.eup %10860  ;;  %v2389_v26 = vsel %vm605_vm2, %v12475_v42, 0.0  ;;  %v3433_v46 = vsel %vm2500_vm3, %v14725_v38, 0 }
 0x45c   :  { %v2472_v63 = vpack.c.bf16 %v2440_v25, %v2440_v25  ;;  %v12487_v17 = vpop.eup %10862  ;;  %v2395_v0 = vsel %vm605_vm2, %v12480_v11, 0.0 }
 0x45d   :  { %9914 = vmatmul.mubr.msk.bf16.vlgmr.msra.gmra.mrb[96].mxu1 %vm605_vm2, %v2473_v3  ;;  %v2386_v13 = vsel %vm605_vm2, %v12487_v17, 0.0 }
 0x45e   :  { %9924 = vmatpush3.bf16.msra.mxu1 %v3139_v18  ;;  %v2349_v59 = vpop.xlane.xlu0 %2348  ;;  %9908 = vmatmul.mubr.msk.bf16.vlgmr.msra.gmra.mrb[88].mxu0 %vm605_vm2, %v2472_v63 }
 0x45f   :  { %10870 = vrcp.f32 %v2349_v59  ;;  %9918 = vmatpush3.bf16.msra.mxu0 %v3090_v51  ;;  %v2346_v44 = vpop.xlane.xlu1 %2345  ;;  %2390 = vadd.xlane.f32.xlu0 %v2389_v26  ;;  %v14726_v59 = vld [vmem:[#allocation93_spill] sm:$0xff] }
 0x460   :  { %v10865_v45 = vpop.eup %10864  ;;  %10872 = vrcp.f32 %v2346_v44  ;;  %9919 = vmatprep.mubr.msk.bf16.mxu0 %vm11276_vm1, %v14707_v22  ;;  %9925 = vmatprep.mubr.msk.bf16.mxu1 %vm11276_vm1, %v14707_v22  ;;  %v3384_v26 = vsel %vm2500_vm3, %v14726_v59, 0 }
 0x461   :  { %v10867_v60 = vpop.eup %10866  ;;  %9929 = vmatprep.subr.bf16.mxu0 %v14707_v22  ;;  %9935 = vmatprep.subr.bf16.mxu1 %v14707_v22  ;;  %v2443_v32 = vmul.f32 %v10865_v45, %v12313_v55  ;;  %v3188_v55 = vsel %vm2500_vm3, %v12120_v27, 0 }
 0x462   :  { %v2442_v16 = vmul.f32 %v10867_v60, %v12315_v61  ;;  %v12501_v49 = vpop.eup %10868 }
 0x463   :  { %2396 = vadd.xlane.f32.xlu0 %v2395_v0  ;;  %v2475_v9 = vpack.c.bf16 %v2443_v32, %v2443_v32  ;;  %v2392_v61 = vsel %vm605_vm2, %v12501_v49, 0.0 }
 0x464   :  { %2387 = vadd.xlane.f32.xlu1 %v2386_v13  ;;  %v2474_v20 = vpack.c.bf16 %v2442_v16, %v2442_v16 }
 0x465   :  { %9926 = vmatmul.mubr.msk.bf16.vlgmr.msra.gmra.mrb[100].mxu1 %vm605_vm2, %v2475_v9 }
 0x466   :  { %9920 = vmatmul.mubr.msk.bf16.vlgmr.msra.gmra.mrb[92].mxu0 %vm605_vm2, %v2474_v20  ;;  %9936 = vmatpush3.bf16.msra.mxu1 %v3237_v40  ;;  %v14728_v20 = vld [vmem:[#allocation100_spill] sm:$0xff] }
 0x467   :  { %9930 = vmatpush3.bf16.msra.mxu0 %v3188_v55  ;;  %9931 = vmatprep.mubr.msk.bf16.mxu0 %vm11276_vm1, %v14707_v22 }
 0x468   :  { %2393 = vadd.xlane.f32.xlu1 %v2392_v61  ;;  %9937 = vmatprep.mubr.msk.bf16.mxu1 %vm11276_vm1, %v14707_v22 }
 0x469   :  { %v10871_v1 = vpop.eup %10870  ;;  %9941 = vmatprep.subr.bf16.mxu0 %v14707_v22  ;;  %9947 = vmatprep.subr.bf16.mxu1 %v14707_v22 }
 0x46a   :  { %v10873_v27 = vpop.eup %10872  ;;  %v2445_v5 = vmul.f32 %v10871_v1, %v12321_v36  ;;  %v14721_v36 = vld [vmem:[#allocation88_spill] sm:$0xff] }
 0x46b   :  { %v2444_v56 = vmul.f32 %v10873_v27, %v12323_v57  ;;  %v14722_v57 = vld [vmem:[#allocation31_spill] sm:$0xff] }
 0x46c   :  { %v2477_v29 = vpack.c.bf16 %v2445_v5, %v2445_v5 }
 0x46d   :  { %v2476_v54 = vpack.c.bf16 %v2444_v56, %v2444_v56 }
 0x46e   :  { %9938 = vmatmul.mubr.msk.bf16.vlgmr.msra.gmra.mrb[104].mxu1 %vm605_vm2, %v2477_v29 }
 0x46f   :  { %9932 = vmatmul.mubr.msk.bf16.vlgmr.msra.gmra.mrb[96].mxu0 %vm605_vm2, %v2476_v54  ;;  %9948 = vmatpush3.bf16.msra.mxu1 %v3335_v35  ;;  %v14730_v35 = vld [vmem:[#allocation98_spill] sm:$0xff] }
 0x470   :  { %9942 = vmatpush3.bf16.msra.mxu0 %v3286_v58  ;;  %9949 = vmatprep.mubr.msk.bf16.mxu1 %vm11276_vm1, %v14707_v22 }
 0x471   :  { %9959 = vmatprep.subr.bf16.mxu1 %v14707_v22  ;;  %9943 = vmatprep.mubr.msk.bf16.mxu0 %vm11276_vm1, %v14707_v22 }
 0x472   :  { %9953 = vmatprep.subr.bf16.mxu0 %v14707_v22 }
 0x479   :  { %4015 = vrot.lane.b32.xlu1 %v14720_v24, %s11274_s28  ;;  %3966 = vrot.lane.b32.xlu0 %v14721_v36, %s11274_s28 }
 0x47d   :  { %4289 = vrot.lane.b32.xlu1 %v14722_v57, %s11268_s27  ;;  %4292 = vrot.lane.b32.xlu0 %v14723_v50, %s11274_s28 }
 0x481   :  { %4343 = vrot.lane.b32.xlu0 %v14724_v48, %s11274_s28 }
 0x493   :  { %v2355_v23 = vpop.xlane.xlu0 %2354 }
 0x494   :  { %10874 = vrcp.f32 %v2355_v23 }
 0x497   :  { %v2361_v43 = vpop.xlane.xlu0 %2360 }
 0x498   :  { %10876 = vrcp.f32 %v2361_v43  ;;  %v2352_v62 = vpop.xlane.xlu1 %2351 }
 0x499   :  { %10878 = vrcp.f32 %v2352_v62 }
 0x49c   :  { %v2358_v10 = vpop.xlane.xlu1 %2357 }
 0x49d   :  { %10880 = vrcp.f32 %v2358_v10 }
 0x49e   :  { %v10875_v4 = vpop.eup %10874 }
 0x49f   :  { %v2367_v14 = vpop.xlane.xlu0 %2366  ;;  %v2447_v21 = vmul.f32 %v10875_v4, %v12340_v39 }
 0x4a0   :  { %10882 = vrcp.f32 %v2367_v14  ;;  %v14732_v14 = vld [vmem:[#allocation96_spill] sm:$0xff] }
 0x4a1   :  { %v2479_v33 = vpack.c.bf16 %v2447_v21, %v2447_v21 }
 0x4a2   :  { %v10877_v7 = vpop.eup %10876 }
 0x4a3   :  { %v10879_v34 = vpop.eup %10878  ;;  %9950 = vmatmul.mubr.msk.bf16.vlgmr.msra.gmra.mrb[108].mxu1 %vm605_vm2, %v2479_v33  ;;  %v2449_v39 = vmul.f32 %v10877_v7, %v12345_v41  ;;  %v14727_v41 = vld [vmem:[#allocation99_spill] sm:$0xff] }
 0x4a4   :  { %9960 = vmatpush3.bf16.msra.mxu1 %v3433_v46  ;;  %v2364_v25 = vpop.xlane.xlu1 %2363  ;;  %v2446_v3 = vmul.f32 %v10879_v34, %v12347_v2  ;;  %9961 = vmatprep.mubr.msk.bf16.mxu1 %vm11276_vm1, %v14707_v22  ;;  %v3531_v60 = vsel %vm2500_vm3, %v14727_v41, 0  ;;  %v14733_v34 = vld [vmem:[#allocation103_spill] sm:$0xff] }
 0x4a5   :  { %10884 = vrcp.f32 %v2364_v25  ;;  %9971 = vmatprep.subr.bf16.mxu1 %v14707_v22  ;;  %v2481_v44 = vpack.c.bf16 %v2449_v39, %v2449_v39 }
 0x4a6   :  { %v2478_v63 = vpack.c.bf16 %v2446_v3, %v2446_v3  ;;  %v14734_v3 = vld [vmem:[#allocation101_spill] sm:$0xff] }
 0x4a7   :  { %v10881_v18 = vpop.eup %10880  ;;  %v2373_v51 = vpop.xlane.xlu0 %2372  ;;  %v3776_v39 = vsel %vm2500_vm3, %v14734_v3, 0 }
 0x4a8   :  { %10886 = vrcp.f32 %v2373_v51  ;;  %9944 = vmatmul.mubr.msk.bf16.vlgmr.msra.gmra.mrb[100].mxu0 %vm605_vm2, %v2478_v63  ;;  %v2448_v45 = vmul.f32 %v10881_v18, %v12355_v53  ;;  %v3482_v53 = vsel %vm2500_vm3, %v14728_v20, 0 }
 0x4a9   :  { %9954 = vmatpush3.bf16.msra.mxu0 %v3384_v26  ;;  %9955 = vmatprep.mubr.msk.bf16.mxu0 %vm11276_vm1, %v14707_v22 }
 0x4aa   :  { %v10883_v2 = vpop.eup %10882  ;;  %9965 = vmatprep.subr.bf16.mxu0 %v14707_v22  ;;  %v2480_v16 = vpack.c.bf16 %v2448_v45, %v2448_v45 }
 0x4ab   :  { %9962 = vmatmul.mubr.msk.bf16.vlgmr.msra.gmra.mrb[112].mxu1 %vm605_vm2, %v2481_v44  ;;  %v2451_v0 = vmul.f32 %v10883_v2, %v12364_v37  ;;  %v14729_v37 = vld [vmem:[#allocation97_spill] sm:$0xff] }
 0x4ac   :  { %9972 = vmatpush3.bf16.msra.mxu1 %v3531_v60  ;;  %v2370_v32 = vpop.xlane.xlu1 %2369  ;;  %9973 = vmatprep.mubr.msk.bf16.mxu1 %vm11276_vm1, %v14707_v22  ;;  %v3629_v1 = vsel %vm2500_vm3, %v14729_v37, 0 }
 0x4ad   :  { %10888 = vrcp.f32 %v2370_v32  ;;  %9983 = vmatprep.subr.bf16.mxu1 %v14707_v22  ;;  %v2483_v40 = vpack.c.bf16 %v2451_v0, %v2451_v0 }
 0x4af   :  { %v10885_v13 = vpop.eup %10884  ;;  %v2379_v9 = vpop.xlane.xlu0 %2378 }
 0x4b0   :  { %10890 = vrcp.f32 %v2379_v9  ;;  %9956 = vmatmul.mubr.msk.bf16.vlgmr.msra.gmra.mrb[104].mxu0 %vm605_vm2, %v2480_v16  ;;  %v2450_v61 = vmul.f32 %v10885_v13, %v12378_v47  ;;  %v3580_v47 = vsel %vm2500_vm3, %v14730_v35, 0 }
 0x4b1   :  { %9966 = vmatpush3.bf16.msra.mxu0 %v3482_v53  ;;  %9967 = vmatprep.mubr.msk.bf16.mxu0 %vm11276_vm1, %v14707_v22 }
 0x4b2   :  { %v10887_v55 = vpop.eup %10886  ;;  %9977 = vmatprep.subr.bf16.mxu0 %v14707_v22  ;;  %v2482_v56 = vpack.c.bf16 %v2450_v61, %v2450_v61 }
 0x4b3   :  { %9974 = vmatmul.mubr.msk.bf16.vlgmr.msra.gmra.mrb[116].mxu1 %vm605_vm2, %v2483_v40  ;;  %v2453_v5 = vmul.f32 %v10887_v55, %v12388_v6  ;;  %v14731_v6 = vld [vmem:[#allocation102_spill] sm:$0xff] }
 0x4b4   :  { %9984 = vmatpush3.bf16.msra.mxu1 %v3629_v1  ;;  %v2376_v27 = vpop.xlane.xlu1 %2375  ;;  %9985 = vmatprep.mubr.msk.bf16.mxu1 %vm11276_vm1, %v14707_v22  ;;  %v3727_v23 = vsel %vm2500_vm3, %v14731_v6, 0 }
 0x4b5   :  { %10892 = vrcp.f32 %v2376_v27  ;;  %9995 = vmatprep.subr.bf16.mxu1 %v14707_v22  ;;  %v2485_v31 = vpack.c.bf16 %v2453_v5, %v2453_v5 }
 0x4b7   :  { %v10889_v29 = vpop.eup %10888  ;;  %v2385_v54 = vpop.xlane.xlu0 %2384 }
 0x4b8   :  { %10894 = vrcp.f32 %v2385_v54  ;;  %9968 = vmatmul.mubr.msk.bf16.vlgmr.msra.gmra.mrb[108].mxu0 %vm605_vm2, %v2482_v56  ;;  %v2452_v57 = vmul.f32 %v10889_v29, %v12402_v15  ;;  %v3678_v15 = vsel %vm2500_vm3, %v14732_v14, 0 }
 0x4b9   :  { %9978 = vmatpush3.bf16.msra.mxu0 %v3580_v47  ;;  %9979 = vmatprep.mubr.msk.bf16.mxu0 %vm11276_vm1, %v14707_v22 }
 0x4ba   :  { %v10891_v58 = vpop.eup %10890  ;;  %9989 = vmatprep.subr.bf16.mxu0 %v14707_v22  ;;  %v2484_v10 = vpack.c.bf16 %v2452_v57, %v2452_v57 }
 0x4bb   :  { %9986 = vmatmul.mubr.msk.bf16.vlgmr.msra.gmra.mrb[120].mxu1 %vm605_vm2, %v2485_v31  ;;  %v2455_v62 = vmul.f32 %v10891_v58, %v12412_v30  ;;  %v3825_v30 = vsel %vm2500_vm3, %v14733_v34, 0 }
 0x4bc   :  { %9996 = vmatpush3.bf16.msra.mxu1 %v3727_v23  ;;  %v2382_v43 = vpop.xlane.xlu1 %2381  ;;  %9997 = vmatprep.mubr.msk.bf16.mxu1 %vm11276_vm1, %v14707_v22 }
 0x4bd   :  { %10896 = vrcp.f32 %v2382_v43  ;;  %10007 = vmatprep.subr.bf16.mxu1 %v14707_v22  ;;  %v2487_v21 = vpack.c.bf16 %v2455_v62, %v2455_v62 }
 0x4bf   :  { %v10893_v4 = vpop.eup %10892 }
 0x4c0   :  { %9980 = vmatmul.mubr.msk.bf16.vlgmr.msra.gmra.mrb[112].mxu0 %vm605_vm2, %v2484_v10  ;;  %v2454_v7 = vmul.f32 %v10893_v4, %v12425_v28  ;;  %v3918_v63 = vpop.permute.xlu1 %3917 }
 0x4c1   :  { %9990 = vmatpush3.bf16.msra.mxu0 %v3678_v15  ;;  %9991 = vmatprep.mubr.msk.bf16.mxu0 %vm11276_vm1, %v14707_v22  ;;  %v3923_v51 = vsel %vm2500_vm3, %v3918_v63, 0 }
 0x4c2   :  { %v10895_v33 = vpop.eup %10894  ;;  %10001 = vmatprep.subr.bf16.mxu0 %v14707_v22  ;;  %v2486_v46 = vpack.c.bf16 %v2454_v7, %v2454_v7 }
 0x4c3   :  { %9998 = vmatmul.mubr.msk.bf16.vlgmr.msra.gmra.mrb[124].mxu1 %vm605_vm2, %v2487_v21  ;;  %v2457_v38 = vmul.f32 %v10895_v33, %v12434_v8  ;;  %v3869_v8 = vpop.permute.xlu0 %3868 }
 0x4c4   :  { %10008 = vmatpush3.bf16.msra.mxu1 %v3825_v30  ;;  %10009 = vmatprep.mubr.msk.bf16.mxu1 %vm11276_vm1, %v14707_v22  ;;  %v3874_v26 = vsel %vm2500_vm3, %v3869_v8, 0 }
 0x4c5   :  { %10019 = vmatprep.subr.bf16.mxu1 %v14707_v22  ;;  %v2489_v28 = vpack.c.bf16 %v2457_v38, %v2457_v38 }
 0x4c7   :  { %v10897_v25 = vpop.eup %10896 }
 0x4c8   :  { %9992 = vmatmul.mubr.msk.bf16.vlgmr.msra.gmra.mrb[116].mxu0 %vm605_vm2, %v2486_v46  ;;  %v2456_v18 = vmul.f32 %v10897_v25, %v12446_v52 }
 0x4c9   :  { %10002 = vmatpush3.bf16.msra.mxu0 %v3776_v39  ;;  %10003 = vmatprep.mubr.msk.bf16.mxu0 %vm11276_vm1, %v14707_v22 }
 0x4ca   :  { %10013 = vmatprep.subr.bf16.mxu0 %v14707_v22  ;;  %v2488_v59 = vpack.c.bf16 %v2456_v18, %v2456_v18 }
 0x4cb   :  { %10010 = vmatmul.mubr.msk.bf16.vlgmr.msra.gmra.mrb[128].mxu1 %vm605_vm2, %v2489_v28 }
 0x4cc   :  { %10020 = vmatpush3.bf16.msra.mxu1 %v3923_v51  ;;  %10021 = vmatprep.mubr.msk.bf16.mxu1 %vm11276_vm1, %v14707_v22 }
 0x4cd   :  { %10031 = vmatprep.subr.bf16.mxu1 %v14707_v22 }
 0x4d0   :  { %10004 = vmatmul.mubr.msk.bf16.vlgmr.msra.gmra.mrb[120].mxu0 %vm605_vm2, %v2488_v59 }
 0x4d1   :  { %10014 = vmatpush3.bf16.msra.mxu0 %v3874_v26  ;;  %10015 = vmatprep.mubr.msk.bf16.mxu0 %vm11276_vm1, %v14707_v22 }
 0x4d2   :  { %10025 = vmatprep.subr.bf16.mxu0 %v14707_v22 }
 0x4e2   :  { %v12623_v52 = vpop.f32.mrb[76].mxu1 }
 0x4e3   :  { %v9855_v44 = vpop.f32.mrb[77].mxu1 }
 0x4e4   :  { %v2590_v2 = vpop.f32.mrb[78].mxu1 }
 0x4e5   :  { %v9856_v45 = vpop.f32.mrb[79].mxu1 }
 0x4e6   :  { %v12625_v41 = vpop.f32.mrb[68].mxu0 }
 0x4e7   :  { %v9849_v60 = vpop.f32.mrb[69].mxu0 }
 0x4e8   :  { %v2541_v32 = vpop.f32.mrb[70].mxu0 }
 0x4e9   :  { %v9850_v0 = vpop.f32.mrb[71].mxu0 }
 0x4ea   :  { %v12627_v16 = vpop.f32.mrb[80].mxu1 }
 0x4eb   :  { %v9867_v13 = vpop.f32.mrb[81].mxu1 }
 0x4ec   :  { %v2688_v9 = vpop.f32.mrb[82].mxu1  ;;  %v2391_v20 = vpop.xlane.xlu0 %2390 }
 0x4ed   :  { %v9868_v53 = vpop.f32.mrb[83].mxu1  ;;  %10898 = vrcp.f32 %v2391_v20 }
 0x4ee   :  { %v12629_v40 = vpop.f32.mrb[72].mxu0 }
 0x4ef   :  { %v9861_v55 = vpop.f32.mrb[73].mxu0 }
 0x4f0   :  { %v2639_v61 = vpop.f32.mrb[74].mxu0  ;;  %v2397_v37 = vpop.xlane.xlu0 %2396 }
 0x4f1   :  { %v9862_v1 = vpop.f32.mrb[75].mxu0  ;;  %10900 = vrcp.f32 %v2397_v37  ;;  %v2388_v27 = vpop.xlane.xlu1 %2387 }
 0x4f2   :  { %v12631_v5 = vpop.f32.mrb[84].mxu1  ;;  %10902 = vrcp.f32 %v2388_v27 }
 0x4f3   :  { %v9879_v56 = vpop.f32.mrb[85].mxu1 }
 0x4f4   :  { %v2786_v29 = vpop.f32.mrb[86].mxu1  ;;  %v3967_v21 = vpop.permute.xlu0 %3966 }
 0x4f5   :  { %v9880_v54 = vpop.f32.mrb[87].mxu1  ;;  %v2394_v35 = vpop.xlane.xlu1 %2393  ;;  %v3972_v63 = vsel %vm2500_vm3, %v3967_v21, 0 }
 0x4f6   :  { %10904 = vrcp.f32 %v2394_v35  ;;  %v12633_v47 = vpop.f32.mrb[76].mxu0 }
 0x4f7   :  { %v10899_v31 = vpop.eup %10898  ;;  %v9873_v58 = vpop.f32.mrb[77].mxu0 }
 0x4f8   :  { %v2737_v57 = vpop.f32.mrb[78].mxu0  ;;  %v2459_v6 = vmul.f32 %v10899_v31, %v12475_v42  ;;  %v4293_v18 = vpop.permute.xlu0 %4292 }
 0x4f9   :  { %v9874_v23 = vpop.f32.mrb[79].mxu0  ;;  %v4016_v43 = vpop.permute.xlu1 %4015 }
 0x4fa   :  { %v12636_v62 = vpop.f32.mrb[88].mxu1  ;;  %v2491_v10 = vpack.c.bf16 %v2459_v6, %v2459_v6  ;;  %v4021_v33 = vsel %vm2500_vm3, %v4016_v43, 0 }
 0x4fb   :  { %v10901_v4 = vpop.eup %10900  ;;  %v9891_v14 = vpop.f32.mrb[89].mxu1 }
 0x4fc   :  { %v10903_v15 = vpop.eup %10902  ;;  %v2884_v7 = vpop.f32.mrb[90].mxu1  ;;  %10022 = vmatmul.mubr.msk.bf16.vlgmr.msra.gmra.mrb[132].mxu1 %vm605_vm2, %v2491_v10  ;;  %v2461_v38 = vmul.f32 %v10901_v4, %v12480_v11  ;;  %v4298_v11 = vsel %vm605_vm2, %v4293_v18, 0 }
 0x4fd   :  { %v9892_v34 = vpop.f32.mrb[91].mxu1  ;;  %10032 = vmatpush3.bf16.msra.mxu1 %v4021_v33  ;;  %v2458_v30 = vmul.f32 %v10903_v15, %v12487_v17  ;;  %10033 = vmatprep.mubr.msk.bf16.mxu1 %vm11276_vm1, %v14707_v22  ;;  %v4344_v59 = vpop.permute.xlu0 %4343 }
 0x4fe   :  { %v12643_v42 = vpop.f32.mrb[80].mxu0  ;;  %10049 = vmatprep.subr.bf16.mxu1 %v14707_v22  ;;  %v2493_v17 = vpack.c.bf16 %v2461_v38, %v2461_v38  ;;  %v4290_v26 = vpop.permute.xlu1 %4289  ;;  %v4349_v44 = vsel %vm605_vm2, %v4344_v59, 0 }
 0x4ff   :  { %v9885_v46 = vpop.f32.mrb[81].mxu0  ;;  %v2490_v25 = vpack.c.bf16 %v2458_v30, %v2458_v30 }
 0x500   :  { %v10905_v3 = vpop.eup %10904  ;;  %v2835_v39 = vpop.f32.mrb[82].mxu0 }
 0x501   :  { %v9886_v28 = vpop.f32.mrb[83].mxu0  ;;  %10016 = vmatmul.mubr.msk.bf16.vlgmr.msra.gmra.mrb[124].mxu0 %vm605_vm2, %v2490_v25  ;;  %v2460_v51 = vmul.f32 %v10905_v3, %v12501_v49 }
 0x502   :  { %10026 = vmatpush3.bf16.msra.mxu0 %v3972_v63  ;;  %10027 = vmatprep.mubr.msk.bf16.mxu0 %vm11276_vm1, %v14707_v22 }
 0x503   :  { %v2492_v8 = vpack.c.bf16 %v2460_v51, %v2460_v51 }
 0x504   :  { %10034 = vmatmul.mubr.msk.bf16.vlgmr.msra.gmra.mrb[136].mxu1 %vm605_vm2, %v2493_v17 }
 0x505   :  { %10051 = vmatprep.mubr.msk.bf16.mxu1 %vm11276_vm1, %v14707_v22 }
 0x506   :  { %10050 = vmatpush3.bf16.xpose.msra.mxu1 %v4298_v11 }
 0x507   :  { %10055 = vmatprep.subr.bf16.mxu1 %v14707_v22 }
 0x509   :  { %10028 = vmatmul.mubr.msk.bf16.vlgmr.msra.gmra.mrb[128].mxu0 %vm605_vm2, %v2492_v8 }
 0x50d   :  { %10052 = vmatmul.mubr.msk.bf16.vlgmr.msra.gmra.mrb[140].mxu1 %vm605_vm2, %v4290_v26 }
 0x50e   :  { %10056 = vmatpush3.bf16.xpose.msra.mxu1 %v4349_v44  ;;  %10057 = vmatprep.mubr.msk.bf16.mxu1 %vm11276_vm1, %v14707_v22 }
 0x50f   :  { %10067 = vmatprep.subr.bf16.mxu1 %v14707_v22 }
 0x528   :  { %v2979_v49 = vpop.f32.mrb[92].mxu1 }
 0x529   :  { %v2930_v2 = vpop.f32.mrb[84].mxu0  ;;  %v9903_v45 = vpop.f32.mrb[93].mxu1 }
 0x52a   :  { %v10644_v60 = vpack.i.bf16 %v2979_v49, %v2930_v2  ;;  %v9897_v32 = vpop.f32.mrb[85].mxu0  ;;  %v2982_v0 = vpop.f32.mrb[94].mxu1 }
 0x52b   :  { %v2933_v13 = vpop.f32.mrb[86].mxu0  ;;  %v9904_v9 = vpop.f32.mrb[95].mxu1 }
 0x52c   :  { %10645 = vrot.lane.b32.xlu1 %v10644_v60, %s11280_s3  ;;  %v9898_v20 = vpop.f32.mrb[87].mxu0 }
 0x530   :  { %v3077_v53 = vpop.f32.mrb[96].mxu1 }
 0x531   :  { %v3028_v55 = vpop.f32.mrb[88].mxu0  ;;  %v9915_v61 = vpop.f32.mrb[97].mxu1 }
 0x532   :  { %v10649_v37 = vpack.i.bf16 %v3077_v53, %v3028_v55  ;;  %v9909_v1 = vpop.f32.mrb[89].mxu0  ;;  %v3080_v27 = vpop.f32.mrb[98].mxu1 }
 0x533   :  { %v3031_v56 = vpop.f32.mrb[90].mxu0  ;;  %v9916_v29 = vpop.f32.mrb[99].mxu1 }
 0x534   :  { %10650 = vrot.lane.b32.xlu0 %v10649_v37, %s11280_s3  ;;  %v9910_v54 = vpop.f32.mrb[91].mxu0  ;;  %v10768_v29 = vld [vmem:[#allocation5] sm:$0xff]  }
 0x535   :  { %10037 = vmatprep.subr.bf16.mxu0 %v10768_v29 }
 0x536   :  { %10038 = vmatpush3.bf16.msra.mxu0 %v10768_v29 }
 0x538   :  { %v3175_v35 = vpop.f32.mrb[100].mxu1 }
 0x539   :  { %v3126_v31 = vpop.f32.mrb[92].mxu0  ;;  %v9927_v58 = vpop.f32.mrb[101].mxu1 }
 0x53a   :  { %v10654_v57 = vpack.i.bf16 %v3175_v35, %v3126_v31  ;;  %v9921_v6 = vpop.f32.mrb[93].mxu0  ;;  %v3178_v23 = vpop.f32.mrb[102].mxu1  ;;  %v10769_v58 = vld [vmem:[#allocation5 + $0x8] sm:$0xff]  }
 0x53b   :  { %v3129_v43 = vpop.f32.mrb[94].mxu0  ;;  %v9928_v10 = vpop.f32.mrb[103].mxu1  ;;  %10039 = vmatprep.subr.bf16.mxu0 %v10769_v58 }
 0x53c   :  { %10655 = vrot.lane.b32.xlu1 %v10654_v57, %s11280_s3  ;;  %v9922_v4 = vpop.f32.mrb[95].mxu0  ;;  %10040 = vmatpush3.bf16.msra.mxu0 %v10769_v58 }
 0x53d   :  { %10061 = vmatprep.subr.bf16.mxu0 %v14707_v22 }
 0x541   :  { %v3273_v14 = vpop.f32.mrb[104].mxu1 }
 0x542   :  { %v3224_v15 = vpop.f32.mrb[96].mxu0  ;;  %v9939_v21 = vpop.f32.mrb[105].mxu1 }
 0x543   :  { %v10659_v33 = vpack.i.bf16 %v3273_v14, %v3224_v15  ;;  %v9933_v7 = vpop.f32.mrb[97].mxu0  ;;  %v3276_v34 = vpop.f32.mrb[106].mxu1  ;;  %v14735_v21 = vld [vmem:[#allocation38_spill] sm:$0xff] }
 0x544   :  { %v3227_v30 = vpop.f32.mrb[98].mxu0  ;;  %v9940_v38 = vpop.f32.mrb[107].mxu1 }
 0x545   :  { %10660 = vrot.lane.b32.xlu0 %v10659_v33, %s11280_s3  ;;  %v9934_v46 = vpop.f32.mrb[99].mxu0 }
 0x576   :  { %v3371_v25 = vpop.f32.mrb[108].mxu1 }
 0x577   :  { %v9951_v3 = vpop.f32.mrb[109].mxu1 }
 0x578   :  { %v3374_v39 = vpop.f32.mrb[110].mxu1 }
 0x579   :  { %v9952_v63 = vpop.f32.mrb[111].mxu1 }
 0x57a   :  { %v14736_v63 = vld [vmem:[#allocation32_spill] sm:$0xff] }
 0x57b   :  { %v3322_v28 = vpop.f32.mrb[100].mxu0 }
 0x57c   :  { %v10664_v18 = vpack.i.bf16 %v3371_v25, %v3322_v28  ;;  %v9945_v17 = vpop.f32.mrb[101].mxu0 }
 0x57d   :  { %v3325_v51 = vpop.f32.mrb[102].mxu0 }
 0x57e   :  { %10665 = vrot.lane.b32.xlu1 %v10664_v18, %s11281_s6  ;;  %v9946_v11 = vpop.f32.mrb[103].mxu0  ;;  %v3469_v8 = vpop.f32.mrb[112].mxu1 }
 0x57f   :  { %v9963_v59 = vpop.f32.mrb[113].mxu1 }
 0x580   :  { %v3472_v26 = vpop.f32.mrb[114].mxu1  ;;  %v14738_v59 = vld [vmem:[#allocation42_spill] sm:$0xff] }
 0x581   :  { %v9964_v44 = vpop.f32.mrb[115].mxu1  ;;  %v14739_v26 = vld [vmem:[#allocation37_spill] sm:$0xff] }
 0x582   :  { %v14740_v44 = vld [vmem:[#allocation45_spill] sm:$0xff] }
 0x583   :  { %v3420_v49 = vpop.f32.mrb[104].mxu0 }
 0x584   :  { %v10669_v2 = vpack.i.bf16 %v3469_v8, %v3420_v49  ;;  %v9957_v45 = vpop.f32.mrb[105].mxu0  ;;  %v14737_v8 = vld [vmem:[#allocation33_spill] sm:$0xff] }
 0x585   :  { %v3423_v60 = vpop.f32.mrb[106].mxu0  ;;  %v14741_v49 = vld [vmem:[#allocation41_spill] sm:$0xff]  ;;  %v14743_v45 = vld [vmem:[#allocation48_spill] sm:$0xff] }
 0x586   :  { %10670 = vrot.lane.b32.xlu0 %v10669_v2, %s11281_s6  ;;  %v9958_v32 = vpop.f32.mrb[107].mxu0  ;;  %v3567_v0 = vpop.f32.mrb[116].mxu1  ;;  %v14742_v2 = vld [vmem:[#allocation52_spill] sm:$0xff] }
 0x587   :  { %v9975_v13 = vpop.f32.mrb[117].mxu1  ;;  %v14744_v60 = vld [vmem:[#allocation56_spill] sm:$0xff]  ;;  %v14745_v32 = vld [vmem:[#allocation50_spill] sm:$0xff] }
 0x588   :  { %v3570_v9 = vpop.f32.mrb[118].mxu1 }
 0x589   :  { %v9976_v20 = vpop.f32.mrb[119].mxu1 }
 0x58b   :  { %v3518_v53 = vpop.f32.mrb[108].mxu0 }
 0x58c   :  { %v10674_v55 = vpack.i.bf16 %v3567_v0, %v3518_v53  ;;  %v9969_v61 = vpop.f32.mrb[109].mxu0  ;;  %v14746_v0 = vld [vmem:[#allocation62_spill] sm:$0xff] }
 0x58d   :  { %v3521_v37 = vpop.f32.mrb[110].mxu0 }
 0x58e   :  { %10675 = vrot.lane.b32.xlu1 %v10674_v55, %s11281_s6  ;;  %v9970_v1 = vpop.f32.mrb[111].mxu0  ;;  %v3665_v27 = vpop.f32.mrb[120].mxu1 }
 0x58f   :  { %v9987_v56 = vpop.f32.mrb[121].mxu1 }
 0x590   :  { %v3668_v54 = vpop.f32.mrb[122].mxu1 }
 0x591   :  { %v9988_v35 = vpop.f32.mrb[123].mxu1 }
 0x593   :  { %v3616_v31 = vpop.f32.mrb[112].mxu0 }
 0x594   :  { %v10679_v57 = vpack.i.bf16 %v3665_v27, %v3616_v31  ;;  %v9981_v6 = vpop.f32.mrb[113].mxu0  ;;  %v14747_v31 = vld [vmem:[#allocation40_spill] sm:$0xff] }
 0x595   :  { %v3619_v23 = vpop.f32.mrb[114].mxu0 }
 0x596   :  { %10680 = vrot.lane.b32.xlu0 %v10679_v57, %s11281_s6  ;;  %v9982_v43 = vpop.f32.mrb[115].mxu0  ;;  %v3763_v10 = vpop.f32.mrb[124].mxu1 }
 0x597   :  { %v9999_v4 = vpop.f32.mrb[125].mxu1  ;;  %v14748_v43 = vld [vmem:[#allocation35_spill] sm:$0xff] }
 0x598   :  { %v3766_v14 = vpop.f32.mrb[126].mxu1 }
 0x599   :  { %v10000_v15 = vpop.f32.mrb[127].mxu1 }
 0x59a   :  { %4394 = vrot.lane.b32.xlu0 %v14735_v21, %s11274_s28 }
 0x59b   :  { %v3714_v33 = vpop.f32.mrb[116].mxu0 }
 0x59c   :  { %v10684_v7 = vpack.i.bf16 %v3763_v10, %v3714_v33  ;;  %v9993_v34 = vpop.f32.mrb[117].mxu0 }
 0x59d   :  { %v3717_v30 = vpop.f32.mrb[118].mxu0  ;;  %v14750_v34 = vld [vmem:[#allocation54_spill] sm:$0xff] }
 0x59e   :  { %10685 = vrot.lane.b32.xlu1 %v10684_v7, %s11282_s30  ;;  %v9994_v38 = vpop.f32.mrb[119].mxu0  ;;  %v3861_v46 = vpop.f32.mrb[128].mxu1  ;;  %v14749_v7 = vld [vmem:[#allocation44_spill] sm:$0xff]  ;;  %v14751_v30 = vld [vmem:[#allocation39_spill] sm:$0xff] }
 0x59f   :  { %v10011_v25 = vpop.f32.mrb[129].mxu1  ;;  %v14752_v38 = vld [vmem:[#allocation67_spill] sm:$0xff] }
 0x5a0   :  { %v3864_v3 = vpop.f32.mrb[130].mxu1  ;;  %v14754_v25 = vld [vmem:[#allocation60_spill] sm:$0xff] }
 0x5a1   :  { %v10012_v39 = vpop.f32.mrb[131].mxu1  ;;  %v14755_v3 = vld [vmem:[#allocation43_spill] sm:$0xff] }
 0x5a2   :  { %4340 = vrot.lane.b32.xlu1 %v14736_v63, %s11268_s27  ;;  %v14756_v39 = vld [vmem:[#allocation71_spill] sm:$0xff] }
 0x5a3   :  { %v3812_v28 = vpop.f32.mrb[120].mxu0  ;;  %v14757_v63 = vld [vmem:[#allocation51_spill] sm:$0xff] }
 0x5a4   :  { %v10689_v18 = vpack.i.bf16 %v3861_v46, %v3812_v28  ;;  %v10005_v17 = vpop.f32.mrb[121].mxu0  ;;  %v14753_v46 = vld [vmem:[#allocation46_spill] sm:$0xff]  ;;  %v14758_v28 = vld [vmem:[#allocation64_spill] sm:$0xff] }
 0x5a5   :  { %v3815_v51 = vpop.f32.mrb[122].mxu0  ;;  %v14760_v17 = vld [vmem:[#allocation75_spill] sm:$0xff] }
 0x5a6   :  { %10690 = vrot.lane.b32.xlu0 %v10689_v18, %s11282_s30  ;;  %v10006_v11 = vpop.f32.mrb[123].mxu0  ;;  %v14759_v18 = vld [vmem:[#allocation47_spill] sm:$0xff] }
 0x5a7   :  { %v14761_v51 = vld [vmem:[#allocation55_spill] sm:$0xff]  ;;  %v14762_v11 = vld [vmem:[#allocation58_spill] sm:$0xff] }
 0x5aa   :  { %4391 = vrot.lane.b32.xlu0 %v14737_v8, %s11268_s27  ;;  %v14763_v8 = vld [vmem:[#allocation49_spill] sm:$0xff] }
 0x5ae   :  { %4496 = vrot.lane.b32.xlu0 %v14738_v59, %s11274_s28 }
 0x5b2   :  { %4493 = vrot.lane.b32.xlu0 %v14739_v26, %s11268_s27  ;;  %v14764_v26 = vld [vmem:[#allocation77_spill] sm:$0xff] }
 0x5b6   :  { %4598 = vrot.lane.b32.xlu0 %v14740_v44, %s11274_s28 }
 0x5ba   :  { %4595 = vrot.lane.b32.xlu0 %v14741_v49, %s11268_s27  ;;  %v10646_v49 = vpop.permute.xlu1 %10645 }
 0x5be   :  { %4700 = vrot.lane.b32.xlu0 %v14742_v2, %s11274_s28 }
 0x5c2   :  { %4697 = vrot.lane.b32.xlu0 %v14743_v45, %s11268_s27  ;;  %v10651_v45 = vpop.permute.xlu0 %10650 }
 0x5c6   :  { %4802 = vrot.lane.b32.xlu0 %v14744_v60, %s11274_s28 }
 0x5ca   :  { %4799 = vrot.lane.b32.xlu0 %v14745_v32, %s11268_s27  ;;  %v14765_v32 = vld [vmem:[#allocation61_spill] sm:$0xff] }
 0x5ce   :  { %4904 = vrot.lane.b32.xlu0 %v14746_v0, %s11274_s28 }
 0x5cf   :  { %v3959_v13 = vpop.f32.mrb[132].mxu1 }
 0x5d0   :  { %v10023_v9 = vpop.f32.mrb[133].mxu1 }
 0x5d1   :  { %v3962_v20 = vpop.f32.mrb[134].mxu1  ;;  %v12742_v9 = vpop.permute.xlu1 %10655 }
 0x5d2   :  { %v10024_v53 = vpop.f32.mrb[135].mxu1  ;;  %v12744_v20 = vpop.permute.xlu0 %10660 }
 0x5d3   :  { %v14767_v53 = vld [vmem:[#allocation53_spill] sm:$0xff] }
 0x5d4   :  { %v3910_v55 = vpop.f32.mrb[124].mxu0 }
 0x5d5   :  { %v10694_v61 = vpack.i.bf16 %v3959_v13, %v3910_v55  ;;  %v10017_v37 = vpop.f32.mrb[125].mxu0  ;;  %v14766_v13 = vld [vmem:[#allocation73_spill] sm:$0xff]  ;;  %v14768_v55 = vld [vmem:[#allocation80_spill] sm:$0xff] }
 0x5d6   :  { %v3913_v1 = vpop.f32.mrb[126].mxu0 }
 0x5d7   :  { %10695 = vrot.lane.b32.xlu1 %v10694_v61, %s11282_s30  ;;  %v10018_v27 = vpop.f32.mrb[127].mxu0  ;;  %v4057_v56 = vpop.f32.mrb[136].mxu1  ;;  %v14769_v1 = vld [vmem:[#allocation66_spill] sm:$0xff] }
 0x5d8   :  { %v10035_v29 = vpop.f32.mrb[137].mxu1  ;;  %v14770_v27 = vld [vmem:[#allocation70_spill] sm:$0xff] }
 0x5d9   :  { %v4060_v54 = vpop.f32.mrb[138].mxu1  ;;  %v10648_v29 = vunpack.i.h.bf16 %v10646_v49 }
 0x5da   :  { %v10036_v35 = vpop.f32.mrb[139].mxu1  ;;  %v10647_v54 = vunpack.i.l.bf16 %v10646_v49  ;;  %v10652_v49 = vunpack.i.l.bf16 %v10651_v45 }
 0x5db   :  { %4445 = vrot.lane.b32.xlu1 %v14747_v31, %s11274_s28 }
 0x5dc   :  { %v4008_v58 = vpop.f32.mrb[128].mxu0 }
 0x5dd   :  { %v10699_v57 = vpack.i.bf16 %v4057_v56, %v4008_v58  ;;  %v10029_v6 = vpop.f32.mrb[129].mxu0 }
 0x5de   :  { %v4011_v23 = vpop.f32.mrb[130].mxu0  ;;  %v14771_v6 = vld [vmem:[#allocation59_spill] sm:$0xff] }
 0x5df   :  { %4442 = vrot.lane.b32.xlu1 %v14748_v43, %s11268_s27  ;;  %10700 = vrot.lane.b32.xlu0 %v10699_v57, %s11282_s30  ;;  %v10030_v10 = vpop.f32.mrb[131].mxu0  ;;  %v14772_v23 = vld [vmem:[#allocation84_spill] sm:$0xff] }
 0x5e0   :  { %v12704_v4 = vpop.f32.mrb[140].mxu1  ;;  %v4160_v10 = vsel %vm605_vm2, %v12623_v52, %v10648_v29 }
 0x5e1   :  { %v10053_v14 = vpop.f32.mrb[141].mxu1 }
 0x5e2   :  { %v4337_v15 = vpop.f32.mrb[142].mxu1  ;;  %v4159_v14 = vsel %vm605_vm2, %v12625_v41, %v10647_v54  ;;  %v10653_v41 = vunpack.i.h.bf16 %v10651_v45  ;;  %v4161_v45 = vsel %vm605_vm2, %v12629_v40, %v10652_v49 }
 0x5e3   :  { %v10054_v33 = vpop.f32.mrb[143].mxu1  ;;  %4547 = vrot.lane.b32.xlu1 %v14749_v7, %s11274_s28  ;;  %4901 = vrot.lane.b32.xlu0 %v14750_v34, %s11268_s27 }
 0x5e4   :  { %v4162_v54 = vsel %vm605_vm2, %v12627_v16, %v10653_v41  ;;  %v14784_v41 = vld [vmem:[#allocation79_spill] sm:$0xff] }
 0x5e7   :  { %4544 = vrot.lane.b32.xlu1 %v14751_v30, %s11268_s27  ;;  %5006 = vrot.lane.b32.xlu0 %v14752_v38, %s11274_s28 }
 0x5eb   :  { %4649 = vrot.lane.b32.xlu1 %v14753_v46, %s11274_s28  ;;  %5003 = vrot.lane.b32.xlu0 %v14754_v25, %s11268_s27 }
 0x5ef   :  { %4646 = vrot.lane.b32.xlu1 %v14755_v3, %s11268_s27  ;;  %5108 = vrot.lane.b32.xlu0 %v14756_v39, %s11274_s28 }
 0x5f0   :  { %v10666_v61 = vpop.permute.xlu1 %10665 }
 0x5f1   :  { %v10668_v35 = vunpack.i.h.bf16 %v10666_v61  ;;  %v10667_v58 = vunpack.i.l.bf16 %v10666_v61  ;;  %v14775_v61 = vld [vmem:[#allocation63_spill] sm:$0xff] }
 0x5f3   :  { %4751 = vrot.lane.b32.xlu1 %v14757_v63, %s11274_s28  ;;  %5105 = vrot.lane.b32.xlu0 %v14758_v28, %s11268_s27  ;;  %v4169_v34 = vsel %vm4167_vm4, %v4160_v10, %v10668_v35  ;;  %v4168_v30 = vsel %vm4167_vm4, %v4159_v14, %v10667_v58  ;;  %v14773_v28 = vld [vmem:[#allocation69_spill] sm:$0xff]  ;;  %v14777_v14 = vld [vmem:[#allocation74_spill] sm:$0xff] }
 0x5f7   :  { %4748 = vrot.lane.b32.xlu1 %v14759_v18, %s11268_s27  ;;  %5210 = vrot.lane.b32.xlu0 %v14760_v17, %s11274_s28  ;;  %v14774_v18 = vld [vmem:[#allocation65_spill] sm:$0xff] }
 0x5f8   :  { %v10671_v37 = vpop.permute.xlu0 %10670 }
 0x5fb   :  { %4853 = vrot.lane.b32.xlu1 %v14761_v51, %s11274_s28  ;;  %5207 = vrot.lane.b32.xlu0 %v14762_v11, %s11268_s27 }
 0x5ff   :  { %4850 = vrot.lane.b32.xlu1 %v14763_v8, %s11268_s27  ;;  %5312 = vrot.lane.b32.xlu0 %v14764_v26, %s11274_s28 }
 0x600   :  { %v12754_v56 = vpop.permute.xlu1 %10675 }
 0x603   :  { %4955 = vrot.lane.b32.xlu1 %v14765_v32, %s11274_s28  ;;  %5309 = vrot.lane.b32.xlu0 %v14766_v13, %s11268_s27  ;;  %v10673_v13 = vunpack.i.h.bf16 %v10671_v37 }
 0x605   :  { %v4171_v58 = vsel %vm4167_vm4, %v4162_v54, %v10673_v13  ;;  %v14786_v13 = vld [vmem:[#allocation83_spill] sm:$0xff]  ;;  %v14790_v54 = vld [vmem:[#allocation89_spill] sm:$0xff] }
 0x607   :  { %4952 = vrot.lane.b32.xlu1 %v14767_v53, %s11268_s27  ;;  %5414 = vrot.lane.b32.xlu0 %v14768_v55, %s11274_s28  ;;  %v10672_v53 = vunpack.i.l.bf16 %v10671_v37 }
 0x608   :  { %v12756_v57 = vpop.permute.xlu0 %10680 }
 0x60b   :  { %5057 = vrot.lane.b32.xlu1 %v14769_v1, %s11274_s28  ;;  %5411 = vrot.lane.b32.xlu0 %v14770_v27, %s11268_s27  ;;  %v14776_v27 = vld [vmem:[#allocation86_spill] sm:$0xff] }
 0x60c   :  { %v4395_v52 = vpop.permute.xlu0 %4394 }
 0x60d   :  { %v4400_v40 = vsel %vm605_vm2, %v4395_v52, 0  ;;  %v14782_v52 = vld [vmem:[#allocation72_spill] sm:$0xff] }
 0x60f   :  { %5054 = vrot.lane.b32.xlu1 %v14771_v6, %s11268_s27  ;;  %5516 = vrot.lane.b32.xlu0 %v14772_v23, %s11274_s28  ;;  %v4170_v6 = vsel %vm4167_vm4, %v4161_v45, %v10672_v53  ;;  %v10657_v45 = vunpack.i.l.bf16 %v12742_v9 }
 0x610   :  { %v10686_v43 = vpop.permute.xlu1 %10685 }
 0x611   :  { %v10688_v15 = vunpack.i.h.bf16 %v10686_v43  ;;  %v10687_v33 = vunpack.i.l.bf16 %v10686_v43 }
 0x613   :  { %v4178_v25 = vsel %vm4176_vm5, %v4169_v34, %v10688_v15  ;;  %v4177_v3 = vsel %vm4176_vm5, %v4168_v30, %v10687_v33  ;;  %5159 = vrot.lane.b32.xlu1 %v14773_v28, %s11274_s28  ;;  %5513 = vrot.lane.b32.xlu0 %v14774_v18, %s11268_s27  ;;  %v14778_v15 = vld [vmem:[#allocation82_spill] sm:$0xff]  ;;  %v14779_v34 = vld [vmem:[#allocation57_spill] sm:$0xff] }
 0x614   :  { %v4341_v11 = vpop.permute.xlu1 %4340  ;;  %v4189_v8 = vpack.c.bf16 %v4178_v25, %v4177_v3  ;;  %v14780_v30 = vld [vmem:[#allocation90_spill] sm:$0xff]  ;;  %v14781_v3 = vld [vmem:[#allocation76_spill] sm:$0xff] }
 0x615   :  { %10058 = vmatmul.mubr.msk.bf16.vlgmr.msra.gmra.mrb[144].mxu1 %vm605_vm2, %v4341_v11  ;;  %v14783_v11 = vld [vmem:[#allocation92_spill] sm:$0xff] }
 0x616   :  { %10041 = vmatprep.mubr.msk.bf16.mxu0 %vm199_vm0, %v4189_v8  ;;  %10069 = vmatprep.mubr.msk.bf16.mxu1 %vm11276_vm1, %v14707_v22 }
 0x617   :  { %5156 = vrot.lane.b32.xlu1 %v14775_v61, %s11268_s27  ;;  %5618 = vrot.lane.b32.xlu0 %v14776_v27, %s11274_s28  ;;  %v14787_v61 = vld [vmem:[#allocation78_spill] sm:$0xff] }
 0x618   :  { %v10691_v29 = vpop.permute.xlu0 %10690 }
 0x619   :  { %v10693_v35 = vunpack.i.h.bf16 %v10691_v29  ;;  %v10692_v37 = vunpack.i.l.bf16 %v10691_v29  ;;  %v14788_v29 = vld [vmem:[#allocation85_spill] sm:$0xff] }
 0x61b   :  { %v4180_v43 = vsel %vm4176_vm5, %v4171_v58, %v10693_v35  ;;  %v4179_v10 = vsel %vm4176_vm5, %v4170_v6, %v10692_v37  ;;  %5261 = vrot.lane.b32.xlu1 %v14777_v14, %s11274_s28  ;;  %5615 = vrot.lane.b32.xlu0 %v14778_v15, %s11268_s27  ;;  %v10677_v35 = vunpack.i.l.bf16 %v12754_v56  ;;  %v4163_v58 = vsel %vm605_vm2, %v12633_v47, %v10657_v45 }
 0x61c   :  { %v4190_v16 = vpack.c.bf16 %v4180_v43, %v4179_v10  ;;  %v12794_v33 = vpop.permute.xlu0 %4391  ;;  %v14791_v10 = vld [vmem:[#allocation91_spill] sm:$0xff] }
 0x61e   :  { %10042 = vmatmul.mubr.msk.bf16.vlgmr.msra.gmra.mrb[132].mxu0 %vm199_vm0, %v4190_v16  ;;  %v10663_v16 = vunpack.i.h.bf16 %v12744_v20 }
 0x61f   :  { %10062 = vmatpush3.bf16.xpose.msra.mxu0 %v4400_v40  ;;  %5258 = vrot.lane.b32.xlu1 %v14779_v34, %s11268_s27  ;;  %v10662_v40 = vunpack.i.l.bf16 %v12744_v20 }
 0x620   :  { %5720 = vrot.lane.b32.xlu0 %v14780_v30, %s11274_s28  ;;  %v12802_v25 = vpop.permute.xlu0 %4496  ;;  %10073 = vmatprep.subr.bf16.mxu0 %v14707_v22 }
 0x621   :  { %v4165_v20 = vsel %vm605_vm2, %v12643_v42, %v10662_v40 }
 0x623   :  { %5363 = vrot.lane.b32.xlu1 %v14781_v3, %s11274_s28 }
 0x624   :  { %5717 = vrot.lane.b32.xlu0 %v11966_v19, %s11268_s27  ;;  %v12809_v18 = vpop.permute.xlu0 %4493  ;;  %v14785_v19 = vld [vmem:[#allocation68_spill] sm:$0xff] }
 0x627   :  { %5360 = vrot.lane.b32.xlu1 %v14782_v52, %s11268_s27  ;;  %v10683_v52 = vunpack.i.h.bf16 %v12756_v57 }
 0x628   :  { %5822 = vrot.lane.b32.xlu0 %v14783_v11, %s11274_s28  ;;  %v12815_v8 = vpop.permute.xlu0 %4598 }
 0x62b   :  { %5465 = vrot.lane.b32.xlu1 %v14784_v41, %s11274_s28 }
 0x62c   :  { %5819 = vrot.lane.b32.xlu0 %v14721_v36, %s11268_s27  ;;  %v12821_v49 = vpop.permute.xlu0 %4595 }
 0x62f   :  { %5462 = vrot.lane.b32.xlu1 %v14785_v19, %s11268_s27  ;;  %v10682_v19 = vunpack.i.l.bf16 %v12756_v57 }
 0x630   :  { %6385 = vrot.lane.b32.xlu0 %v14724_v48, %s11268_s27  ;;  %v12831_v53 = vpop.permute.xlu0 %4700  ;;  %v14789_v48 = vld [vmem:[#allocation81_spill] sm:$0xff] }
 0x633   :  { %5567 = vrot.lane.b32.xlu1 %v14786_v13, %s11274_s28 }
 0x634   :  { %6481 = vrot.lane.b32.xlu0 %v14747_v31, %s11268_s27  ;;  %v12837_v36 = vpop.permute.xlu0 %4697 }
 0x637   :  { %5564 = vrot.lane.b32.xlu1 %v14787_v61, %s11268_s27 }
 0x638   :  { %6577 = vrot.lane.b32.xlu0 %v14749_v7, %s11268_s27  ;;  %v12847_v31 = vpop.permute.xlu0 %4802  ;;  %v10658_v7 = vunpack.i.h.bf16 %v12742_v9 }
 0x63b   :  { %5669 = vrot.lane.b32.xlu1 %v14788_v29, %s11274_s28 }
 0x63c   :  { %6673 = vrot.lane.b32.xlu0 %v14753_v46, %s11268_s27  ;;  %v10678_v46 = vunpack.i.h.bf16 %v12754_v56  ;;  %v12857_v37 = vpop.permute.xlu0 %4799  ;;  %v4172_v56 = vsel %vm4167_vm4, %v4163_v58, %v10677_v35 }
 0x63f   :  { %5666 = vrot.lane.b32.xlu1 %v14789_v48, %s11268_s27  ;;  %v4166_v48 = vsel %vm605_vm2, %v12636_v62, %v10663_v16 }
 0x640   :  { %6769 = vrot.lane.b32.xlu0 %v14757_v63, %s11268_s27  ;;  %v4175_v57 = vsel %vm4167_vm4, %v4166_v48, %v10683_v52 }
 0x643   :  { %5771 = vrot.lane.b32.xlu1 %v14790_v54, %s11274_s28 }
 0x644   :  { %6865 = vrot.lane.b32.xlu0 %v14761_v51, %s11268_s27  ;;  %v4164_v51 = vsel %vm605_vm2, %v12631_v5, %v10658_v7  ;;  %v12875_v5 = vpop.permute.xlu0 %4904 }
 0x645   :  { %v4173_v43 = vsel %vm4167_vm4, %v4164_v51, %v10678_v46  ;;  %v4174_v46 = vsel %vm4167_vm4, %v4165_v20, %v10682_v19 }
 0x647   :  { %5768 = vrot.lane.b32.xlu1 %v11963_v12, %s11268_s27 }
 0x648   :  { %6961 = vrot.lane.b32.xlu0 %v14765_v32, %s11268_s27 }
 0x649   :  { %v10696_v63 = vpop.permute.xlu1 %10695 }
 0x64a   :  { %v10698_v9 = vunpack.i.h.bf16 %v10696_v63  ;;  %v10697_v6 = vunpack.i.l.bf16 %v10696_v63 }
 0x64b   :  { %5873 = vrot.lane.b32.xlu1 %v14791_v10, %s11274_s28 }
 0x64c   :  { %v4182_v12 = vsel %vm4176_vm5, %v4173_v43, %v10698_v9  ;;  %v4181_v32 = vsel %vm4176_vm5, %v4172_v56, %v10697_v6  ;;  %7057 = vrot.lane.b32.xlu0 %v14769_v1, %s11268_s27  ;;  %v4502_v43 = vsel %vm605_vm2, %v12802_v25, 0 }
 0x64d   :  { %v4446_v15 = vpop.permute.xlu1 %4445  ;;  %v4191_v47 = vpack.c.bf16 %v4182_v12, %v4181_v32  ;;  %v4604_v12 = vsel %vm605_vm2, %v12815_v8, 0  ;;  %v4706_v8 = vsel %vm605_vm2, %v12831_v53, 0 }
 0x64e   :  { %v4451_v34 = vsel %vm605_vm2, %v4446_v15, 0 }
 0x64f   :  { %5870 = vrot.lane.b32.xlu1 %v14720_v24, %s11268_s27  ;;  %10045 = vmatprep.mubr.msk.bf16.mxu0 %vm199_vm0, %v4191_v47  ;;  %v4808_v47 = vsel %vm605_vm2, %v12847_v31, 0 }
 0x650   :  { %10068 = vmatpush3.bf16.xpose.msra.mxu1 %v4451_v34 }
 0x651   :  { %v4443_v1 = vpop.permute.xlu1 %4442  ;;  %v10701_v61 = vpop.permute.xlu0 %10700  ;;  %10079 = vmatprep.subr.bf16.mxu1 %v14707_v22 }
 0x652   :  { %v10703_v7 = vunpack.i.h.bf16 %v10701_v61  ;;  %v10702_v45 = vunpack.i.l.bf16 %v10701_v61 }
 0x653   :  { %6337 = vrot.lane.b32.xlu1 %v14723_v50, %s11268_s27 }
 0x654   :  { %v4184_v24 = vsel %vm4176_vm5, %v4175_v57, %v10703_v7  ;;  %v4183_v35 = vsel %vm4176_vm5, %v4174_v46, %v10702_v45 }
 0x655   :  { %v4548_v63 = vpop.permute.xlu1 %4547  ;;  %v12896_v51 = vpop.permute.xlu0 %4901  ;;  %v4192_v62 = vpack.c.bf16 %v4184_v24, %v4183_v35 }
 0x656   :  { %v4553_v58 = vsel %vm605_vm2, %v4548_v63, 0 }
 0x657   :  { %10070 = vmatmul.mubr.msk.bf16.vlgmr.msra.gmra.mrb[148].mxu1 %vm605_vm2, %v4443_v1  ;;  %6433 = vrot.lane.b32.xlu1 %v14735_v21, %s11268_s27 }
 0x658   :  { %10046 = vmatmul.mubr.msk.bf16.gmra.mrb[136].mxu0 %vm199_vm0, %v4192_v62  ;;  %10080 = vmatpush3.bf16.xpose.msra.mxu1 %v4553_v58 }
 0x659   :  { %v4545_v42 = vpop.permute.xlu1 %4544  ;;  %v12903_v50 = vpop.permute.xlu0 %5006  ;;  %10081 = vmatprep.mubr.msk.bf16.mxu1 %vm11276_vm1, %v14707_v22  ;;  %10063 = vmatprep.mubr.msk.bf16.mxu0 %vm11276_vm1, %v14707_v22 }
 0x65a   :  { %10091 = vmatprep.subr.bf16.mxu1 %v14707_v22 }
 0x65b   :  { %6529 = vrot.lane.b32.xlu1 %v14738_v59, %s11268_s27 }
 0x65d   :  { %v4650_v9 = vpop.permute.xlu1 %4649  ;;  %v12913_v6 = vpop.permute.xlu0 %5003 }
 0x65e   :  { %v4655_v21 = vsel %vm605_vm2, %v4650_v9, 0 }
 0x65f   :  { %10082 = vmatmul.mubr.msk.bf16.vlgmr.msra.gmra.mrb[152].mxu1 %vm605_vm2, %v4545_v42  ;;  %6625 = vrot.lane.b32.xlu1 %v14740_v44, %s11268_s27 }
 0x660   :  { %10064 = vmatmul.mubr.msk.bf16.vlgmr.msra.gmra.mrb[140].mxu0 %vm605_vm2, %v12794_v33  ;;  %10092 = vmatpush3.bf16.xpose.msra.mxu1 %v4655_v21  ;;  %v12933_v33 = vmul.f32 0.35355338, %v12704_v4 }
 0x661   :  { %10074 = vmatpush3.bf16.xpose.msra.mxu0 %v4502_v43  ;;  %v4647_v56 = vpop.permute.xlu1 %4646  ;;  %10093 = vmatprep.mubr.msk.bf16.mxu1 %vm11276_vm1, %v14707_v22  ;;  %v12930_v59 = vpop.permute.xlu0 %5108 }
 0x662   :  { %10075 = vmatprep.mubr.msk.bf16.mxu0 %vm11276_vm1, %v14707_v22  ;;  %10085 = vmatprep.subr.bf16.mxu0 %v14707_v22  ;;  %v5953_v32 = vsel %vm605_vm2, %v12933_v33, -inf  ;;  %v5114_v45 = vsel %vm605_vm2, %v12930_v59, 0 }
 0x663   :  { %6721 = vrot.lane.b32.xlu1 %v14742_v2, %s11268_s27  ;;  %10103 = vmatprep.subr.bf16.mxu1 %v14707_v22 }
 0x665   :  { %v4752_v44 = vpop.permute.xlu1 %4751  ;;  %v12945_v4 = vpop.permute.xlu0 %5105 }
 0x666   :  { %v4757_v25 = vsel %vm605_vm2, %v4752_v44, 0 }
 0x667   :  { %10094 = vmatmul.mubr.msk.bf16.vlgmr.msra.gmra.mrb[156].mxu1 %vm605_vm2, %v4647_v56  ;;  %6817 = vrot.lane.b32.xlu1 %v14744_v60, %s11268_s27 }
 0x668   :  { %10076 = vmatmul.mubr.msk.bf16.vlgmr.msra.gmra.mrb[144].mxu0 %vm605_vm2, %v12809_v18  ;;  %10104 = vmatpush3.bf16.xpose.msra.mxu1 %v4757_v25 }
 0x669   :  { %10086 = vmatpush3.bf16.xpose.msra.mxu0 %v4604_v12  ;;  %v4749_v2 = vpop.permute.xlu1 %4748  ;;  %10105 = vmatprep.mubr.msk.bf16.mxu1 %vm11276_vm1, %v14707_v22  ;;  %v12961_v15 = vpop.permute.xlu0 %5210 }
 0x66a   :  { %10087 = vmatprep.mubr.msk.bf16.mxu0 %vm11276_vm1, %v14707_v22  ;;  %10097 = vmatprep.subr.bf16.mxu0 %v14707_v22  ;;  %v5216_v63 = vsel %vm605_vm2, %v12961_v15, 0 }
 0x66b   :  { %5954 = vmax.xlane.f32.xlu0 %v5953_v32  ;;  %6913 = vrot.lane.b32.xlu1 %v14746_v0, %s11268_s27 }
 0x66c   :  { %10115 = vmatprep.subr.bf16.mxu1 %v14707_v22 }
 0x66d   :  { %v4854_v60 = vpop.permute.xlu1 %4853  ;;  %v12973_v53 = vpop.permute.xlu0 %5207 }
 0x66e   :  { %v4859_v18 = vsel %vm605_vm2, %v4854_v60, 0 }
 0x66f   :  { %10106 = vmatmul.mubr.msk.bf16.vlgmr.msra.gmra.mrb[160].mxu1 %vm605_vm2, %v4749_v2  ;;  %7009 = vrot.lane.b32.xlu1 %v14752_v38, %s11268_s27 }
 0x670   :  { %10088 = vmatmul.mubr.msk.bf16.vlgmr.msra.gmra.mrb[148].mxu0 %vm605_vm2, %v12821_v49  ;;  %10116 = vmatpush3.bf16.xpose.msra.mxu1 %v4859_v18 }
 0x671   :  { %10098 = vmatpush3.bf16.xpose.msra.mxu0 %v4706_v8  ;;  %v4851_v0 = vpop.permute.xlu1 %4850  ;;  %10117 = vmatprep.mubr.msk.bf16.mxu1 %vm11276_vm1, %v14707_v22 }
 0x672   :  { %10099 = vmatprep.mubr.msk.bf16.mxu0 %vm11276_vm1, %v14707_v22  ;;  %10109 = vmatprep.subr.bf16.mxu0 %v14707_v22 }
 0x673   :  { %7105 = vrot.lane.b32.xlu1 %v14756_v39, %s11268_s27  ;;  %10127 = vmatprep.subr.bf16.mxu1 %v14707_v22  ;;  %v5313_v39 = vpop.permute.xlu0 %5312 }
 0x675   :  { %v4956_v38 = vpop.permute.xlu1 %4955 }
 0x676   :  { %v4961_v49 = vsel %vm605_vm2, %v4956_v38, 0 }
 0x677   :  { %10118 = vmatmul.mubr.msk.bf16.vlgmr.msra.gmra.mrb[164].mxu1 %vm605_vm2, %v4851_v0  ;;  %v5310_v52 = vpop.permute.xlu0 %5309 }
 0x678   :  { %10100 = vmatmul.mubr.msk.bf16.vlgmr.msra.gmra.mrb[152].mxu0 %vm605_vm2, %v12837_v36  ;;  %10128 = vmatpush3.bf16.xpose.msra.mxu1 %v4961_v49  ;;  %v4910_v36 = vsel %vm605_vm2, %v12875_v5, 0 }
 0x679   :  { %10110 = vmatpush3.bf16.xpose.msra.mxu0 %v4808_v47  ;;  %v4953_v16 = vpop.permute.xlu1 %4952  ;;  %10129 = vmatprep.mubr.msk.bf16.mxu1 %vm11276_vm1, %v14707_v22 }
 0x67a   :  { %10111 = vmatprep.mubr.msk.bf16.mxu0 %vm11276_vm1, %v14707_v22  ;;  %10121 = vmatprep.subr.bf16.mxu0 %v14707_v22 }
 0x67b   :  { %10139 = vmatprep.subr.bf16.mxu1 %v14707_v22  ;;  %v5415_v1 = vpop.permute.xlu0 %5414 }
 0x67c   :  { %v5420_v59 = vsel %vm605_vm2, %v5415_v1, 0 }
 0x67d   :  { %v5058_v40 = vpop.permute.xlu1 %5057 }
 0x67e   :  { %v5063_v31 = vsel %vm605_vm2, %v5058_v40, 0 }
 0x67f   :  { %10130 = vmatmul.mubr.msk.bf16.vlgmr.msra.gmra.mrb[168].mxu1 %vm605_vm2, %v4953_v16  ;;  %v5412_v20 = vpop.permute.xlu0 %5411 }
 0x680   :  { %10112 = vmatmul.mubr.msk.bf16.vlgmr.msra.gmra.mrb[156].mxu0 %vm605_vm2, %v12857_v37  ;;  %10140 = vmatpush3.bf16.xpose.msra.mxu1 %v5063_v31  ;;  %v5012_v37 = vsel %vm605_vm2, %v12903_v50, 0  ;;  %v5318_v50 = vsel %vm605_vm2, %v5313_v39, 0 }
 0x681   :  { %10122 = vmatpush3.bf16.xpose.msra.mxu0 %v4910_v36  ;;  %v5055_v34 = vpop.permute.xlu1 %5054  ;;  %10141 = vmatprep.mubr.msk.bf16.mxu1 %vm11276_vm1, %v14707_v22 }
 0x682   :  { %10123 = vmatprep.mubr.msk.bf16.mxu0 %vm11276_vm1, %v14707_v22  ;;  %10133 = vmatprep.subr.bf16.mxu0 %v14707_v22 }
 0x683   :  { %10151 = vmatprep.subr.bf16.mxu1 %v14707_v22  ;;  %v5517_v46 = vpop.permute.xlu0 %5516 }
 0x685   :  { %v5160_v19 = vpop.permute.xlu1 %5159 }
 0x686   :  { %v5165_v5 = vsel %vm605_vm2, %v5160_v19, 0 }
 0x687   :  { %10142 = vmatmul.mubr.msk.bf16.vlgmr.msra.gmra.mrb[172].mxu1 %vm605_vm2, %v5055_v34  ;;  %v5514_v62 = vpop.permute.xlu0 %5513 }
 0x688   :  { %10124 = vmatmul.mubr.msk.bf16.vlgmr.msra.gmra.mrb[160].mxu0 %vm605_vm2, %v12896_v51  ;;  %10152 = vmatpush3.bf16.xpose.msra.mxu1 %v5165_v5 }
 0x689   :  { %10134 = vmatpush3.bf16.xpose.msra.mxu0 %v5012_v37  ;;  %v5157_v61 = vpop.permute.xlu1 %5156  ;;  %10153 = vmatprep.mubr.msk.bf16.mxu1 %vm11276_vm1, %v14707_v22 }
 0x68a   :  { %10135 = vmatprep.mubr.msk.bf16.mxu0 %vm11276_vm1, %v14707_v22  ;;  %10145 = vmatprep.subr.bf16.mxu0 %v14707_v22 }
 0x68b   :  { %10163 = vmatprep.subr.bf16.mxu1 %v14707_v22  ;;  %v5619_v9 = vpop.permute.xlu0 %5618 }
 0x68c   :  { %v5624_v15 = vsel %vm605_vm2, %v5619_v9, 0 }
 0x68d   :  { %v5262_v48 = vpop.permute.xlu1 %5261 }
 0x68e   :  { %v5267_v7 = vsel %vm605_vm2, %v5262_v48, 0 }
 0x68f   :  { %10154 = vmatmul.mubr.msk.bf16.vlgmr.msra.gmra.mrb[176].mxu1 %vm605_vm2, %v5157_v61  ;;  %v5616_v43 = vpop.permute.xlu0 %5615 }
 0x690   :  { %10136 = vmatmul.mubr.msk.bf16.vlgmr.msra.gmra.mrb[164].mxu0 %vm605_vm2, %v12913_v6  ;;  %10164 = vmatpush3.bf16.xpose.msra.mxu1 %v5267_v7 }
 0x691   :  { %10146 = vmatpush3.bf16.xpose.msra.mxu0 %v5114_v45  ;;  %v5259_v57 = vpop.permute.xlu1 %5258  ;;  %10165 = vmatprep.mubr.msk.bf16.mxu1 %vm11276_vm1, %v14707_v22 }
 0x692   :  { %10147 = vmatprep.mubr.msk.bf16.mxu0 %vm11276_vm1, %v14707_v22  ;;  %10157 = vmatprep.subr.bf16.mxu0 %v14707_v22 }
 0x693   :  { %10175 = vmatprep.subr.bf16.mxu1 %v14707_v22  ;;  %v5721_v25 = vpop.permute.xlu0 %5720 }
 0x694   :  { %v5726_v16 = vsel %vm605_vm2, %v5721_v25, 0 }
 0x695   :  { %v5364_v24 = vpop.permute.xlu1 %5363 }
 0x696   :  { %v5369_v35 = vsel %vm605_vm2, %v5364_v24, 0 }
 0x697   :  { %10166 = vmatmul.mubr.msk.bf16.vlgmr.msra.gmra.mrb[180].mxu1 %vm605_vm2, %v5259_v57  ;;  %v5718_v60 = vpop.permute.xlu0 %5717 }
 0x698   :  { %10148 = vmatmul.mubr.msk.bf16.vlgmr.msra.gmra.mrb[168].mxu0 %vm605_vm2, %v12945_v4  ;;  %10176 = vmatpush3.bf16.xpose.msra.mxu1 %v5369_v35  ;;  %v5522_v4 = vsel %vm605_vm2, %v5517_v46, 0 }
 0x699   :  { %10158 = vmatpush3.bf16.xpose.msra.mxu0 %v5216_v63  ;;  %v5361_v51 = vpop.permute.xlu1 %5360  ;;  %10177 = vmatprep.mubr.msk.bf16.mxu1 %vm11276_vm1, %v14707_v22 }
 0x69a   :  { %10159 = vmatprep.mubr.msk.bf16.mxu0 %vm11276_vm1, %v14707_v22  ;;  %10169 = vmatprep.subr.bf16.mxu0 %v14707_v22 }
 0x69b   :  { %10187 = vmatprep.subr.bf16.mxu1 %v14707_v22  ;;  %v5823_v0 = vpop.permute.xlu0 %5822 }
 0x69c   :  { %v5828_v36 = vsel %vm605_vm2, %v5823_v0, 0 }
 0x69d   :  { %v5466_v58 = vpop.permute.xlu1 %5465 }
 0x69e   :  { %v5471_v42 = vsel %vm605_vm2, %v5466_v58, 0 }
 0x69f   :  { %10178 = vmatmul.mubr.msk.bf16.vlgmr.msra.gmra.mrb[184].mxu1 %vm605_vm2, %v5361_v51  ;;  %v5820_v49 = vpop.permute.xlu0 %5819 }
 0x6a0   :  { %10160 = vmatmul.mubr.msk.bf16.vlgmr.msra.gmra.mrb[172].mxu0 %vm605_vm2, %v12973_v53  ;;  %10188 = vmatpush3.bf16.xpose.msra.mxu1 %v5471_v42 }
 0x6a1   :  { %10170 = vmatpush3.bf16.xpose.msra.mxu0 %v5318_v50  ;;  %v5463_v21 = vpop.permute.xlu1 %5462  ;;  %10189 = vmatprep.mubr.msk.bf16.mxu1 %vm11276_vm1, %v14707_v22 }
 0x6a2   :  { %10171 = vmatprep.mubr.msk.bf16.mxu0 %vm11276_vm1, %v14707_v22  ;;  %10181 = vmatprep.subr.bf16.mxu0 %v14707_v22 }
 0x6a3   :  { %10199 = vmatprep.subr.bf16.mxu1 %v14707_v22  ;;  %v6386_v39 = vpop.permute.xlu0 %6385 }
 0x6a4   :  { %v6391_v31 = vsel %vm2500_vm3, %v6386_v39, 0 }
 0x6a5   :  { %v5568_v6 = vpop.permute.xlu1 %5567 }
 0x6a6   :  { %v5573_v56 = vsel %vm605_vm2, %v5568_v6, 0 }
 0x6a7   :  { %10190 = vmatmul.mubr.msk.bf16.vlgmr.msra.gmra.mrb[188].mxu1 %vm605_vm2, %v5463_v21 }
 0x6a8   :  { %10172 = vmatmul.mubr.msk.bf16.vlgmr.msra.gmra.mrb[176].mxu0 %vm605_vm2, %v5310_v52  ;;  %10200 = vmatpush3.bf16.xpose.msra.mxu1 %v5573_v56  ;;  %v13096_v52 = vpop.permute.xlu0 %6481 }
 0x6a9   :  { %10182 = vmatpush3.bf16.xpose.msra.mxu0 %v5420_v59  ;;  %v5565_v44 = vpop.permute.xlu1 %5564  ;;  %10201 = vmatprep.mubr.msk.bf16.mxu1 %vm11276_vm1, %v14707_v22 }
 0x6aa   :  { %10183 = vmatprep.mubr.msk.bf16.mxu0 %vm11276_vm1, %v14707_v22  ;;  %10193 = vmatprep.subr.bf16.mxu0 %v14707_v22 }
 0x6ab   :  { %10211 = vmatprep.subr.bf16.mxu1 %v14707_v22 }
 0x6ac   :  { %v13103_v5 = vpop.permute.xlu0 %6577 }
 0x6ad   :  { %v5670_v12 = vpop.permute.xlu1 %5669 }
 0x6ae   :  { %v5675_v2 = vsel %vm605_vm2, %v5670_v12, 0 }
 0x6af   :  { %10202 = vmatmul.mubr.msk.bf16.vlgmr.msra.gmra.mrb[192].mxu1 %vm605_vm2, %v5565_v44 }
 0x6b0   :  { %10184 = vmatmul.mubr.msk.bf16.vlgmr.msra.gmra.mrb[180].mxu0 %vm605_vm2, %v5412_v20  ;;  %10212 = vmatpush3.bf16.xpose.msra.mxu1 %v5675_v2  ;;  %v13105_v37 = vpop.permute.xlu0 %6673 }
 0x6b1   :  { %10194 = vmatpush3.bf16.xpose.msra.mxu0 %v5522_v4  ;;  %v5667_v32 = vpop.permute.xlu1 %5666  ;;  %10213 = vmatprep.mubr.msk.bf16.mxu1 %vm11276_vm1, %v14707_v22 }
 0x6b2   :  { %10195 = vmatprep.mubr.msk.bf16.mxu0 %vm11276_vm1, %v14707_v22  ;;  %10205 = vmatprep.subr.bf16.mxu0 %v14707_v22 }
 0x6b3   :  { %10223 = vmatprep.subr.bf16.mxu1 %v14707_v22 }
 0x6b4   :  { %v13107_v1 = vpop.permute.xlu0 %6769 }
 0x6b5   :  { %v5772_v18 = vpop.permute.xlu1 %5771 }
 0x6b6   :  { %v5777_v8 = vsel %vm605_vm2, %v5772_v18, 0 }
 0x6b7   :  { %10214 = vmatmul.mubr.msk.bf16.vlgmr.msra.gmra.mrb[196].mxu1 %vm605_vm2, %v5667_v32 }
 0x6b8   :  { %10196 = vmatmul.mubr.msk.bf16.vlgmr.msra.gmra.mrb[184].mxu0 %vm605_vm2, %v5514_v62  ;;  %10224 = vmatpush3.bf16.xpose.msra.mxu1 %v5777_v8  ;;  %v13109_v61 = vpop.permute.xlu0 %6865 }
 0x6b9   :  { %10206 = vmatpush3.bf16.xpose.msra.mxu0 %v5624_v15  ;;  %v5769_v38 = vpop.permute.xlu1 %5768  ;;  %10225 = vmatprep.mubr.msk.bf16.mxu1 %vm11276_vm1, %v14707_v22 }
 0x6ba   :  { %10207 = vmatprep.mubr.msk.bf16.mxu0 %vm11276_vm1, %v14707_v22  ;;  %10217 = vmatprep.subr.bf16.mxu0 %v14707_v22 }
 0x6bb   :  { %10235 = vmatprep.subr.bf16.mxu1 %v14707_v22 }
 0x6bc   :  { %v13115_v24 = vpop.permute.xlu0 %6961 }
 0x6bd   :  { %v5874_v53 = vpop.permute.xlu1 %5873 }
 0x6be   :  { %v5879_v47 = vsel %vm605_vm2, %v5874_v53, 0 }
 0x6bf   :  { %10226 = vmatmul.mubr.msk.bf16.vlgmr.msra.gmra.mrb[200].mxu1 %vm605_vm2, %v5769_v38 }
 0x6c0   :  { %10208 = vmatmul.mubr.msk.bf16.vlgmr.msra.gmra.mrb[188].mxu0 %vm605_vm2, %v5616_v43  ;;  %10236 = vmatpush3.bf16.xpose.msra.mxu1 %v5879_v47  ;;  %v13123_v62 = vpop.permute.xlu0 %7057 }
 0x6c1   :  { %10218 = vmatpush3.bf16.xpose.msra.mxu0 %v5726_v16  ;;  %10237 = vmatprep.mubr.msk.bf16.mxu1 %vm11276_vm1, %v14707_v22  ;;  %v5871_v40 = vpop.permute.xlu1 %5870 }
 0x6c2   :  { %10219 = vmatprep.mubr.msk.bf16.mxu0 %vm11276_vm1, %v14707_v22  ;;  %10229 = vmatprep.subr.bf16.mxu0 %v14707_v22 }
 0x6c3   :  { %10247 = vmatprep.subr.bf16.mxu1 %v14707_v22 }
 0x6c5   :  { %v6338_v34 = vpop.permute.xlu1 %6337 }
 0x6c6   :  { %v6343_v19 = vsel %vm2500_vm3, %v6338_v34, 0 }
 0x6c7   :  { %10238 = vmatmul.mubr.msk.bf16.vlgmr.msra.gmra.mrb[204].mxu1 %vm605_vm2, %v5871_v40 }
 0x6c8   :  { %10220 = vmatmul.mubr.msk.bf16.vlgmr.msra.gmra.mrb[192].mxu0 %vm605_vm2, %v5718_v60  ;;  %10248 = vmatpush3.bf16.msra.mxu1 %v6391_v31 }
 0x6c9   :  { %10230 = vmatpush3.bf16.xpose.msra.mxu0 %v5828_v36  ;;  %10231 = vmatprep.mubr.msk.bf16.mxu0 %vm11276_vm1, %v14707_v22 }
 0x6ca   :  { %10241 = vmatprep.subr.bf16.mxu0 %v14707_v22  ;;  %10249 = vmatprep.mubr.msk.bf16.mxu1 %vm11276_vm1, %v14707_v22 }
 0x6cb   :  { %10259 = vmatprep.subr.bf16.mxu1 %v14707_v22 }
 0x6d0   :  { %10232 = vmatmul.mubr.msk.bf16.vlgmr.msra.gmra.mrb[196].mxu0 %vm605_vm2, %v5820_v49 }
 0x6d1   :  { %10242 = vmatpush3.bf16.msra.mxu0 %v6343_v19  ;;  %10243 = vmatprep.mubr.msk.bf16.mxu0 %vm11276_vm1, %v14707_v22 }
 0x6d2   :  { %10253 = vmatprep.subr.bf16.mxu0 %v14707_v22 }
 0x6e8   :  { %v4385_v48 = vpop.f32.mrb[144].mxu1 }
 0x6e9   :  { %v13111_v20 = vmul.f32 0.35355338, %v4385_v48  ;;  %v10059_v7 = vpop.f32.mrb[145].mxu1 }
 0x6ea   :  { %v4388_v45 = vpop.f32.mrb[146].mxu1 }
 0x6eb   :  { %v10060_v57 = vpop.f32.mrb[147].mxu1  ;;  %v5956_v46 = vsel %vm605_vm2, %v13111_v20, -inf }
 0x6ec   :  { %5957 = vmax.xlane.f32.xlu1 %v5956_v46 }
 0x6f1   :  { %v13117_v35 = vpop.f32.mrb[132].mxu0 }
 0x6f2   :  { %14792 = vst [vmem:[#allocation95_spill] sm:$0xff] %v13117_v35  ;;  %v13119_v63 = vpop.f32.mrb[133].mxu0 }
 0x6f3   :  { %14793 = vst [vmem:[#allocation87_spill] sm:$0xff] %v13119_v63  ;;  %v13121_v51 = vpop.f32.mrb[134].mxu0 }
 0x6f4   :  { %14794 = vst [vmem:[#allocation88_spill] sm:$0xff] %v13121_v51  ;;  %v13125_v58 = vpop.f32.mrb[135].mxu0 }
 0x6f5   :  { %14795 = vst [vmem:[#allocation31_spill] sm:$0xff] %v13125_v58 }
 0x6f8   :  { %v5955_v42 = vpop.xlane.xlu0 %5954 }
 0x6f9   :  { %v6049_v50 = vsub.f32 %v12933_v33, %v5955_v42 }
 0x6fb   :  { %v6081_v9 = vmul.f32 1.442695, %v6049_v50 }
 0x6fd   :  { %10906 = vpow2.f32 %v6081_v9 }
 0x707   :  { %v13128_v21 = vpop.eup %10906 }
 0x708   :  { %v6145_v6 = vsel %vm605_vm2, %v13128_v21, 0.0 }
 0x709   :  { %6146 = vadd.xlane.f32.xlu1 %v6145_v6 }
 0x71a   :  { %7201 = vrot.lane.b32.xlu1 %v14760_v17, %s11268_s27 }
 0x71e   :  { %7297 = vrot.lane.b32.xlu1 %v14764_v26, %s11268_s27 }
 0x722   :  { %7393 = vrot.lane.b32.xlu1 %v14768_v55, %s11268_s27 }
 0x726   :  { %7489 = vrot.lane.b32.xlu1 %v14772_v23, %s11268_s27 }
 0x72a   :  { %v4487_v33 = vpop.f32.mrb[148].mxu1  ;;  %7585 = vrot.lane.b32.xlu1 %v14776_v27, %s11268_s27 }
 0x72b   :  { %v13142_v43 = vmul.f32 0.35355338, %v4487_v33  ;;  %v13144_v56 = vpop.f32.mrb[136].mxu0  ;;  %v10071_v59 = vpop.f32.mrb[149].mxu1 }
 0x72c   :  { %14796 = vst [vmem:[#allocation34_spill] sm:$0xff] %v13144_v56  ;;  %v13146_v44 = vpop.f32.mrb[137].mxu0  ;;  %v4490_v17 = vpop.f32.mrb[150].mxu1 }
 0x72d   :  { %14797 = vst [vmem:[#allocation36_spill] sm:$0xff] %v13146_v44  ;;  %v13148_v25 = vpop.f32.mrb[138].mxu0  ;;  %v10072_v26 = vpop.f32.mrb[151].mxu1  ;;  %v5962_v55 = vsel %vm605_vm2, %v13142_v43, -inf }
 0x72e   :  { %14798 = vst [vmem:[#allocation94_spill] sm:$0xff] %v13148_v25  ;;  %5963 = vmax.xlane.f32.xlu0 %v5962_v55  ;;  %v13152_v23 = vpop.f32.mrb[139].mxu0  ;;  %v13170_v59 = vpop.permute.xlu1 %6433 }
 0x72f   :  { %14799 = vst [vmem:[#allocation93_spill] sm:$0xff] %v13152_v23 }
 0x732   :  { %v4589_v12 = vpop.f32.mrb[152].mxu1 }
 0x733   :  { %v13154_v2 = vmul.f32 0.35355338, %v4589_v12  ;;  %v13156_v27 = vpop.f32.mrb[140].mxu0  ;;  %v10083_v4 = vpop.f32.mrb[153].mxu1 }
 0x734   :  { %v10065_v32 = vpop.f32.mrb[141].mxu0  ;;  %v4592_v60 = vpop.f32.mrb[154].mxu1 }
 0x735   :  { %v4439_v18 = vpop.f32.mrb[142].mxu0  ;;  %v10084_v8 = vpop.f32.mrb[155].mxu1  ;;  %v5968_v15 = vsel %vm605_vm2, %v13154_v2, -inf }
 0x736   :  { %5969 = vmax.xlane.f32.xlu0 %v5968_v15  ;;  %v10066_v0 = vpop.f32.mrb[143].mxu0 }
 0x73a   :  { %v4691_v38 = vpop.f32.mrb[156].mxu1 }
 0x73b   :  { %v13160_v53 = vmul.f32 0.35355338, %v4691_v38  ;;  %v4538_v49 = vpop.f32.mrb[144].mxu0  ;;  %v10095_v47 = vpop.f32.mrb[157].mxu1 }
 0x73c   :  { %v10077_v16 = vpop.f32.mrb[145].mxu0  ;;  %v4694_v39 = vpop.f32.mrb[158].mxu1  ;;  %v13168_v33 = vmul.f32 0.35355338, %v4538_v49 }
 0x73d   :  { %v4541_v40 = vpop.f32.mrb[146].mxu0  ;;  %v10096_v31 = vpop.f32.mrb[159].mxu1  ;;  %v5974_v36 = vsel %vm605_vm2, %v13160_v53, -inf }
 0x73e   :  { %5975 = vmax.xlane.f32.xlu0 %v5974_v36  ;;  %v10078_v34 = vpop.f32.mrb[147].mxu0  ;;  %v5965_v0 = vsel %vm605_vm2, %v13168_v33, -inf  ;;  %v13184_v16 = vpop.permute.xlu1 %6529 }
 0x742   :  { %v4793_v19 = vpop.f32.mrb[160].mxu1 }
 0x743   :  { %v13164_v48 = vmul.f32 0.35355338, %v4793_v19  ;;  %v4640_v7 = vpop.f32.mrb[148].mxu0  ;;  %v10107_v45 = vpop.f32.mrb[161].mxu1 }
 0x744   :  { %v10089_v57 = vpop.f32.mrb[149].mxu0  ;;  %v4796_v46 = vpop.f32.mrb[162].mxu1  ;;  %v13174_v60 = vmul.f32 0.35355338, %v4640_v7 }
 0x745   :  { %v4643_v42 = vpop.f32.mrb[150].mxu0  ;;  %v10108_v50 = vpop.f32.mrb[163].mxu1  ;;  %v5980_v9 = vsel %vm605_vm2, %v13164_v48, -inf }
 0x746   :  { %5981 = vmax.xlane.f32.xlu0 %v5980_v9  ;;  %v10090_v6 = vpop.f32.mrb[151].mxu0  ;;  %v5971_v47 = vsel %vm605_vm2, %v13174_v60, -inf }
 0x747   :  { %v13196_v6 = vpop.permute.xlu1 %6625 }
 0x74a   :  { %v4895_v17 = vpop.f32.mrb[164].mxu1 }
 0x74b   :  { %v13172_v26 = vmul.f32 0.35355338, %v4895_v17  ;;  %v4742_v55 = vpop.f32.mrb[152].mxu0  ;;  %v10119_v12 = vpop.f32.mrb[165].mxu1 }
 0x74c   :  { %v10101_v4 = vpop.f32.mrb[153].mxu0  ;;  %v4898_v32 = vpop.f32.mrb[166].mxu1  ;;  %v13180_v49 = vmul.f32 0.35355338, %v4742_v55 }
 0x74d   :  { %v4745_v18 = vpop.f32.mrb[154].mxu0  ;;  %v10120_v8 = vpop.f32.mrb[167].mxu1  ;;  %v5986_v15 = vsel %vm605_vm2, %v13172_v26, -inf }
 0x74e   :  { %5987 = vmax.xlane.f32.xlu0 %v5986_v15  ;;  %5966 = vmax.xlane.f32.xlu1 %v5965_v0  ;;  %v10102_v38 = vpop.f32.mrb[155].mxu0  ;;  %v5977_v42 = vsel %vm605_vm2, %v13180_v49, -inf }
 0x752   :  { %v4997_v39 = vpop.f32.mrb[168].mxu1  ;;  %5972 = vmax.xlane.f32.xlu1 %v5971_v47 }
 0x753   :  { %v13186_v40 = vmul.f32 0.35355338, %v4997_v39  ;;  %v4844_v31 = vpop.f32.mrb[156].mxu0  ;;  %v10131_v36 = vpop.f32.mrb[169].mxu1 }
 0x754   :  { %v10113_v34 = vpop.f32.mrb[157].mxu0  ;;  %v5000_v19 = vpop.f32.mrb[170].mxu1  ;;  %v13188_v7 = vmul.f32 0.35355338, %v4844_v31 }
 0x755   :  { %v4847_v45 = vpop.f32.mrb[158].mxu0  ;;  %v10132_v57 = vpop.f32.mrb[171].mxu1  ;;  %v5992_v46 = vsel %vm605_vm2, %v13186_v40, -inf }
 0x756   :  { %5993 = vmax.xlane.f32.xlu0 %v5992_v46  ;;  %5978 = vmax.xlane.f32.xlu1 %v5977_v42  ;;  %v10114_v50 = vpop.f32.mrb[159].mxu0  ;;  %v5983_v9 = vsel %vm605_vm2, %v13188_v7, -inf  ;;  %v13206_v31 = vpop.permute.xlu1 %6721 }
 0x75a   :  { %v5099_v17 = vpop.f32.mrb[172].mxu1  ;;  %5984 = vmax.xlane.f32.xlu1 %v5983_v9 }
 0x75b   :  { %v13198_v55 = vmul.f32 0.35355338, %v5099_v17  ;;  %v4946_v12 = vpop.f32.mrb[160].mxu0  ;;  %v10143_v4 = vpop.f32.mrb[173].mxu1 }
 0x75c   :  { %v13200_v32 = vmul.f32 0.35355338, %v4946_v12  ;;  %v10125_v18 = vpop.f32.mrb[161].mxu0  ;;  %v5102_v8 = vpop.f32.mrb[174].mxu1 }
 0x75d   :  { %v4949_v15 = vpop.f32.mrb[162].mxu0  ;;  %v10144_v0 = vpop.f32.mrb[175].mxu1  ;;  %v5998_v38 = vsel %vm605_vm2, %v13198_v55, -inf }
 0x75e   :  { %5999 = vmax.xlane.f32.xlu0 %v5998_v38  ;;  %v10126_v47 = vpop.f32.mrb[163].mxu0  ;;  %v5989_v39 = vsel %vm605_vm2, %v13200_v32, -inf  ;;  %v13214_v12 = vpop.permute.xlu1 %6817 }
 0x75f   :  { %5990 = vmax.xlane.f32.xlu1 %v5989_v39  ;;  %14800 = vst [vmem:[#allocation99_spill] sm:$0xff] %v13214_v12 }
 0x762   :  { %v5201_v36 = vpop.f32.mrb[176].mxu1 }
 0x763   :  { %v13208_v34 = vmul.f32 0.35355338, %v5201_v36  ;;  %v13210_v19 = vpop.f32.mrb[164].mxu0  ;;  %v10155_v45 = vpop.f32.mrb[177].mxu1 }
 0x764   :  { %v10137_v57 = vpop.f32.mrb[165].mxu0  ;;  %v5204_v46 = vpop.f32.mrb[178].mxu1 }
 0x765   :  { %v5051_v42 = vpop.f32.mrb[166].mxu0  ;;  %v10156_v50 = vpop.f32.mrb[179].mxu1  ;;  %v6004_v9 = vsel %vm605_vm2, %v13208_v34, -inf }
 0x766   :  { %6005 = vmax.xlane.f32.xlu0 %v6004_v9  ;;  %v10138_v17 = vpop.f32.mrb[167].mxu0  ;;  %v13224_v57 = vpop.permute.xlu1 %6913 }
 0x767   :  { %14801 = vst [vmem:[#allocation100_spill] sm:$0xff] %v13224_v57 }
 0x76a   :  { %v5303_v4 = vpop.f32.mrb[180].mxu1 }
 0x76b   :  { %v13216_v18 = vmul.f32 0.35355338, %v5303_v4  ;;  %v13218_v8 = vpop.f32.mrb[168].mxu0  ;;  %v10167_v15 = vpop.f32.mrb[181].mxu1 }
 0x76c   :  { %v10149_v0 = vpop.f32.mrb[169].mxu0  ;;  %v5306_v38 = vpop.f32.mrb[182].mxu1 }
 0x76d   :  { %v5153_v47 = vpop.f32.mrb[170].mxu0  ;;  %v10168_v39 = vpop.f32.mrb[183].mxu1  ;;  %v6010_v36 = vsel %vm605_vm2, %v13216_v18, -inf }
 0x76e   :  { %6011 = vmax.xlane.f32.xlu0 %v6010_v36  ;;  %v10150_v45 = vpop.f32.mrb[171].mxu0  ;;  %v13230_v39 = vpop.permute.xlu1 %7009 }
 0x76f   :  { %14802 = vst [vmem:[#allocation97_spill] sm:$0xff] %v13230_v39 }
 0x770   :  { %7633 = vrot.lane.b32.xlu1 %v14788_v29, %s11268_s27 }
 0x772   :  { %v5405_v46 = vpop.f32.mrb[184].mxu1 }
 0x773   :  { %v13226_v42 = vmul.f32 0.35355338, %v5405_v46  ;;  %v5252_v50 = vpop.f32.mrb[172].mxu0  ;;  %v10179_v9 = vpop.f32.mrb[185].mxu1 }
 0x774   :  { %v10161_v17 = vpop.f32.mrb[173].mxu0  ;;  %v5408_v4 = vpop.f32.mrb[186].mxu1 }
 0x775   :  { %v5255_v15 = vpop.f32.mrb[174].mxu0  ;;  %v10180_v0 = vpop.f32.mrb[187].mxu1  ;;  %v6016_v38 = vsel %vm605_vm2, %v13226_v42, -inf }
 0x776   :  { %6017 = vmax.xlane.f32.xlu0 %v6016_v38  ;;  %v10162_v47 = vpop.f32.mrb[175].mxu0  ;;  %v13236_v15 = vpop.permute.xlu1 %7105 }
 0x777   :  { %14803 = vst [vmem:[#allocation98_spill] sm:$0xff] %v13236_v15 }
 0x77a   :  { %v5507_v36 = vpop.f32.mrb[188].mxu1 }
 0x77b   :  { %v13232_v29 = vmul.f32 0.35355338, %v5507_v36  ;;  %v5354_v45 = vpop.f32.mrb[176].mxu0  ;;  %v10191_v56 = vpop.f32.mrb[189].mxu1 }
 0x77c   :  { %v10173_v46 = vpop.f32.mrb[177].mxu0  ;;  %v5510_v44 = vpop.f32.mrb[190].mxu1 }
 0x77d   :  { %v5357_v25 = vpop.f32.mrb[178].mxu0  ;;  %v10192_v9 = vpop.f32.mrb[191].mxu1  ;;  %v6022_v17 = vsel %vm605_vm2, %v13232_v29, -inf }
 0x77e   :  { %6023 = vmax.xlane.f32.xlu0 %v6022_v17  ;;  %v10174_v4 = vpop.f32.mrb[179].mxu0  ;;  %v5958_v46 = vpop.xlane.xlu1 %5957 }
 0x782   :  { %v5609_v0 = vpop.f32.mrb[192].mxu1 }
 0x783   :  { %v13238_v38 = vmul.f32 0.35355338, %v5609_v0  ;;  %v5456_v47 = vpop.f32.mrb[180].mxu0  ;;  %v10203_v58 = vpop.f32.mrb[193].mxu1  ;;  %v6050_v0 = vsub.f32 %v13111_v20, %v5958_v46 }
 0x784   :  { %v10185_v36 = vpop.f32.mrb[181].mxu0  ;;  %v5612_v23 = vpop.f32.mrb[194].mxu1  ;;  %v13273_v57 = vmul.f32 0.35355338, %v5456_v47 }
 0x785   :  { %v5459_v51 = vpop.f32.mrb[182].mxu0  ;;  %v10204_v56 = vpop.f32.mrb[195].mxu1  ;;  %v6028_v44 = vsel %vm605_vm2, %v13238_v38, -inf  ;;  %v13248_v23 = vmul.f32 0.35355338, %v13210_v19 }
 0x786   :  { %6029 = vmax.xlane.f32.xlu0 %v6028_v44  ;;  %v10186_v25 = vpop.f32.mrb[183].mxu0  ;;  %v6083_v44 = vmul.f32 1.442695, %v6050_v0 }
 0x788   :  { %10908 = vpow2.f32 %v6083_v44 }
 0x78a   :  { %v5711_v9 = vpop.f32.mrb[196].mxu1 }
 0x78b   :  { %v13242_v17 = vmul.f32 0.35355338, %v5711_v9  ;;  %v5558_v4 = vpop.f32.mrb[184].mxu0  ;;  %v10215_v35 = vpop.f32.mrb[197].mxu1  ;;  %v5995_v9 = vsel %vm605_vm2, %v13248_v23, -inf }
 0x78c   :  { %v10197_v63 = vpop.f32.mrb[185].mxu0  ;;  %v5714_v15 = vpop.f32.mrb[198].mxu1  ;;  %v13253_v35 = vmul.f32 0.35355338, %v13218_v8 }
 0x78d   :  { %v5561_v58 = vpop.f32.mrb[186].mxu0  ;;  %v10216_v36 = vpop.f32.mrb[199].mxu1  ;;  %v6034_v51 = vsel %vm605_vm2, %v13242_v17, -inf }
 0x78e   :  { %6035 = vmax.xlane.f32.xlu0 %v6034_v51  ;;  %v10198_v56 = vpop.f32.mrb[187].mxu0  ;;  %v13259_v51 = vmul.f32 0.35355338, %v5252_v50  ;;  %v6001_v8 = vsel %vm605_vm2, %v13253_v35, -inf }
 0x790   :  { %v6007_v44 = vsel %vm605_vm2, %v13259_v51, -inf }
 0x792   :  { %v5813_v25 = vpop.f32.mrb[200].mxu1 }
 0x793   :  { %v13255_v20 = vmul.f32 0.35355338, %v5813_v25  ;;  %v5660_v63 = vpop.f32.mrb[188].mxu0  ;;  %v10227_v15 = vpop.f32.mrb[201].mxu1 }
 0x794   :  { %v5816_v46 = vpop.f32.mrb[202].mxu1  ;;  %5996 = vmax.xlane.f32.xlu1 %v5995_v9  ;;  %v10209_v58 = vpop.f32.mrb[189].mxu0  ;;  %v13265_v9 = vmul.f32 0.35355338, %v5354_v45  ;;  %v13287_v12 = vmul.f32 0.35355338, %v5660_v63 }
 0x795   :  { %v5663_v19 = vpop.f32.mrb[190].mxu0  ;;  %v10228_v36 = vpop.f32.mrb[203].mxu1  ;;  %v6040_v0 = vsel %vm605_vm2, %v13255_v20, -inf }
 0x796   :  { %6041 = vmax.xlane.f32.xlu0 %v6040_v0  ;;  %v6147_v56 = vpop.xlane.xlu1 %6146  ;;  %v10210_v39 = vpop.f32.mrb[191].mxu0  ;;  %v6013_v45 = vsel %vm605_vm2, %v13265_v9, -inf }
 0x797   :  { %10910 = vrcp.f32 %v6147_v56  ;;  %v13271_v56 = vpop.eup %10908 }
 0x798   :  { %6002 = vmax.xlane.f32.xlu1 %v6001_v8 }
 0x79a   :  { %v5915_v25 = vpop.f32.mrb[204].mxu1 }
 0x79b   :  { %v13267_v15 = vmul.f32 0.35355338, %v5915_v25  ;;  %v5762_v46 = vpop.f32.mrb[192].mxu0  ;;  %v10239_v58 = vpop.f32.mrb[205].mxu1 }
 0x79c   :  { %v5918_v50 = vpop.f32.mrb[206].mxu1  ;;  %6008 = vmax.xlane.f32.xlu1 %v6007_v44  ;;  %v10221_v19 = vpop.f32.mrb[193].mxu0  ;;  %v6148_v44 = vsel %vm605_vm2, %v13271_v56, 0.0 }
 0x79d   :  { %v5765_v36 = vpop.f32.mrb[194].mxu0  ;;  %v10240_v39 = vpop.f32.mrb[207].mxu1  ;;  %v6046_v0 = vsel %vm605_vm2, %v13267_v15, -inf  ;;  %v13280_v50 = vmul.f32 0.35355338, %v5558_v4 }
 0x79e   :  { %6047 = vmax.xlane.f32.xlu0 %v6046_v0  ;;  %v10222_v8 = vpop.f32.mrb[195].mxu0  ;;  %v6019_v36 = vsel %vm605_vm2, %v13273_v57, -inf  ;;  %v13294_v4 = vmul.f32 0.35355338, %v5762_v46 }
 0x79f   :  { %v6439_v8 = vsel %vm2500_vm3, %v13170_v59, 0  ;;  %v6031_v59 = vsel %vm605_vm2, %v13287_v12, -inf }
 0x7a0   :  { %6014 = vmax.xlane.f32.xlu1 %v6013_v45  ;;  %v6037_v63 = vsel %vm605_vm2, %v13294_v4, -inf }
 0x7a1   :  { %v10911_v25 = vpop.eup %10910 }
 0x7a2   :  { %6149 = vadd.xlane.f32.xlu0 %v6148_v44  ;;  %v6273_v58 = vmul.f32 %v10911_v25, %v13128_v21  ;;  %v6025_v21 = vsel %vm605_vm2, %v13280_v50, -inf }
 0x7a3   :  { %v5864_v19 = vpop.f32.mrb[196].mxu0 }
 0x7a4   :  { %6020 = vmax.xlane.f32.xlu1 %v6019_v36  ;;  %v10233_v47 = vpop.f32.mrb[197].mxu0  ;;  %v6305_v39 = vpack.c.bf16 %v6273_v58, %v6273_v58  ;;  %v13298_v25 = vmul.f32 0.35355338, %v5864_v19 }
 0x7a5   :  { %v5867_v0 = vpop.f32.mrb[198].mxu0 }
 0x7a6   :  { %v10234_v45 = vpop.f32.mrb[199].mxu0  ;;  %10244 = vmatmul.mubr.msk.bf16.vlgmr.msra.gmra.mrb[200].mxu0 %vm605_vm2, %v6305_v39  ;;  %v6043_v44 = vsel %vm605_vm2, %v13298_v25, -inf }
 0x7a7   :  { %10254 = vmatpush3.bf16.msra.mxu0 %v6439_v8  ;;  %10255 = vmatprep.mubr.msk.bf16.mxu0 %vm11276_vm1, %v14707_v22 }
 0x7a8   :  { %6026 = vmax.xlane.f32.xlu1 %v6025_v21  ;;  %10265 = vmatprep.subr.bf16.mxu0 %v14707_v22 }
 0x7ac   :  { %6032 = vmax.xlane.f32.xlu1 %v6031_v59 }
 0x7b0   :  { %6038 = vmax.xlane.f32.xlu1 %v6037_v63 }
 0x7b4   :  { %6044 = vmax.xlane.f32.xlu1 %v6043_v44 }
 0x7bb   :  { %v5964_v58 = vpop.xlane.xlu0 %5963 }
 0x7bc   :  { %v6052_v36 = vsub.f32 %v13142_v43, %v5964_v58 }
 0x7be   :  { %v6087_v47 = vmul.f32 1.442695, %v6052_v36 }
 0x7c0   :  { %10912 = vpow2.f32 %v6087_v47 }
 0x7c3   :  { %v5970_v46 = vpop.xlane.xlu0 %5969 }
 0x7c4   :  { %v6054_v39 = vsub.f32 %v13154_v2, %v5970_v46 }
 0x7c6   :  { %v6091_v0 = vmul.f32 1.442695, %v6054_v39 }
 0x7c8   :  { %10914 = vpow2.f32 %v6091_v0 }
 0x7ca   :  { %v13306_v19 = vpop.eup %10912 }
 0x7cb   :  { %v5976_v8 = vpop.xlane.xlu0 %5975  ;;  %v6154_v45 = vsel %vm605_vm2, %v13306_v19, 0.0 }
 0x7cc   :  { %v6056_v21 = vsub.f32 %v13160_v53, %v5976_v8  ;;  %6155 = vadd.xlane.f32.xlu0 %v6154_v45 }
 0x7ce   :  { %v6095_v59 = vmul.f32 1.442695, %v6056_v21 }
 0x7d0   :  { %10916 = vpow2.f32 %v6095_v59 }
 0x7d2   :  { %v13311_v63 = vpop.eup %10914 }
 0x7d3   :  { %v5982_v43 = vpop.xlane.xlu0 %5981  ;;  %v6160_v44 = vsel %vm605_vm2, %v13311_v63, 0.0 }
 0x7d4   :  { %v6058_v2 = vsub.f32 %v13164_v48, %v5982_v43  ;;  %6161 = vadd.xlane.f32.xlu0 %v6160_v44 }
 0x7d6   :  { %v6099_v58 = vmul.f32 1.442695, %v6058_v2 }
 0x7d8   :  { %10918 = vpow2.f32 %v6099_v58 }
 0x7da   :  { %v13316_v36 = vpop.eup %10916 }
 0x7db   :  { %v5988_v47 = vpop.xlane.xlu0 %5987  ;;  %v6166_v53 = vsel %vm605_vm2, %v13316_v36, 0.0 }
 0x7dc   :  { %v6060_v46 = vsub.f32 %v13172_v26, %v5988_v47  ;;  %6167 = vadd.xlane.f32.xlu0 %v6166_v53 }
 0x7de   :  { %v6103_v39 = vmul.f32 1.442695, %v6060_v46 }
 0x7e0   :  { %10920 = vpow2.f32 %v6103_v39 }
 0x7e2   :  { %v13321_v0 = vpop.eup %10918 }
 0x7e3   :  { %v5994_v8 = vpop.xlane.xlu0 %5993  ;;  %v6172_v48 = vsel %vm605_vm2, %v13321_v0, 0.0 }
 0x7e4   :  { %v6062_v45 = vsub.f32 %v13186_v40, %v5994_v8  ;;  %6173 = vadd.xlane.f32.xlu0 %v6172_v48 }
 0x7e6   :  { %v6107_v21 = vmul.f32 1.442695, %v6062_v45 }
 0x7e8   :  { %10922 = vpow2.f32 %v6107_v21 }
 0x7ea   :  { %v13326_v59 = vpop.eup %10920 }
 0x7eb   :  { %v6000_v43 = vpop.xlane.xlu0 %5999  ;;  %v6178_v26 = vsel %vm605_vm2, %v13326_v59, 0.0 }
 0x7ec   :  { %v6064_v44 = vsub.f32 %v13198_v55, %v6000_v43  ;;  %6179 = vadd.xlane.f32.xlu0 %v6178_v26 }
 0x7ee   :  { %v6111_v2 = vmul.f32 1.442695, %v6064_v44 }
 0x7f0   :  { %10924 = vpow2.f32 %v6111_v2 }
 0x7f2   :  { %v13331_v58 = vpop.eup %10922 }
 0x7f3   :  { %v6006_v47 = vpop.xlane.xlu0 %6005  ;;  %v6184_v40 = vsel %vm605_vm2, %v13331_v58, 0.0 }
 0x7f4   :  { %v6066_v53 = vsub.f32 %v13208_v34, %v6006_v47  ;;  %6185 = vadd.xlane.f32.xlu0 %v6184_v40 }
 0x7f6   :  { %v6115_v46 = vmul.f32 1.442695, %v6066_v53 }
 0x7f8   :  { %10926 = vpow2.f32 %v6115_v46 }
 0x7fa   :  { %v13336_v39 = vpop.eup %10924 }
 0x7fb   :  { %v6012_v8 = vpop.xlane.xlu0 %6011  ;;  %v6190_v55 = vsel %vm605_vm2, %v13336_v39, 0.0 }
 0x7fc   :  { %v6068_v48 = vsub.f32 %v13216_v18, %v6012_v8  ;;  %6191 = vadd.xlane.f32.xlu0 %v6190_v55  ;;  %v13358_v55 = vmul.f32 0.35355338, %v13156_v27 }
 0x7fe   :  { %v6119_v45 = vmul.f32 1.442695, %v6068_v48 }
 0x800   :  { %10928 = vpow2.f32 %v6119_v45 }
 0x802   :  { %v13341_v21 = vpop.eup %10926 }
 0x803   :  { %v6018_v43 = vpop.xlane.xlu0 %6017  ;;  %v6196_v34 = vsel %vm605_vm2, %v13341_v21, 0.0 }
 0x804   :  { %v6070_v26 = vsub.f32 %v13226_v42, %v6018_v43  ;;  %6197 = vadd.xlane.f32.xlu0 %v6196_v34 }
 0x806   :  { %v6123_v44 = vmul.f32 1.442695, %v6070_v26 }
 0x808   :  { %10930 = vpow2.f32 %v6123_v44 }
 0x80a   :  { %v13346_v2 = vpop.eup %10928 }
 0x80b   :  { %v6024_v47 = vpop.xlane.xlu0 %6023  ;;  %v6202_v18 = vsel %vm605_vm2, %v13346_v2, 0.0 }
 0x80c   :  { %v6072_v40 = vsub.f32 %v13232_v29, %v6024_v47  ;;  %6203 = vadd.xlane.f32.xlu0 %v6202_v18  ;;  %v5959_v29 = vsel %vm605_vm2, %v13358_v55, -inf }
 0x80e   :  { %v6127_v53 = vmul.f32 1.442695, %v6072_v40 }
 0x810   :  { %10932 = vpow2.f32 %v6127_v53  ;;  %v6487_v53 = vsel %vm2500_vm3, %v13096_v52, 0 }
 0x812   :  { %v13351_v46 = vpop.eup %10930 }
 0x813   :  { %v6208_v8 = vsel %vm605_vm2, %v13351_v46, 0.0  ;;  %v6030_v45 = vpop.xlane.xlu0 %6029 }
 0x814   :  { %6209 = vadd.xlane.f32.xlu0 %v6208_v8  ;;  %v6074_v40 = vsub.f32 %v13238_v38, %v6030_v45 }
 0x816   :  { %v6131_v8 = vmul.f32 1.442695, %v6074_v40 }
 0x81a   :  { %v13355_v42 = vpop.eup %10932 }
 0x81b   :  { %v6214_v48 = vsel %vm605_vm2, %v13355_v42, 0.0  ;;  %v6036_v43 = vpop.xlane.xlu0 %6035 }
 0x81c   :  { %6215 = vadd.xlane.f32.xlu0 %v6214_v48 }
 0x820   :  { %5960 = vmax.xlane.f32.xlu0 %v5959_v29 }
 0x823   :  { %v13364_v34 = vpop.xlane.xlu0 %6041 }
 0x82b   :  { %v13366_v26 = vpop.xlane.xlu0 %6047 }
 0x82f   :  { %v6150_v44 = vpop.xlane.xlu0 %6149 }
 0x830   :  { %10934 = vrcp.f32 %v6150_v44  ;;  %v6583_v44 = vsel %vm2500_vm3, %v13103_v5, 0  ;;  %v6679_v5 = vsel %vm2500_vm3, %v13105_v37, 0  ;;  %v6775_v37 = vsel %vm2500_vm3, %v13107_v1, 0 }
 0x831   :  { %10936 = vpow2.f32 %v6131_v8  ;;  %v13399_v8 = vpop.permute.xlu1 %7201 }
 0x836   :  { %7153 = vrot.lane.b32.xlu0 %v14773_v28, %s11268_s27 }
 0x83a   :  { %v10935_v27 = vpop.eup %10934 }
 0x83b   :  { %v6274_v47 = vmul.f32 %v10935_v27, %v13271_v56  ;;  %v13378_v28 = vpop.eup %10936 }
 0x83c   :  { %v6220_v56 = vsel %vm605_vm2, %v13378_v28, 0.0 }
 0x83d   :  { %v6306_v18 = vpack.c.bf16 %v6274_v47, %v6274_v47 }
 0x83f   :  { %10250 = vmatmul.mubr.msk.bf16.vlgmr.msra.gmra.mrb[208].mxu1 %vm605_vm2, %v6306_v18 }
 0x840   :  { %10260 = vmatpush3.bf16.msra.mxu1 %v6487_v53  ;;  %10261 = vmatprep.mubr.msk.bf16.mxu1 %vm11276_vm1, %v14707_v22  ;;  %v6076_v53 = vsub.f32 %v13242_v17, %v6036_v43  ;;  %v13409_v17 = vpop.permute.xlu1 %7297 }
 0x841   :  { %10271 = vmatprep.subr.bf16.mxu1 %v14707_v22 }
 0x855   :  { %6221 = vadd.xlane.f32.xlu0 %v6220_v56 }
 0x859   :  { %v6156_v38 = vpop.xlane.xlu0 %6155 }
 0x85a   :  { %10938 = vrcp.f32 %v6156_v38  ;;  %v6135_v38 = vmul.f32 1.442695, %v6076_v53 }
 0x861   :  { %v6162_v48 = vpop.xlane.xlu0 %6161 }
 0x862   :  { %10940 = vrcp.f32 %v6162_v48 }
 0x864   :  { %v10939_v52 = vpop.eup %10938 }
 0x865   :  { %v6276_v45 = vmul.f32 %v10939_v52, %v13306_v19 }
 0x867   :  { %v6308_v29 = vpack.c.bf16 %v6276_v45, %v6276_v45 }
 0x869   :  { %10262 = vmatmul.mubr.msk.bf16.vlgmr.msra.gmra.mrb[212].mxu1 %vm605_vm2, %v6308_v29  ;;  %v6168_v27 = vpop.xlane.xlu0 %6167 }
 0x86a   :  { %10272 = vmatpush3.bf16.msra.mxu1 %v6583_v44  ;;  %10942 = vrcp.f32 %v6168_v27  ;;  %10273 = vmatprep.mubr.msk.bf16.mxu1 %vm11276_vm1, %v14707_v22  ;;  %v6871_v27 = vsel %vm2500_vm3, %v13109_v61, 0 }
 0x86b   :  { %7249 = vrot.lane.b32.xlu0 %v14777_v14, %s11268_s27  ;;  %10283 = vmatprep.subr.bf16.mxu1 %v14707_v22 }
 0x86c   :  { %v10941_v47 = vpop.eup %10940 }
 0x86d   :  { %v6278_v19 = vmul.f32 %v10941_v47, %v13311_v63  ;;  %v13415_v47 = vpop.permute.xlu1 %7393 }
 0x86f   :  { %v6310_v18 = vpack.c.bf16 %v6278_v19, %v6278_v19 }
 0x871   :  { %10274 = vmatmul.mubr.msk.bf16.vlgmr.msra.gmra.mrb[216].mxu1 %vm605_vm2, %v6310_v18  ;;  %v6174_v40 = vpop.xlane.xlu0 %6173 }
 0x872   :  { %10284 = vmatpush3.bf16.msra.mxu1 %v6679_v5  ;;  %10944 = vrcp.f32 %v6174_v40  ;;  %10285 = vmatprep.mubr.msk.bf16.mxu1 %vm11276_vm1, %v14707_v22  ;;  %v13424_v40 = vpop.permute.xlu1 %7489 }
 0x873   :  { %10295 = vmatprep.subr.bf16.mxu1 %v14707_v22 }
 0x874   :  { %v10943_v14 = vpop.eup %10942 }
 0x875   :  { %v6280_v63 = vmul.f32 %v10943_v14, %v13316_v36  ;;  %v6967_v14 = vsel %vm2500_vm3, %v13115_v24, 0 }
 0x877   :  { %v6312_v56 = vpack.c.bf16 %v6280_v63, %v6280_v63 }
 0x879   :  { %10286 = vmatmul.mubr.msk.bf16.vlgmr.msra.gmra.mrb[220].mxu1 %vm605_vm2, %v6312_v56  ;;  %v6180_v48 = vpop.xlane.xlu0 %6179  ;;  %v13405_v52 = vpop.f32.mrb[200].mxu0 }
 0x87a   :  { %10296 = vmatpush3.bf16.msra.mxu1 %v6775_v37  ;;  %10946 = vrcp.f32 %v6180_v48  ;;  %v10245_v45 = vpop.f32.mrb[201].mxu0  ;;  %10297 = vmatprep.mubr.msk.bf16.mxu1 %vm11276_vm1, %v14707_v22  ;;  %v13434_v56 = vpop.permute.xlu1 %7585  ;;  %v7063_v37 = vsel %vm2500_vm3, %v13123_v62, 0 }
 0x87b   :  { %v6382_v43 = vpop.f32.mrb[202].mxu0  ;;  %10307 = vmatprep.subr.bf16.mxu1 %v14707_v22  ;;  %10948 = vpow2.f32 %v6135_v38 }
 0x87c   :  { %v10945_v36 = vpop.eup %10944  ;;  %v10246_v29 = vpop.f32.mrb[203].mxu0 }
 0x87d   :  { %v6282_v1 = vmul.f32 %v10945_v36, %v13321_v0 }
 0x87e   :  { %v5967_v48 = vpop.xlane.xlu1 %5966 }
 0x87f   :  { %v6314_v44 = vpack.c.bf16 %v6282_v1, %v6282_v1 }
 0x881   :  { %10298 = vmatmul.mubr.msk.bf16.vlgmr.msra.gmra.mrb[224].mxu1 %vm605_vm2, %v6314_v44  ;;  %v6186_v19 = vpop.xlane.xlu0 %6185 }
 0x882   :  { %10308 = vmatpush3.bf16.msra.mxu1 %v6871_v27  ;;  %10950 = vrcp.f32 %v6186_v19  ;;  %10309 = vmatprep.mubr.msk.bf16.mxu1 %vm11276_vm1, %v14707_v22  ;;  %v5973_v36 = vpop.xlane.xlu1 %5972 }
 0x883   :  { %10319 = vmatprep.subr.bf16.mxu1 %v14707_v22 }
 0x884   :  { %v10947_v18 = vpop.eup %10946 }
 0x885   :  { %v6284_v5 = vmul.f32 %v10947_v18, %v13326_v59  ;;  %v13422_v0 = vpop.eup %10948 }
 0x886   :  { %v6226_v63 = vsel %vm605_vm2, %v13422_v0, 0.0  ;;  %v5979_v62 = vpop.xlane.xlu1 %5978 }
 0x887   :  { %v6316_v61 = vpack.c.bf16 %v6284_v5, %v6284_v5  ;;  %v6053_v5 = vsub.f32 %v13168_v33, %v5967_v48  ;;  %v6057_v48 = vsub.f32 %v13180_v49, %v5979_v62 }
 0x889   :  { %10310 = vmatmul.mubr.msk.bf16.vlgmr.msra.gmra.mrb[228].mxu1 %vm605_vm2, %v6316_v61  ;;  %v6192_v53 = vpop.xlane.xlu0 %6191 }
 0x88a   :  { %10320 = vmatpush3.bf16.msra.mxu1 %v6967_v14  ;;  %10952 = vrcp.f32 %v6192_v53  ;;  %6227 = vadd.xlane.f32.xlu0 %v6226_v63  ;;  %v5985_v44 = vpop.xlane.xlu1 %5984 }
 0x88b   :  { %10321 = vmatprep.mubr.msk.bf16.mxu1 %vm11276_vm1, %v14707_v22  ;;  %10331 = vmatprep.subr.bf16.mxu1 %v14707_v22 }
 0x88c   :  { %v10951_v59 = vpop.eup %10950 }
 0x88d   :  { %v6286_v38 = vmul.f32 %v10951_v59, %v13331_v58  ;;  %v6089_v59 = vmul.f32 1.442695, %v6053_v5 }
 0x88e   :  { %v5991_v19 = vpop.xlane.xlu1 %5990 }
 0x88f   :  { %v6318_v24 = vpack.c.bf16 %v6286_v38, %v6286_v38  ;;  %v6055_v38 = vsub.f32 %v13174_v60, %v5973_v36  ;;  %v6097_v60 = vmul.f32 1.442695, %v6057_v48  ;;  %v6061_v49 = vsub.f32 %v13200_v32, %v5991_v19 }
 0x891   :  { %10322 = vmatmul.mubr.msk.bf16.vlgmr.msra.gmra.mrb[232].mxu1 %vm605_vm2, %v6318_v24  ;;  %v6198_v58 = vpop.xlane.xlu0 %6197  ;;  %v6093_v33 = vmul.f32 1.442695, %v6055_v38 }
 0x892   :  { %10332 = vmatpush3.bf16.msra.mxu1 %v7063_v37  ;;  %10333 = vmatprep.mubr.msk.bf16.mxu1 %vm11276_vm1, %v14707_v22  ;;  %10954 = vrcp.f32 %v6198_v58 }
 0x893   :  { %10343 = vmatprep.subr.bf16.mxu1 %v14707_v22 }
 0x894   :  { %v10953_v45 = vpop.eup %10952 }
 0x895   :  { %v6288_v43 = vmul.f32 %v10953_v45, %v13336_v39  ;;  %v6078_v39 = vsub.f32 %v13255_v20, %v13364_v34 }
 0x897   :  { %v6320_v29 = vpack.c.bf16 %v6288_v43, %v6288_v43  ;;  %v6139_v14 = vmul.f32 1.442695, %v6078_v39 }
 0x899   :  { %10334 = vmatmul.mubr.msk.bf16.vlgmr.msra.gmra.mrb[236].mxu1 %vm605_vm2, %v6320_v29  ;;  %v13449_v1 = vpop.xlane.xlu0 %6203  ;;  %10956 = vpow2.f32 %v6139_v14 }
 0x89a   :  { %10345 = vmatprep.mubr.msk.bf16.mxu1 %vm11276_vm1, %v14707_v22 }
 0x89c   :  { %v10955_v61 = vpop.eup %10954 }
 0x89d   :  { %v6290_v37 = vmul.f32 %v10955_v61, %v13341_v21  ;;  %v6059_v21 = vsub.f32 %v13188_v7, %v5985_v44  ;;  %v6105_v7 = vmul.f32 1.442695, %v6061_v49 }
 0x89f   :  { %v6101_v58 = vmul.f32 1.442695, %v6059_v21 }
 0x8a0   :  { %7345 = vrot.lane.b32.xlu0 %v14781_v3, %s11268_s27  ;;  %v13459_v3 = vpop.permute.xlu1 %7633 }
 0x8a1   :  { %v13451_v27 = vpop.xlane.xlu0 %6209 }
 0x8a3   :  { %v13470_v36 = vpop.eup %10956 }
 0x8a4   :  { %v5997_v34 = vpop.xlane.xlu1 %5996  ;;  %v6232_v5 = vsel %vm605_vm2, %v13470_v36, 0.0 }
 0x8a5   :  { %v6063_v44 = vsub.f32 %v13248_v23, %v5997_v34 }
 0x8a7   :  { %v6109_v32 = vmul.f32 1.442695, %v6063_v44 }
 0x8a8   :  { %v6003_v43 = vpop.xlane.xlu1 %6002 }
 0x8a9   :  { %v13455_v18 = vpop.xlane.xlu0 %6215  ;;  %v6065_v19 = vsub.f32 %v13253_v35, %v6003_v43 }
 0x8ac   :  { %v6009_v61 = vpop.xlane.xlu1 %6008 }
 0x8ad   :  { %v5961_v53 = vpop.xlane.xlu0 %5960  ;;  %v6067_v23 = vsub.f32 %v13259_v51, %v6009_v61 }
 0x8ae   :  { %v6051_v63 = vsub.f32 %v13358_v55, %v5961_v53  ;;  %v6322_v55 = vpack.c.bf16 %v6290_v37, %v6290_v37 }
 0x8af   :  { %v6117_v35 = vmul.f32 1.442695, %v6067_v23 }
 0x8b0   :  { %v6085_v24 = vmul.f32 1.442695, %v6051_v63  ;;  %v6015_v63 = vpop.xlane.xlu1 %6014 }
 0x8b1   :  { %v7154_v45 = vpop.permute.xlu0 %7153  ;;  %v6069_v34 = vsub.f32 %v13265_v9, %v6015_v63 }
 0x8b2   :  { %10958 = vpow2.f32 %v6085_v24  ;;  %v7159_v20 = vsel %vm2500_vm3, %v7154_v45, 0  ;;  %v6113_v24 = vmul.f32 1.442695, %v6065_v19 }
 0x8b3   :  { %10344 = vmatpush3.bf16.msra.mxu1 %v7159_v20  ;;  %10960 = vpow2.f32 %v6089_v59  ;;  %v6121_v51 = vmul.f32 1.442695, %v6069_v34 }
 0x8b4   :  { %10355 = vmatprep.subr.bf16.mxu1 %v14707_v22  ;;  %10962 = vpow2.f32 %v6093_v33  ;;  %v6021_v20 = vpop.xlane.xlu1 %6020 }
 0x8b5   :  { %10964 = vpow2.f32 %v6097_v60 }
 0x8b6   :  { %10346 = vmatmul.mubr.msk.bf16.vlgmr.msra.gmra.mrb[240].mxu1 %vm605_vm2, %v6322_v55  ;;  %10966 = vpow2.f32 %v6101_v58  ;;  %v6071_v55 = vsub.f32 %v13273_v57, %v6021_v20 }
 0x8b7   :  { %10357 = vmatprep.mubr.msk.bf16.mxu1 %vm11276_vm1, %v14707_v22  ;;  %10968 = vpow2.f32 %v6105_v7  ;;  %v6080_v7 = vsub.f32 %v13267_v15, %v13366_v26 }
 0x8b8   :  { %10970 = vpow2.f32 %v6109_v32  ;;  %v6027_v60 = vpop.xlane.xlu1 %6026  ;;  %v6125_v58 = vmul.f32 1.442695, %v6071_v55 }
 0x8b9   :  { %10972 = vpow2.f32 %v6113_v24  ;;  %v6073_v9 = vsub.f32 %v13280_v50, %v6027_v60  ;;  %v6143_v32 = vmul.f32 1.442695, %v6080_v7 }
 0x8ba   :  { %10974 = vpow2.f32 %v6117_v35 }
 0x8bb   :  { %10976 = vpow2.f32 %v6121_v51 }
 0x8bc   :  { %v13472_v29 = vpop.eup %10958  ;;  %10978 = vpow2.f32 %v6125_v58  ;;  %v6033_v35 = vpop.xlane.xlu1 %6032 }
 0x8bd   :  { %v6151_v62 = vsel %vm605_vm2, %v13472_v29, 0.0  ;;  %v13477_v39 = vpop.eup %10960  ;;  %10980 = vrcp.f32 %v13449_v1 }
 0x8be   :  { %6152 = vadd.xlane.f32.xlu1 %v6151_v62  ;;  %v6157_v14 = vsel %vm605_vm2, %v13477_v39, 0.0  ;;  %v13484_v53 = vpop.eup %10962  ;;  %v6129_v62 = vmul.f32 1.442695, %v6073_v9 }
 0x8bf   :  { %6233 = vadd.xlane.f32.xlu0 %v6232_v5  ;;  %v6163_v59 = vsel %vm605_vm2, %v13484_v53, 0.0  ;;  %v13489_v38 = vpop.eup %10964 }
 0x8c0   :  { %v6169_v37 = vsel %vm605_vm2, %v13489_v38, 0.0  ;;  %v13494_v45 = vpop.eup %10966  ;;  %10982 = vpow2.f32 %v6129_v62  ;;  %v6039_v34 = vpop.xlane.xlu1 %6038 }
 0x8c1   :  { %v6175_v33 = vsel %vm605_vm2, %v13494_v45, 0.0  ;;  %v13499_v48 = vpop.eup %10968  ;;  %10984 = vpow2.f32 %v6143_v32  ;;  %v6077_v51 = vsub.f32 %v13294_v4, %v6039_v34 }
 0x8c2   :  { %6158 = vadd.xlane.f32.xlu1 %v6157_v14  ;;  %v6181_v21 = vsel %vm605_vm2, %v13499_v48, 0.0  ;;  %v13504_v43 = vpop.eup %10970  ;;  %10986 = vrcp.f32 %v13451_v27 }
 0x8c3   :  { %v6187_v49 = vsel %vm605_vm2, %v13504_v43, 0.0  ;;  %v13511_v57 = vpop.eup %10972 }
 0x8c4   :  { %v6193_v5 = vsel %vm605_vm2, %v13511_v57, 0.0  ;;  %v13516_v61 = vpop.eup %10974  ;;  %v6045_v60 = vpop.xlane.xlu1 %6044 }
 0x8c5   :  { %v13520_v50 = vpop.eup %10976 }
 0x8c6   :  { %6164 = vadd.xlane.f32.xlu1 %v6163_v59  ;;  %v13524_v44 = vpop.eup %10978  ;;  %v6205_v1 = vsel %vm605_vm2, %v13520_v50, 0.0 }
 0x8c7   :  { %v10981_v14 = vpop.eup %10980  ;;  %v6211_v63 = vsel %vm605_vm2, %v13524_v44, 0.0 }
 0x8c8   :  { %v6292_v59 = vmul.f32 %v10981_v14, %v13346_v2 }
 0x8ca   :  { %6170 = vadd.xlane.f32.xlu1 %v6169_v37  ;;  %v13533_v24 = vpop.eup %10982  ;;  %v6324_v37 = vpack.c.bf16 %v6292_v59, %v6292_v59 }
 0x8cb   :  { %v6217_v23 = vsel %vm605_vm2, %v13533_v24, 0.0  ;;  %v13542_v2 = vpop.eup %10984 }
 0x8cc   :  { %v6238_v20 = vsel %vm605_vm2, %v13542_v2, 0.0 }
 0x8ce   :  { %6176 = vadd.xlane.f32.xlu1 %v6175_v33  ;;  %v6075_v33 = vsub.f32 %v13287_v12, %v6033_v35 }
 0x8d0   :  { %v6133_v55 = vmul.f32 1.442695, %v6075_v33 }
 0x8d2   :  { %6182 = vadd.xlane.f32.xlu1 %v6181_v21  ;;  %10988 = vpow2.f32 %v6133_v55  ;;  %v6137_v21 = vmul.f32 1.442695, %v6077_v51 }
 0x8d4   :  { %10990 = vpow2.f32 %v6137_v21 }
 0x8d5   :  { %7441 = vrot.lane.b32.xlu0 %v14784_v41, %s11268_s27  ;;  %v6199_v41 = vsel %vm605_vm2, %v13516_v61, 0.0 }
 0x8d6   :  { %6188 = vadd.xlane.f32.xlu1 %v6187_v49  ;;  %v10987_v49 = vpop.eup %10986 }
 0x8da   :  { %6194 = vadd.xlane.f32.xlu1 %v6193_v5 }
 0x8dc   :  { %v13563_v62 = vpop.eup %10988 }
 0x8de   :  { %6200 = vadd.xlane.f32.xlu1 %v6199_v41  ;;  %v13569_v7 = vpop.eup %10990 }
 0x8e2   :  { %v13528_v19 = vpop.xlane.xlu0 %6221  ;;  %6206 = vadd.xlane.f32.xlu1 %v6205_v1 }
 0x8e6   :  { %v7250_v15 = vpop.permute.xlu0 %7249  ;;  %6212 = vadd.xlane.f32.xlu1 %v6211_v63 }
 0x8e7   :  { %v7255_v26 = vsel %vm2500_vm3, %v7250_v15, 0 }
 0x8e8   :  { %10356 = vmatpush3.bf16.msra.mxu1 %v7255_v26 }
 0x8e9   :  { %10367 = vmatprep.subr.bf16.mxu1 %v14707_v22 }
 0x8ea   :  { %6218 = vadd.xlane.f32.xlu1 %v6217_v23 }
 0x8eb   :  { %10358 = vmatmul.mubr.msk.bf16.vlgmr.msra.gmra.mrb[244].mxu1 %vm605_vm2, %v6324_v37 }
 0x8ec   :  { %10369 = vmatprep.mubr.msk.bf16.mxu1 %vm11276_vm1, %v14707_v22 }
 0x8f4   :  { %6239 = vadd.xlane.f32.xlu0 %v6238_v20 }
 0x8fb   :  { %7729 = vrot.lane.b32.xlu1 %v14790_v54, %s11268_s27  ;;  %v6079_v54 = vsub.f32 %v13298_v25, %v6045_v60 }
 0x90a   :  { %7537 = vrot.lane.b32.xlu0 %v14786_v13, %s11268_s27  ;;  %v6141_v13 = vmul.f32 1.442695, %v6079_v54 }
 0x90c   :  { %10992 = vpow2.f32 %v6141_v13 }
 0x90d   :  { %10994 = vrcp.f32 %v13455_v18 }
 0x90e   :  { %7681 = vrot.lane.b32.xlu0 %v14780_v30, %s11268_s27  ;;  %v6294_v30 = vmul.f32 %v10987_v49, %v13351_v46  ;;  %v6229_v46 = vsel %vm605_vm2, %v13569_v7, 0.0 }
 0x910   :  { %v6326_v41 = vpack.c.bf16 %v6294_v30, %v6294_v30 }
 0x912   :  { %7777 = vrot.lane.b32.xlu0 %v14783_v11, %s11268_s27  ;;  %v13558_v12 = vpop.f32.mrb[208].mxu1  ;;  %v6223_v11 = vsel %vm605_vm2, %v13563_v62, 0.0 }
 0x913   :  { %v10251_v58 = vpop.f32.mrb[209].mxu1 }
 0x914   :  { %v6430_v9 = vpop.f32.mrb[210].mxu1 }
 0x915   :  { %v10252_v4 = vpop.f32.mrb[211].mxu1 }
 0x916   :  { %v13576_v1 = vpop.eup %10992 }
 0x917   :  { %v13560_v27 = vpop.xlane.xlu0 %6227  ;;  %v6235_v14 = vsel %vm605_vm2, %v13576_v1, 0.0  ;;  %v10995_v34 = vpop.eup %10994 }
 0x918   :  { %v6296_v54 = vmul.f32 %v10995_v34, %v13355_v42 }
 0x91a   :  { %v6328_v9 = vpack.c.bf16 %v6296_v54, %v6296_v54 }
 0x91b   :  { %v7346_v5 = vpop.permute.xlu0 %7345 }
 0x91c   :  { %v7351_v25 = vsel %vm2500_vm3, %v7346_v5, 0 }
 0x91d   :  { %10368 = vmatpush3.bf16.msra.mxu1 %v7351_v25 }
 0x91e   :  { %10379 = vmatprep.subr.bf16.mxu1 %v14707_v22 }
 0x91f   :  { %6224 = vadd.xlane.f32.xlu1 %v6223_v11 }
 0x920   :  { %10370 = vmatmul.mubr.msk.bf16.vlgmr.msra.gmra.mrb[248].mxu1 %vm605_vm2, %v6326_v41 }
 0x921   :  { %10381 = vmatprep.mubr.msk.bf16.mxu1 %vm11276_vm1, %v14707_v22 }
 0x923   :  { %6230 = vadd.xlane.f32.xlu1 %v6229_v46 }
 0x927   :  { %6236 = vadd.xlane.f32.xlu1 %v6235_v14  ;;  %v6535_v14 = vsel %vm2500_vm3, %v13184_v16, 0  ;;  %v6631_v16 = vsel %vm2500_vm3, %v13196_v6, 0  ;;  %v6727_v6 = vsel %vm2500_vm3, %v13206_v31, 0 }
 0x938   :  { %7825 = vrot.lane.b32.xlu1 %v14791_v10, %s11268_s27 }
 0x93c   :  { %v13582_v32 = vpop.f32.mrb[212].mxu1 }
 0x93d   :  { %v10263_v63 = vpop.f32.mrb[213].mxu1 }
 0x93e   :  { %v6526_v59 = vpop.f32.mrb[214].mxu1 }
 0x93f   :  { %v10264_v15 = vpop.f32.mrb[215].mxu1 }
 0x944   :  { %v13585_v26 = vpop.f32.mrb[216].mxu1 }
 0x945   :  { %v10275_v23 = vpop.f32.mrb[217].mxu1 }
 0x946   :  { %v6622_v37 = vpop.f32.mrb[218].mxu1 }
 0x947   :  { %v10276_v20 = vpop.f32.mrb[219].mxu1 }
 0x94b   :  { %v6153_v35 = vpop.xlane.xlu1 %6152 }
 0x94c   :  { %10996 = vrcp.f32 %v6153_v35  ;;  %v13587_v33 = vpop.f32.mrb[220].mxu1  ;;  %v13589_v55 = vpop.xlane.xlu0 %6233 }
 0x94d   :  { %v10287_v10 = vpop.f32.mrb[221].mxu1 }
 0x94e   :  { %v6718_v51 = vpop.f32.mrb[222].mxu1 }
 0x94f   :  { %v10288_v60 = vpop.f32.mrb[223].mxu1  ;;  %v6159_v21 = vpop.xlane.xlu1 %6158 }
 0x950   :  { %10998 = vrcp.f32 %v6159_v21  ;;  %v7442_v18 = vpop.permute.xlu0 %7441 }
 0x951   :  { %v7447_v58 = vsel %vm2500_vm3, %v7442_v18, 0 }
 0x952   :  { %10380 = vmatpush3.bf16.msra.mxu1 %v7447_v58 }
 0x953   :  { %v6165_v13 = vpop.xlane.xlu1 %6164  ;;  %10391 = vmatprep.subr.bf16.mxu1 %v14707_v22 }
 0x954   :  { %v13594_v4 = vpop.f32.mrb[224].mxu1  ;;  %11000 = vrcp.f32 %v6165_v13 }
 0x955   :  { %v10299_v49 = vpop.f32.mrb[225].mxu1  ;;  %10382 = vmatmul.mubr.msk.bf16.vlgmr.msra.gmra.mrb[252].mxu1 %vm605_vm2, %v6328_v9 }
 0x956   :  { %v10997_v30 = vpop.eup %10996  ;;  %v6814_v5 = vpop.f32.mrb[226].mxu1  ;;  %10393 = vmatprep.mubr.msk.bf16.mxu1 %vm11276_vm1, %v14707_v22 }
 0x957   :  { %v10300_v42 = vpop.f32.mrb[227].mxu1  ;;  %v6275_v25 = vmul.f32 %v10997_v30, %v13472_v29  ;;  %v6171_v11 = vpop.xlane.xlu1 %6170 }
 0x958   :  { %11002 = vrcp.f32 %v6171_v11 }
 0x959   :  { %v6307_v41 = vpack.c.bf16 %v6275_v25, %v6275_v25  ;;  %v14804_v25 = vld [vmem:[#allocation99_spill] sm:$0xff] }
 0x95a   :  { %v10999_v46 = vpop.eup %10998  ;;  %v6823_v11 = vsel %vm2500_vm3, %v14804_v25, 0 }
 0x95b   :  { %10256 = vmatmul.mubr.msk.bf16.vlgmr.msra.gmra.mrb[204].mxu0 %vm605_vm2, %v6307_v41  ;;  %v6277_v29 = vmul.f32 %v10999_v46, %v13477_v39  ;;  %v6177_v23 = vpop.xlane.xlu1 %6176 }
 0x95c   :  { %10266 = vmatpush3.bf16.msra.mxu0 %v6535_v14  ;;  %v13603_v63 = vpop.f32.mrb[228].mxu1  ;;  %10267 = vmatprep.mubr.msk.bf16.mxu0 %vm11276_vm1, %v14707_v22  ;;  %11004 = vrcp.f32 %v6177_v23 }
 0x95d   :  { %v10311_v59 = vpop.f32.mrb[229].mxu1  ;;  %10277 = vmatprep.subr.bf16.mxu0 %v14707_v22  ;;  %v6309_v20 = vpack.c.bf16 %v6277_v29, %v6277_v29 }
 0x95e   :  { %v6910_v15 = vpop.f32.mrb[230].mxu1  ;;  %v11001_v35 = vpop.eup %11000  ;;  %v14805_v59 = vld [vmem:[#allocation100_spill] sm:$0xff] }
 0x95f   :  { %v10312_v37 = vpop.f32.mrb[231].mxu1  ;;  %v6183_v10 = vpop.xlane.xlu1 %6182  ;;  %v6279_v39 = vmul.f32 %v11001_v35, %v13484_v53  ;;  %v6919_v29 = vsel %vm2500_vm3, %v14805_v59, 0  ;;  %v14806_v35 = vld [vmem:[#allocation97_spill] sm:$0xff] }
 0x960   :  { %11006 = vrcp.f32 %v6183_v10 }
 0x961   :  { %v6311_v54 = vpack.c.bf16 %v6279_v39, %v6279_v39  ;;  %11008 = vrcp.f32 %v13528_v19 }
 0x962   :  { %v11003_v18 = vpop.eup %11002 }
 0x963   :  { %10268 = vmatmul.mubr.msk.bf16.vlgmr.msra.gmra.mrb[208].mxu0 %vm605_vm2, %v6309_v20  ;;  %v6189_v58 = vpop.xlane.xlu1 %6188  ;;  %v6281_v53 = vmul.f32 %v11003_v18, %v13489_v38 }
 0x964   :  { %10278 = vmatpush3.bf16.msra.mxu0 %v6631_v16  ;;  %v13612_v34 = vpop.f32.mrb[232].mxu1  ;;  %10279 = vmatprep.mubr.msk.bf16.mxu0 %vm11276_vm1, %v14707_v22  ;;  %11010 = vrcp.f32 %v6189_v58  ;;  %v7015_v16 = vsel %vm2500_vm3, %v14806_v35, 0  ;;  %v7639_v58 = vsel %vm2500_vm3, %v13459_v3, 0 }
 0x965   :  { %v10323_v51 = vpop.f32.mrb[233].mxu1  ;;  %10289 = vmatprep.subr.bf16.mxu0 %v14707_v22  ;;  %v6313_v42 = vpack.c.bf16 %v6281_v53, %v6281_v53  ;;  %11012 = vrcp.f32 %v13560_v27 }
 0x966   :  { %v7006_v60 = vpop.f32.mrb[234].mxu1  ;;  %v11005_v31 = vpop.eup %11004 }
 0x967   :  { %v10324_v21 = vpop.f32.mrb[235].mxu1  ;;  %v6195_v5 = vpop.xlane.xlu1 %6194  ;;  %v6283_v41 = vmul.f32 %v11005_v31, %v13494_v45 }
 0x968   :  { %11014 = vrcp.f32 %v6195_v5 }
 0x969   :  { %v6315_v46 = vpack.c.bf16 %v6283_v41, %v6283_v41  ;;  %11016 = vrcp.f32 %v13589_v55  ;;  %v7207_v41 = vsel %vm2500_vm3, %v13399_v8, 0 }
 0x96a   :  { %v11007_v14 = vpop.eup %11006 }
 0x96b   :  { %10280 = vmatmul.mubr.msk.bf16.vlgmr.msra.gmra.mrb[212].mxu0 %vm605_vm2, %v6311_v54  ;;  %v6201_v38 = vpop.xlane.xlu1 %6200  ;;  %v6285_v45 = vmul.f32 %v11007_v14, %v13499_v48  ;;  %v11009_v19 = vpop.eup %11008 }
 0x96c   :  { %10290 = vmatpush3.bf16.msra.mxu0 %v6727_v6  ;;  %v13621_v13 = vpop.f32.mrb[236].mxu1  ;;  %10291 = vmatprep.mubr.msk.bf16.mxu0 %vm11276_vm1, %v14707_v22  ;;  %v6298_v51 = vmul.f32 %v11009_v19, %v13378_v28  ;;  %11018 = vrcp.f32 %v6201_v38 }
 0x96d   :  { %v10335_v9 = vpop.f32.mrb[237].mxu1  ;;  %10301 = vmatprep.subr.bf16.mxu0 %v14707_v22  ;;  %v6317_v37 = vpack.c.bf16 %v6285_v45, %v6285_v45 }
 0x96e   :  { %v7102_v49 = vpop.f32.mrb[238].mxu1  ;;  %v11011_v20 = vpop.eup %11010  ;;  %v6330_v60 = vpack.c.bf16 %v6298_v51, %v6298_v51 }
 0x96f   :  { %v10336_v30 = vpop.f32.mrb[239].mxu1  ;;  %v6207_v15 = vpop.xlane.xlu1 %6206  ;;  %v6287_v27 = vmul.f32 %v11011_v20, %v13504_v43  ;;  %v14807_v43 = vld [vmem:[#allocation98_spill] sm:$0xff] }
 0x970   :  { %v11013_v21 = vpop.eup %11012  ;;  %v7111_v55 = vsel %vm2500_vm3, %v14807_v43, 0  ;;  %11020 = vrcp.f32 %v6207_v15  ;;  %v7399_v15 = vsel %vm2500_vm3, %v13415_v47, 0 }
 0x971   :  { %v6319_v18 = vpack.c.bf16 %v6287_v27, %v6287_v27  ;;  %v6300_v49 = vmul.f32 %v11013_v21, %v13422_v0 }
 0x972   :  { %v11015_v6 = vpop.eup %11014 }
 0x973   :  { %10292 = vmatmul.mubr.msk.bf16.vlgmr.msra.gmra.mrb[216].mxu0 %vm605_vm2, %v6313_v42  ;;  %v6213_v10 = vpop.xlane.xlu1 %6212  ;;  %v6289_v3 = vmul.f32 %v11015_v6, %v13511_v57  ;;  %v6332_v42 = vpack.c.bf16 %v6300_v49, %v6300_v49  ;;  %v11017_v31 = vpop.eup %11016 }
 0x974   :  { %10302 = vmatpush3.bf16.msra.mxu0 %v6823_v11  ;;  %10303 = vmatprep.mubr.msk.bf16.mxu0 %vm11276_vm1, %v14707_v22  ;;  %v6302_v57 = vmul.f32 %v11017_v31, %v13470_v36  ;;  %11022 = vrcp.f32 %v6213_v10  ;;  %v7303_v36 = vsel %vm2500_vm3, %v13409_v17, 0 }
 0x975   :  { %10313 = vmatprep.subr.bf16.mxu0 %v14707_v22  ;;  %v6321_v25 = vpack.c.bf16 %v6289_v3, %v6289_v3 }
 0x976   :  { %v11019_v0 = vpop.eup %11018 }
 0x977   :  { %v6219_v28 = vpop.xlane.xlu1 %6218  ;;  %v6291_v38 = vmul.f32 %v11019_v0, %v13516_v61 }
 0x978   :  { %11024 = vrcp.f32 %v6219_v28 }
 0x979   :  { %v6323_v8 = vpack.c.bf16 %v6291_v38, %v6291_v38 }
 0x97a   :  { %v11021_v14 = vpop.eup %11020 }
 0x97b   :  { %10304 = vmatmul.mubr.msk.bf16.vlgmr.msra.gmra.mrb[220].mxu0 %vm605_vm2, %v6315_v46  ;;  %v7730_v5 = vpop.permute.xlu1 %7729  ;;  %v6334_v46 = vpack.c.bf16 %v6302_v57, %v6302_v57  ;;  %v6293_v61 = vmul.f32 %v11021_v14, %v13520_v50  ;;  %v7495_v50 = vsel %vm2500_vm3, %v13424_v40, 0 }
 0x97c   :  { %10314 = vmatpush3.bf16.msra.mxu0 %v6919_v29  ;;  %10315 = vmatprep.mubr.msk.bf16.mxu0 %vm11276_vm1, %v14707_v22  ;;  %v7735_v11 = vsel %vm2500_vm3, %v7730_v5, 0 }
 0x97d   :  { %10325 = vmatprep.subr.bf16.mxu0 %v14707_v22  ;;  %v6325_v59 = vpack.c.bf16 %v6293_v61, %v6293_v61 }
 0x97e   :  { %v11023_v29 = vpop.eup %11022 }
 0x97f   :  { %v6295_v17 = vmul.f32 %v11023_v29, %v13524_v44 }
 0x981   :  { %v13643_v23 = vpop.xlane.xlu0 %6239  ;;  %v6327_v45 = vpack.c.bf16 %v6295_v17, %v6295_v17 }
 0x982   :  { %v11025_v19 = vpop.eup %11024  ;;  %11026 = vrcp.f32 %v13643_v23  ;;  %v7591_v23 = vsel %vm2500_vm3, %v13434_v56, 0 }
 0x983   :  { %10316 = vmatmul.mubr.msk.bf16.vlgmr.msra.gmra.mrb[224].mxu0 %vm605_vm2, %v6317_v37  ;;  %v6297_v37 = vmul.f32 %v11025_v19, %v13533_v24 }
 0x984   :  { %10326 = vmatpush3.bf16.msra.mxu0 %v7015_v16  ;;  %10327 = vmatprep.mubr.msk.bf16.mxu0 %vm11276_vm1, %v14707_v22 }
 0x985   :  { %v7538_v48 = vpop.permute.xlu0 %7537  ;;  %10337 = vmatprep.subr.bf16.mxu0 %v14707_v22  ;;  %v6329_v20 = vpack.c.bf16 %v6297_v37, %v6297_v37 }
 0x986   :  { %v7543_v39 = vsel %vm2500_vm3, %v7538_v48, 0 }
 0x987   :  { %10392 = vmatpush3.bf16.msra.mxu1 %v7543_v39 }
 0x988   :  { %10403 = vmatprep.subr.bf16.mxu1 %v14707_v22 }
 0x989   :  { %v13656_v54 = vpop.f32.mrb[240].mxu1  ;;  %v7682_v48 = vpop.permute.xlu0 %7681 }
 0x98a   :  { %v10347_v9 = vpop.f32.mrb[241].mxu1  ;;  %10394 = vmatmul.mubr.msk.bf16.vlgmr.msra.gmra.mrb[0].mxu1 %vm605_vm2, %v6330_v60  ;;  %v7687_v21 = vsel %vm2500_vm3, %v7682_v48, 0 }
 0x98b   :  { %10328 = vmatmul.mubr.msk.bf16.vlgmr.msra.gmra.mrb[228].mxu0 %vm605_vm2, %v6319_v18  ;;  %v7198_v53 = vpop.f32.mrb[242].mxu1  ;;  %10404 = vmatpush3.bf16.msra.mxu1 %v7639_v58 }
 0x98c   :  { %10338 = vmatpush3.bf16.msra.mxu0 %v7111_v55  ;;  %v10348_v30 = vpop.f32.mrb[243].mxu1  ;;  %10405 = vmatprep.mubr.msk.bf16.mxu1 %vm11276_vm1, %v14707_v22  ;;  %v11027_v40 = vpop.eup %11026 }
 0x98d   :  { %10415 = vmatprep.subr.bf16.mxu1 %v14707_v22  ;;  %10339 = vmatprep.mubr.msk.bf16.mxu0 %vm11276_vm1, %v14707_v22  ;;  %v6304_v10 = vmul.f32 %v11027_v40, %v13542_v2  ;;  %v7778_v6 = vpop.permute.xlu0 %7777 }
 0x98e   :  { %10349 = vmatprep.subr.bf16.mxu0 %v14707_v22  ;;  %v7783_v55 = vsel %vm2500_vm3, %v7778_v6, 0 }
 0x98f   :  { %v6336_v60 = vpack.c.bf16 %v6304_v10, %v6304_v10 }
 0x992   :  { %10406 = vmatmul.mubr.msk.bf16.vlgmr.msra.gmra.mrb[4].mxu1 %vm605_vm2, %v6332_v42 }
 0x993   :  { %10416 = vmatpush3.bf16.msra.mxu1 %v7735_v11  ;;  %10340 = vmatmul.mubr.msk.bf16.vlgmr.msra.gmra.mrb[232].mxu0 %vm605_vm2, %v6321_v25 }
 0x994   :  { %10350 = vmatpush3.bf16.msra.mxu0 %v7207_v41  ;;  %10417 = vmatprep.mubr.msk.bf16.mxu1 %vm11276_vm1, %v14707_v22 }
 0x995   :  { %10351 = vmatprep.mubr.msk.bf16.mxu0 %vm11276_vm1, %v14707_v22  ;;  %10361 = vmatprep.subr.bf16.mxu0 %v14707_v22 }
 0x996   :  { %10427 = vmatprep.subr.bf16.mxu1 %v14707_v22 }
 0x99a   :  { %10418 = vmatmul.mubr.msk.bf16.vlgmr.msra.gmra.mrb[8].mxu1 %vm605_vm2, %v6334_v46 }
 0x99b   :  { %10352 = vmatmul.mubr.msk.bf16.vlgmr.msra.gmra.mrb[236].mxu0 %vm605_vm2, %v6323_v8  ;;  %10429 = vmatprep.mubr.msk.bf16.mxu1 %vm11276_vm1, %v14707_v22 }
 0x99c   :  { %10362 = vmatpush3.bf16.msra.mxu0 %v7303_v36  ;;  %10363 = vmatprep.mubr.msk.bf16.mxu0 %vm11276_vm1, %v14707_v22 }
 0x99d   :  { %10373 = vmatprep.subr.bf16.mxu0 %v14707_v22 }
 0x9a3   :  { %10364 = vmatmul.mubr.msk.bf16.vlgmr.msra.gmra.mrb[240].mxu0 %vm605_vm2, %v6325_v59 }
 0x9a4   :  { %10374 = vmatpush3.bf16.msra.mxu0 %v7399_v15  ;;  %10375 = vmatprep.mubr.msk.bf16.mxu0 %vm11276_vm1, %v14707_v22 }
 0x9a5   :  { %10385 = vmatprep.subr.bf16.mxu0 %v14707_v22 }
 0x9ab   :  { %10376 = vmatmul.mubr.msk.bf16.vlgmr.msra.gmra.mrb[244].mxu0 %vm605_vm2, %v6327_v45 }
 0x9ac   :  { %10386 = vmatpush3.bf16.msra.mxu0 %v7495_v50  ;;  %v6225_v47 = vpop.xlane.xlu1 %6224  ;;  %10387 = vmatprep.mubr.msk.bf16.mxu0 %vm11276_vm1, %v14707_v22 }
 0x9ad   :  { %11028 = vrcp.f32 %v6225_v47  ;;  %10397 = vmatprep.subr.bf16.mxu0 %v14707_v22 }
 0x9b0   :  { %v6231_v44 = vpop.xlane.xlu1 %6230 }
 0x9b1   :  { %11030 = vrcp.f32 %v6231_v44 }
 0x9b3   :  { %10388 = vmatmul.mubr.msk.bf16.vlgmr.msra.gmra.mrb[248].mxu0 %vm605_vm2, %v6329_v20 }
 0x9b4   :  { %10398 = vmatpush3.bf16.msra.mxu0 %v7591_v23  ;;  %v6237_v35 = vpop.xlane.xlu1 %6236  ;;  %10399 = vmatprep.mubr.msk.bf16.mxu0 %vm11276_vm1, %v14707_v22 }
 0x9b5   :  { %10409 = vmatprep.subr.bf16.mxu0 %v14707_v22  ;;  %11032 = vrcp.f32 %v6237_v35 }
 0x9b7   :  { %v11029_v16 = vpop.eup %11028 }
 0x9b8   :  { %v6299_v24 = vmul.f32 %v11029_v16, %v13563_v62  ;;  %v7826_v51 = vpop.permute.xlu1 %7825 }
 0x9b9   :  { %v7831_v56 = vsel %vm2500_vm3, %v7826_v51, 0 }
 0x9ba   :  { %10428 = vmatpush3.bf16.msra.mxu1 %v7831_v56  ;;  %v6331_v27 = vpack.c.bf16 %v6299_v24, %v6299_v24 }
 0x9bb   :  { %v11031_v39 = vpop.eup %11030 }
 0x9bc   :  { %10400 = vmatmul.mubr.msk.bf16.vlgmr.msra.gmra.mrb[252].mxu0 %vm605_vm2, %v6331_v27  ;;  %v6301_v2 = vmul.f32 %v11031_v39, %v13569_v7 }
 0x9bd   :  { %10410 = vmatpush3.bf16.msra.mxu0 %v7687_v21  ;;  %10430 = vmatmul.mubr.msk.bf16.vlgmr.msra.gmra.mrb[12].mxu1 %vm605_vm2, %v6336_v60 }
 0x9be   :  { %v13723_v28 = vpop.f32.mrb[244].mxu1  ;;  %10411 = vmatprep.mubr.msk.bf16.mxu0 %vm11276_vm1, %v14707_v22  ;;  %10421 = vmatprep.subr.bf16.mxu0 %v14707_v22  ;;  %v6333_v9 = vpack.c.bf16 %v6301_v2, %v6301_v2 }
 0x9bf   :  { %v10359_v62 = vpop.f32.mrb[245].mxu1  ;;  %v11033_v43 = vpop.eup %11032 }
 0x9c0   :  { %v7294_v18 = vpop.f32.mrb[246].mxu1  ;;  %v6303_v7 = vmul.f32 %v11033_v43, %v13576_v1 }
 0x9c1   :  { %v10360_v58 = vpop.f32.mrb[247].mxu1 }
 0x9c2   :  { %v6335_v53 = vpack.c.bf16 %v6303_v7, %v6303_v7 }
 0x9c4   :  { %10412 = vmatmul.mubr.msk.bf16.vlgmr.msra.gmra.mrb[0].mxu0 %vm605_vm2, %v6333_v9 }
 0x9c5   :  { %10422 = vmatpush3.bf16.msra.mxu0 %v7783_v55  ;;  %10423 = vmatprep.mubr.msk.bf16.mxu0 %vm11276_vm1, %v14707_v22 }
 0x9cc   :  { %10424 = vmatmul.mubr.msk.bf16.vlgmr.msra.gmra.mrb[4].mxu0 %vm605_vm2, %v6335_v53 }
 0x9f3   :  { %v13734_v49 = vpop.f32.mrb[248].mxu1 }
 0x9f4   :  { %v10371_v30 = vpop.f32.mrb[249].mxu1 }
 0x9f5   :  { %v7390_v3 = vpop.f32.mrb[250].mxu1 }
 0x9f6   :  { %v10372_v5 = vpop.f32.mrb[251].mxu1 }
 0xa28   :  { %v13736_v42 = vpop.f32.mrb[252].mxu1 }
 0xa29   :  { %v10383_v31 = vpop.f32.mrb[253].mxu1 }
 0xa2a   :  { %v7486_v25 = vpop.f32.mrb[254].mxu1 }
 0xa2b   :  { %v10384_v0 = vpop.f32.mrb[255].mxu1 }
 0xa2e   :  { %v13738_v11 = vpop.f32.mrb[204].mxu0 }
 0xa2f   :  { %v10257_v41 = vpop.f32.mrb[205].mxu0 }
 0xa30   :  { %v6478_v57 = vpop.f32.mrb[206].mxu0 }
 0xa31   :  { %v10258_v22 = vpop.f32.mrb[207].mxu0 }
 0xa36   :  { %v13740_v38 = vpop.f32.mrb[208].mxu0 }
 0xa37   :  { %v10269_v1 = vpop.f32.mrb[209].mxu0 }
 0xa38   :  { %v6574_v46 = vpop.f32.mrb[210].mxu0 }
 0xa39   :  { %v10270_v8 = vpop.f32.mrb[211].mxu0 }
 0xa3e   :  { %v13742_v14 = vpop.f32.mrb[212].mxu0 }
 0xa3f   :  { %v10281_v36 = vpop.f32.mrb[213].mxu0 }
 0xa40   :  { %v6670_v61 = vpop.f32.mrb[214].mxu0 }
 0xa41   :  { %v10282_v59 = vpop.f32.mrb[215].mxu0 }
 0xa46   :  { %v6763_v29 = vpop.f32.mrb[216].mxu0 }
 0xa47   :  { %v10704_v15 = vpack.i.bf16 %v13594_v4, %v6763_v29  ;;  %v10293_v17 = vpop.f32.mrb[217].mxu0 }
 0xa48   :  { %v6766_v45 = vpop.f32.mrb[218].mxu0  ;;  %v10771_v17 = vld [vmem:[#allocation8 + $0x8] sm:$0xff]  }
 0xa49   :  { %10705 = vrot.lane.b32.xlu0 %v10704_v15, %s11280_s3  ;;  %v10294_v19 = vpop.f32.mrb[219].mxu0 }
 0xa4e   :  { %v6859_v50 = vpop.f32.mrb[220].mxu0 }
 0xa4f   :  { %v10709_v47 = vpack.i.bf16 %v13603_v63, %v6859_v50  ;;  %v10305_v37 = vpop.f32.mrb[221].mxu0 }
 0xa50   :  { %v6862_v44 = vpop.f32.mrb[222].mxu0 }
 0xa51   :  { %10710 = vrot.lane.b32.xlu1 %v10709_v47, %s11280_s3  ;;  %v10306_v20 = vpop.f32.mrb[223].mxu0 }
 0xa56   :  { %v6955_v23 = vpop.f32.mrb[224].mxu0 }
 0xa57   :  { %v10714_v40 = vpack.i.bf16 %v13612_v34, %v6955_v23  ;;  %v10317_v35 = vpop.f32.mrb[225].mxu0 }
 0xa58   :  { %v6958_v16 = vpop.f32.mrb[226].mxu0 }
 0xa59   :  { %10715 = vrot.lane.b32.xlu0 %v10714_v40, %s11280_s3  ;;  %v10318_v4 = vpop.f32.mrb[227].mxu0 }
 0xa5d   :  { %v7579_v10 = vpop.f32.mrb[0].mxu1 }
 0xa5e   :  { %v7051_v24 = vpop.f32.mrb[228].mxu0  ;;  %v10395_v51 = vpop.f32.mrb[1].mxu1 }
 0xa5f   :  { %v10719_v48 = vpack.i.bf16 %v13621_v13, %v7051_v24  ;;  %v10329_v56 = vpop.f32.mrb[229].mxu0  ;;  %v7582_v63 = vpop.f32.mrb[2].mxu1 }
 0xa60   :  { %v7054_v27 = vpop.f32.mrb[230].mxu0  ;;  %v10396_v39 = vpop.f32.mrb[3].mxu1 }
 0xa61   :  { %10720 = vrot.lane.b32.xlu1 %v10719_v48, %s11280_s3  ;;  %v10330_v60 = vpop.f32.mrb[231].mxu0  ;;  %v9215_v39 = vld [vmem:[#allocation7] ss:$0 sm:$0xff] }
 0xa62   :  { %v14808_v60 = vld [vmem:[#allocation87_spill] sm:$0xff] }
 0xa65   :  { %v7675_v21 = vpop.f32.mrb[4].mxu1 }
 0xa66   :  { %v7147_v2 = vpop.f32.mrb[232].mxu0  ;;  %v10407_v34 = vpop.f32.mrb[5].mxu1 }
 0xa67   :  { %v10724_v62 = vpack.i.bf16 %v13656_v54, %v7147_v2  ;;  %v10341_v18 = vpop.f32.mrb[233].mxu0  ;;  %v7678_v6 = vpop.f32.mrb[6].mxu1  ;;  %v14809_v2 = vld [vmem:[#allocation95_spill] sm:$0xff] }
 0xa68   :  { %v7150_v58 = vpop.f32.mrb[234].mxu0  ;;  %v10408_v9 = vpop.f32.mrb[7].mxu1  ;;  %v4267_v34 = vadd.f32 %v14809_v2, %v9215_v39  ;;  %v14810_v6 = vld [vmem:[#allocation25_spill] sm:$0xff] }
 0xa69   :  { %10725 = vrot.lane.b32.xlu0 %v10724_v62, %s11281_s6  ;;  %v10342_v43 = vpop.f32.mrb[235].mxu0  ;;  %v11098_v62 = vld [vmem:[%s14629_s25] sm:$0xff] }
 0xa6a   :  { %v13772_v58 = vadd.f32 %v4267_v34, %v14810_v6  ;;  %v14811_v9 = vld [vmem:[#allocation88_spill] sm:$0xff] }
 0xa6b   :  { %v4270_v43 = vadd.f32 %v14811_v9, %v9215_v39 }
 0xa6d   :  { %v7771_v13 = vpop.f32.mrb[8].mxu1 }
 0xa6e   :  { %v7243_v55 = vpop.f32.mrb[236].mxu0  ;;  %v10419_v7 = vpop.f32.mrb[9].mxu1 }
 0xa6f   :  { %v10729_v53 = vpack.i.bf16 %v13723_v28, %v7243_v55  ;;  %v10353_v30 = vpop.f32.mrb[237].mxu0  ;;  %v7774_v3 = vpop.f32.mrb[10].mxu1  ;;  %v10770_v28 = vld [vmem:[#allocation8] sm:$0xff]  }
 0xa70   :  { %v7246_v5 = vpop.f32.mrb[238].mxu0  ;;  %v10420_v31 = vpop.f32.mrb[11].mxu1  ;;  %10433 = vmatprep.subr.bf16.mxu0 %v10770_v28  ;;  %v14812_v55 = vld [vmem:[#allocation28_spill] sm:$0xff]  ;;  %v8111_v3 = vsel %vm199_vm0, %v13772_v58, 0.0 }
 0xa71   :  { %10730 = vrot.lane.b32.xlu1 %v10729_v53, %s11281_s6  ;;  %v10354_v25 = vpop.f32.mrb[239].mxu0  ;;  %10434 = vmatpush3.bf16.msra.mxu0 %v10770_v28  ;;  %v13778_v7 = vadd.f32 %v4270_v43, %v14812_v55  ;;  %v14813_v53 = vld [vmem:[#allocation93_spill] sm:$0xff]  ;;  %v14814_v5 = vld [vmem:[#allocation31_spill] sm:$0xff] }
 0xa72   :  { %10435 = vmatprep.subr.bf16.mxu0 %v10771_v17  ;;  %v4278_v30 = vadd.f32 %v9215_v39, %v14813_v53  ;;  %v4262_v31 = vadd.f32 %v9215_v39, %v14814_v5  ;;  %v14815_v25 = vld [vmem:[#allocation94_spill] sm:$0xff] }
 0xa75   :  { %10436 = vmatpush3.bf16.msra.mxu0 %v10771_v17 }
 0xa76   :  { %v7339_v54 = vpop.f32.mrb[240].mxu0 }
 0xa77   :  { %v10739_v0 = vpack.i.bf16 %v13734_v49, %v7339_v54  ;;  %v10365_v41 = vpop.f32.mrb[241].mxu0  ;;  %v4286_v54 = vadd.f32 %v14815_v25, %v9215_v39 }
 0xa78   :  { %v7342_v57 = vpop.f32.mrb[242].mxu0 }
 0xa79   :  { %v10366_v22 = vpop.f32.mrb[243].mxu0  ;;  %v8114_v57 = vsel %vm199_vm0, %v13778_v7, 0.0 }
 0xa7a   :  { %v14817_v22 = vld [vmem:[#allocation26_spill] sm:$0xff] }
 0xa7e   :  { %v7435_v1 = vpop.f32.mrb[244].mxu0 }
 0xa7f   :  { %v10749_v46 = vpack.i.bf16 %v13736_v42, %v7435_v1  ;;  %v10377_v8 = vpop.f32.mrb[245].mxu0  ;;  %v13791_v1 = vadd.f32 %v4262_v31, %v14817_v22 }
 0xa80   :  { %v7438_v36 = vpop.f32.mrb[246].mxu0 }
 0xa81   :  { %v10378_v61 = vpop.f32.mrb[247].mxu0  ;;  %v14819_v36 = vld [vmem:[#allocation19_spill] sm:$0xff] }
 0xa82   :  { %v13795_v61 = vadd.f32 %v4286_v54, %v14819_v36 }
 0xa86   :  { %v7531_v59 = vpop.f32.mrb[248].mxu0 }
 0xa87   :  { %v10734_v29 = vpack.i.bf16 %v7579_v10, %v7531_v59  ;;  %v10389_v15 = vpop.f32.mrb[249].mxu0  ;;  %v14820_v59 = vld [vmem:[#allocation34_spill] sm:$0xff] }
 0xa88   :  { %v7534_v45 = vpop.f32.mrb[250].mxu0  ;;  %v11099_v15 = vld [vmem:[%s14629_s25 + $0x8] sm:$0xff] }
 0xa89   :  { %10735 = vrot.lane.b32.xlu0 %v10734_v29, %s11282_s30  ;;  %v10390_v49 = vpop.f32.mrb[251].mxu0  ;;  %v4283_v29 = vadd.f32 %v14820_v59, %v9215_v39  ;;  %v8108_v45 = vsel %vm199_vm0, %v13791_v1, 0.0 }
 0xa8a   :  { %v8126_v49 = vsel %vm199_vm0, %v13795_v61, 0.0 }
 0xa8d   :  { %10740 = vrot.lane.b32.xlu0 %v10739_v0, %s11281_s6  ;;  %v14816_v0 = vld [vmem:[#allocation20_spill] sm:$0xff] }
 0xa8e   :  { %v13786_v41 = vadd.f32 %v4278_v30, %v14816_v0 }
 0xa8f   :  { %v7627_v19 = vpop.f32.mrb[252].mxu0 }
 0xa90   :  { %v10744_v42 = vpack.i.bf16 %v7675_v21, %v7627_v19  ;;  %v10401_v50 = vpop.f32.mrb[253].mxu0  ;;  %v7867_v47 = vpop.f32.mrb[12].mxu1  ;;  %v4259_v21 = vadd.f32 %v9215_v39, %v14808_v60  ;;  %v8120_v28 = vsel %vm199_vm0, %v13786_v41, 0.0  ;;  %v14821_v19 = vld [vmem:[#allocation22_spill] sm:$0xff] }
 0xa91   :  { %v7630_v37 = vpop.f32.mrb[254].mxu0  ;;  %v10431_v44 = vpop.f32.mrb[13].mxu1 }
 0xa92   :  { %v7870_v20 = vpop.f32.mrb[14].mxu1  ;;  %10745 = vrot.lane.b32.xlu1 %v10744_v42, %s11282_s30  ;;  %v10402_v23 = vpop.f32.mrb[255].mxu0  ;;  %v13769_v18 = vadd.f32 %v11098_v62, %v4259_v21  ;;  %v13810_v42 = vadd.f32 %v4283_v29, %v14821_v19 }
 0xa93   :  { %v10432_v40 = vpop.f32.mrb[15].mxu1 }
 0xa96   :  { %10750 = vrot.lane.b32.xlu1 %v10749_v46, %s11281_s6  ;;  %v14818_v46 = vld [vmem:[#allocation36_spill] sm:$0xff] }
 0xa97   :  { %v7723_v35 = vpop.f32.mrb[0].mxu0  ;;  %v4275_v8 = vadd.f32 %v9215_v39, %v14818_v46 }
 0xa98   :  { %v10754_v16 = vpack.i.bf16 %v7771_v13, %v7723_v35  ;;  %v10413_v4 = vpop.f32.mrb[1].mxu0  ;;  %v8105_v13 = vsel %vm199_vm0, %v13769_v18, 0.0 }
 0xa99   :  { %v7726_v10 = vpop.f32.mrb[2].mxu0  ;;  %v13803_v17 = vadd.f32 %v11099_v15, %v4275_v8 }
 0xa9a   :  { %10755 = vrot.lane.b32.xlu0 %v10754_v16, %s11282_s30  ;;  %v10414_v24 = vpop.f32.mrb[3].mxu0 }
 0xa9b   :  { %v8117_v50 = vsel %vm199_vm0, %v13803_v17, 0.0 }
 0xa9f   :  { %v7819_v51 = vpop.f32.mrb[4].mxu0 }
 0xaa0   :  { %v10759_v48 = vpack.i.bf16 %v7867_v47, %v7819_v51  ;;  %v10425_v56 = vpop.f32.mrb[5].mxu0  ;;  %v8123_v47 = vsel %vm199_vm0, %v13810_v42, 0.0 }
 0xaa1   :  { %v7822_v63 = vpop.f32.mrb[6].mxu0 }
 0xaa2   :  { %10760 = vrot.lane.b32.xlu1 %v10759_v48, %s11282_s30  ;;  %v10426_v27 = vpop.f32.mrb[7].mxu0 }
 0xab9   :  { %8106 = vadd.xlane.f32.xlu0 %v8105_v13 }
 0xabb   :  { %v10706_v37 = vpop.permute.xlu0 %10705 }
 0xabc   :  { %v10708_v40 = vunpack.i.h.bf16 %v10706_v37  ;;  %v10707_v35 = vunpack.i.l.bf16 %v10706_v37 }
 0xabd   :  { %8112 = vadd.xlane.f32.xlu0 %v8111_v3 }
 0xabe   :  { %v7970_v51 = vsel %vm605_vm2, %v13558_v12, %v10708_v40  ;;  %v7969_v48 = vsel %vm605_vm2, %v13405_v52, %v10707_v35 }
 0xac1   :  { %8115 = vadd.xlane.f32.xlu0 %v8114_v57 }
 0xac3   :  { %v10711_v23 = vpop.permute.xlu1 %10710 }
 0xac4   :  { %v10713_v62 = vunpack.i.h.bf16 %v10711_v23  ;;  %v10712_v6 = vunpack.i.l.bf16 %v10711_v23 }
 0xac5   :  { %8121 = vadd.xlane.f32.xlu0 %v8120_v28 }
 0xac6   :  { %8109 = vadd.xlane.f32.xlu1 %v8108_v45  ;;  %v7972_v52 = vsel %vm605_vm2, %v13582_v32, %v10713_v62  ;;  %v7971_v13 = vsel %vm605_vm2, %v13738_v11, %v10712_v6  ;;  %v14822_v62 = vld [vmem:[#allocation24_spill] sm:$0xff] }
 0xac9   :  { %8127 = vadd.xlane.f32.xlu0 %v8126_v49 }
 0xaca   :  { %8118 = vadd.xlane.f32.xlu1 %v8117_v50 }
 0xacb   :  { %v10716_v44 = vpop.permute.xlu0 %10715 }
 0xacc   :  { %v10718_v0 = vunpack.i.h.bf16 %v10716_v44  ;;  %v10717_v57 = vunpack.i.l.bf16 %v10716_v44 }
 0xace   :  { %8124 = vadd.xlane.f32.xlu1 %v8123_v47  ;;  %v7974_v11 = vsel %vm605_vm2, %v13585_v26, %v10718_v0  ;;  %v7973_v8 = vsel %vm605_vm2, %v13740_v38, %v10717_v57 }
 0xad3   :  { %v10721_v10 = vpop.permute.xlu1 %10720 }
 0xad4   :  { %v10723_v50 = vunpack.i.h.bf16 %v10721_v10  ;;  %v10722_v47 = vunpack.i.l.bf16 %v10721_v10 }
 0xad6   :  { %v7976_v38 = vsel %vm605_vm2, %v13587_v33, %v10723_v50  ;;  %v14826_v50 = vld [vmem:[#allocation27_spill] sm:$0xff] }
 0xadb   :  { %v10726_v20 = vpop.permute.xlu0 %10725 }
 0xadc   :  { %v10728_v16 = vunpack.i.h.bf16 %v10726_v20  ;;  %v10727_v4 = vunpack.i.l.bf16 %v10726_v20  ;;  %v7975_v20 = vsel %vm605_vm2, %v13742_v14, %v10722_v47 }
 0xade   :  { %v7978_v27 = vsel %vm4167_vm4, %v7970_v51, %v10728_v16  ;;  %v7977_v39 = vsel %vm4167_vm4, %v7969_v48, %v10727_v4  ;;  %v9286_v51 = vld [vmem:[#allocation10] ss:$0 sm:$0xff] }
 0xae3   :  { %v10731_v2 = vpop.permute.xlu1 %10730 }
 0xae4   :  { %v10733_v12 = vunpack.i.h.bf16 %v10731_v2  ;;  %v10732_v9 = vunpack.i.l.bf16 %v10731_v2 }
 0xae6   :  { %v7980_v30 = vsel %vm4167_vm4, %v7972_v52, %v10733_v12  ;;  %v7979_v3 = vsel %vm4167_vm4, %v7971_v13, %v10732_v9  ;;  %v14823_v12 = vld [vmem:[#allocation21_spill] sm:$0xff]  ;;  %v14824_v52 = vld [vmem:[#allocation23_spill] sm:$0xff] }
 0xafb   :  { %v10736_v24 = vpop.permute.xlu0 %10735 }
 0xafc   :  { %v10738_v56 = vunpack.i.h.bf16 %v10736_v24  ;;  %v10737_v63 = vunpack.i.l.bf16 %v10736_v24 }
 0xafe   :  { %v7986_v60 = vsel %vm4176_vm5, %v7978_v27, %v10738_v56  ;;  %v7985_v21 = vsel %vm4176_vm5, %v7977_v39, %v10737_v63  ;;  %v11100_v39 = vld [vmem:[%s14630_s21] sm:$0xff] }
 0xaff   :  { %v7997_v34 = vpack.c.bf16 %v7986_v60, %v7985_v21  ;;  %v10741_v5 = vpop.permute.xlu0 %10740 }
 0xb00   :  { %v10743_v22 = vunpack.i.h.bf16 %v10741_v5  ;;  %v10742_v46 = vunpack.i.l.bf16 %v10741_v5 }
 0xb01   :  { %10437 = vmatprep.mubr.msk.bf16.mxu0 %vm199_vm0, %v7997_v34 }
 0xb02   :  { %v7982_v59 = vsel %vm4167_vm4, %v7974_v11, %v10743_v22  ;;  %v7981_v29 = vsel %vm4167_vm4, %v7973_v8, %v10742_v46  ;;  %v11101_v8 = vld [vmem:[%s14630_s21 + $0x8] sm:$0xff] }
 0xb04   :  { %v10746_v43 = vpop.permute.xlu1 %10745 }
 0xb05   :  { %v10748_v55 = vunpack.i.h.bf16 %v10746_v43  ;;  %v10747_v53 = vunpack.i.l.bf16 %v10746_v43 }
 0xb07   :  { %v7988_v31 = vsel %vm4176_vm5, %v7980_v30, %v10748_v55  ;;  %v7987_v25 = vsel %vm4176_vm5, %v7979_v3, %v10747_v53 }
 0xb08   :  { %v7998_v54 = vpack.c.bf16 %v7988_v31, %v7987_v25  ;;  %v10751_v15 = vpop.permute.xlu1 %10750 }
 0xb09   :  { %v10753_v37 = vunpack.i.h.bf16 %v10751_v15  ;;  %v10752_v44 = vunpack.i.l.bf16 %v10751_v15 }
 0xb0a   :  { %10438 = vmatmul.mubr.msk.bf16.vlgmr.msra.gmra.mrb[8].mxu0 %vm199_vm0, %v7998_v54 }
 0xb0b   :  { %v7984_v35 = vsel %vm4167_vm4, %v7976_v38, %v10753_v37  ;;  %v7983_v16 = vsel %vm4167_vm4, %v7975_v20, %v10752_v44  ;;  %v14827_v20 = vld [vmem:[#allocation29_spill] sm:$0xff] }
 0xb0c   :  { %v10756_v32 = vpop.permute.xlu0 %10755 }
 0xb0d   :  { %v10758_v36 = vunpack.i.h.bf16 %v10756_v32  ;;  %v10757_v28 = vunpack.i.l.bf16 %v10756_v32 }
 0xb0f   :  { %v7990_v45 = vsel %vm4176_vm5, %v7982_v59, %v10758_v36  ;;  %v7989_v49 = vsel %vm4176_vm5, %v7981_v29, %v10757_v28 }
 0xb10   :  { %v7999_v19 = vpack.c.bf16 %v7990_v45, %v7989_v49  ;;  %v14825_v49 = vld [vmem:[#allocation30_spill] sm:$0xff] }
 0xb12   :  { %10441 = vmatprep.mubr.msk.bf16.mxu0 %vm199_vm0, %v7999_v19 }
 0xb14   :  { %v10761_v26 = vpop.permute.xlu1 %10760 }
 0xb15   :  { %v10763_v23 = vunpack.i.h.bf16 %v10761_v26  ;;  %v10762_v40 = vunpack.i.l.bf16 %v10761_v26 }
 0xb17   :  { %v7992_v4 = vsel %vm4176_vm5, %v7984_v35, %v10763_v23  ;;  %v7991_v10 = vsel %vm4176_vm5, %v7983_v16, %v10762_v40 }
 0xb18   :  { %v8000_v24 = vpack.c.bf16 %v7992_v4, %v7991_v10 }
 0xb1a   :  { %10442 = vmatmul.mubr.msk.bf16.gmra.mrb[12].mxu0 %vm199_vm0, %v8000_v24 }
 0xb46   :  { %v8107_v34 = vpop.xlane.xlu0 %8106 }
 0xb47   :  { %v8130_v25 = vmul.f32 0.03125, %v8107_v34 }
 0xb49   :  { %v13880_v29 = vsub.f32 %v13769_v18, %v8130_v25 }
 0xb4a   :  { %v8113_v30 = vpop.xlane.xlu0 %8112 }
 0xb4b   :  { %v8132_v45 = vmul.f32 0.03125, %v8113_v30  ;;  %v8146_v4 = vmul.f32 %v13880_v29, %v13880_v29  ;;  %v13947_v30 = vld [vmem:[%s14504_s12] sm:$0xff]  }
 0xb4c   :  { %10445 = vmatprep.subr.bf16.mxu1 %v13947_v30 }
 0xb4d   :  { %v13899_v40 = vsub.f32 %v13772_v58, %v8132_v45  ;;  %10446 = vmatpush3.bf16.msra.mxu1 %v13947_v30 }
 0xb4e   :  { %v8116_v54 = vpop.xlane.xlu0 %8115 }
 0xb4f   :  { %v8133_v26 = vmul.f32 0.03125, %v8116_v54 }
 0xb52   :  { %v8122_v44 = vpop.xlane.xlu0 %8121 }
 0xb53   :  { %v8110_v5 = vpop.xlane.xlu1 %8109  ;;  %v8135_v24 = vmul.f32 0.03125, %v8122_v44 }
 0xb54   :  { %v8131_v11 = vmul.f32 0.03125, %v8110_v5 }
 0xb56   :  { %v13891_v38 = vsub.f32 %v13791_v1, %v8131_v11  ;;  %v13906_v1 = vsub.f32 %v13778_v7, %v8133_v26  ;;  %v13919_v7 = vsub.f32 %v13786_v41, %v8135_v24 }
 0xb57   :  { %v8119_v15 = vpop.xlane.xlu1 %8118 }
 0xb58   :  { %v8134_v35 = vmul.f32 0.03125, %v8119_v15  ;;  %v8147_v58 = vmul.f32 %v13891_v38, %v13891_v38 }
 0xb5b   :  { %v8125_v10 = vpop.xlane.xlu1 %8124 }
 0xbdd   :  { %v10439_v48 = vpop.f32.mrb[8].mxu0 }
 0xbde   :  { %v8066_v56 = vpop.f32.mrb[9].mxu0  ;;  %v8075_v33 = vadd.f32 %v10439_v48, %v9286_v51  ;;  %v8128_v48 = vpop.xlane.xlu0 %8127 }
 0xbdf   :  { %v8067_v63 = vadd.f32 %v9286_v51, %v8066_v56  ;;  %v10440_v27 = vpop.f32.mrb[10].mxu0  ;;  %v13913_v56 = vsub.f32 %v13803_v17, %v8134_v35 }
 0xbe0   :  { %v8069_v14 = vpop.f32.mrb[11].mxu0  ;;  %v8078_v21 = vadd.f32 %v10440_v27, %v9286_v51  ;;  %v13858_v6 = vadd.f32 %v8075_v33, %v14822_v62  ;;  %v8136_v33 = vmul.f32 0.03125, %v8125_v10  ;;  %v8148_v27 = vmul.f32 %v13899_v40, %v13899_v40 }
 0xbe1   :  { %v13855_v60 = vadd.f32 %v11100_v39, %v8067_v63  ;;  %v8070_v2 = vadd.f32 %v9286_v51, %v8069_v14  ;;  %v8154_v63 = vsel %vm199_vm0, %v8146_v4, 0.0  ;;  %v8137_v14 = vmul.f32 0.03125, %v8128_v48 }
 0xbe2   :  { %v13866_v13 = vadd.f32 %v8078_v21, %v14824_v52  ;;  %v8254_v53 = vsel %vm199_vm0, %v13858_v6, 0.0  ;;  %v8157_v39 = vsel %vm199_vm0, %v8147_v58, 0.0  ;;  %v8149_v21 = vmul.f32 %v13906_v1, %v13906_v1 }
 0xbe3   :  { %v13861_v9 = vadd.f32 %v8070_v2, %v14823_v12  ;;  %v8248_v43 = vsel %vm199_vm0, %v13855_v60, 0.0  ;;  %v13925_v17 = vsub.f32 %v13810_v42, %v8136_v33  ;;  %v8160_v2 = vsel %vm199_vm0, %v8148_v27, 0.0 }
 0xbe4   :  { %8249 = vadd.xlane.f32.xlu1 %v8248_v43  ;;  %v8257_v3 = vsel %vm199_vm0, %v13866_v13, 0.0  ;;  %v8150_v34 = vmul.f32 %v13913_v56, %v13913_v56  ;;  %v13931_v62 = vsub.f32 %v13795_v61, %v8137_v14  ;;  %v8163_v41 = vsel %vm199_vm0, %v8149_v21, 0.0 }
 0xbe5   :  { %v8251_v55 = vsel %vm199_vm0, %v13861_v9, 0.0  ;;  %v8151_v12 = vmul.f32 %v13919_v7, %v13919_v7  ;;  %v8152_v42 = vmul.f32 %v13925_v17, %v13925_v17 }
 0xbe6   :  { %8252 = vadd.xlane.f32.xlu0 %v8251_v55  ;;  %v8166_v43 = vsel %vm199_vm0, %v8150_v34, 0.0  ;;  %v8153_v55 = vmul.f32 %v13931_v62, %v13931_v62 }
 0xbe7   :  { %v8169_v52 = vsel %vm199_vm0, %v8151_v12, 0.0  ;;  %v8172_v61 = vsel %vm199_vm0, %v8152_v42, 0.0 }
 0xbe8   :  { %8255 = vadd.xlane.f32.xlu1 %v8254_v53  ;;  %v8175_v53 = vsel %vm199_vm0, %v8153_v55, 0.0 }
 0xbea   :  { %8258 = vadd.xlane.f32.xlu0 %v8257_v3  ;;  %v13954_v3 = vld [vmem:[%s14504_s12 + $0x8] sm:$0xff]  }
 0xbeb   :  { %10447 = vmatprep.subr.bf16.mxu1 %v13954_v3 }
 0xbec   :  { %10448 = vmatpush3.bf16.msra.mxu1 %v13954_v3 }
 0xbed   :  { %v10443_v31 = vpop.f32.mrb[12].mxu0  ;;  %10473 = vmatprep.subr.bf16.mxu1 %v13947_v30 }
 0xbee   :  { %v8082_v0 = vpop.f32.mrb[13].mxu0  ;;  %v8091_v57 = vadd.f32 %v10443_v31, %v9286_v51 }
 0xbef   :  { %v8083_v22 = vadd.f32 %v9286_v51, %v8082_v0  ;;  %v10444_v46 = vpop.f32.mrb[14].mxu0 }
 0xbf0   :  { %v8085_v32 = vpop.f32.mrb[15].mxu0  ;;  %v8094_v28 = vadd.f32 %v10444_v46, %v9286_v51  ;;  %v13883_v19 = vadd.f32 %v8091_v57, %v14825_v49 }
 0xbf1   :  { %v13877_v36 = vadd.f32 %v11101_v8, %v8083_v22  ;;  %v8086_v59 = vadd.f32 %v9286_v51, %v8085_v32 }
 0xbf2   :  { %v13894_v18 = vadd.f32 %v8094_v28, %v14827_v20  ;;  %v8266_v16 = vsel %vm199_vm0, %v13883_v19, 0.0 }
 0xbf3   :  { %v13886_v47 = vadd.f32 %v8086_v59, %v14826_v50  ;;  %v8260_v37 = vsel %vm199_vm0, %v13877_v36, 0.0 }
 0xbf4   :  { %8261 = vadd.xlane.f32.xlu1 %v8260_v37  ;;  %v8269_v51 = vsel %vm199_vm0, %v13894_v18, 0.0 }
 0xbf5   :  { %v8263_v23 = vsel %vm199_vm0, %v13886_v47, 0.0 }
 0xbf6   :  { %8264 = vadd.xlane.f32.xlu0 %v8263_v23 }
 0xbf8   :  { %8267 = vadd.xlane.f32.xlu1 %v8266_v16 }
 0xbfa   :  { %8270 = vadd.xlane.f32.xlu0 %v8269_v51 }
 0xbfc   :  { %8155 = vadd.xlane.f32.xlu1 %v8154_v63 }
 0xbfe   :  { %8158 = vadd.xlane.f32.xlu0 %v8157_v39 }
 0xc00   :  { %8161 = vadd.xlane.f32.xlu1 %v8160_v2 }
 0xc02   :  { %8164 = vadd.xlane.f32.xlu0 %v8163_v41 }
 0xc04   :  { %8167 = vadd.xlane.f32.xlu1 %v8166_v43 }
 0xc06   :  { %8170 = vadd.xlane.f32.xlu0 %v8169_v52 }
 0xc08   :  { %8173 = vadd.xlane.f32.xlu1 %v8172_v61 }
 0xc0a   :  { %8176 = vadd.xlane.f32.xlu0 %v8175_v53 }
 0xc71   :  { %v8250_v5 = vpop.xlane.xlu1 %8249 }
 0xc72   :  { %v8272_v31 = vmul.f32 0.03125, %v8250_v5 }
 0xc73   :  { %v8253_v25 = vpop.xlane.xlu0 %8252 }
 0xc74   :  { %v13960_v54 = vsub.f32 %v13855_v60, %v8272_v31  ;;  %v8273_v0 = vmul.f32 0.03125, %v8253_v25 }
 0xc75   :  { %v8256_v57 = vpop.xlane.xlu1 %8255 }
 0xc76   :  { %v13963_v22 = vsub.f32 %v13861_v9, %v8273_v0  ;;  %v8274_v46 = vmul.f32 0.03125, %v8256_v57  ;;  %v8288_v32 = vmul.f32 %v13960_v54, %v13960_v54 }
 0xc77   :  { %v8259_v11 = vpop.xlane.xlu0 %8258 }
 0xc78   :  { %v13968_v8 = vsub.f32 %v13858_v6, %v8274_v46  ;;  %v8275_v28 = vmul.f32 0.03125, %v8259_v11  ;;  %v8296_v59 = vsel %vm199_vm0, %v8288_v32, 0.0  ;;  %v8289_v60 = vmul.f32 %v13963_v22, %v13963_v22 }
 0xc79   :  { %8297 = vadd.xlane.f32.xlu1 %v8296_v59 }
 0xc7a   :  { %v13974_v15 = vsub.f32 %v13866_v13, %v8275_v28  ;;  %v8299_v9 = vsel %vm199_vm0, %v8289_v60, 0.0  ;;  %v8290_v45 = vmul.f32 %v13968_v8, %v13968_v8  ;;  %v14010_v28 = vld [vmem:[%s14502_s10] ss:$0 sm:$0xff] }
 0xc7b   :  { %8300 = vadd.xlane.f32.xlu0 %v8299_v9 }
 0xc7c   :  { %v8302_v49 = vsel %vm199_vm0, %v8290_v45, 0.0  ;;  %v8291_v6 = vmul.f32 %v13974_v15, %v13974_v15 }
 0xc7d   :  { %8303 = vadd.xlane.f32.xlu1 %v8302_v49 }
 0xc7e   :  { %v8305_v50 = vsel %vm199_vm0, %v8291_v6, 0.0 }
 0xc7f   :  { %8306 = vadd.xlane.f32.xlu0 %v8305_v50 }
 0xc81   :  { %v8262_v37 = vpop.xlane.xlu1 %8261 }
 0xc82   :  { %v8276_v44 = vmul.f32 0.03125, %v8262_v37 }
 0xc83   :  { %v8265_v26 = vpop.xlane.xlu0 %8264 }
 0xc84   :  { %v13984_v13 = vsub.f32 %v13877_v36, %v8276_v44  ;;  %v8277_v20 = vmul.f32 0.03125, %v8265_v26  ;;  %v14018_v44 = vld [vmem:[%s14503_s11] ss:$0 sm:$0xff] }
 0xc85   :  { %v8268_v23 = vpop.xlane.xlu1 %8267 }
 0xc86   :  { %v13987_v35 = vsub.f32 %v13886_v47, %v8277_v20  ;;  %v8278_v16 = vmul.f32 0.03125, %v8268_v23  ;;  %v8292_v4 = vmul.f32 %v13984_v13, %v13984_v13 }
 0xc87   :  { %v8271_v10 = vpop.xlane.xlu0 %8270 }
 0xc88   :  { %v13992_v24 = vsub.f32 %v13883_v19, %v8278_v16  ;;  %v8279_v51 = vmul.f32 0.03125, %v8271_v10  ;;  %v8308_v58 = vsel %vm199_vm0, %v8292_v4, 0.0  ;;  %v8293_v36 = vmul.f32 %v13987_v35, %v13987_v35 }
 0xc89   :  { %v8156_v48 = vpop.xlane.xlu1 %8155  ;;  %8309 = vadd.xlane.f32.xlu1 %v8308_v58 }
 0xc8a   :  { %v13998_v33 = vsub.f32 %v13894_v18, %v8279_v51  ;;  %v8178_v47 = vmul.f32 0.03125, %v8156_v48  ;;  %v8311_v63 = vsel %vm199_vm0, %v8293_v36, 0.0  ;;  %v8294_v27 = vmul.f32 %v13992_v24, %v13992_v24 }
 0xc8b   :  { %8312 = vadd.xlane.f32.xlu0 %v8311_v63  ;;  %v8159_v19 = vpop.xlane.xlu0 %8158 }
 0xc8c   :  { %v8187_v14 = vadd.f32 1e-12, %v8178_v47  ;;  %v8179_v39 = vmul.f32 0.03125, %v8159_v19  ;;  %v8314_v21 = vsel %vm199_vm0, %v8294_v27, 0.0  ;;  %v8295_v2 = vmul.f32 %v13998_v33, %v13998_v33 }
 0xc8d   :  { %8315 = vadd.xlane.f32.xlu1 %v8314_v21  ;;  %v8162_v34 = vpop.xlane.xlu1 %8161 }
 0xc8e   :  { %11034 = vrsqrt.f32 %v8187_v14  ;;  %v8188_v18 = vadd.f32 1e-12, %v8179_v39  ;;  %v8180_v41 = vmul.f32 0.03125, %v8162_v34  ;;  %v8317_v12 = vsel %vm199_vm0, %v8295_v2, 0.0 }
 0xc8f   :  { %8318 = vadd.xlane.f32.xlu0 %v8317_v12  ;;  %v8165_v43 = vpop.xlane.xlu0 %8164  ;;  %v14075_v12 = vld [vmem:[%s14506_s14] sm:$0xff]  }
 0xc90   :  { %11036 = vrsqrt.f32 %v8188_v18  ;;  %v8189_v42 = vadd.f32 1e-12, %v8180_v41  ;;  %v8181_v52 = vmul.f32 0.03125, %v8165_v43  ;;  %v14080_v43 = vld [vmem:[%s14506_s14 + $0x8] sm:$0xff]   ;;  %10457 = vmatprep.subr.bf16.mxu0 %v14075_v12 }
 0xc91   :  { %v8168_v55 = vpop.xlane.xlu1 %8167  ;;  %10458 = vmatpush3.bf16.msra.mxu0 %v14075_v12 }
 0xc92   :  { %11038 = vrsqrt.f32 %v8189_v42  ;;  %v8190_v61 = vadd.f32 1e-12, %v8181_v52  ;;  %v8182_v53 = vmul.f32 0.03125, %v8168_v55  ;;  %10459 = vmatprep.subr.bf16.mxu0 %v14080_v43  ;;  %v14096_v42 = vld [vmem:[%s14506_s14 + $0x18] sm:$0xff]  }
 0xc93   :  { %v8171_v5 = vpop.xlane.xlu0 %8170 }
 0xc94   :  { %11040 = vrsqrt.f32 %v8190_v61  ;;  %v8191_v31 = vadd.f32 1e-12, %v8182_v53  ;;  %v8183_v25 = vmul.f32 0.03125, %v8171_v5 }
 0xc95   :  { %v8174_v0 = vpop.xlane.xlu1 %8173  ;;  %10460 = vmatpush3.bf16.msra.mxu0 %v14080_v43 }
 0xc96   :  { %11042 = vrsqrt.f32 %v8191_v31  ;;  %v8192_v57 = vadd.f32 1e-12, %v8183_v25  ;;  %v8184_v46 = vmul.f32 0.03125, %v8174_v0 }
 0xc97   :  { %v8177_v32 = vpop.xlane.xlu0 %8176 }
 0xc98   :  { %v11035_v11 = vpop.eup %11034  ;;  %11044 = vrsqrt.f32 %v8192_v57  ;;  %v8193_v59 = vadd.f32 1e-12, %v8184_v46  ;;  %v8185_v60 = vmul.f32 0.03125, %v8177_v32 }
 0xc99   :  { %v8203_v9 = vmul.f32 %v11035_v11, %v13880_v29 }
 0xc9a   :  { %v11037_v45 = vpop.eup %11036  ;;  %11046 = vrsqrt.f32 %v8193_v59  ;;  %v8194_v49 = vadd.f32 1e-12, %v8185_v60 }
 0xc9b   :  { %v8204_v6 = vmul.f32 %v11037_v45, %v13891_v38  ;;  %v8217_v50 = vmul.f32 %v14010_v28, %v8203_v9 }
 0xc9c   :  { %v11039_v37 = vpop.eup %11038  ;;  %11048 = vrsqrt.f32 %v8194_v49 }
 0xc9d   :  { %v8205_v26 = vmul.f32 %v11039_v37, %v13899_v40  ;;  %v8218_v20 = vmul.f32 %v14010_v28, %v8204_v6  ;;  %v14025_v38 = vadd.f32 %v14018_v44, %v8217_v50 }
 0xc9e   :  { %v11041_v23 = vpop.eup %11040 }
 0xc9f   :  { %v8219_v29 = vmul.f32 %v14010_v28, %v8205_v26  ;;  %v8206_v16 = vmul.f32 %v11041_v23, %v13906_v1  ;;  %v14028_v4 = vadd.f32 %v14018_v44, %v8218_v20 }
 0xca0   :  { %v11043_v10 = vpop.eup %11042 }
 0xca1   :  { %v8220_v51 = vmul.f32 %v14010_v28, %v8206_v16  ;;  %v8207_v58 = vmul.f32 %v11043_v10, %v13913_v56  ;;  %v8372_v40 = vpack.c.bf16 %v14028_v4, %v14025_v38  ;;  %v14035_v48 = vadd.f32 %v14018_v44, %v8219_v29 }
 0xca2   :  { %v11045_v36 = vpop.eup %11044 }
 0xca3   :  { %v14038_v1 = vadd.f32 %v14018_v44, %v8220_v51  ;;  %v8208_v47 = vmul.f32 %v11045_v36, %v13919_v7  ;;  %10449 = vmatprep.mubr.msk.bf16.mxu1 %vm199_vm0, %v8372_v40  ;;  %v8221_v63 = vmul.f32 %v14010_v28, %v8207_v58 }
 0xca4   :  { %v11047_v27 = vpop.eup %11046 }
 0xca5   :  { %v8373_v56 = vpack.c.bf16 %v14038_v1, %v14035_v48  ;;  %v8209_v19 = vmul.f32 %v11047_v27, %v13925_v17  ;;  %v8222_v14 = vmul.f32 %v14010_v28, %v8208_v47  ;;  %v14051_v7 = vadd.f32 %v14018_v44, %v8221_v63 }
 0xca6   :  { %v11049_v39 = vpop.eup %11048 }
 0xca7   :  { %v8223_v21 = vmul.f32 %v14010_v28, %v8209_v19  ;;  %v8210_v2 = vmul.f32 %v11049_v39, %v13931_v62  ;;  %10450 = vmatmul.mubr.msk.bf16.vlgmr.msra.gmra.mrb[16].mxu1 %vm199_vm0, %v8373_v56  ;;  %v14054_v34 = vadd.f32 %v14018_v44, %v8222_v14 }
 0xca8   :  { %10474 = vmatpush3.bf16.msra.mxu1 %v13947_v30 }
 0xca9   :  { %v8224_v18 = vmul.f32 %v14010_v28, %v8210_v2  ;;  %v8374_v17 = vpack.c.bf16 %v14054_v34, %v14051_v7  ;;  %10475 = vmatprep.subr.bf16.mxu1 %v13954_v3  ;;  %v14062_v41 = vadd.f32 %v14018_v44, %v8223_v21 }
 0xcab   :  { %v14065_v62 = vadd.f32 %v14018_v44, %v8224_v18  ;;  %10453 = vmatprep.mubr.msk.bf16.mxu1 %vm199_vm0, %v8374_v17 }
 0xcac   :  { %10476 = vmatpush3.bf16.msra.mxu1 %v13954_v3  ;;  %v14089_v3 = vld [vmem:[%s14506_s14 + $0x10] sm:$0xff]  }
 0xcad   :  { %v8375_v30 = vpack.c.bf16 %v14065_v62, %v14062_v41  ;;  %10461 = vmatprep.subr.bf16.mxu0 %v14089_v3 }
 0xcae   :  { %10462 = vmatpush3.bf16.msra.mxu0 %v14089_v3 }
 0xcaf   :  { %10454 = vmatmul.mubr.msk.bf16.gmra.mrb[20].mxu1 %vm199_vm0, %v8375_v30  ;;  %10463 = vmatprep.subr.bf16.mxu0 %v14096_v42 }
 0xcb2   :  { %10464 = vmatpush3.bf16.msra.mxu0 %v14096_v42 }
 0xcb3   :  { %10485 = vmatprep.subr.bf16.mxu0 %v14075_v12 }
 0xd06   :  { %v8298_v52 = vpop.xlane.xlu1 %8297 }
 0xd07   :  { %v8320_v55 = vmul.f32 0.03125, %v8298_v52 }
 0xd08   :  { %v8301_v61 = vpop.xlane.xlu0 %8300 }
 0xd09   :  { %v8328_v53 = vadd.f32 1e-12, %v8320_v55  ;;  %v8321_v5 = vmul.f32 0.03125, %v8301_v61 }
 0xd0a   :  { %v8304_v31 = vpop.xlane.xlu1 %8303 }
 0xd0b   :  { %11050 = vrsqrt.f32 %v8328_v53  ;;  %v8329_v25 = vadd.f32 1e-12, %v8321_v5  ;;  %v8322_v0 = vmul.f32 0.03125, %v8304_v31 }
 0xd0c   :  { %v8307_v57 = vpop.xlane.xlu0 %8306 }
 0xd0d   :  { %11052 = vrsqrt.f32 %v8329_v25  ;;  %v8330_v46 = vadd.f32 1e-12, %v8322_v0  ;;  %v8323_v32 = vmul.f32 0.03125, %v8307_v57 }
 0xd0f   :  { %11054 = vrsqrt.f32 %v8330_v46  ;;  %v8331_v11 = vadd.f32 1e-12, %v8323_v32 }
 0xd11   :  { %11056 = vrsqrt.f32 %v8331_v11 }
 0xd15   :  { %v11051_v59 = vpop.eup %11050 }
 0xd16   :  { %v8344_v60 = vmul.f32 %v11051_v59, %v13960_v54  ;;  %v8310_v9 = vpop.xlane.xlu1 %8309 }
 0xd17   :  { %v11053_v45 = vpop.eup %11052  ;;  %v8324_v49 = vmul.f32 0.03125, %v8310_v9 }
 0xd18   :  { %v8345_v6 = vmul.f32 %v11053_v45, %v13963_v22  ;;  %v8313_v50 = vpop.xlane.xlu0 %8312  ;;  %v8352_v37 = vmul.f32 %v14010_v28, %v8344_v60 }
 0xd19   :  { %v11055_v26 = vpop.eup %11054  ;;  %v8332_v20 = vadd.f32 1e-12, %v8324_v49  ;;  %v8325_v23 = vmul.f32 0.03125, %v8313_v50 }
 0xd1a   :  { %v8346_v29 = vmul.f32 %v11055_v26, %v13968_v8  ;;  %v8316_v16 = vpop.xlane.xlu1 %8315  ;;  %v8353_v10 = vmul.f32 %v14010_v28, %v8345_v6  ;;  %v14109_v47 = vadd.f32 %v14018_v44, %v8352_v37 }
 0xd1b   :  { %v11057_v51 = vpop.eup %11056  ;;  %11058 = vrsqrt.f32 %v8332_v20  ;;  %v8333_v58 = vadd.f32 1e-12, %v8325_v23  ;;  %v8326_v54 = vmul.f32 0.03125, %v8316_v16 }
 0xd1c   :  { %v8354_v40 = vmul.f32 %v14010_v28, %v8346_v29  ;;  %v8347_v36 = vmul.f32 %v11057_v51, %v13974_v15  ;;  %v8319_v22 = vpop.xlane.xlu0 %8318  ;;  %v14112_v63 = vadd.f32 %v14018_v44, %v8353_v10 }
 0xd1d   :  { %11060 = vrsqrt.f32 %v8333_v58  ;;  %v8334_v8 = vadd.f32 1e-12, %v8326_v54  ;;  %v8327_v27 = vmul.f32 0.03125, %v8319_v22 }
 0xd1e   :  { %v8355_v56 = vmul.f32 %v14010_v28, %v8347_v36  ;;  %v8743_v19 = vpack.c.bf16 %v14112_v63, %v14109_v47  ;;  %v14118_v39 = vadd.f32 %v14018_v44, %v8354_v40 }
 0xd1f   :  { %11062 = vrsqrt.f32 %v8334_v8  ;;  %v8335_v14 = vadd.f32 1e-12, %v8327_v27 }
 0xd20   :  { %v14121_v15 = vadd.f32 %v14018_v44, %v8355_v56  ;;  %10477 = vmatprep.mubr.msk.bf16.mxu1 %vm199_vm0, %v8743_v19 }
 0xd21   :  { %11064 = vrsqrt.f32 %v8335_v14 }
 0xd22   :  { %v8744_v21 = vpack.c.bf16 %v14121_v15, %v14118_v39 }
 0xd24   :  { %10478 = vmatmul.mubr.msk.bf16.vlgmr.msra.gmra.mrb[24].mxu1 %vm199_vm0, %v8744_v21 }
 0xd25   :  { %v11059_v2 = vpop.eup %11058 }
 0xd26   :  { %v8348_v18 = vmul.f32 %v11059_v2, %v13984_v13 }
 0xd27   :  { %v11061_v17 = vpop.eup %11060 }
 0xd28   :  { %v8349_v30 = vmul.f32 %v11061_v17, %v13987_v35  ;;  %v8356_v52 = vmul.f32 %v14010_v28, %v8348_v18 }
 0xd29   :  { %v11063_v55 = vpop.eup %11062 }
 0xd2a   :  { %v8350_v61 = vmul.f32 %v11063_v55, %v13992_v24  ;;  %v8357_v53 = vmul.f32 %v14010_v28, %v8349_v30  ;;  %v14135_v0 = vadd.f32 %v14018_v44, %v8356_v52 }
 0xd2b   :  { %v11065_v5 = vpop.eup %11064 }
 0xd2c   :  { %v8358_v31 = vmul.f32 %v14010_v28, %v8350_v61  ;;  %v8351_v25 = vmul.f32 %v11065_v5, %v13998_v33  ;;  %v14138_v13 = vadd.f32 %v14018_v44, %v8357_v53 }
 0xd2e   :  { %v8359_v35 = vmul.f32 %v14010_v28, %v8351_v25  ;;  %v8745_v57 = vpack.c.bf16 %v14138_v13, %v14135_v0  ;;  %v14144_v24 = vadd.f32 %v14018_v44, %v8358_v31  ;;  %v14156_v28 = vld [vmem:[%s14505_s13] ss:$0 sm:$0xff] }
 0xd30   :  { %v14147_v46 = vadd.f32 %v14018_v44, %v8359_v35  ;;  %10481 = vmatprep.mubr.msk.bf16.mxu1 %vm199_vm0, %v8745_v57 }
 0xd32   :  { %v8746_v33 = vpack.c.bf16 %v14147_v46, %v14144_v24 }
 0xd34   :  { %10482 = vmatmul.mubr.msk.bf16.gmra.mrb[28].mxu1 %vm199_vm0, %v8746_v33 }
 0xd7a   :  { %v10451_v32 = vpop.f32.mrb[16].mxu1 }
 0xd7b   :  { %v8450_v11 = vadd.f32 %v10451_v32, %v14156_v28  ;;  %v8441_v59 = vpop.f32.mrb[17].mxu1 }
 0xd7c   :  { %v8442_v60 = vadd.f32 %v14156_v28, %v8441_v59  ;;  %v10452_v44 = vpop.f32.mrb[18].mxu1 }
 0xd7d   :  { %v8453_v9 = vadd.f32 %v10452_v44, %v14156_v28  ;;  %v8444_v45 = vpop.f32.mrb[19].mxu1  ;;  %v8474_v6 = vmax.f32 %v8450_v11, 0.0 }
 0xd7e   :  { %v8445_v49 = vadd.f32 %v14156_v28, %v8444_v45  ;;  %v8472_v37 = vmax.f32 %v8442_v60, 0.0 }
 0xd7f   :  { %v8475_v50 = vmax.f32 %v8453_v9, 0.0 }
 0xd80   :  { %v8473_v26 = vmax.f32 %v8445_v49, 0.0 }
 0xd81   :  { %v8489_v20 = vpack.c.bf16 %v8475_v50, %v8474_v6 }
 0xd82   :  { %v8488_v23 = vpack.c.bf16 %v8473_v26, %v8472_v37  ;;  %v10455_v29 = vpop.f32.mrb[20].mxu1  ;;  %v14192_v37 = vld [vmem:[%s14507_s15] ss:$0 sm:$0xff] }
 0xd83   :  { %v8466_v16 = vadd.f32 %v10455_v29, %v14156_v28  ;;  %v8457_v10 = vpop.f32.mrb[21].mxu1 }
 0xd84   :  { %v8458_v51 = vadd.f32 %v14156_v28, %v8457_v10  ;;  %v10456_v58 = vpop.f32.mrb[22].mxu1  ;;  %10465 = vmatprep.mubr.msk.bf16.mxu0 %vm8523_vm6, %v8488_v23 }
 0xd85   :  { %v8469_v54 = vadd.f32 %v10456_v58, %v14156_v28  ;;  %v8460_v40 = vpop.f32.mrb[23].mxu1  ;;  %10466 = vmatmul.mubr.msk.bf16.vlgmr.msra.gmra.mrb[16].mxu0 %vm8523_vm6, %v8489_v20  ;;  %v8478_v22 = vmax.f32 %v8466_v16, 0.0 }
 0xd86   :  { %v8461_v36 = vadd.f32 %v14156_v28, %v8460_v40  ;;  %10486 = vmatpush3.bf16.msra.mxu0 %v14075_v12  ;;  %v8476_v27 = vmax.f32 %v8458_v51, 0.0 }
 0xd87   :  { %v8479_v8 = vmax.f32 %v8469_v54, 0.0  ;;  %10487 = vmatprep.subr.bf16.mxu0 %v14080_v43 }
 0xd88   :  { %v8477_v56 = vmax.f32 %v8461_v36, 0.0 }
 0xd89   :  { %v8491_v19 = vpack.c.bf16 %v8479_v8, %v8478_v22 }
 0xd8a   :  { %v8490_v14 = vpack.c.bf16 %v8477_v56, %v8476_v27  ;;  %10488 = vmatpush3.bf16.msra.mxu0 %v14080_v43 }
 0xd8b   :  { %10489 = vmatprep.subr.bf16.mxu0 %v14089_v3 }
 0xd8c   :  { %10469 = vmatprep.mubr.msk.bf16.mxu0 %vm8523_vm6, %v8490_v14 }
 0xd8d   :  { %10470 = vmatmul.mubr.msk.bf16.gmra.mrb[20].mxu0 %vm8523_vm6, %v8491_v19 }
 0xd8e   :  { %10490 = vmatpush3.bf16.msra.mxu0 %v14089_v3 }
 0xd8f   :  { %10491 = vmatprep.subr.bf16.mxu0 %v14096_v42 }
 0xd92   :  { %10492 = vmatpush3.bf16.msra.mxu0 %v14096_v42 }
 0xdf7   :  { %v10479_v12 = vpop.f32.mrb[24].mxu1 }
 0xdf8   :  { %v8802_v21 = vadd.f32 %v10479_v12, %v14156_v28  ;;  %v8793_v2 = vpop.f32.mrb[25].mxu1 }
 0xdf9   :  { %v8794_v18 = vadd.f32 %v14156_v28, %v8793_v2  ;;  %v10480_v17 = vpop.f32.mrb[26].mxu1 }
 0xdfa   :  { %v8805_v43 = vadd.f32 %v10480_v17, %v14156_v28  ;;  %v8796_v30 = vpop.f32.mrb[27].mxu1  ;;  %v8826_v55 = vmax.f32 %v8802_v21, 0.0 }
 0xdfb   :  { %v8797_v52 = vadd.f32 %v14156_v28, %v8796_v30  ;;  %v8824_v53 = vmax.f32 %v8794_v18, 0.0 }
 0xdfc   :  { %v8827_v61 = vmax.f32 %v8805_v43, 0.0 }
 0xdfd   :  { %v8825_v3 = vmax.f32 %v8797_v52, 0.0 }
 0xdfe   :  { %v8833_v5 = vpack.c.bf16 %v8827_v61, %v8826_v55 }
 0xdff   :  { %v8832_v31 = vpack.c.bf16 %v8825_v3, %v8824_v53 }
 0xe01   :  { %10493 = vmatprep.mubr.msk.bf16.mxu0 %vm8523_vm6, %v8832_v31 }
 0xe02   :  { %10494 = vmatmul.mubr.msk.bf16.vlgmr.msra.gmra.mrb[24].mxu0 %vm8523_vm6, %v8833_v5 }
 0xe07   :  { %v10483_v42 = vpop.f32.mrb[28].mxu1 }
 0xe08   :  { %v8818_v25 = vadd.f32 %v10483_v42, %v14156_v28  ;;  %v8809_v35 = vpop.f32.mrb[29].mxu1 }
 0xe09   :  { %v8810_v57 = vadd.f32 %v14156_v28, %v8809_v35  ;;  %v10484_v33 = vpop.f32.mrb[30].mxu1 }
 0xe0a   :  { %v8821_v32 = vadd.f32 %v10484_v33, %v14156_v28  ;;  %v8812_v11 = vpop.f32.mrb[31].mxu1  ;;  %v8830_v60 = vmax.f32 %v8818_v25, 0.0 }
 0xe0b   :  { %v8813_v59 = vadd.f32 %v14156_v28, %v8812_v11  ;;  %v8828_v9 = vmax.f32 %v8810_v57, 0.0 }
 0xe0c   :  { %v8831_v44 = vmax.f32 %v8821_v32, 0.0 }
 0xe0d   :  { %v8829_v45 = vmax.f32 %v8813_v59, 0.0 }
 0xe0e   :  { %v8835_v49 = vpack.c.bf16 %v8831_v44, %v8830_v60 }
 0xe0f   :  { %v8834_v6 = vpack.c.bf16 %v8829_v45, %v8828_v9 }
 0xe11   :  { %10497 = vmatprep.mubr.msk.bf16.mxu0 %vm8523_vm6, %v8834_v6 }
 0xe12   :  { %10498 = vmatmul.mubr.msk.bf16.gmra.mrb[28].mxu0 %vm8523_vm6, %v8835_v49 }
 0xe58   :  { %v10467_v50 = vpop.f32.mrb[16].mxu0 }
 0xe59   :  { %v8570_v26 = vpop.f32.mrb[17].mxu0  ;;  %v8579_v28 = vadd.f32 %v10467_v50, %v14192_v37 }
 0xe5a   :  { %v10468_v20 = vpop.f32.mrb[18].mxu0  ;;  %v8571_v5 = vadd.f32 %v14192_v37, %v8570_v26 }
 0xe5b   :  { %v8573_v23 = vpop.f32.mrb[19].mxu0  ;;  %v14200_v10 = vadd.f32 %v8579_v28, %v14035_v48  ;;  %v8582_v51 = vadd.f32 %v10468_v20, %v14192_v37 }
 0xe5c   :  { %v8574_v29 = vadd.f32 %v14192_v37, %v8573_v23  ;;  %v14248_v31 = vadd.f32 %v8571_v5, %v14025_v38 }
 0xe5d   :  { %v14206_v8 = vadd.f32 %v8582_v51, %v14038_v1  ;;  %v8615_v48 = vsel %vm199_vm0, %v14200_v10, 0.0 }
 0xe5e   :  { %v14197_v16 = vadd.f32 %v8574_v29, %v14028_v4 }
 0xe5f   :  { %v8618_v1 = vsel %vm199_vm0, %v14206_v8, 0.0 }
 0xe60   :  { %v10471_v58 = vpop.f32.mrb[20].mxu0  ;;  %v8612_v54 = vsel %vm199_vm0, %v14197_v16, 0.0 }
 0xe61   :  { %8613 = vadd.xlane.f32.xlu1 %v8612_v54  ;;  %v8586_v40 = vpop.f32.mrb[21].mxu0  ;;  %v8595_v27 = vadd.f32 %v10471_v58, %v14192_v37 }
 0xe62   :  { %v10472_v36 = vpop.f32.mrb[22].mxu0  ;;  %v8587_v45 = vadd.f32 %v14192_v37, %v8586_v40 }
 0xe63   :  { %v8589_v22 = vpop.f32.mrb[23].mxu0  ;;  %v14216_v19 = vadd.f32 %v8595_v27, %v14062_v41  ;;  %v8598_v14 = vadd.f32 %v10472_v36, %v14192_v37 }
 0xe64   :  { %v8590_v4 = vadd.f32 %v14192_v37, %v8589_v22  ;;  %v14281_v20 = vadd.f32 %v8587_v45, %v14051_v7 }
 0xe65   :  { %8616 = vadd.xlane.f32.xlu1 %v8615_v48  ;;  %v14224_v21 = vadd.f32 %v8598_v14, %v14065_v62 }
 0xe66   :  { %v14213_v56 = vadd.f32 %v8590_v4, %v14054_v34  ;;  %v8627_v34 = vsel %vm199_vm0, %v14216_v19, 0.0  ;;  %v8621_v54 = vsel %vm199_vm0, %v14281_v20, 0.0 }
 0xe67   :  { %v8630_v41 = vsel %vm199_vm0, %v14224_v21, 0.0 }
 0xe68   :  { %v8624_v12 = vsel %vm199_vm0, %v14213_v56, 0.0 }
 0xe69   :  { %8619 = vadd.xlane.f32.xlu1 %v8618_v1  ;;  %8625 = vadd.xlane.f32.xlu0 %v8624_v12 }
 0xe6d   :  { %8628 = vadd.xlane.f32.xlu0 %v8627_v34 }
 0xe71   :  { %8631 = vadd.xlane.f32.xlu0 %v8630_v41 }
 0xed5   :  { %v10495_v2 = vpop.f32.mrb[24].mxu0 }
 0xed6   :  { %v8891_v18 = vadd.f32 %v10495_v2, %v14192_v37  ;;  %v8882_v17 = vpop.f32.mrb[25].mxu0 }
 0xed7   :  { %v10496_v43 = vpop.f32.mrb[26].mxu0  ;;  %v8883_v42 = vadd.f32 %v14192_v37, %v8882_v17 }
 0xed8   :  { %v14232_v30 = vadd.f32 %v8891_v18, %v14118_v39  ;;  %v8885_v52 = vpop.f32.mrb[27].mxu0  ;;  %v8894_v55 = vadd.f32 %v10496_v43, %v14192_v37 }
 0xed9   :  { %v8886_v62 = vadd.f32 %v14192_v37, %v8885_v52  ;;  %v14254_v35 = vadd.f32 %v8883_v42, %v14109_v47 }
 0xeda   :  { %v8927_v61 = vsel %vm199_vm0, %v14232_v30, 0.0  ;;  %v14245_v39 = vadd.f32 %v8894_v55, %v14121_v15  ;;  %v8609_v15 = vsel %vm199_vm0, %v14248_v31, 0.0 }
 0xedb   :  { %v14239_v53 = vadd.f32 %v8886_v62, %v14112_v63  ;;  %8928 = vadd.xlane.f32.xlu1 %v8927_v61  ;;  %v8921_v47 = vsel %vm199_vm0, %v14254_v35, 0.0 }
 0xedc   :  { %v8930_v25 = vsel %vm199_vm0, %v14245_v39, 0.0 }
 0xedd   :  { %v8924_v3 = vsel %vm199_vm0, %v14239_v53, 0.0 }
 0xedf   :  { %8925 = vadd.xlane.f32.xlu1 %v8924_v3 }
 0xee3   :  { %8931 = vadd.xlane.f32.xlu1 %v8930_v25 }
 0xee5   :  { %v10499_v63 = vpop.f32.mrb[28].mxu0 }
 0xee6   :  { %v8907_v57 = vadd.f32 %v10499_v63, %v14192_v37  ;;  %v8898_v33 = vpop.f32.mrb[29].mxu0 }
 0xee7   :  { %8610 = vadd.xlane.f32.xlu1 %v8609_v15  ;;  %v10500_v32 = vpop.f32.mrb[30].mxu0 }
 0xee8   :  { %v14260_v38 = vadd.f32 %v8907_v57, %v14144_v24  ;;  %v8901_v11 = vpop.f32.mrb[31].mxu0  ;;  %v8910_v60 = vadd.f32 %v10500_v32, %v14192_v37 }
 0xee9   :  { %v8902_v59 = vadd.f32 %v14192_v37, %v8901_v11 }
 0xeea   :  { %v8939_v44 = vsel %vm199_vm0, %v14260_v38, 0.0  ;;  %v14275_v49 = vadd.f32 %v8910_v60, %v14147_v46 }
 0xeeb   :  { %v14269_v9 = vadd.f32 %v8902_v59, %v14138_v13  ;;  %8922 = vadd.xlane.f32.xlu1 %v8921_v47  ;;  %8940 = vadd.xlane.f32.xlu0 %v8939_v44  ;;  %v8899_v13 = vadd.f32 %v14192_v37, %v8898_v33 }
 0xeec   :  { %v8942_v28 = vsel %vm199_vm0, %v14275_v49, 0.0 }
 0xeed   :  { %v8936_v24 = vsel %vm199_vm0, %v14269_v9, 0.0  ;;  %v14293_v58 = vadd.f32 %v8899_v13, %v14135_v0 }
 0xeee   :  { %v8614_v6 = vpop.xlane.xlu1 %8613 }
 0xeef   :  { %v8634_v50 = vmul.f32 0.03125, %v8614_v6  ;;  %8937 = vadd.xlane.f32.xlu0 %v8936_v24  ;;  %v8933_v48 = vsel %vm199_vm0, %v14293_v58, 0.0 }
 0xef1   :  { %v14278_v26 = vsub.f32 %v14197_v16, %v8634_v50 }
 0xef2   :  { %v8617_v23 = vpop.xlane.xlu1 %8616 }
 0xef3   :  { %v8635_v29 = vmul.f32 0.03125, %v8617_v23  ;;  %8943 = vadd.xlane.f32.xlu0 %v8942_v28  ;;  %v8650_v46 = vmul.f32 %v14278_v26, %v14278_v26 }
 0xef5   :  { %v14289_v51 = vsub.f32 %v14200_v10, %v8635_v29  ;;  %v8660_v16 = vsel %vm199_vm0, %v8650_v46, 0.0 }
 0xef6   :  { %v8620_v7 = vpop.xlane.xlu1 %8619  ;;  %8661 = vadd.xlane.f32.xlu1 %v8660_v16  ;;  %v8626_v37 = vpop.xlane.xlu0 %8625 }
 0xef7   :  { %v8636_v40 = vmul.f32 0.03125, %v8620_v7  ;;  %v8638_v36 = vmul.f32 0.03125, %v8626_v37  ;;  %8622 = vadd.xlane.f32.xlu0 %v8621_v54  ;;  %v8651_v22 = vmul.f32 %v14289_v51, %v14289_v51 }
 0xef9   :  { %v14300_v10 = vsub.f32 %v14206_v8, %v8636_v40  ;;  %v14303_v27 = vsub.f32 %v14213_v56, %v8638_v36  ;;  %v8663_v0 = vsel %vm199_vm0, %v8651_v22, 0.0 }
 0xefa   :  { %8664 = vadd.xlane.f32.xlu1 %v8663_v0  ;;  %v8629_v4 = vpop.xlane.xlu0 %8628 }
 0xefb   :  { %v8639_v14 = vmul.f32 0.03125, %v8629_v4  ;;  %8934 = vadd.xlane.f32.xlu0 %v8933_v48  ;;  %v8652_v1 = vmul.f32 %v14300_v10, %v14300_v10  ;;  %v8654_v12 = vmul.f32 %v14303_v27, %v14303_v27 }
 0xefd   :  { %v14313_v8 = vsub.f32 %v14216_v19, %v8639_v14  ;;  %v8666_v56 = vsel %vm199_vm0, %v8652_v1, 0.0  ;;  %v8672_v34 = vsel %vm199_vm0, %v8654_v12, 0.0 }
 0xefe   :  { %8667 = vadd.xlane.f32.xlu1 %v8666_v56  ;;  %v8632_v41 = vpop.xlane.xlu0 %8631 }
 0xeff   :  { %v8640_v2 = vmul.f32 0.03125, %v8632_v41  ;;  %8673 = vadd.xlane.f32.xlu0 %v8672_v34  ;;  %v8655_v18 = vmul.f32 %v14313_v8, %v14313_v8 }
 0xf01   :  { %v14320_v17 = vsub.f32 %v14224_v21, %v8640_v2  ;;  %v8675_v43 = vsel %vm199_vm0, %v8655_v18, 0.0 }
 0xf03   :  { %8676 = vadd.xlane.f32.xlu0 %v8675_v43  ;;  %v8656_v19 = vmul.f32 %v14320_v17, %v14320_v17 }
 0xf05   :  { %v8678_v52 = vsel %vm199_vm0, %v8656_v19, 0.0 }
 0xf07   :  { %8679 = vadd.xlane.f32.xlu0 %v8678_v52 }
 0xf68   :  { %v8929_v62 = vpop.xlane.xlu1 %8928 }
 0xf69   :  { %v8947_v55 = vmul.f32 0.03125, %v8929_v62 }
 0xf6b   :  { %v14327_v61 = vsub.f32 %v14232_v30, %v8947_v55 }
 0xf6c   :  { %v8926_v3 = vpop.xlane.xlu1 %8925 }
 0xf6d   :  { %v8946_v5 = vmul.f32 0.03125, %v8926_v3  ;;  %v8963_v21 = vmul.f32 %v14327_v61, %v14327_v61 }
 0xf6f   :  { %v14332_v42 = vsub.f32 %v14239_v53, %v8946_v5  ;;  %v8975_v25 = vsel %vm199_vm0, %v8963_v21, 0.0 }
 0xf70   :  { %v8932_v63 = vpop.xlane.xlu1 %8931  ;;  %8976 = vadd.xlane.f32.xlu1 %v8975_v25 }
 0xf71   :  { %v8948_v57 = vmul.f32 0.03125, %v8932_v63  ;;  %v8962_v33 = vmul.f32 %v14332_v42, %v14332_v42  ;;  %v14389_v63 = vld [vmem:[%s14508_s16] ss:$0 sm:$0xff]  ;;  %s11283_s16 = smov [#allocation11]  }
 0xf73   :  { %v14338_v15 = vsub.f32 %v14245_v39, %v8948_v57  ;;  %v8972_v30 = vsel %vm199_vm0, %v8962_v33, 0.0 }
 0xf74   :  { %v8611_v32 = vpop.xlane.xlu1 %8610  ;;  %8973 = vadd.xlane.f32.xlu1 %v8972_v30 }
 0xf75   :  { %v8633_v11 = vmul.f32 0.03125, %v8611_v32  ;;  %v8964_v53 = vmul.f32 %v14338_v15, %v14338_v15 }
 0xf77   :  { %v14344_v59 = vsub.f32 %v14248_v31, %v8633_v11  ;;  %v8978_v60 = vsel %vm199_vm0, %v8964_v53, 0.0  ;;  %v14395_v11 = vld [vmem:[%s14509_s17] ss:$0 sm:$0xff]  ;;  %s9112_s17 = sshll.u32 %s11283_s16, 4  ;;  %s9113_s17 = int_to_ptr.vmem [resolvable:$true] %s9112_s17 }
 0xf78   :  { %8979 = vadd.xlane.f32.xlu1 %v8978_v60  ;;  %v8923_v47 = vpop.xlane.xlu1 %8922  ;;  %v8941_v44 = vpop.xlane.xlu0 %8940  ;;  %p11217_p13 = scmp.lt.s32.totalorder %s9113_s17, %s9113_s17 }
 0xf79   :  { %v8945_v24 = vmul.f32 0.03125, %v8923_v47  ;;  %v8951_v45 = vmul.f32 0.03125, %v8941_v44  ;;  %v8649_v39 = vmul.f32 %v14344_v59, %v14344_v59 }
 0xf7b   :  { %v14350_v6 = vsub.f32 %v14254_v35, %v8945_v24  ;;  %v14353_v50 = vsub.f32 %v14260_v38, %v8951_v45  ;;  %v8657_v13 = vsel %vm199_vm0, %v8649_v39, 0.0 }
 0xf7c   :  { %8658 = vadd.xlane.f32.xlu1 %v8657_v13  ;;  %v8938_v31 = vpop.xlane.xlu0 %8937 }
 0xf7d   :  { %v8950_v23 = vmul.f32 0.03125, %v8938_v31  ;;  %v8961_v28 = vmul.f32 %v14350_v6, %v14350_v6  ;;  %v8967_v29 = vmul.f32 %v14353_v50, %v14353_v50 }
 0xf7f   :  { %v14361_v46 = vsub.f32 %v14269_v9, %v8950_v23  ;;  %v8969_v35 = vsel %vm199_vm0, %v8961_v28, 0.0  ;;  %v8987_v16 = vsel %vm199_vm0, %v8967_v29, 0.0 }
 0xf80   :  { %8970 = vadd.xlane.f32.xlu1 %v8969_v35  ;;  %8988 = vadd.xlane.f32.xlu0 %v8987_v16  ;;  %v8944_v38 = vpop.xlane.xlu0 %8943 }
 0xf81   :  { %v8952_v7 = vmul.f32 0.03125, %v8944_v38  ;;  %v8966_v37 = vmul.f32 %v14361_v46, %v14361_v46 }
 0xf83   :  { %v14368_v54 = vsub.f32 %v14275_v49, %v8952_v7  ;;  %v8662_v40 = vpop.xlane.xlu1 %8661  ;;  %v8984_v36 = vsel %vm199_vm0, %v8966_v37, 0.0 }
 0xf84   :  { %v8682_v22 = vmul.f32 0.03125, %v8662_v40  ;;  %8985 = vadd.xlane.f32.xlu0 %v8984_v36  ;;  %v8623_v9 = vpop.xlane.xlu0 %8622 }
 0xf85   :  { %v8637_v0 = vmul.f32 0.03125, %v8623_v9  ;;  %v8968_v4 = vmul.f32 %v14368_v54, %v14368_v54 }
 0xf86   :  { %v8691_v48 = vadd.f32 1e-12, %v8682_v22 }
 0xf87   :  { %v14374_v14 = vsub.f32 %v14281_v20, %v8637_v0  ;;  %v8665_v1 = vpop.xlane.xlu1 %8664  ;;  %v8990_v12 = vsel %vm199_vm0, %v8968_v4, 0.0 }
 0xf88   :  { %11066 = vrsqrt.f32 %v8691_v48  ;;  %8991 = vadd.xlane.f32.xlu0 %v8990_v12  ;;  %v8935_v49 = vpop.xlane.xlu0 %8934  ;;  %v8683_v41 = vmul.f32 0.03125, %v8665_v1 }
 0xf89   :  { %v8949_v56 = vmul.f32 0.03125, %v8935_v49  ;;  %v8653_v34 = vmul.f32 %v14374_v14, %v14374_v14 }
 0xf8a   :  { %v8692_v62 = vadd.f32 1e-12, %v8683_v41 }
 0xf8b   :  { %v14380_v2 = vsub.f32 %v14293_v58, %v8949_v56  ;;  %v8669_v18 = vsel %vm199_vm0, %v8653_v34, 0.0  ;;  %v8668_v43 = vpop.xlane.xlu1 %8667 }
 0xf8c   :  { %8670 = vadd.xlane.f32.xlu0 %v8669_v18  ;;  %v8674_v20 = vpop.xlane.xlu0 %8673  ;;  %v8684_v55 = vmul.f32 0.03125, %v8668_v43 }
 0xf8d   :  { %v8686_v19 = vmul.f32 0.03125, %v8674_v20  ;;  %v8965_v52 = vmul.f32 %v14380_v2, %v14380_v2 }
 0xf8e   :  { %v8693_v57 = vadd.f32 1e-12, %v8684_v55 }
 0xf8f   :  { %v8695_v3 = vadd.f32 1e-12, %v8686_v19  ;;  %v8981_v5 = vsel %vm199_vm0, %v8965_v52, 0.0 }
 0xf90   :  { %8982 = vadd.xlane.f32.xlu0 %v8981_v5  ;;  %v8677_v21 = vpop.xlane.xlu0 %8676 }
 0xf91   :  { %11068 = vrsqrt.f32 %v8695_v3  ;;  %v8687_v25 = vmul.f32 0.03125, %v8677_v21 }
 0xf92   :  { %v11067_v58 = vpop.eup %11066  ;;  %11070 = vrsqrt.f32 %v8692_v62 }
 0xf93   :  { %v8696_v33 = vadd.f32 1e-12, %v8687_v25  ;;  %v8707_v30 = vmul.f32 %v11067_v58, %v14278_v26 }
 0xf94   :  { %v8680_v32 = vpop.xlane.xlu0 %8679 }
 0xf95   :  { %11072 = vrsqrt.f32 %v8696_v33  ;;  %v8688_v53 = vmul.f32 0.03125, %v8680_v32  ;;  %v8721_v60 = vmul.f32 %v14389_v63, %v8707_v30 }
 0xf96   :  { %11074 = vrsqrt.f32 %v8693_v57 }
 0xf97   :  { %v8697_v47 = vadd.f32 1e-12, %v8688_v53  ;;  %v8736_v44 = vadd.f32 %v14395_v11, %v8721_v60 }
 0xf99   :  { %11076 = vrsqrt.f32 %v8697_v47  ;;  %9042 = vrot.lane.b32.xlu1 %v8736_v44, %s11273_s4 }
 0xf9b   :  { %v11069_v24 = vpop.eup %11068 }
 0xf9c   :  { %v11071_v45 = vpop.eup %11070  ;;  %v8711_v26 = vmul.f32 %v11069_v24, %v14303_v27 }
 0xf9d   :  { %v8708_v13 = vmul.f32 %v11071_v45, %v14289_v51 }
 0xf9e   :  { %v8725_v31 = vmul.f32 %v14389_v63, %v8711_v26 }
 0xf9f   :  { %v11073_v39 = vpop.eup %11072  ;;  %v8722_v16 = vmul.f32 %v14389_v63, %v8708_v13 }
 0xfa0   :  { %v8712_v23 = vmul.f32 %v11073_v39, %v14313_v8  ;;  %v11075_v28 = vpop.eup %11074  ;;  %v8740_v38 = vadd.f32 %v14395_v11, %v8725_v31 }
 0xfa1   :  { %v8709_v27 = vmul.f32 %v11075_v28, %v14300_v10  ;;  %v8737_v8 = vadd.f32 %v14395_v11, %v8722_v16 }
 0xfa2   :  { %v8726_v29 = vmul.f32 %v14389_v63, %v8712_v23 }
 0xfa3   :  { %v11077_v35 = vpop.eup %11076  ;;  %v8723_v36 = vmul.f32 %v14389_v63, %v8709_v27 }
 0xfa4   :  { %v8741_v7 = vadd.f32 %v14395_v11, %v8726_v29  ;;  %v8713_v37 = vmul.f32 %v11077_v35, %v14320_v17 }
 0xfa5   :  { %v8738_v17 = vadd.f32 %v14395_v11, %v8723_v36 }
 0xfa6   :  { %9054 = vrot.lane.b32.xlu0 %v8740_v38, %s11273_s4  ;;  %9058 = vrot.lane.b32.xlu1 %v8741_v7, %s11268_s27  ;;  %v8727_v51 = vmul.f32 %v14389_v63, %v8713_v37 }
 0xfa8   :  { %v8742_v40 = vadd.f32 %v14395_v11, %v8727_v51 }
 0xfaa   :  { %9046 = vrot.lane.b32.xlu0 %v8737_v8, %s11268_s27  ;;  %9062 = vrot.lane.b32.xlu1 %v8742_v40, %s11274_s28 }
 0xfae   :  { %9050 = vrot.lane.b32.xlu0 %v8738_v17, %s11274_s28 }
 0xffd   :  { %v8977_v10 = vpop.xlane.xlu1 %8976 }
 0xffe   :  { %v8995_v22 = vmul.f32 0.03125, %v8977_v10 }
0x1000   :  { %v9003_v9 = vadd.f32 1e-12, %v8995_v22 }
0x1001   :  { %v8974_v0 = vpop.xlane.xlu1 %8973 }
0x1002   :  { %11078 = vrsqrt.f32 %v9003_v9  ;;  %v8994_v4 = vmul.f32 0.03125, %v8974_v0 }
0x1004   :  { %v9002_v48 = vadd.f32 1e-12, %v8994_v4 }
0x1005   :  { %v8980_v1 = vpop.xlane.xlu1 %8979 }
0x1006   :  { %11080 = vrsqrt.f32 %v9002_v48  ;;  %v8996_v12 = vmul.f32 0.03125, %v8980_v1 }
0x1008   :  { %v9004_v49 = vadd.f32 1e-12, %v8996_v12 }
0x1009   :  { %v8659_v56 = vpop.xlane.xlu1 %8658 }
0x100a   :  { %11082 = vrsqrt.f32 %v9004_v49  ;;  %v8681_v34 = vmul.f32 0.03125, %v8659_v56 }
0x100c   :  { %v11079_v41 = vpop.eup %11078  ;;  %v8690_v18 = vadd.f32 1e-12, %v8681_v34 }
0x100d   :  { %v8989_v43 = vpop.xlane.xlu0 %8988  ;;  %v9019_v20 = vmul.f32 %v11079_v41, %v14327_v61  ;;  %v8971_v28 = vpop.xlane.xlu1 %8970 }
0x100e   :  { %v8999_v19 = vmul.f32 0.03125, %v8989_v43  ;;  %11084 = vrsqrt.f32 %v8690_v18 }
0x100f   :  { %v9027_v52 = vmul.f32 %v14389_v63, %v9019_v20 }
0x1010   :  { %v11081_v62 = vpop.eup %11080  ;;  %v9007_v55 = vadd.f32 1e-12, %v8999_v19 }
0x1011   :  { %v8986_v3 = vpop.xlane.xlu0 %8985  ;;  %v9035_v5 = vadd.f32 %v14395_v11, %v9027_v52  ;;  %v9018_v21 = vmul.f32 %v11081_v62, %v14332_v42  ;;  %v9043_v40 = vpop.permute.xlu1 %9042 }
0x1012   :  { %v8998_v25 = vmul.f32 0.03125, %v8986_v3  ;;  %11086 = vrsqrt.f32 %v9007_v55 }
0x1013   :  { %9079 = vrot.lane.b32.xlu0 %v9035_v5, %s11268_s27  ;;  %v9026_v58 = vmul.f32 %v14389_v63, %v9018_v21 }
0x1014   :  { %v11083_v57 = vpop.eup %11082  ;;  %v9006_v33 = vadd.f32 1e-12, %v8998_v25 }
0x1015   :  { %v8992_v61 = vpop.xlane.xlu0 %8991  ;;  %v9034_v30 = vadd.f32 %v14395_v11, %v9026_v58  ;;  %v9020_v32 = vmul.f32 %v11083_v57, %v14338_v15 }
0x1016   :  { %11088 = vrsqrt.f32 %v9006_v33  ;;  %v9000_v53 = vmul.f32 0.03125, %v8992_v61 }
0x1017   :  { %9075 = vrot.lane.b32.xlu1 %v9034_v30, %s11273_s4  ;;  %v9028_v60 = vmul.f32 %v14389_v63, %v9020_v32 }
0x1018   :  { %v9008_v42 = vadd.f32 1e-12, %v9000_v53  ;;  %v11085_v47 = vpop.eup %11084  ;;  %v9059_v4 = vpop.permute.xlu1 %9058 }
0x1019   :  { %v8671_v44 = vpop.xlane.xlu0 %8670  ;;  %v9036_v24 = vadd.f32 %v14395_v11, %v9028_v60  ;;  %v8706_v26 = vmul.f32 %v11085_v47, %v14344_v59 }
0x101a   :  { %11090 = vrsqrt.f32 %v9008_v42  ;;  %v8685_v45 = vmul.f32 0.03125, %v8671_v44 }
0x101b   :  { %9083 = vrot.lane.b32.xlu0 %v9036_v24, %s11274_s28  ;;  %v8720_v29 = vmul.f32 %v14389_v63, %v8706_v26 }
0x101c   :  { %v8694_v39 = vadd.f32 1e-12, %v8685_v45  ;;  %v11087_v13 = vpop.eup %11086 }
0x101d   :  { %v8983_v15 = vpop.xlane.xlu0 %8982  ;;  %v9023_v31 = vmul.f32 %v11087_v13, %v14353_v50  ;;  %v8735_v27 = vadd.f32 %v14395_v11, %v8720_v29 }
0x101e   :  { %11092 = vrsqrt.f32 %v8694_v39 }
0x101f   :  { %v9031_v35 = vmul.f32 %v14389_v63, %v9023_v31 }
0x1020   :  { %v11089_v23 = vpop.eup %11088 }
0x1021   :  { %v9055_v16 = vpop.permute.xlu0 %9054  ;;  %v9022_v38 = vmul.f32 %v11089_v23, %v14361_v46  ;;  %v9039_v7 = vadd.f32 %v14395_v11, %v9031_v35  ;;  %v9065_v46 = vsel %vm199_vm0, %v8735_v27, %v9043_v40 }
0x1023   :  { %v9030_v37 = vmul.f32 %v14389_v63, %v9022_v38  ;;  %9091 = vrot.lane.b32.xlu1 %v9039_v7, %s11268_s27  ;;  %s11212_s27 = scalar_lea.vmem %s9113_s17, 256 }
0x1024   :  { %v11091_v59 = vpop.eup %11090  ;;  %p11213_p12 = scmp.ne.s32.totalorder %s9113_s17, %s11212_s27  ;;  %p11218_p0 = scmp.lt.s32.totalorder %s11212_s27, %s11212_s27 }
0x1025   :  { %v9047_v51 = vpop.permute.xlu0 %9046  ;;  %v9038_v50 = vadd.f32 %v14395_v11, %v9030_v37  ;;  %v9024_v8 = vmul.f32 %v11091_v59, %v14368_v54 }
0x1026   :  { %v9066_v22 = vsel %vm8523_vm6, %v9065_v46, %v9047_v51  ;;  %p11219_p1 = por %p11218_p0, %p11217_p13 }
0x1027   :  { %v9032_v36 = vmul.f32 %v14389_v63, %v9024_v8  ;;  %9087 = vrot.lane.b32.xlu1 %v9038_v50, %s11273_s4 }
0x1028   :  { %v11093_v17 = vpop.eup %11092  ;;  %p11220_p2 = pnand %p11219_p1, %p11213_p12 }
0x1029   :  { %v8710_v10 = vmul.f32 %v11093_v17, %v14374_v14  ;;  %v9051_v9 = vpop.permute.xlu0 %9050  ;;  %v9040_v0 = vadd.f32 %v14395_v11, %v9032_v36  ;;  %v9063_v14 = vpop.permute.xlu1 %9062 }
0x102a   :  { %v9068_v48 = vsel %vm9067_vm7, %v9066_v22, %v9051_v9 }
0x102b   :  { %v8724_v54 = vmul.f32 %v14389_v63, %v8710_v10  ;;  %9072 = vst [vmem:[#allocation11] sm:$0xff] %v9068_v48  ;;  %9095 = vrot.lane.b32.xlu1 %v9040_v0, %s11274_s28 }
0x102d   :  { %v8739_v1 = vadd.f32 %v14395_v11, %v8724_v54 }
0x102f   :  { %v9069_v12 = vsel %vm199_vm0, %v8739_v1, %v9055_v16 }
0x1030   :  { %v9070_v49 = vsel %vm8523_vm6, %v9069_v12, %v9059_v4 }
0x1031   :  { %v9071_v56 = vsel %vm9067_vm7, %v9070_v49, %v9063_v14 }
0x1032   :  { %9073 = vst [vmem:[#allocation11 + $0x8] sm:$0xff] %v9071_v56 }
0x1033   :  { %11223 = shalt.err (!%p11220_p2)
}
0x1034   :  { %s11224_s21 = scalar_lea.hbm %s14510_s18, 256 }
0x1035   :  { %p11225_p3 = scmp.ne.s32.totalorder %s14510_s18, %s11224_s21  ;;  %p11228_p4 = scmp.lt.u32.totalorder %s11224_s21, %s14510_s18 }
0x1037   :  { %p11230_p5 = pnand %p11228_p4, %p11225_p3 }
0x1039   :  { %11233 = shalt.err (!%p11230_p5)
}
0x103a   :  { %9115 = dma.vmem_to_hbm [thread:$0]  %s9113_s17, 256, %s14510_s18, [#allocation4]   ;;  %v8993_v34 = vmul.f32 0.03125, %v8971_v28  ;;  %v8997_v18 = vmul.f32 0.03125, %v8983_v15 }
0x103b   :  { %s11284_s18 = smov [#allocation12]  }
0x103c   :  { %v9001_v41 = vadd.f32 1e-12, %v8993_v34  ;;  %v9005_v20 = vadd.f32 1e-12, %v8997_v18  ;;  %s9122_s9 = sshll.u32 %s11284_s18, 4  ;;  %s9123_s9 = int_to_ptr.vmem [resolvable:$true] %s9122_s9 }
0x103d   :  { %s11234_s10 = scalar_lea.vmem %s9123_s9, 256  ;;  %p11239_p7 = scmp.lt.s32.totalorder %s9123_s9, %s9123_s9 }
0x103e   :  { %11094 = vrsqrt.f32 %v9001_v41  ;;  %p11235_p6 = scmp.ne.s32.totalorder %s9123_s9, %s11234_s10  ;;  %p11240_p8 = scmp.lt.s32.totalorder %s11234_s10, %s11234_s10 }
0x103f   :  { %11096 = vrsqrt.f32 %v9005_v20 }
0x1040   :  { %p11241_p9 = por %p11240_p8, %p11239_p7 }
0x1042   :  { %p11242_p10 = pnand %p11241_p9, %p11235_p6 }
0x1048   :  { %v11095_v43 = vpop.eup %11094 }
0x1049   :  { %v9017_v19 = vmul.f32 %v11095_v43, %v14350_v6  ;;  %v11097_v58 = vpop.eup %11096 }
0x104a   :  { %v9021_v33 = vmul.f32 %v11097_v58, %v14380_v2 }
0x104b   :  { %v9025_v52 = vmul.f32 %v14389_v63, %v9017_v19 }
0x104c   :  { %v9029_v6 = vmul.f32 %v14389_v63, %v9021_v33 }
0x104d   :  { %v9033_v62 = vadd.f32 %v14395_v11, %v9025_v52 }
0x104e   :  { %v9037_v30 = vadd.f32 %v14395_v11, %v9029_v6 }
0x1085   :  { %v9080_v55 = vpop.permute.xlu0 %9079 }
0x1089   :  { %v9076_v3 = vpop.permute.xlu1 %9075 }
0x108a   :  { %v9098_v5 = vsel %vm199_vm0, %v9033_v62, %v9076_v3 }
0x108b   :  { %v9099_v21 = vsel %vm8523_vm6, %v9098_v5, %v9080_v55 }
0x108d   :  { %v9084_v25 = vpop.permute.xlu0 %9083 }
0x108e   :  { %v9100_v57 = vsel %vm9067_vm7, %v9099_v21, %v9084_v25 }
0x108f   :  { %9104 = vst [vmem:[#allocation12] sm:$0xff] %v9100_v57 }
0x1095   :  { %v9092_v61 = vpop.permute.xlu1 %9091 }
0x1099   :  { %v9088_v32 = vpop.permute.xlu1 %9087 }
0x109a   :  { %v9101_v53 = vsel %vm199_vm0, %v9037_v30, %v9088_v32 }
0x109b   :  { %v9102_v42 = vsel %vm8523_vm6, %v9101_v53, %v9092_v61 }
0x109d   :  { %v9096_v60 = vpop.permute.xlu1 %9095 }
0x109e   :  { %v9103_v47 = vsel %vm9067_vm7, %v9102_v42, %v9096_v60 }
0x109f   :  { %9105 = vst [vmem:[#allocation12 + $0x8] sm:$0xff] %v9103_v47 }
0x10a0   :  { %11245 = shalt.err (!%p11242_p10)
}
0x10a1   :  { %s11246_s6 = scalar_lea.hbm %s14511_s19, 256 }
0x10a2   :  { %p11247_p11 = scmp.ne.s32.totalorder %s14511_s19, %s11246_s6  ;;  %p11250_p12 = scmp.lt.u32.totalorder %s11246_s6, %s14511_s19 }
0x10a4   :  { %p11252_p13 = pnand %p11250_p12, %p11247_p11 }
0x10a6   :  { %11255 = shalt.err (!%p11252_p13)
}
0x10a7   :  { %9125 = dma.vmem_to_hbm [thread:$0]  %s9123_s9, 256, %s14511_s19, [#allocation13]  }
0x10a8   :  { %11262 = dma.done.wait [#allocation4], 256  }
0x10a9   :  { %11263 = vsyncadd [#allocation4], 4294967040 }
0x10aa   :  { %11264 = dma.done.wait [#allocation13], 256  }
0x10ab   :  { %11265 = vsyncadd [#allocation13], 4294967040 }
0x10ac   :  { %9132 = vsyncpa [#allocation3], 1 }
0x10ad   :  { %9133 = vsyncpa [#allocation6], 1 }
0x10ae   :  { %9134 = vsyncpa [#allocation9], 1 }
0x10af   :  { %9135 = vsyncpa [#allocation4], 1 }
0x10b0   :  { %9136 = vsyncpa [#allocation13], 1 }

</bundles_post_ra>
